<compile_context>
chip_gen: v7x
topology: tpu7x:2x2x1
jax: 0.10.0
libtpu: 0.0.40
codegen_flags: <defaults>
</compile_context>

<pallas_src>
import functools
import math

import jax
import jax.numpy as jnp
from jax import lax
from jax.experimental import pallas as pl
from jax.experimental.pallas import tpu as pltpu


# ---------------------------------------------------------------------------
# Fused kernel: 3 x (3x3 dilated conv + folded BN + ReLU) + 2x2 ceil max-pool.
#
# Layout trick: padded activations are flattened row-major over (y, x) into a
# (Hp*Wp + 2d, C) matrix.  For output position p = h*Wp + w, conv tap (kh, kw) reads
# the contiguous row window starting at p + (kh*Wp + kw)*d, so every tap is a plain
# 2-D slice — no reshape / concatenate / gather inside the kernel.  Flattened rows
# with w >= W are "wrap" garbage; they are masked to zero before being stored, which
# lands exactly on the next layer's horizontal zero-padding ring.
# ---------------------------------------------------------------------------
def _encode_b_kernel(x_ref, w1_ref, w2_ref, w3_ref, st_ref, o_ref,
                     abuf, pbuf, *, H, W, Wp, d, Hc, Wc):
    M = H * Wp                                  # flattened GEMM rows (valid + garbage)
    Cout = o_ref.shape[-1]

    row_col = lax.broadcasted_iota(jnp.int32, (M, Cout), 0) % Wp
    valid = row_col < W                         # mask for interleaved garbage columns

    def conv3x3(tap, w_ref, layer):
        acc = jnp.zeros((M, Cout), jnp.float32)
        for kh in range(3):
            for kw in range(3):
                a = tap((kh * Wp + kw) * d)     # (M, C_in) bf16 contiguous window
                acc = acc + jnp.dot(a, w_ref[kh * 3 + kw],
                                    preferred_element_type=jnp.float32)
        y = acc * st_ref[layer, 0:1, :] + st_ref[layer, 1:2, :]   # folded BN (+bias)
        return jnp.maximum(y, 0.0)              # ReLU, f32 (M, Cout)

    def stash(y):
        # Store as the next conv's zero-padded flattened bf16 input.  Masked garbage
        # columns land on the horizontal padding ring; the vertical ring / slack rows
        # stay zero from the one-time clear below.
        off = d * Wp + d
        abuf[off:off + M, :] = jnp.where(valid, y, 0.0).astype(abuf.dtype)

    abuf[...] = jnp.zeros(abuf.shape, abuf.dtype)            # padding ring + slack
    y = conv3x3(lambda o: x_ref[0, o:o + M, :], w1_ref, 0)
    stash(y)
    y = conv3x3(lambda o: abuf[o:o + M, :], w2_ref, 1)
    stash(y)
    y = conv3x3(lambda o: abuf[o:o + M, :], w3_ref, 2)

    # Fused MaxPool2d(2, stride=2, ceil_mode=True) in f32, written straight into the
    # output block (which also performs the final f32 cast).  Tiny static loops keep
    # all indexing to plain int/contiguous-slice form (guaranteed lowering); the trip
    # counts (H + Wc + Hc) are trivial at these sizes.
    if 2 * Hc != H or 2 * Wc != W:                           # ceil-mode ragged edge
        pbuf[...] = jnp.full(pbuf.shape, -jnp.inf, pbuf.dtype)
    for h in range(H):                                       # drop garbage columns
        pbuf[h, 0:W, :] = y[h * Wp:h * Wp + W, :]
    for j in range(Wc):                                      # max over column pairs
        pbuf[:, j, :] = jnp.maximum(pbuf[:, 2 * j, :], pbuf[:, 2 * j + 1, :])
    for i in range(Hc):                                      # max over row pairs
        o_ref[0, i] = jnp.maximum(pbuf[2 * i, 0:Wc, :],
                                  pbuf[2 * i + 1, 0:Wc, :]).astype(o_ref.dtype)


# ---------------------------------------------------------------------------
# Host-side wrappers
# ---------------------------------------------------------------------------
def _fold_bn(p, eps=1e-5):
    scale = p['gamma'] / jnp.sqrt(p['var'] + eps)
    shift = (p['b'] - p['mean']) * scale + p['beta']
    return jnp.stack([scale, shift]).astype(jnp.float32)     # (2, Cout)


def _tap_weights(p):
    # (O, I, 3, 3) torch layout -> (9, I, O) with tap index t = kh*3 + kw.
    O, I, kh, kw = p['w'].shape
    return (jnp.transpose(p['w'], (2, 3, 1, 0))
            .reshape(kh * kw, I, O).astype(jnp.bfloat16))


def encode_b_forward(params, x_nchw, dilation=1, grid=(1, 1, 1)):
    d = dilation * grid[0]            # dil_1 == dil_2 == dil_3 in the reference module
    B, Cin, H, W = x_nchw.shape
    Cout = params['c1']['w'].shape[0]
    Hp, Wp = H + 2 * d, W + 2 * d
    Hc, Wc = -(-H // 2), -(-W // 2)   # ceil-mode pooled size
    rows = Hp * Wp + 2 * d            # flattened padded rows + tap-overrun slack

    # TODO(synk): spatial tiling with halo exchange for feature maps that do not fit
    # the fused VMEM-resident path.
    assert (rows * 128 * 2 * 3 + H * Wp * Cout * 8
            + 4 * Hc * Wc * 128 * 4) < 8 * 1024 * 1024, "input too large for fused path"

    # One-time input glue (tiny): NCHW -> NHWC -> zero-pad -> flatten rows -> bf16.
    x = jnp.transpose(x_nchw, (0, 2, 3, 1))
    x = jnp.pad(x, ((0, 0), (d, d), (d, d), (0, 0)))
    x = x.reshape(B, Hp * Wp, Cin)
    x = jnp.pad(x, ((0, 0), (0, 2 * d), (0, 0))).astype(jnp.bfloat16)

    w1, w2, w3 = (_tap_weights(params[k]) for k in ('c1', 'c2', 'c3'))
    st = jnp.stack([_fold_bn(params[k]) for k in ('c1', 'c2', 'c3')])   # (3, 2, Cout)

    kernel = functools.partial(_encode_b_kernel, H=H, W=W, Wp=Wp, d=d, Hc=Hc, Wc=Wc)
    cost = pl.CostEstimate(
        flops=2 * B * H * Wp * 9 * Cout * (Cin + 2 * Cout),
        transcendentals=0,
        bytes_accessed=(x.size * 2 + (w1.size + w2.size + w3.size) * 2
                        + st.size * 4 + B * Hc * Wc * Cout * 4))

    out = pl.pallas_call(
        kernel,
        out_shape=jax.ShapeDtypeStruct((B, Hc, Wc, Cout), jnp.float32),
        grid_spec=pltpu.PrefetchScalarGridSpec(
            num_scalar_prefetch=0,
            grid=(B,),
            in_specs=[
                pl.BlockSpec((1, rows, Cin), lambda b: (b, 0, 0)),     # flat padded x
                pl.BlockSpec((9, Cin, Cout), lambda b: (0, 0, 0)),     # conv1 taps
                pl.BlockSpec((9, Cout, Cout), lambda b: (0, 0, 0)),    # conv2 taps
                pl.BlockSpec((9, Cout, Cout), lambda b: (0, 0, 0)),    # conv3 taps
                pl.BlockSpec((3, 2, Cout), lambda b: (0, 0, 0)),       # BN scale/shift
            ],
            out_specs=pl.BlockSpec((1, Hc, Wc, Cout), lambda b: (b, 0, 0, 0)),
            scratch_shapes=[
                pltpu.VMEM((rows, Cout), jnp.bfloat16),            # padded activations
                pltpu.VMEM((2 * Hc, 2 * Wc, Cout), jnp.float32),   # pool staging
            ],
        ),
        compiler_params=pltpu.CompilerParams(dimension_semantics=("parallel",)),
        cost_estimate=cost,
    )(x, w1, w2, w3, st)

    # Dropout2d: identity in eval mode (the reference forward calls `self.dropout()`
    # with no argument — a bug; intended behaviour is the pooled feature map).
    return jnp.transpose(out, (0, 3, 1, 2))                    # NHWC -> NCHW, f32


# ---------------------------------------------------------------------------
# Deterministic synthetic parameters + pure-JAX reference (test-only)
# ---------------------------------------------------------------------------
def _conv_params(key, out_c, in_c, k):
    k1, k2, k3, k4, k5, k6 = jax.random.split(key, 6)
    fan_in, fan_out = in_c * k * k, out_c * k * k
    std = math.sqrt(2.0 / (fan_in + fan_out))
    return dict(
        w=std * jax.random.normal(k1, (out_c, in_c, k, k), jnp.float32),
        b=0.01 * jax.random.normal(k2, (out_c,), jnp.float32),
        gamma=1.0 + 0.1 * jax.random.normal(k3, (out_c,), jnp.float32),
        beta=0.1 * jax.random.normal(k4, (out_c,), jnp.float32),
        mean=0.1 * jax.random.normal(k5, (out_c,), jnp.float32),
        var=1.0 + 0.1 * jax.random.uniform(k6, (out_c,), jnp.float32),
    )


def init_encode_b_params(key, in_c, out_c):
    k1, k2, k3 = jax.random.split(key, 3)
    return {'c1': _conv_params(k1, out_c, in_c, 3),
            'c2': _conv_params(k2, out_c, out_c, 3),
            'c3': _conv_params(k3, out_c, out_c, 3)}


def _reference_forward(params, x, dilation=1, grid=(1, 1, 1)):
    """Pure-JAX (XLA) f32 reference, used only to validate the Pallas kernel."""
    d = dilation * grid[0]

    def cbr(h, p):
        y = lax.conv_general_dilated(
            h, p['w'], window_strides=(1, 1), padding=[(d, d), (d, d)],
            rhs_dilation=(d, d), dimension_numbers=('NCHW', 'OIHW', 'NCHW'))
        y = y + p['b'][None, :, None, None]
        scale = (p['gamma'] / jnp.sqrt(p['var'] + 1e-5))[None, :, None, None]
        y = (y - p['mean'][None, :, None, None]) * scale + p['beta'][None, :, None, None]
        return jnp.maximum(y, 0.0)

    h = cbr(x, params['c1'])
    h = cbr(h, params['c2'])
    h = cbr(h, params['c3'])
    B, C, H, W = h.shape
    Hc, Wc = -(-H // 2), -(-W // 2)
    h = jnp.pad(h, ((0, 0), (0, 0), (0, 2 * Hc - H), (0, 2 * Wc - W)),
                constant_values=-jnp.inf)
    return h.reshape(B, C, Hc, 2, Wc, 2).max(axis=(3, 5))


if __name__ == "__main__":
    key = jax.random.PRNGKey(0)
    pkey, xkey = jax.random.split(key)

    in_c, out_c = 4, 32
    params = init_encode_b_params(pkey, in_c, out_c)
    x = jax.random.normal(xkey, (2, in_c, 16, 16), jnp.float32)

    fwd = jax.jit(functools.partial(encode_b_forward, dilation=1, grid=(1, 1, 1)))
    out = jax.block_until_ready(fwd(params, x))

    assert out.shape == (2, out_c, 8, 8), out.shape
    assert bool(jnp.all(jnp.isfinite(out)))

    # bf16 weights/activations vs f32 reference: validate with an explicit tolerance.
    ref = _reference_forward(params, x, dilation=1, grid=(1, 1, 1))
    err = float(jnp.max(jnp.abs(out - ref)))
    assert err < 1e-1, f"kernel/reference mismatch: max abs err = {err}"
    print("KERNEL_OK")
</pallas_src>

<mosaic_0001>
module attributes {stable_mosaic.version = 11 : i64} {
  func.func @_encode_b_kernel(%arg0: i32, %arg1: memref<1x326x4xbf16, #tpu.memory_space<vmem>>, %arg2: memref<9x4x32xbf16, #tpu.memory_space<vmem>>, %arg3: memref<9x32x32xbf16, #tpu.memory_space<vmem>>, %arg4: memref<9x32x32xbf16, #tpu.memory_space<vmem>>, %arg5: memref<3x2x32xf32, #tpu.memory_space<vmem>>, %arg6: memref<1x8x8x32xf32, #tpu.memory_space<vmem>>, %arg7: memref<326x32xbf16, #tpu.memory_space<vmem>>, %arg8: memref<16x16x32xf32, #tpu.memory_space<vmem>>) attributes {dimension_semantics = [#tpu.dimension_semantics<parallel>], iteration_bounds = array<i64: 2>, scalar_prefetch = 0 : i64, scratch_operands = 2 : i64, tpu.core_type = #tpu.core_type<tc>, window_params = [{transform_indices = @transform_0, window_bounds = array<i64: 1, 326, 4>}, {pipeline_mode = #tpu.pipeline_mode<synchronous>, transform_indices = @transform_1, window_bounds = array<i64: 9, 4, 32>}, {pipeline_mode = #tpu.pipeline_mode<synchronous>, transform_indices = @transform_2, window_bounds = array<i64: 9, 32, 32>}, {pipeline_mode = #tpu.pipeline_mode<synchronous>, transform_indices = @transform_3, window_bounds = array<i64: 9, 32, 32>}, {pipeline_mode = #tpu.pipeline_mode<synchronous>, transform_indices = @transform_4, window_bounds = array<i64: 3, 2, 32>}, {transform_indices = @transform_5, window_bounds = array<i64: 1, 8, 8, 32>}]} {
    %0 = tpu.iota {dimensions = array<i32: 0>} : vector<288x32xi32>
    %c18_i32 = arith.constant 18 : i32
    %c0_i32 = arith.constant 0 : i32
    %1 = arith.cmpi eq, %c18_i32, %c0_i32 : i32
    %c1_i32 = arith.constant 1 : i32
    %2 = arith.select %1, %c1_i32, %c18_i32 : i32
    %3 = vector.broadcast %2 : i32 to vector<288x32xi32>
    %4 = arith.remsi %0, %3 : vector<288x32xi32>
    %c0_i32_0 = arith.constant 0 : i32
    %5 = vector.broadcast %c0_i32_0 : i32 to vector<288x32xi32>
    %6 = arith.cmpi ne, %4, %5 : vector<288x32xi32>
    %c0_i32_1 = arith.constant 0 : i32
    %7 = vector.broadcast %c0_i32_1 : i32 to vector<288x32xi32>
    %8 = arith.cmpi slt, %4, %7 : vector<288x32xi32>
    %c0_i32_2 = arith.constant 0 : i32
    %9 = arith.cmpi slt, %2, %c0_i32_2 : i32
    %10 = vector.broadcast %9 : i1 to vector<288x32xi1>
    %11 = vector.broadcast %10 : vector<288x32xi1> to vector<288x32xi1>
    %12 = arith.xori %8, %11 : vector<288x32xi1>
    %13 = arith.andi %12, %6 : vector<288x32xi1>
    %14 = vector.broadcast %2 : i32 to vector<288x32xi32>
    %15 = arith.addi %4, %14 : vector<288x32xi32>
    %16 = arith.select %13, %15, %4 : vector<288x32xi1>, vector<288x32xi32>
    %c16_i32 = arith.constant 16 : i32
    %17 = vector.broadcast %c16_i32 : i32 to vector<288x32xi32>
    %18 = arith.cmpi slt, %16, %17 : vector<288x32xi32>
    %cst = arith.constant 0.000000e+00 : bf16
    %19 = vector.broadcast %cst : bf16 to vector<326x32xbf16>
    %c0 = arith.constant 0 : index
    %c0_3 = arith.constant 0 : index
    %20 = vector.load %arg7[%c0, %c0_3] : memref<326x32xbf16, #tpu.memory_space<vmem>>, vector<326x32xbf16>
    tpu.vector_store %arg7[%c0, %c0_3], %19 {strides = array<i32>} : memref<326x32xbf16, #tpu.memory_space<vmem>>, vector<326x32xbf16>,
    %cst_4 = arith.constant 0.000000e+00 : f32
    %21 = vector.broadcast %cst_4 : f32 to vector<288x32xf32>
    %c0_5 = arith.constant 0 : index
    %c0_6 = arith.constant 0 : index
    %c0_7 = arith.constant 0 : index
    %22 = vector.load %arg1[%c0_5, %c0_6, %c0_7] : memref<1x326x4xbf16, #tpu.memory_space<vmem>>, vector<1x288x4xbf16>
    %23 = vector.shape_cast %22 : vector<1x288x4xbf16> to vector<288x4xbf16>
    %c0_8 = arith.constant 0 : index
    %c0_9 = arith.constant 0 : index
    %c0_10 = arith.constant 0 : index
    %24 = vector.load %arg2[%c0_8, %c0_9, %c0_10] : memref<9x4x32xbf16, #tpu.memory_space<vmem>>, vector<1x4x32xbf16>
    %25 = vector.shape_cast %24 : vector<1x4x32xbf16> to vector<4x32xbf16>
    %cst_11 = arith.constant dense<0.000000e+00> : vector<288x32xf32>
    %26 = tpu.matmul %23, %25, %cst_11 {dimension_numbers = #tpu.dot_dimension_numbers<[1], [0], [0], [1], [0, 0, 1, 1], [], []>} : vector<288x4xbf16>, vector<4x32xbf16>, vector<288x32xf32> -> vector<288x32xf32>
    %27 = arith.addf %21, %26 : vector<288x32xf32>
    %c0_12 = arith.constant 0 : index
    %c1 = arith.constant 1 : index
    %c0_13 = arith.constant 0 : index
    %28 = vector.load %arg1[%c0_12, %c1, %c0_13] : memref<1x326x4xbf16, #tpu.memory_space<vmem>>, vector<1x288x4xbf16>
    %29 = vector.shape_cast %28 : vector<1x288x4xbf16> to vector<288x4xbf16>
    %c1_14 = arith.constant 1 : index
    %c0_15 = arith.constant 0 : index
    %c0_16 = arith.constant 0 : index
    %30 = vector.load %arg2[%c1_14, %c0_15, %c0_16] : memref<9x4x32xbf16, #tpu.memory_space<vmem>>, vector<1x4x32xbf16>
    %31 = vector.shape_cast %30 : vector<1x4x32xbf16> to vector<4x32xbf16>
    %cst_17 = arith.constant dense<0.000000e+00> : vector<288x32xf32>
    %32 = tpu.matmul %29, %31, %cst_17 {dimension_numbers = #tpu.dot_dimension_numbers<[1], [0], [0], [1], [0, 0, 1, 1], [], []>} : vector<288x4xbf16>, vector<4x32xbf16>, vector<288x32xf32> -> vector<288x32xf32>
    %33 = arith.addf %27, %32 : vector<288x32xf32>
    %c0_18 = arith.constant 0 : index
    %c2 = arith.constant 2 : index
    %c0_19 = arith.constant 0 : index
    %34 = vector.load %arg1[%c0_18, %c2, %c0_19] : memref<1x326x4xbf16, #tpu.memory_space<vmem>>, vector<1x288x4xbf16>
    %35 = vector.shape_cast %34 : vector<1x288x4xbf16> to vector<288x4xbf16>
    %c2_20 = arith.constant 2 : index
    %c0_21 = arith.constant 0 : index
    %c0_22 = arith.constant 0 : index
    %36 = vector.load %arg2[%c2_20, %c0_21, %c0_22] : memref<9x4x32xbf16, #tpu.memory_space<vmem>>, vector<1x4x32xbf16>
    %37 = vector.shape_cast %36 : vector<1x4x32xbf16> to vector<4x32xbf16>
    %cst_23 = arith.constant dense<0.000000e+00> : vector<288x32xf32>
    %38 = tpu.matmul %35, %37, %cst_23 {dimension_numbers = #tpu.dot_dimension_numbers<[1], [0], [0], [1], [0, 0, 1, 1], [], []>} : vector<288x4xbf16>, vector<4x32xbf16>, vector<288x32xf32> -> vector<288x32xf32>
    %39 = arith.addf %33, %38 : vector<288x32xf32>
    %c0_24 = arith.constant 0 : index
    %c18 = arith.constant 18 : index
    %c0_25 = arith.constant 0 : index
    %40 = vector.load %arg1[%c0_24, %c18, %c0_25] : memref<1x326x4xbf16, #tpu.memory_space<vmem>>, vector<1x288x4xbf16>
    %41 = vector.shape_cast %40 : vector<1x288x4xbf16> to vector<288x4xbf16>
    %c3 = arith.constant 3 : index
    %c0_26 = arith.constant 0 : index
    %c0_27 = arith.constant 0 : index
    %42 = vector.load %arg2[%c3, %c0_26, %c0_27] : memref<9x4x32xbf16, #tpu.memory_space<vmem>>, vector<1x4x32xbf16>
    %43 = vector.shape_cast %42 : vector<1x4x32xbf16> to vector<4x32xbf16>
    %cst_28 = arith.constant dense<0.000000e+00> : vector<288x32xf32>
    %44 = tpu.matmul %41, %43, %cst_28 {dimension_numbers = #tpu.dot_dimension_numbers<[1], [0], [0], [1], [0, 0, 1, 1], [], []>} : vector<288x4xbf16>, vector<4x32xbf16>, vector<288x32xf32> -> vector<288x32xf32>
    %45 = arith.addf %39, %44 : vector<288x32xf32>
    %c0_29 = arith.constant 0 : index
    %c19 = arith.constant 19 : index
    %c0_30 = arith.constant 0 : index
    %46 = vector.load %arg1[%c0_29, %c19, %c0_30] : memref<1x326x4xbf16, #tpu.memory_space<vmem>>, vector<1x288x4xbf16>
    %47 = vector.shape_cast %46 : vector<1x288x4xbf16> to vector<288x4xbf16>
    %c4 = arith.constant 4 : index
    %c0_31 = arith.constant 0 : index
    %c0_32 = arith.constant 0 : index
    %48 = vector.load %arg2[%c4, %c0_31, %c0_32] : memref<9x4x32xbf16, #tpu.memory_space<vmem>>, vector<1x4x32xbf16>
    %49 = vector.shape_cast %48 : vector<1x4x32xbf16> to vector<4x32xbf16>
    %cst_33 = arith.constant dense<0.000000e+00> : vector<288x32xf32>
    %50 = tpu.matmul %47, %49, %cst_33 {dimension_numbers = #tpu.dot_dimension_numbers<[1], [0], [0], [1], [0, 0, 1, 1], [], []>} : vector<288x4xbf16>, vector<4x32xbf16>, vector<288x32xf32> -> vector<288x32xf32>
    %51 = arith.addf %45, %50 : vector<288x32xf32>
    %c0_34 = arith.constant 0 : index
    %c20 = arith.constant 20 : index
    %c0_35 = arith.constant 0 : index
    %52 = vector.load %arg1[%c0_34, %c20, %c0_35] : memref<1x326x4xbf16, #tpu.memory_space<vmem>>, vector<1x288x4xbf16>
    %53 = vector.shape_cast %52 : vector<1x288x4xbf16> to vector<288x4xbf16>
    %c5 = arith.constant 5 : index
    %c0_36 = arith.constant 0 : index
    %c0_37 = arith.constant 0 : index
    %54 = vector.load %arg2[%c5, %c0_36, %c0_37] : memref<9x4x32xbf16, #tpu.memory_space<vmem>>, vector<1x4x32xbf16>
    %55 = vector.shape_cast %54 : vector<1x4x32xbf16> to vector<4x32xbf16>
    %cst_38 = arith.constant dense<0.000000e+00> : vector<288x32xf32>
    %56 = tpu.matmul %53, %55, %cst_38 {dimension_numbers = #tpu.dot_dimension_numbers<[1], [0], [0], [1], [0, 0, 1, 1], [], []>} : vector<288x4xbf16>, vector<4x32xbf16>, vector<288x32xf32> -> vector<288x32xf32>
    %57 = arith.addf %51, %56 : vector<288x32xf32>
    %c0_39 = arith.constant 0 : index
    %c36 = arith.constant 36 : index
    %c0_40 = arith.constant 0 : index
    %58 = vector.load %arg1[%c0_39, %c36, %c0_40] : memref<1x326x4xbf16, #tpu.memory_space<vmem>>, vector<1x288x4xbf16>
    %59 = vector.shape_cast %58 : vector<1x288x4xbf16> to vector<288x4xbf16>
    %c6 = arith.constant 6 : index
    %c0_41 = arith.constant 0 : index
    %c0_42 = arith.constant 0 : index
    %60 = vector.load %arg2[%c6, %c0_41, %c0_42] : memref<9x4x32xbf16, #tpu.memory_space<vmem>>, vector<1x4x32xbf16>
    %61 = vector.shape_cast %60 : vector<1x4x32xbf16> to vector<4x32xbf16>
    %cst_43 = arith.constant dense<0.000000e+00> : vector<288x32xf32>
    %62 = tpu.matmul %59, %61, %cst_43 {dimension_numbers = #tpu.dot_dimension_numbers<[1], [0], [0], [1], [0, 0, 1, 1], [], []>} : vector<288x4xbf16>, vector<4x32xbf16>, vector<288x32xf32> -> vector<288x32xf32>
    %63 = arith.addf %57, %62 : vector<288x32xf32>
    %c0_44 = arith.constant 0 : index
    %c37 = arith.constant 37 : index
    %c0_45 = arith.constant 0 : index
    %64 = vector.load %arg1[%c0_44, %c37, %c0_45] : memref<1x326x4xbf16, #tpu.memory_space<vmem>>, vector<1x288x4xbf16>
    %65 = vector.shape_cast %64 : vector<1x288x4xbf16> to vector<288x4xbf16>
    %c7 = arith.constant 7 : index
    %c0_46 = arith.constant 0 : index
    %c0_47 = arith.constant 0 : index
    %66 = vector.load %arg2[%c7, %c0_46, %c0_47] : memref<9x4x32xbf16, #tpu.memory_space<vmem>>, vector<1x4x32xbf16>
    %67 = vector.shape_cast %66 : vector<1x4x32xbf16> to vector<4x32xbf16>
    %cst_48 = arith.constant dense<0.000000e+00> : vector<288x32xf32>
    %68 = tpu.matmul %65, %67, %cst_48 {dimension_numbers = #tpu.dot_dimension_numbers<[1], [0], [0], [1], [0, 0, 1, 1], [], []>} : vector<288x4xbf16>, vector<4x32xbf16>, vector<288x32xf32> -> vector<288x32xf32>
    %69 = arith.addf %63, %68 : vector<288x32xf32>
    %c0_49 = arith.constant 0 : index
    %c38 = arith.constant 38 : index
    %c0_50 = arith.constant 0 : index
    %70 = vector.load %arg1[%c0_49, %c38, %c0_50] : memref<1x326x4xbf16, #tpu.memory_space<vmem>>, vector<1x288x4xbf16>
    %71 = vector.shape_cast %70 : vector<1x288x4xbf16> to vector<288x4xbf16>
    %c8 = arith.constant 8 : index
    %c0_51 = arith.constant 0 : index
    %c0_52 = arith.constant 0 : index
    %72 = vector.load %arg2[%c8, %c0_51, %c0_52] : memref<9x4x32xbf16, #tpu.memory_space<vmem>>, vector<1x4x32xbf16>
    %73 = vector.shape_cast %72 : vector<1x4x32xbf16> to vector<4x32xbf16>
    %cst_53 = arith.constant dense<0.000000e+00> : vector<288x32xf32>
    %74 = tpu.matmul %71, %73, %cst_53 {dimension_numbers = #tpu.dot_dimension_numbers<[1], [0], [0], [1], [0, 0, 1, 1], [], []>} : vector<288x4xbf16>, vector<4x32xbf16>, vector<288x32xf32> -> vector<288x32xf32>
    %75 = arith.addf %69, %74 : vector<288x32xf32>
    %c0_54 = arith.constant 0 : index
    %c0_55 = arith.constant 0 : index
    %c0_56 = arith.constant 0 : index
    %76 = vector.load %arg5[%c0_54, %c0_55, %c0_56] : memref<3x2x32xf32, #tpu.memory_space<vmem>>, vector<1x1x32xf32>
    %77 = vector.shape_cast %76 : vector<1x1x32xf32> to vector<1x32xf32>
    %78 = vector.broadcast %77 : vector<1x32xf32> to vector<288x32xf32>
    %79 = arith.mulf %75, %78 : vector<288x32xf32>
    %c0_57 = arith.constant 0 : index
    %c1_58 = arith.constant 1 : index
    %c0_59 = arith.constant 0 : index
    %80 = vector.load %arg5[%c0_57, %c1_58, %c0_59] : memref<3x2x32xf32, #tpu.memory_space<vmem>>, vector<1x1x32xf32>
    %81 = vector.shape_cast %80 : vector<1x1x32xf32> to vector<1x32xf32>
    %82 = vector.broadcast %81 : vector<1x32xf32> to vector<288x32xf32>
    %83 = arith.addf %79, %82 : vector<288x32xf32>
    %cst_60 = arith.constant 0.000000e+00 : f32
    %84 = vector.broadcast %cst_60 : f32 to vector<288x32xf32>
    %85 = arith.maximumf %83, %84 : vector<288x32xf32>
    %cst_61 = arith.constant 0.000000e+00 : f32
    %86 = vector.broadcast %cst_61 : f32 to vector<288x32xf32>
    %87 = arith.select %18, %85, %86 : vector<288x32xi1>, vector<288x32xf32>
    %88 = arith.truncf %87 : vector<288x32xf32> to vector<288x32xbf16>
    %c19_62 = arith.constant 19 : index
    %c0_63 = arith.constant 0 : index
    %89 = vector.load %arg7[%c19_62, %c0_63] : memref<326x32xbf16, #tpu.memory_space<vmem>>, vector<288x32xbf16>
    tpu.vector_store %arg7[%c19_62, %c0_63], %88 {strides = array<i32>} : memref<326x32xbf16, #tpu.memory_space<vmem>>, vector<288x32xbf16>,
    %cst_64 = arith.constant 0.000000e+00 : f32
    %90 = vector.broadcast %cst_64 : f32 to vector<288x32xf32>
    %c0_65 = arith.constant 0 : index
    %c0_66 = arith.constant 0 : index
    %91 = vector.load %arg7[%c0_65, %c0_66] : memref<326x32xbf16, #tpu.memory_space<vmem>>, vector<288x32xbf16>
    %c0_67 = arith.constant 0 : index
    %c0_68 = arith.constant 0 : index
    %c0_69 = arith.constant 0 : index
    %92 = vector.load %arg3[%c0_67, %c0_68, %c0_69] : memref<9x32x32xbf16, #tpu.memory_space<vmem>>, vector<1x32x32xbf16>
    %93 = vector.shape_cast %92 : vector<1x32x32xbf16> to vector<32x32xbf16>
    %cst_70 = arith.constant dense<0.000000e+00> : vector<288x32xf32>
    %94 = tpu.matmul %91, %93, %cst_70 {dimension_numbers = #tpu.dot_dimension_numbers<[1], [0], [0], [1], [0, 0, 1, 1], [], []>} : vector<288x32xbf16>, vector<32x32xbf16>, vector<288x32xf32> -> vector<288x32xf32>
    %95 = arith.addf %90, %94 : vector<288x32xf32>
    %c1_71 = arith.constant 1 : index
    %c0_72 = arith.constant 0 : index
    %96 = vector.load %arg7[%c1_71, %c0_72] : memref<326x32xbf16, #tpu.memory_space<vmem>>, vector<288x32xbf16>
    %c1_73 = arith.constant 1 : index
    %c0_74 = arith.constant 0 : index
    %c0_75 = arith.constant 0 : index
    %97 = vector.load %arg3[%c1_73, %c0_74, %c0_75] : memref<9x32x32xbf16, #tpu.memory_space<vmem>>, vector<1x32x32xbf16>
    %98 = vector.shape_cast %97 : vector<1x32x32xbf16> to vector<32x32xbf16>
    %cst_76 = arith.constant dense<0.000000e+00> : vector<288x32xf32>
    %99 = tpu.matmul %96, %98, %cst_76 {dimension_numbers = #tpu.dot_dimension_numbers<[1], [0], [0], [1], [0, 0, 1, 1], [], []>} : vector<288x32xbf16>, vector<32x32xbf16>, vector<288x32xf32> -> vector<288x32xf32>
    %100 = arith.addf %95, %99 : vector<288x32xf32>
    %c2_77 = arith.constant 2 : index
    %c0_78 = arith.constant 0 : index
    %101 = vector.load %arg7[%c2_77, %c0_78] : memref<326x32xbf16, #tpu.memory_space<vmem>>, vector<288x32xbf16>
    %c2_79 = arith.constant 2 : index
    %c0_80 = arith.constant 0 : index
    %c0_81 = arith.constant 0 : index
    %102 = vector.load %arg3[%c2_79, %c0_80, %c0_81] : memref<9x32x32xbf16, #tpu.memory_space<vmem>>, vector<1x32x32xbf16>
    %103 = vector.shape_cast %102 : vector<1x32x32xbf16> to vector<32x32xbf16>
    %cst_82 = arith.constant dense<0.000000e+00> : vector<288x32xf32>
    %104 = tpu.matmul %101, %103, %cst_82 {dimension_numbers = #tpu.dot_dimension_numbers<[1], [0], [0], [1], [0, 0, 1, 1], [], []>} : vector<288x32xbf16>, vector<32x32xbf16>, vector<288x32xf32> -> vector<288x32xf32>
    %105 = arith.addf %100, %104 : vector<288x32xf32>
    %c18_83 = arith.constant 18 : index
    %c0_84 = arith.constant 0 : index
    %106 = vector.load %arg7[%c18_83, %c0_84] : memref<326x32xbf16, #tpu.memory_space<vmem>>, vector<288x32xbf16>
    %c3_85 = arith.constant 3 : index
    %c0_86 = arith.constant 0 : index
    %c0_87 = arith.constant 0 : index
    %107 = vector.load %arg3[%c3_85, %c0_86, %c0_87] : memref<9x32x32xbf16, #tpu.memory_space<vmem>>, vector<1x32x32xbf16>
    %108 = vector.shape_cast %107 : vector<1x32x32xbf16> to vector<32x32xbf16>
    %cst_88 = arith.constant dense<0.000000e+00> : vector<288x32xf32>
    %109 = tpu.matmul %106, %108, %cst_88 {dimension_numbers = #tpu.dot_dimension_numbers<[1], [0], [0], [1], [0, 0, 1, 1], [], []>} : vector<288x32xbf16>, vector<32x32xbf16>, vector<288x32xf32> -> vector<288x32xf32>
    %110 = arith.addf %105, %109 : vector<288x32xf32>
    %c19_89 = arith.constant 19 : index
    %c0_90 = arith.constant 0 : index
    %111 = vector.load %arg7[%c19_89, %c0_90] : memref<326x32xbf16, #tpu.memory_space<vmem>>, vector<288x32xbf16>
    %c4_91 = arith.constant 4 : index
    %c0_92 = arith.constant 0 : index
    %c0_93 = arith.constant 0 : index
    %112 = vector.load %arg3[%c4_91, %c0_92, %c0_93] : memref<9x32x32xbf16, #tpu.memory_space<vmem>>, vector<1x32x32xbf16>
    %113 = vector.shape_cast %112 : vector<1x32x32xbf16> to vector<32x32xbf16>
    %cst_94 = arith.constant dense<0.000000e+00> : vector<288x32xf32>
    %114 = tpu.matmul %111, %113, %cst_94 {dimension_numbers = #tpu.dot_dimension_numbers<[1], [0], [0], [1], [0, 0, 1, 1], [], []>} : vector<288x32xbf16>, vector<32x32xbf16>, vector<288x32xf32> -> vector<288x32xf32>
    %115 = arith.addf %110, %114 : vector<288x32xf32>
    %c20_95 = arith.constant 20 : index
    %c0_96 = arith.constant 0 : index
    %116 = vector.load %arg7[%c20_95, %c0_96] : memref<326x32xbf16, #tpu.memory_space<vmem>>, vector<288x32xbf16>
    %c5_97 = arith.constant 5 : index
    %c0_98 = arith.constant 0 : index
    %c0_99 = arith.constant 0 : index
    %117 = vector.load %arg3[%c5_97, %c0_98, %c0_99] : memref<9x32x32xbf16, #tpu.memory_space<vmem>>, vector<1x32x32xbf16>
    %118 = vector.shape_cast %117 : vector<1x32x32xbf16> to vector<32x32xbf16>
    %cst_100 = arith.constant dense<0.000000e+00> : vector<288x32xf32>
    %119 = tpu.matmul %116, %118, %cst_100 {dimension_numbers = #tpu.dot_dimension_numbers<[1], [0], [0], [1], [0, 0, 1, 1], [], []>} : vector<288x32xbf16>, vector<32x32xbf16>, vector<288x32xf32> -> vector<288x32xf32>
    %120 = arith.addf %115, %119 : vector<288x32xf32>
    %c36_101 = arith.constant 36 : index
    %c0_102 = arith.constant 0 : index
    %121 = vector.load %arg7[%c36_101, %c0_102] : memref<326x32xbf16, #tpu.memory_space<vmem>>, vector<288x32xbf16>
    %c6_103 = arith.constant 6 : index
    %c0_104 = arith.constant 0 : index
    %c0_105 = arith.constant 0 : index
    %122 = vector.load %arg3[%c6_103, %c0_104, %c0_105] : memref<9x32x32xbf16, #tpu.memory_space<vmem>>, vector<1x32x32xbf16>
    %123 = vector.shape_cast %122 : vector<1x32x32xbf16> to vector<32x32xbf16>
    %cst_106 = arith.constant dense<0.000000e+00> : vector<288x32xf32>
    %124 = tpu.matmul %121, %123, %cst_106 {dimension_numbers = #tpu.dot_dimension_numbers<[1], [0], [0], [1], [0, 0, 1, 1], [], []>} : vector<288x32xbf16>, vector<32x32xbf16>, vector<288x32xf32> -> vector<288x32xf32>
    %125 = arith.addf %120, %124 : vector<288x32xf32>
    %c37_107 = arith.constant 37 : index
    %c0_108 = arith.constant 0 : index
    %126 = vector.load %arg7[%c37_107, %c0_108] : memref<326x32xbf16, #tpu.memory_space<vmem>>, vector<288x32xbf16>
    %c7_109 = arith.constant 7 : index
    %c0_110 = arith.constant 0 : index
    %c0_111 = arith.constant 0 : index
    %127 = vector.load %arg3[%c7_109, %c0_110, %c0_111] : memref<9x32x32xbf16, #tpu.memory_space<vmem>>, vector<1x32x32xbf16>
    %128 = vector.shape_cast %127 : vector<1x32x32xbf16> to vector<32x32xbf16>
    %cst_112 = arith.constant dense<0.000000e+00> : vector<288x32xf32>
    %129 = tpu.matmul %126, %128, %cst_112 {dimension_numbers = #tpu.dot_dimension_numbers<[1], [0], [0], [1], [0, 0, 1, 1], [], []>} : vector<288x32xbf16>, vector<32x32xbf16>, vector<288x32xf32> -> vector<288x32xf32>
    %130 = arith.addf %125, %129 : vector<288x32xf32>
    %c38_113 = arith.constant 38 : index
    %c0_114 = arith.constant 0 : index
    %131 = vector.load %arg7[%c38_113, %c0_114] : memref<326x32xbf16, #tpu.memory_space<vmem>>, vector<288x32xbf16>
    %c8_115 = arith.constant 8 : index
    %c0_116 = arith.constant 0 : index
    %c0_117 = arith.constant 0 : index
    %132 = vector.load %arg3[%c8_115, %c0_116, %c0_117] : memref<9x32x32xbf16, #tpu.memory_space<vmem>>, vector<1x32x32xbf16>
    %133 = vector.shape_cast %132 : vector<1x32x32xbf16> to vector<32x32xbf16>
    %cst_118 = arith.constant dense<0.000000e+00> : vector<288x32xf32>
    %134 = tpu.matmul %131, %133, %cst_118 {dimension_numbers = #tpu.dot_dimension_numbers<[1], [0], [0], [1], [0, 0, 1, 1], [], []>} : vector<288x32xbf16>, vector<32x32xbf16>, vector<288x32xf32> -> vector<288x32xf32>
    %135 = arith.addf %130, %134 : vector<288x32xf32>
    %c1_119 = arith.constant 1 : index
    %c0_120 = arith.constant 0 : index
    %c0_121 = arith.constant 0 : index
    %136 = vector.load %arg5[%c1_119, %c0_120, %c0_121] : memref<3x2x32xf32, #tpu.memory_space<vmem>>, vector<1x1x32xf32>
    %137 = vector.shape_cast %136 : vector<1x1x32xf32> to vector<1x32xf32>
    %138 = vector.broadcast %137 : vector<1x32xf32> to vector<288x32xf32>
    %139 = arith.mulf %135, %138 : vector<288x32xf32>
    %c1_122 = arith.constant 1 : index
    %c1_123 = arith.constant 1 : index
    %c0_124 = arith.constant 0 : index
    %140 = vector.load %arg5[%c1_122, %c1_123, %c0_124] : memref<3x2x32xf32, #tpu.memory_space<vmem>>, vector<1x1x32xf32>
    %141 = vector.shape_cast %140 : vector<1x1x32xf32> to vector<1x32xf32>
    %142 = vector.broadcast %141 : vector<1x32xf32> to vector<288x32xf32>
    %143 = arith.addf %139, %142 : vector<288x32xf32>
    %cst_125 = arith.constant 0.000000e+00 : f32
    %144 = vector.broadcast %cst_125 : f32 to vector<288x32xf32>
    %145 = arith.maximumf %143, %144 : vector<288x32xf32>
    %cst_126 = arith.constant 0.000000e+00 : f32
    %146 = vector.broadcast %cst_126 : f32 to vector<288x32xf32>
    %147 = arith.select %18, %145, %146 : vector<288x32xi1>, vector<288x32xf32>
    %148 = arith.truncf %147 : vector<288x32xf32> to vector<288x32xbf16>
    %c19_127 = arith.constant 19 : index
    %c0_128 = arith.constant 0 : index
    %149 = vector.load %arg7[%c19_127, %c0_128] : memref<326x32xbf16, #tpu.memory_space<vmem>>, vector<288x32xbf16>
    tpu.vector_store %arg7[%c19_127, %c0_128], %148 {strides = array<i32>} : memref<326x32xbf16, #tpu.memory_space<vmem>>, vector<288x32xbf16>,
    %cst_129 = arith.constant 0.000000e+00 : f32
    %150 = vector.broadcast %cst_129 : f32 to vector<288x32xf32>
    %c0_130 = arith.constant 0 : index
    %c0_131 = arith.constant 0 : index
    %151 = vector.load %arg7[%c0_130, %c0_131] : memref<326x32xbf16, #tpu.memory_space<vmem>>, vector<288x32xbf16>
    %c0_132 = arith.constant 0 : index
    %c0_133 = arith.constant 0 : index
    %c0_134 = arith.constant 0 : index
    %152 = vector.load %arg4[%c0_132, %c0_133, %c0_134] : memref<9x32x32xbf16, #tpu.memory_space<vmem>>, vector<1x32x32xbf16>
    %153 = vector.shape_cast %152 : vector<1x32x32xbf16> to vector<32x32xbf16>
    %cst_135 = arith.constant dense<0.000000e+00> : vector<288x32xf32>
    %154 = tpu.matmul %151, %153, %cst_135 {dimension_numbers = #tpu.dot_dimension_numbers<[1], [0], [0], [1], [0, 0, 1, 1], [], []>} : vector<288x32xbf16>, vector<32x32xbf16>, vector<288x32xf32> -> vector<288x32xf32>
    %155 = arith.addf %150, %154 : vector<288x32xf32>
    %c1_136 = arith.constant 1 : index
    %c0_137 = arith.constant 0 : index
    %156 = vector.load %arg7[%c1_136, %c0_137] : memref<326x32xbf16, #tpu.memory_space<vmem>>, vector<288x32xbf16>
    %c1_138 = arith.constant 1 : index
    %c0_139 = arith.constant 0 : index
    %c0_140 = arith.constant 0 : index
    %157 = vector.load %arg4[%c1_138, %c0_139, %c0_140] : memref<9x32x32xbf16, #tpu.memory_space<vmem>>, vector<1x32x32xbf16>
    %158 = vector.shape_cast %157 : vector<1x32x32xbf16> to vector<32x32xbf16>
    %cst_141 = arith.constant dense<0.000000e+00> : vector<288x32xf32>
    %159 = tpu.matmul %156, %158, %cst_141 {dimension_numbers = #tpu.dot_dimension_numbers<[1], [0], [0], [1], [0, 0, 1, 1], [], []>} : vector<288x32xbf16>, vector<32x32xbf16>, vector<288x32xf32> -> vector<288x32xf32>
    %160 = arith.addf %155, %159 : vector<288x32xf32>
    %c2_142 = arith.constant 2 : index
    %c0_143 = arith.constant 0 : index
    %161 = vector.load %arg7[%c2_142, %c0_143] : memref<326x32xbf16, #tpu.memory_space<vmem>>, vector<288x32xbf16>
    %c2_144 = arith.constant 2 : index
    %c0_145 = arith.constant 0 : index
    %c0_146 = arith.constant 0 : index
    %162 = vector.load %arg4[%c2_144, %c0_145, %c0_146] : memref<9x32x32xbf16, #tpu.memory_space<vmem>>, vector<1x32x32xbf16>
    %163 = vector.shape_cast %162 : vector<1x32x32xbf16> to vector<32x32xbf16>
    %cst_147 = arith.constant dense<0.000000e+00> : vector<288x32xf32>
    %164 = tpu.matmul %161, %163, %cst_147 {dimension_numbers = #tpu.dot_dimension_numbers<[1], [0], [0], [1], [0, 0, 1, 1], [], []>} : vector<288x32xbf16>, vector<32x32xbf16>, vector<288x32xf32> -> vector<288x32xf32>
    %165 = arith.addf %160, %164 : vector<288x32xf32>
    %c18_148 = arith.constant 18 : index
    %c0_149 = arith.constant 0 : index
    %166 = vector.load %arg7[%c18_148, %c0_149] : memref<326x32xbf16, #tpu.memory_space<vmem>>, vector<288x32xbf16>
    %c3_150 = arith.constant 3 : index
    %c0_151 = arith.constant 0 : index
    %c0_152 = arith.constant 0 : index
    %167 = vector.load %arg4[%c3_150, %c0_151, %c0_152] : memref<9x32x32xbf16, #tpu.memory_space<vmem>>, vector<1x32x32xbf16>
    %168 = vector.shape_cast %167 : vector<1x32x32xbf16> to vector<32x32xbf16>
    %cst_153 = arith.constant dense<0.000000e+00> : vector<288x32xf32>
    %169 = tpu.matmul %166, %168, %cst_153 {dimension_numbers = #tpu.dot_dimension_numbers<[1], [0], [0], [1], [0, 0, 1, 1], [], []>} : vector<288x32xbf16>, vector<32x32xbf16>, vector<288x32xf32> -> vector<288x32xf32>
    %170 = arith.addf %165, %169 : vector<288x32xf32>
    %c19_154 = arith.constant 19 : index
    %c0_155 = arith.constant 0 : index
    %171 = vector.load %arg7[%c19_154, %c0_155] : memref<326x32xbf16, #tpu.memory_space<vmem>>, vector<288x32xbf16>
    %c4_156 = arith.constant 4 : index
    %c0_157 = arith.constant 0 : index
    %c0_158 = arith.constant 0 : index
    %172 = vector.load %arg4[%c4_156, %c0_157, %c0_158] : memref<9x32x32xbf16, #tpu.memory_space<vmem>>, vector<1x32x32xbf16>
    %173 = vector.shape_cast %172 : vector<1x32x32xbf16> to vector<32x32xbf16>
    %cst_159 = arith.constant dense<0.000000e+00> : vector<288x32xf32>
    %174 = tpu.matmul %171, %173, %cst_159 {dimension_numbers = #tpu.dot_dimension_numbers<[1], [0], [0], [1], [0, 0, 1, 1], [], []>} : vector<288x32xbf16>, vector<32x32xbf16>, vector<288x32xf32> -> vector<288x32xf32>
    %175 = arith.addf %170, %174 : vector<288x32xf32>
    %c20_160 = arith.constant 20 : index
    %c0_161 = arith.constant 0 : index
    %176 = vector.load %arg7[%c20_160, %c0_161] : memref<326x32xbf16, #tpu.memory_space<vmem>>, vector<288x32xbf16>
    %c5_162 = arith.constant 5 : index
    %c0_163 = arith.constant 0 : index
    %c0_164 = arith.constant 0 : index
    %177 = vector.load %arg4[%c5_162, %c0_163, %c0_164] : memref<9x32x32xbf16, #tpu.memory_space<vmem>>, vector<1x32x32xbf16>
    %178 = vector.shape_cast %177 : vector<1x32x32xbf16> to vector<32x32xbf16>
    %cst_165 = arith.constant dense<0.000000e+00> : vector<288x32xf32>
    %179 = tpu.matmul %176, %178, %cst_165 {dimension_numbers = #tpu.dot_dimension_numbers<[1], [0], [0], [1], [0, 0, 1, 1], [], []>} : vector<288x32xbf16>, vector<32x32xbf16>, vector<288x32xf32> -> vector<288x32xf32>
    %180 = arith.addf %175, %179 : vector<288x32xf32>
    %c36_166 = arith.constant 36 : index
    %c0_167 = arith.constant 0 : index
    %181 = vector.load %arg7[%c36_166, %c0_167] : memref<326x32xbf16, #tpu.memory_space<vmem>>, vector<288x32xbf16>
    %c6_168 = arith.constant 6 : index
    %c0_169 = arith.constant 0 : index
    %c0_170 = arith.constant 0 : index
    %182 = vector.load %arg4[%c6_168, %c0_169, %c0_170] : memref<9x32x32xbf16, #tpu.memory_space<vmem>>, vector<1x32x32xbf16>
    %183 = vector.shape_cast %182 : vector<1x32x32xbf16> to vector<32x32xbf16>
    %cst_171 = arith.constant dense<0.000000e+00> : vector<288x32xf32>
    %184 = tpu.matmul %181, %183, %cst_171 {dimension_numbers = #tpu.dot_dimension_numbers<[1], [0], [0], [1], [0, 0, 1, 1], [], []>} : vector<288x32xbf16>, vector<32x32xbf16>, vector<288x32xf32> -> vector<288x32xf32>
    %185 = arith.addf %180, %184 : vector<288x32xf32>
    %c37_172 = arith.constant 37 : index
    %c0_173 = arith.constant 0 : index
    %186 = vector.load %arg7[%c37_172, %c0_173] : memref<326x32xbf16, #tpu.memory_space<vmem>>, vector<288x32xbf16>
    %c7_174 = arith.constant 7 : index
    %c0_175 = arith.constant 0 : index
    %c0_176 = arith.constant 0 : index
    %187 = vector.load %arg4[%c7_174, %c0_175, %c0_176] : memref<9x32x32xbf16, #tpu.memory_space<vmem>>, vector<1x32x32xbf16>
    %188 = vector.shape_cast %187 : vector<1x32x32xbf16> to vector<32x32xbf16>
    %cst_177 = arith.constant dense<0.000000e+00> : vector<288x32xf32>
    %189 = tpu.matmul %186, %188, %cst_177 {dimension_numbers = #tpu.dot_dimension_numbers<[1], [0], [0], [1], [0, 0, 1, 1], [], []>} : vector<288x32xbf16>, vector<32x32xbf16>, vector<288x32xf32> -> vector<288x32xf32>
    %190 = arith.addf %185, %189 : vector<288x32xf32>
    %c38_178 = arith.constant 38 : index
    %c0_179 = arith.constant 0 : index
    %191 = vector.load %arg7[%c38_178, %c0_179] : memref<326x32xbf16, #tpu.memory_space<vmem>>, vector<288x32xbf16>
    %c8_180 = arith.constant 8 : index
    %c0_181 = arith.constant 0 : index
    %c0_182 = arith.constant 0 : index
    %192 = vector.load %arg4[%c8_180, %c0_181, %c0_182] : memref<9x32x32xbf16, #tpu.memory_space<vmem>>, vector<1x32x32xbf16>
    %193 = vector.shape_cast %192 : vector<1x32x32xbf16> to vector<32x32xbf16>
    %cst_183 = arith.constant dense<0.000000e+00> : vector<288x32xf32>
    %194 = tpu.matmul %191, %193, %cst_183 {dimension_numbers = #tpu.dot_dimension_numbers<[1], [0], [0], [1], [0, 0, 1, 1], [], []>} : vector<288x32xbf16>, vector<32x32xbf16>, vector<288x32xf32> -> vector<288x32xf32>
    %195 = arith.addf %190, %194 : vector<288x32xf32>
    %c2_184 = arith.constant 2 : index
    %c0_185 = arith.constant 0 : index
    %c0_186 = arith.constant 0 : index
    %196 = vector.load %arg5[%c2_184, %c0_185, %c0_186] : memref<3x2x32xf32, #tpu.memory_space<vmem>>, vector<1x1x32xf32>
    %197 = vector.shape_cast %196 : vector<1x1x32xf32> to vector<1x32xf32>
    %198 = vector.broadcast %197 : vector<1x32xf32> to vector<288x32xf32>
    %199 = arith.mulf %195, %198 : vector<288x32xf32>
    %c2_187 = arith.constant 2 : index
    %c1_188 = arith.constant 1 : index
    %c0_189 = arith.constant 0 : index
    %200 = vector.load %arg5[%c2_187, %c1_188, %c0_189] : memref<3x2x32xf32, #tpu.memory_space<vmem>>, vector<1x1x32xf32>
    %201 = vector.shape_cast %200 : vector<1x1x32xf32> to vector<1x32xf32>
    %202 = vector.broadcast %201 : vector<1x32xf32> to vector<288x32xf32>
    %203 = arith.addf %199, %202 : vector<288x32xf32>
    %cst_190 = arith.constant 0.000000e+00 : f32
    %204 = vector.broadcast %cst_190 : f32 to vector<288x32xf32>
    %205 = arith.maximumf %203, %204 : vector<288x32xf32>
    %206 = vector.extract_strided_slice %205 {offsets = [0, 0], sizes = [16, 32], strides = [1, 1]} : vector<288x32xf32> to vector<16x32xf32>
    %c0_191 = arith.constant 0 : index
    %c0_192 = arith.constant 0 : index
    %c0_193 = arith.constant 0 : index
    %207 = vector.load %arg8[%c0_191, %c0_192, %c0_193] : memref<16x16x32xf32, #tpu.memory_space<vmem>>, vector<1x16x32xf32>
    %208 = vector.shape_cast %207 : vector<1x16x32xf32> to vector<16x32xf32>
    %209 = vector.shape_cast %206 : vector<16x32xf32> to vector<1x16x32xf32>
    tpu.vector_store %arg8[%c0_191, %c0_192, %c0_193], %209 {strides = array<i32>} : memref<16x16x32xf32, #tpu.memory_space<vmem>>, vector<1x16x32xf32>,
    %210 = vector.extract_strided_slice %205 {offsets = [18, 0], sizes = [16, 32], strides = [1, 1]} : vector<288x32xf32> to vector<16x32xf32>
    %c1_194 = arith.constant 1 : index
    %c0_195 = arith.constant 0 : index
    %c0_196 = arith.constant 0 : index
    %211 = vector.load %arg8[%c1_194, %c0_195, %c0_196] : memref<16x16x32xf32, #tpu.memory_space<vmem>>, vector<1x16x32xf32>
    %212 = vector.shape_cast %211 : vector<1x16x32xf32> to vector<16x32xf32>
    %213 = vector.shape_cast %210 : vector<16x32xf32> to vector<1x16x32xf32>
    tpu.vector_store %arg8[%c1_194, %c0_195, %c0_196], %213 {strides = array<i32>} : memref<16x16x32xf32, #tpu.memory_space<vmem>>, vector<1x16x32xf32>,
    %214 = vector.extract_strided_slice %205 {offsets = [36, 0], sizes = [16, 32], strides = [1, 1]} : vector<288x32xf32> to vector<16x32xf32>
    %c2_197 = arith.constant 2 : index
    %c0_198 = arith.constant 0 : index
    %c0_199 = arith.constant 0 : index
    %215 = vector.load %arg8[%c2_197, %c0_198, %c0_199] : memref<16x16x32xf32, #tpu.memory_space<vmem>>, vector<1x16x32xf32>
    %216 = vector.shape_cast %215 : vector<1x16x32xf32> to vector<16x32xf32>
    %217 = vector.shape_cast %214 : vector<16x32xf32> to vector<1x16x32xf32>
    tpu.vector_store %arg8[%c2_197, %c0_198, %c0_199], %217 {strides = array<i32>} : memref<16x16x32xf32, #tpu.memory_space<vmem>>, vector<1x16x32xf32>,
    %218 = vector.extract_strided_slice %205 {offsets = [54, 0], sizes = [16, 32], strides = [1, 1]} : vector<288x32xf32> to vector<16x32xf32>
    %c3_200 = arith.constant 3 : index
    %c0_201 = arith.constant 0 : index
    %c0_202 = arith.constant 0 : index
    %219 = vector.load %arg8[%c3_200, %c0_201, %c0_202] : memref<16x16x32xf32, #tpu.memory_space<vmem>>, vector<1x16x32xf32>
    %220 = vector.shape_cast %219 : vector<1x16x32xf32> to vector<16x32xf32>
    %221 = vector.shape_cast %218 : vector<16x32xf32> to vector<1x16x32xf32>
    tpu.vector_store %arg8[%c3_200, %c0_201, %c0_202], %221 {strides = array<i32>} : memref<16x16x32xf32, #tpu.memory_space<vmem>>, vector<1x16x32xf32>,
    %222 = vector.extract_strided_slice %205 {offsets = [72, 0], sizes = [16, 32], strides = [1, 1]} : vector<288x32xf32> to vector<16x32xf32>
    %c4_203 = arith.constant 4 : index
    %c0_204 = arith.constant 0 : index
    %c0_205 = arith.constant 0 : index
    %223 = vector.load %arg8[%c4_203, %c0_204, %c0_205] : memref<16x16x32xf32, #tpu.memory_space<vmem>>, vector<1x16x32xf32>
    %224 = vector.shape_cast %223 : vector<1x16x32xf32> to vector<16x32xf32>
    %225 = vector.shape_cast %222 : vector<16x32xf32> to vector<1x16x32xf32>
    tpu.vector_store %arg8[%c4_203, %c0_204, %c0_205], %225 {strides = array<i32>} : memref<16x16x32xf32, #tpu.memory_space<vmem>>, vector<1x16x32xf32>,
    %226 = vector.extract_strided_slice %205 {offsets = [90, 0], sizes = [16, 32], strides = [1, 1]} : vector<288x32xf32> to vector<16x32xf32>
    %c5_206 = arith.constant 5 : index
    %c0_207 = arith.constant 0 : index
    %c0_208 = arith.constant 0 : index
    %227 = vector.load %arg8[%c5_206, %c0_207, %c0_208] : memref<16x16x32xf32, #tpu.memory_space<vmem>>, vector<1x16x32xf32>
    %228 = vector.shape_cast %227 : vector<1x16x32xf32> to vector<16x32xf32>
    %229 = vector.shape_cast %226 : vector<16x32xf32> to vector<1x16x32xf32>
    tpu.vector_store %arg8[%c5_206, %c0_207, %c0_208], %229 {strides = array<i32>} : memref<16x16x32xf32, #tpu.memory_space<vmem>>, vector<1x16x32xf32>,
    %230 = vector.extract_strided_slice %205 {offsets = [108, 0], sizes = [16, 32], strides = [1, 1]} : vector<288x32xf32> to vector<16x32xf32>
    %c6_209 = arith.constant 6 : index
    %c0_210 = arith.constant 0 : index
    %c0_211 = arith.constant 0 : index
    %231 = vector.load %arg8[%c6_209, %c0_210, %c0_211] : memref<16x16x32xf32, #tpu.memory_space<vmem>>, vector<1x16x32xf32>
    %232 = vector.shape_cast %231 : vector<1x16x32xf32> to vector<16x32xf32>
    %233 = vector.shape_cast %230 : vector<16x32xf32> to vector<1x16x32xf32>
    tpu.vector_store %arg8[%c6_209, %c0_210, %c0_211], %233 {strides = array<i32>} : memref<16x16x32xf32, #tpu.memory_space<vmem>>, vector<1x16x32xf32>,
    %234 = vector.extract_strided_slice %205 {offsets = [126, 0], sizes = [16, 32], strides = [1, 1]} : vector<288x32xf32> to vector<16x32xf32>
    %c7_212 = arith.constant 7 : index
    %c0_213 = arith.constant 0 : index
    %c0_214 = arith.constant 0 : index
    %235 = vector.load %arg8[%c7_212, %c0_213, %c0_214] : memref<16x16x32xf32, #tpu.memory_space<vmem>>, vector<1x16x32xf32>
    %236 = vector.shape_cast %235 : vector<1x16x32xf32> to vector<16x32xf32>
    %237 = vector.shape_cast %234 : vector<16x32xf32> to vector<1x16x32xf32>
    tpu.vector_store %arg8[%c7_212, %c0_213, %c0_214], %237 {strides = array<i32>} : memref<16x16x32xf32, #tpu.memory_space<vmem>>, vector<1x16x32xf32>,
    %238 = vector.extract_strided_slice %205 {offsets = [144, 0], sizes = [16, 32], strides = [1, 1]} : vector<288x32xf32> to vector<16x32xf32>
    %c8_215 = arith.constant 8 : index
    %c0_216 = arith.constant 0 : index
    %c0_217 = arith.constant 0 : index
    %239 = vector.load %arg8[%c8_215, %c0_216, %c0_217] : memref<16x16x32xf32, #tpu.memory_space<vmem>>, vector<1x16x32xf32>
    %240 = vector.shape_cast %239 : vector<1x16x32xf32> to vector<16x32xf32>
    %241 = vector.shape_cast %238 : vector<16x32xf32> to vector<1x16x32xf32>
    tpu.vector_store %arg8[%c8_215, %c0_216, %c0_217], %241 {strides = array<i32>} : memref<16x16x32xf32, #tpu.memory_space<vmem>>, vector<1x16x32xf32>,
    %242 = vector.extract_strided_slice %205 {offsets = [162, 0], sizes = [16, 32], strides = [1, 1]} : vector<288x32xf32> to vector<16x32xf32>
    %c9 = arith.constant 9 : index
    %c0_218 = arith.constant 0 : index
    %c0_219 = arith.constant 0 : index
    %243 = vector.load %arg8[%c9, %c0_218, %c0_219] : memref<16x16x32xf32, #tpu.memory_space<vmem>>, vector<1x16x32xf32>
    %244 = vector.shape_cast %243 : vector<1x16x32xf32> to vector<16x32xf32>
    %245 = vector.shape_cast %242 : vector<16x32xf32> to vector<1x16x32xf32>
    tpu.vector_store %arg8[%c9, %c0_218, %c0_219], %245 {strides = array<i32>} : memref<16x16x32xf32, #tpu.memory_space<vmem>>, vector<1x16x32xf32>,
    %246 = vector.extract_strided_slice %205 {offsets = [180, 0], sizes = [16, 32], strides = [1, 1]} : vector<288x32xf32> to vector<16x32xf32>
    %c10 = arith.constant 10 : index
    %c0_220 = arith.constant 0 : index
    %c0_221 = arith.constant 0 : index
    %247 = vector.load %arg8[%c10, %c0_220, %c0_221] : memref<16x16x32xf32, #tpu.memory_space<vmem>>, vector<1x16x32xf32>
    %248 = vector.shape_cast %247 : vector<1x16x32xf32> to vector<16x32xf32>
    %249 = vector.shape_cast %246 : vector<16x32xf32> to vector<1x16x32xf32>
    tpu.vector_store %arg8[%c10, %c0_220, %c0_221], %249 {strides = array<i32>} : memref<16x16x32xf32, #tpu.memory_space<vmem>>, vector<1x16x32xf32>,
    %250 = vector.extract_strided_slice %205 {offsets = [198, 0], sizes = [16, 32], strides = [1, 1]} : vector<288x32xf32> to vector<16x32xf32>
    %c11 = arith.constant 11 : index
    %c0_222 = arith.constant 0 : index
    %c0_223 = arith.constant 0 : index
    %251 = vector.load %arg8[%c11, %c0_222, %c0_223] : memref<16x16x32xf32, #tpu.memory_space<vmem>>, vector<1x16x32xf32>
    %252 = vector.shape_cast %251 : vector<1x16x32xf32> to vector<16x32xf32>
    %253 = vector.shape_cast %250 : vector<16x32xf32> to vector<1x16x32xf32>
    tpu.vector_store %arg8[%c11, %c0_222, %c0_223], %253 {strides = array<i32>} : memref<16x16x32xf32, #tpu.memory_space<vmem>>, vector<1x16x32xf32>,
    %254 = vector.extract_strided_slice %205 {offsets = [216, 0], sizes = [16, 32], strides = [1, 1]} : vector<288x32xf32> to vector<16x32xf32>
    %c12 = arith.constant 12 : index
    %c0_224 = arith.constant 0 : index
    %c0_225 = arith.constant 0 : index
    %255 = vector.load %arg8[%c12, %c0_224, %c0_225] : memref<16x16x32xf32, #tpu.memory_space<vmem>>, vector<1x16x32xf32>
    %256 = vector.shape_cast %255 : vector<1x16x32xf32> to vector<16x32xf32>
    %257 = vector.shape_cast %254 : vector<16x32xf32> to vector<1x16x32xf32>
    tpu.vector_store %arg8[%c12, %c0_224, %c0_225], %257 {strides = array<i32>} : memref<16x16x32xf32, #tpu.memory_space<vmem>>, vector<1x16x32xf32>,
    %258 = vector.extract_strided_slice %205 {offsets = [234, 0], sizes = [16, 32], strides = [1, 1]} : vector<288x32xf32> to vector<16x32xf32>
    %c13 = arith.constant 13 : index
    %c0_226 = arith.constant 0 : index
    %c0_227 = arith.constant 0 : index
    %259 = vector.load %arg8[%c13, %c0_226, %c0_227] : memref<16x16x32xf32, #tpu.memory_space<vmem>>, vector<1x16x32xf32>
    %260 = vector.shape_cast %259 : vector<1x16x32xf32> to vector<16x32xf32>
    %261 = vector.shape_cast %258 : vector<16x32xf32> to vector<1x16x32xf32>
    tpu.vector_store %arg8[%c13, %c0_226, %c0_227], %261 {strides = array<i32>} : memref<16x16x32xf32, #tpu.memory_space<vmem>>, vector<1x16x32xf32>,
    %262 = vector.extract_strided_slice %205 {offsets = [252, 0], sizes = [16, 32], strides = [1, 1]} : vector<288x32xf32> to vector<16x32xf32>
    %c14 = arith.constant 14 : index
    %c0_228 = arith.constant 0 : index
    %c0_229 = arith.constant 0 : index
    %263 = vector.load %arg8[%c14, %c0_228, %c0_229] : memref<16x16x32xf32, #tpu.memory_space<vmem>>, vector<1x16x32xf32>
    %264 = vector.shape_cast %263 : vector<1x16x32xf32> to vector<16x32xf32>
    %265 = vector.shape_cast %262 : vector<16x32xf32> to vector<1x16x32xf32>
    tpu.vector_store %arg8[%c14, %c0_228, %c0_229], %265 {strides = array<i32>} : memref<16x16x32xf32, #tpu.memory_space<vmem>>, vector<1x16x32xf32>,
    %266 = vector.extract_strided_slice %205 {offsets = [270, 0], sizes = [16, 32], strides = [1, 1]} : vector<288x32xf32> to vector<16x32xf32>
    %c15 = arith.constant 15 : index
    %c0_230 = arith.constant 0 : index
    %c0_231 = arith.constant 0 : index
    %267 = vector.load %arg8[%c15, %c0_230, %c0_231] : memref<16x16x32xf32, #tpu.memory_space<vmem>>, vector<1x16x32xf32>
    %268 = vector.shape_cast %267 : vector<1x16x32xf32> to vector<16x32xf32>
    %269 = vector.shape_cast %266 : vector<16x32xf32> to vector<1x16x32xf32>
    tpu.vector_store %arg8[%c15, %c0_230, %c0_231], %269 {strides = array<i32>} : memref<16x16x32xf32, #tpu.memory_space<vmem>>, vector<1x16x32xf32>,
    %c0_232 = arith.constant 0 : index
    %c0_233 = arith.constant 0 : index
    %c0_234 = arith.constant 0 : index
    %270 = vector.load %arg8[%c0_232, %c0_233, %c0_234] : memref<16x16x32xf32, #tpu.memory_space<vmem>>, vector<16x1x32xf32>
    %271 = vector.shape_cast %270 : vector<16x1x32xf32> to vector<16x32xf32>
    %c0_235 = arith.constant 0 : index
    %c1_236 = arith.constant 1 : index
    %c0_237 = arith.constant 0 : index
    %272 = vector.load %arg8[%c0_235, %c1_236, %c0_237] : memref<16x16x32xf32, #tpu.memory_space<vmem>>, vector<16x1x32xf32>
    %273 = vector.shape_cast %272 : vector<16x1x32xf32> to vector<16x32xf32>
    %274 = arith.maximumf %271, %273 : vector<16x32xf32>
    %c0_238 = arith.constant 0 : index
    %c0_239 = arith.constant 0 : index
    %c0_240 = arith.constant 0 : index
    %275 = vector.load %arg8[%c0_238, %c0_239, %c0_240] : memref<16x16x32xf32, #tpu.memory_space<vmem>>, vector<16x1x32xf32>
    %276 = vector.shape_cast %275 : vector<16x1x32xf32> to vector<16x32xf32>
    %277 = vector.shape_cast %274 : vector<16x32xf32> to vector<16x1x32xf32>
    tpu.vector_store %arg8[%c0_238, %c0_239, %c0_240], %277 {strides = array<i32>} : memref<16x16x32xf32, #tpu.memory_space<vmem>>, vector<16x1x32xf32>,
    %c0_241 = arith.constant 0 : index
    %c2_242 = arith.constant 2 : index
    %c0_243 = arith.constant 0 : index
    %278 = vector.load %arg8[%c0_241, %c2_242, %c0_243] : memref<16x16x32xf32, #tpu.memory_space<vmem>>, vector<16x1x32xf32>
    %279 = vector.shape_cast %278 : vector<16x1x32xf32> to vector<16x32xf32>
    %c0_244 = arith.constant 0 : index
    %c3_245 = arith.constant 3 : index
    %c0_246 = arith.constant 0 : index
    %280 = vector.load %arg8[%c0_244, %c3_245, %c0_246] : memref<16x16x32xf32, #tpu.memory_space<vmem>>, vector<16x1x32xf32>
    %281 = vector.shape_cast %280 : vector<16x1x32xf32> to vector<16x32xf32>
    %282 = arith.maximumf %279, %281 : vector<16x32xf32>
    %c0_247 = arith.constant 0 : index
    %c1_248 = arith.constant 1 : index
    %c0_249 = arith.constant 0 : index
    %283 = vector.load %arg8[%c0_247, %c1_248, %c0_249] : memref<16x16x32xf32, #tpu.memory_space<vmem>>, vector<16x1x32xf32>
    %284 = vector.shape_cast %283 : vector<16x1x32xf32> to vector<16x32xf32>
    %285 = vector.shape_cast %282 : vector<16x32xf32> to vector<16x1x32xf32>
    tpu.vector_store %arg8[%c0_247, %c1_248, %c0_249], %285 {strides = array<i32>} : memref<16x16x32xf32, #tpu.memory_space<vmem>>, vector<16x1x32xf32>,
    %c0_250 = arith.constant 0 : index
    %c4_251 = arith.constant 4 : index
    %c0_252 = arith.constant 0 : index
    %286 = vector.load %arg8[%c0_250, %c4_251, %c0_252] : memref<16x16x32xf32, #tpu.memory_space<vmem>>, vector<16x1x32xf32>
    %287 = vector.shape_cast %286 : vector<16x1x32xf32> to vector<16x32xf32>
    %c0_253 = arith.constant 0 : index
    %c5_254 = arith.constant 5 : index
    %c0_255 = arith.constant 0 : index
    %288 = vector.load %arg8[%c0_253, %c5_254, %c0_255] : memref<16x16x32xf32, #tpu.memory_space<vmem>>, vector<16x1x32xf32>
    %289 = vector.shape_cast %288 : vector<16x1x32xf32> to vector<16x32xf32>
    %290 = arith.maximumf %287, %289 : vector<16x32xf32>
    %c0_256 = arith.constant 0 : index
    %c2_257 = arith.constant 2 : index
    %c0_258 = arith.constant 0 : index
    %291 = vector.load %arg8[%c0_256, %c2_257, %c0_258] : memref<16x16x32xf32, #tpu.memory_space<vmem>>, vector<16x1x32xf32>
    %292 = vector.shape_cast %291 : vector<16x1x32xf32> to vector<16x32xf32>
    %293 = vector.shape_cast %290 : vector<16x32xf32> to vector<16x1x32xf32>
    tpu.vector_store %arg8[%c0_256, %c2_257, %c0_258], %293 {strides = array<i32>} : memref<16x16x32xf32, #tpu.memory_space<vmem>>, vector<16x1x32xf32>,
    %c0_259 = arith.constant 0 : index
    %c6_260 = arith.constant 6 : index
    %c0_261 = arith.constant 0 : index
    %294 = vector.load %arg8[%c0_259, %c6_260, %c0_261] : memref<16x16x32xf32, #tpu.memory_space<vmem>>, vector<16x1x32xf32>
    %295 = vector.shape_cast %294 : vector<16x1x32xf32> to vector<16x32xf32>
    %c0_262 = arith.constant 0 : index
    %c7_263 = arith.constant 7 : index
    %c0_264 = arith.constant 0 : index
    %296 = vector.load %arg8[%c0_262, %c7_263, %c0_264] : memref<16x16x32xf32, #tpu.memory_space<vmem>>, vector<16x1x32xf32>
    %297 = vector.shape_cast %296 : vector<16x1x32xf32> to vector<16x32xf32>
    %298 = arith.maximumf %295, %297 : vector<16x32xf32>
    %c0_265 = arith.constant 0 : index
    %c3_266 = arith.constant 3 : index
    %c0_267 = arith.constant 0 : index
    %299 = vector.load %arg8[%c0_265, %c3_266, %c0_267] : memref<16x16x32xf32, #tpu.memory_space<vmem>>, vector<16x1x32xf32>
    %300 = vector.shape_cast %299 : vector<16x1x32xf32> to vector<16x32xf32>
    %301 = vector.shape_cast %298 : vector<16x32xf32> to vector<16x1x32xf32>
    tpu.vector_store %arg8[%c0_265, %c3_266, %c0_267], %301 {strides = array<i32>} : memref<16x16x32xf32, #tpu.memory_space<vmem>>, vector<16x1x32xf32>,
    %c0_268 = arith.constant 0 : index
    %c8_269 = arith.constant 8 : index
    %c0_270 = arith.constant 0 : index
    %302 = vector.load %arg8[%c0_268, %c8_269, %c0_270] : memref<16x16x32xf32, #tpu.memory_space<vmem>>, vector<16x1x32xf32>
    %303 = vector.shape_cast %302 : vector<16x1x32xf32> to vector<16x32xf32>
    %c0_271 = arith.constant 0 : index
    %c9_272 = arith.constant 9 : index
    %c0_273 = arith.constant 0 : index
    %304 = vector.load %arg8[%c0_271, %c9_272, %c0_273] : memref<16x16x32xf32, #tpu.memory_space<vmem>>, vector<16x1x32xf32>
    %305 = vector.shape_cast %304 : vector<16x1x32xf32> to vector<16x32xf32>
    %306 = arith.maximumf %303, %305 : vector<16x32xf32>
    %c0_274 = arith.constant 0 : index
    %c4_275 = arith.constant 4 : index
    %c0_276 = arith.constant 0 : index
    %307 = vector.load %arg8[%c0_274, %c4_275, %c0_276] : memref<16x16x32xf32, #tpu.memory_space<vmem>>, vector<16x1x32xf32>
    %308 = vector.shape_cast %307 : vector<16x1x32xf32> to vector<16x32xf32>
    %309 = vector.shape_cast %306 : vector<16x32xf32> to vector<16x1x32xf32>
    tpu.vector_store %arg8[%c0_274, %c4_275, %c0_276], %309 {strides = array<i32>} : memref<16x16x32xf32, #tpu.memory_space<vmem>>, vector<16x1x32xf32>,
    %c0_277 = arith.constant 0 : index
    %c10_278 = arith.constant 10 : index
    %c0_279 = arith.constant 0 : index
    %310 = vector.load %arg8[%c0_277, %c10_278, %c0_279] : memref<16x16x32xf32, #tpu.memory_space<vmem>>, vector<16x1x32xf32>
    %311 = vector.shape_cast %310 : vector<16x1x32xf32> to vector<16x32xf32>
    %c0_280 = arith.constant 0 : index
    %c11_281 = arith.constant 11 : index
    %c0_282 = arith.constant 0 : index
    %312 = vector.load %arg8[%c0_280, %c11_281, %c0_282] : memref<16x16x32xf32, #tpu.memory_space<vmem>>, vector<16x1x32xf32>
    %313 = vector.shape_cast %312 : vector<16x1x32xf32> to vector<16x32xf32>
    %314 = arith.maximumf %311, %313 : vector<16x32xf32>
    %c0_283 = arith.constant 0 : index
    %c5_284 = arith.constant 5 : index
    %c0_285 = arith.constant 0 : index
    %315 = vector.load %arg8[%c0_283, %c5_284, %c0_285] : memref<16x16x32xf32, #tpu.memory_space<vmem>>, vector<16x1x32xf32>
    %316 = vector.shape_cast %315 : vector<16x1x32xf32> to vector<16x32xf32>
    %317 = vector.shape_cast %314 : vector<16x32xf32> to vector<16x1x32xf32>
    tpu.vector_store %arg8[%c0_283, %c5_284, %c0_285], %317 {strides = array<i32>} : memref<16x16x32xf32, #tpu.memory_space<vmem>>, vector<16x1x32xf32>,
    %c0_286 = arith.constant 0 : index
    %c12_287 = arith.constant 12 : index
    %c0_288 = arith.constant 0 : index
    %318 = vector.load %arg8[%c0_286, %c12_287, %c0_288] : memref<16x16x32xf32, #tpu.memory_space<vmem>>, vector<16x1x32xf32>
    %319 = vector.shape_cast %318 : vector<16x1x32xf32> to vector<16x32xf32>
    %c0_289 = arith.constant 0 : index
    %c13_290 = arith.constant 13 : index
    %c0_291 = arith.constant 0 : index
    %320 = vector.load %arg8[%c0_289, %c13_290, %c0_291] : memref<16x16x32xf32, #tpu.memory_space<vmem>>, vector<16x1x32xf32>
    %321 = vector.shape_cast %320 : vector<16x1x32xf32> to vector<16x32xf32>
    %322 = arith.maximumf %319, %321 : vector<16x32xf32>
    %c0_292 = arith.constant 0 : index
    %c6_293 = arith.constant 6 : index
    %c0_294 = arith.constant 0 : index
    %323 = vector.load %arg8[%c0_292, %c6_293, %c0_294] : memref<16x16x32xf32, #tpu.memory_space<vmem>>, vector<16x1x32xf32>
    %324 = vector.shape_cast %323 : vector<16x1x32xf32> to vector<16x32xf32>
    %325 = vector.shape_cast %322 : vector<16x32xf32> to vector<16x1x32xf32>
    tpu.vector_store %arg8[%c0_292, %c6_293, %c0_294], %325 {strides = array<i32>} : memref<16x16x32xf32, #tpu.memory_space<vmem>>, vector<16x1x32xf32>,
    %c0_295 = arith.constant 0 : index
    %c14_296 = arith.constant 14 : index
    %c0_297 = arith.constant 0 : index
    %326 = vector.load %arg8[%c0_295, %c14_296, %c0_297] : memref<16x16x32xf32, #tpu.memory_space<vmem>>, vector<16x1x32xf32>
    %327 = vector.shape_cast %326 : vector<16x1x32xf32> to vector<16x32xf32>
    %c0_298 = arith.constant 0 : index
    %c15_299 = arith.constant 15 : index
    %c0_300 = arith.constant 0 : index
    %328 = vector.load %arg8[%c0_298, %c15_299, %c0_300] : memref<16x16x32xf32, #tpu.memory_space<vmem>>, vector<16x1x32xf32>
    %329 = vector.shape_cast %328 : vector<16x1x32xf32> to vector<16x32xf32>
    %330 = arith.maximumf %327, %329 : vector<16x32xf32>
    %c0_301 = arith.constant 0 : index
    %c7_302 = arith.constant 7 : index
    %c0_303 = arith.constant 0 : index
    %331 = vector.load %arg8[%c0_301, %c7_302, %c0_303] : memref<16x16x32xf32, #tpu.memory_space<vmem>>, vector<16x1x32xf32>
    %332 = vector.shape_cast %331 : vector<16x1x32xf32> to vector<16x32xf32>
    %333 = vector.shape_cast %330 : vector<16x32xf32> to vector<16x1x32xf32>
    tpu.vector_store %arg8[%c0_301, %c7_302, %c0_303], %333 {strides = array<i32>} : memref<16x16x32xf32, #tpu.memory_space<vmem>>, vector<16x1x32xf32>,
    %c0_304 = arith.constant 0 : index
    %c0_305 = arith.constant 0 : index
    %c0_306 = arith.constant 0 : index
    %334 = vector.load %arg8[%c0_304, %c0_305, %c0_306] : memref<16x16x32xf32, #tpu.memory_space<vmem>>, vector<1x8x32xf32>
    %335 = vector.shape_cast %334 : vector<1x8x32xf32> to vector<8x32xf32>
    %c1_307 = arith.constant 1 : index
    %c0_308 = arith.constant 0 : index
    %c0_309 = arith.constant 0 : index
    %336 = vector.load %arg8[%c1_307, %c0_308, %c0_309] : memref<16x16x32xf32, #tpu.memory_space<vmem>>, vector<1x8x32xf32>
    %337 = vector.shape_cast %336 : vector<1x8x32xf32> to vector<8x32xf32>
    %338 = arith.maximumf %335, %337 : vector<8x32xf32>
    %c0_310 = arith.constant 0 : index
    %c0_311 = arith.constant 0 : index
    %c0_312 = arith.constant 0 : index
    %c0_313 = arith.constant 0 : index
    %339 = vector.load %arg6[%c0_310, %c0_311, %c0_312, %c0_313] : memref<1x8x8x32xf32, #tpu.memory_space<vmem>>, vector<1x1x8x32xf32>
    %340 = vector.shape_cast %339 : vector<1x1x8x32xf32> to vector<8x32xf32>
    %341 = vector.shape_cast %338 : vector<8x32xf32> to vector<1x1x8x32xf32>
    tpu.vector_store %arg6[%c0_310, %c0_311, %c0_312, %c0_313], %341 {strides = array<i32>} : memref<1x8x8x32xf32, #tpu.memory_space<vmem>>, vector<1x1x8x32xf32>,
    %c2_314 = arith.constant 2 : index
    %c0_315 = arith.constant 0 : index
    %c0_316 = arith.constant 0 : index
    %342 = vector.load %arg8[%c2_314, %c0_315, %c0_316] : memref<16x16x32xf32, #tpu.memory_space<vmem>>, vector<1x8x32xf32>
    %343 = vector.shape_cast %342 : vector<1x8x32xf32> to vector<8x32xf32>
    %c3_317 = arith.constant 3 : index
    %c0_318 = arith.constant 0 : index
    %c0_319 = arith.constant 0 : index
    %344 = vector.load %arg8[%c3_317, %c0_318, %c0_319] : memref<16x16x32xf32, #tpu.memory_space<vmem>>, vector<1x8x32xf32>
    %345 = vector.shape_cast %344 : vector<1x8x32xf32> to vector<8x32xf32>
    %346 = arith.maximumf %343, %345 : vector<8x32xf32>
    %c0_320 = arith.constant 0 : index
    %c1_321 = arith.constant 1 : index
    %c0_322 = arith.constant 0 : index
    %c0_323 = arith.constant 0 : index
    %347 = vector.load %arg6[%c0_320, %c1_321, %c0_322, %c0_323] : memref<1x8x8x32xf32, #tpu.memory_space<vmem>>, vector<1x1x8x32xf32>
    %348 = vector.shape_cast %347 : vector<1x1x8x32xf32> to vector<8x32xf32>
    %349 = vector.shape_cast %346 : vector<8x32xf32> to vector<1x1x8x32xf32>
    tpu.vector_store %arg6[%c0_320, %c1_321, %c0_322, %c0_323], %349 {strides = array<i32>} : memref<1x8x8x32xf32, #tpu.memory_space<vmem>>, vector<1x1x8x32xf32>,
    %c4_324 = arith.constant 4 : index
    %c0_325 = arith.constant 0 : index
    %c0_326 = arith.constant 0 : index
    %350 = vector.load %arg8[%c4_324, %c0_325, %c0_326] : memref<16x16x32xf32, #tpu.memory_space<vmem>>, vector<1x8x32xf32>
    %351 = vector.shape_cast %350 : vector<1x8x32xf32> to vector<8x32xf32>
    %c5_327 = arith.constant 5 : index
    %c0_328 = arith.constant 0 : index
    %c0_329 = arith.constant 0 : index
    %352 = vector.load %arg8[%c5_327, %c0_328, %c0_329] : memref<16x16x32xf32, #tpu.memory_space<vmem>>, vector<1x8x32xf32>
    %353 = vector.shape_cast %352 : vector<1x8x32xf32> to vector<8x32xf32>
    %354 = arith.maximumf %351, %353 : vector<8x32xf32>
    %c0_330 = arith.constant 0 : index
    %c2_331 = arith.constant 2 : index
    %c0_332 = arith.constant 0 : index
    %c0_333 = arith.constant 0 : index
    %355 = vector.load %arg6[%c0_330, %c2_331, %c0_332, %c0_333] : memref<1x8x8x32xf32, #tpu.memory_space<vmem>>, vector<1x1x8x32xf32>
    %356 = vector.shape_cast %355 : vector<1x1x8x32xf32> to vector<8x32xf32>
    %357 = vector.shape_cast %354 : vector<8x32xf32> to vector<1x1x8x32xf32>
    tpu.vector_store %arg6[%c0_330, %c2_331, %c0_332, %c0_333], %357 {strides = array<i32>} : memref<1x8x8x32xf32, #tpu.memory_space<vmem>>, vector<1x1x8x32xf32>,
    %c6_334 = arith.constant 6 : index
    %c0_335 = arith.constant 0 : index
    %c0_336 = arith.constant 0 : index
    %358 = vector.load %arg8[%c6_334, %c0_335, %c0_336] : memref<16x16x32xf32, #tpu.memory_space<vmem>>, vector<1x8x32xf32>
    %359 = vector.shape_cast %358 : vector<1x8x32xf32> to vector<8x32xf32>
    %c7_337 = arith.constant 7 : index
    %c0_338 = arith.constant 0 : index
    %c0_339 = arith.constant 0 : index
    %360 = vector.load %arg8[%c7_337, %c0_338, %c0_339] : memref<16x16x32xf32, #tpu.memory_space<vmem>>, vector<1x8x32xf32>
    %361 = vector.shape_cast %360 : vector<1x8x32xf32> to vector<8x32xf32>
    %362 = arith.maximumf %359, %361 : vector<8x32xf32>
    %c0_340 = arith.constant 0 : index
    %c3_341 = arith.constant 3 : index
    %c0_342 = arith.constant 0 : index
    %c0_343 = arith.constant 0 : index
    %363 = vector.load %arg6[%c0_340, %c3_341, %c0_342, %c0_343] : memref<1x8x8x32xf32, #tpu.memory_space<vmem>>, vector<1x1x8x32xf32>
    %364 = vector.shape_cast %363 : vector<1x1x8x32xf32> to vector<8x32xf32>
    %365 = vector.shape_cast %362 : vector<8x32xf32> to vector<1x1x8x32xf32>
    tpu.vector_store %arg6[%c0_340, %c3_341, %c0_342, %c0_343], %365 {strides = array<i32>} : memref<1x8x8x32xf32, #tpu.memory_space<vmem>>, vector<1x1x8x32xf32>,
    %c8_344 = arith.constant 8 : index
    %c0_345 = arith.constant 0 : index
    %c0_346 = arith.constant 0 : index
    %366 = vector.load %arg8[%c8_344, %c0_345, %c0_346] : memref<16x16x32xf32, #tpu.memory_space<vmem>>, vector<1x8x32xf32>
    %367 = vector.shape_cast %366 : vector<1x8x32xf32> to vector<8x32xf32>
    %c9_347 = arith.constant 9 : index
    %c0_348 = arith.constant 0 : index
    %c0_349 = arith.constant 0 : index
    %368 = vector.load %arg8[%c9_347, %c0_348, %c0_349] : memref<16x16x32xf32, #tpu.memory_space<vmem>>, vector<1x8x32xf32>
    %369 = vector.shape_cast %368 : vector<1x8x32xf32> to vector<8x32xf32>
    %370 = arith.maximumf %367, %369 : vector<8x32xf32>
    %c0_350 = arith.constant 0 : index
    %c4_351 = arith.constant 4 : index
    %c0_352 = arith.constant 0 : index
    %c0_353 = arith.constant 0 : index
    %371 = vector.load %arg6[%c0_350, %c4_351, %c0_352, %c0_353] : memref<1x8x8x32xf32, #tpu.memory_space<vmem>>, vector<1x1x8x32xf32>
    %372 = vector.shape_cast %371 : vector<1x1x8x32xf32> to vector<8x32xf32>
    %373 = vector.shape_cast %370 : vector<8x32xf32> to vector<1x1x8x32xf32>
    tpu.vector_store %arg6[%c0_350, %c4_351, %c0_352, %c0_353], %373 {strides = array<i32>} : memref<1x8x8x32xf32, #tpu.memory_space<vmem>>, vector<1x1x8x32xf32>,
    %c10_354 = arith.constant 10 : index
    %c0_355 = arith.constant 0 : index
    %c0_356 = arith.constant 0 : index
    %374 = vector.load %arg8[%c10_354, %c0_355, %c0_356] : memref<16x16x32xf32, #tpu.memory_space<vmem>>, vector<1x8x32xf32>
    %375 = vector.shape_cast %374 : vector<1x8x32xf32> to vector<8x32xf32>
    %c11_357 = arith.constant 11 : index
    %c0_358 = arith.constant 0 : index
    %c0_359 = arith.constant 0 : index
    %376 = vector.load %arg8[%c11_357, %c0_358, %c0_359] : memref<16x16x32xf32, #tpu.memory_space<vmem>>, vector<1x8x32xf32>
    %377 = vector.shape_cast %376 : vector<1x8x32xf32> to vector<8x32xf32>
    %378 = arith.maximumf %375, %377 : vector<8x32xf32>
    %c0_360 = arith.constant 0 : index
    %c5_361 = arith.constant 5 : index
    %c0_362 = arith.constant 0 : index
    %c0_363 = arith.constant 0 : index
    %379 = vector.load %arg6[%c0_360, %c5_361, %c0_362, %c0_363] : memref<1x8x8x32xf32, #tpu.memory_space<vmem>>, vector<1x1x8x32xf32>
    %380 = vector.shape_cast %379 : vector<1x1x8x32xf32> to vector<8x32xf32>
    %381 = vector.shape_cast %378 : vector<8x32xf32> to vector<1x1x8x32xf32>
    tpu.vector_store %arg6[%c0_360, %c5_361, %c0_362, %c0_363], %381 {strides = array<i32>} : memref<1x8x8x32xf32, #tpu.memory_space<vmem>>, vector<1x1x8x32xf32>,
    %c12_364 = arith.constant 12 : index
    %c0_365 = arith.constant 0 : index
    %c0_366 = arith.constant 0 : index
    %382 = vector.load %arg8[%c12_364, %c0_365, %c0_366] : memref<16x16x32xf32, #tpu.memory_space<vmem>>, vector<1x8x32xf32>
    %383 = vector.shape_cast %382 : vector<1x8x32xf32> to vector<8x32xf32>
    %c13_367 = arith.constant 13 : index
    %c0_368 = arith.constant 0 : index
    %c0_369 = arith.constant 0 : index
    %384 = vector.load %arg8[%c13_367, %c0_368, %c0_369] : memref<16x16x32xf32, #tpu.memory_space<vmem>>, vector<1x8x32xf32>
    %385 = vector.shape_cast %384 : vector<1x8x32xf32> to vector<8x32xf32>
    %386 = arith.maximumf %383, %385 : vector<8x32xf32>
    %c0_370 = arith.constant 0 : index
    %c6_371 = arith.constant 6 : index
    %c0_372 = arith.constant 0 : index
    %c0_373 = arith.constant 0 : index
    %387 = vector.load %arg6[%c0_370, %c6_371, %c0_372, %c0_373] : memref<1x8x8x32xf32, #tpu.memory_space<vmem>>, vector<1x1x8x32xf32>
    %388 = vector.shape_cast %387 : vector<1x1x8x32xf32> to vector<8x32xf32>
    %389 = vector.shape_cast %386 : vector<8x32xf32> to vector<1x1x8x32xf32>
    tpu.vector_store %arg6[%c0_370, %c6_371, %c0_372, %c0_373], %389 {strides = array<i32>} : memref<1x8x8x32xf32, #tpu.memory_space<vmem>>, vector<1x1x8x32xf32>,
    %c14_374 = arith.constant 14 : index
    %c0_375 = arith.constant 0 : index
    %c0_376 = arith.constant 0 : index
    %390 = vector.load %arg8[%c14_374, %c0_375, %c0_376] : memref<16x16x32xf32, #tpu.memory_space<vmem>>, vector<1x8x32xf32>
    %391 = vector.shape_cast %390 : vector<1x8x32xf32> to vector<8x32xf32>
    %c15_377 = arith.constant 15 : index
    %c0_378 = arith.constant 0 : index
    %c0_379 = arith.constant 0 : index
    %392 = vector.load %arg8[%c15_377, %c0_378, %c0_379] : memref<16x16x32xf32, #tpu.memory_space<vmem>>, vector<1x8x32xf32>
    %393 = vector.shape_cast %392 : vector<1x8x32xf32> to vector<8x32xf32>
    %394 = arith.maximumf %391, %393 : vector<8x32xf32>
    %c0_380 = arith.constant 0 : index
    %c7_381 = arith.constant 7 : index
    %c0_382 = arith.constant 0 : index
    %c0_383 = arith.constant 0 : index
    %395 = vector.load %arg6[%c0_380, %c7_381, %c0_382, %c0_383] : memref<1x8x8x32xf32, #tpu.memory_space<vmem>>, vector<1x1x8x32xf32>
    %396 = vector.shape_cast %395 : vector<1x1x8x32xf32> to vector<8x32xf32>
    %397 = vector.shape_cast %394 : vector<8x32xf32> to vector<1x1x8x32xf32>
    tpu.vector_store %arg6[%c0_380, %c7_381, %c0_382, %c0_383], %397 {strides = array<i32>} : memref<1x8x8x32xf32, #tpu.memory_space<vmem>>, vector<1x1x8x32xf32>,
    return
  }
  func.func @transform_0(%arg0: i32) -> (i32, i32, i32) {
    %c0_i32 = arith.constant 0 : i32
    %c0_i32_0 = arith.constant 0 : i32
    %c0_i32_1 = arith.constant 0 : i32
    return %arg0, %c0_i32, %c0_i32_0 : i32, i32, i32
  }
  func.func @transform_1(%arg0: i32) -> (i32, i32, i32) {
    %c0_i32 = arith.constant 0 : i32
    %c0_i32_0 = arith.constant 0 : i32
    %c0_i32_1 = arith.constant 0 : i32
    %c0_i32_2 = arith.constant 0 : i32
    return %c0_i32, %c0_i32_0, %c0_i32_1 : i32, i32, i32
  }
  func.func @transform_2(%arg0: i32) -> (i32, i32, i32) {
    %c0_i32 = arith.constant 0 : i32
    %c0_i32_0 = arith.constant 0 : i32
    %c0_i32_1 = arith.constant 0 : i32
    %c0_i32_2 = arith.constant 0 : i32
    return %c0_i32, %c0_i32_0, %c0_i32_1 : i32, i32, i32
  }
  func.func @transform_3(%arg0: i32) -> (i32, i32, i32) {
    %c0_i32 = arith.constant 0 : i32
    %c0_i32_0 = arith.constant 0 : i32
    %c0_i32_1 = arith.constant 0 : i32
    %c0_i32_2 = arith.constant 0 : i32
    return %c0_i32, %c0_i32_0, %c0_i32_1 : i32, i32, i32
  }
  func.func @transform_4(%arg0: i32) -> (i32, i32, i32) {
    %c0_i32 = arith.constant 0 : i32
    %c0_i32_0 = arith.constant 0 : i32
    %c0_i32_1 = arith.constant 0 : i32
    %c0_i32_2 = arith.constant 0 : i32
    return %c0_i32, %c0_i32_0, %c0_i32_1 : i32, i32, i32
  }
  func.func @transform_5(%arg0: i32) -> (i32, i32, i32, i32) {
    %c0_i32 = arith.constant 0 : i32
    %c0_i32_0 = arith.constant 0 : i32
    %c0_i32_1 = arith.constant 0 : i32
    %c0_i32_2 = arith.constant 0 : i32
    return %arg0, %c0_i32, %c0_i32_0, %c0_i32_1 : i32, i32, i32, i32
  }
}

</mosaic_0001>

<bundles_post_ra>
// kernel: encode_b_forward.1
= control target key start
LH: loop header
LB: loop body
LE: loop exit
PB: predicated region body
PF: predicated region fallthrough
CT: control target
= control target key end

     0   :  { %10 = vsyncpa [#allocation5], 0  ;;  %s22719_s0 = inlined_call_operand.vmem [shape: bf16[2,326,4], index: 0, kind: input, shape index: {}]   ;;  %s22720_s1 = inlined_call_operand.vmem [shape: bf16[9,4,32], index: 1, kind: input, shape index: {}]   ;;  %s22721_s2 = inlined_call_operand.vmem [shape: bf16[9,32,32], index: 2, kind: input, shape index: {}]   ;;  %s22722_s3 = inlined_call_operand.vmem [shape: bf16[9,32,32], index: 3, kind: input, shape index: {}]   ;;  %s22723_s4 = inlined_call_operand.vmem [shape: f32[3,2,32], index: 4, kind: input, shape index: {}]   ;;  %s22724_s5 = inlined_call_operand.hbm [shape: f32[2,8,8,32], index: 5, kind: output, shape index: {}]  }
   0x1   :  { %12 = vsyncpa [#allocation5 + $0x1], 0  ;;  %s17569_s18 = smov 0   ;;  %s17571_s19 = smov 0  }
   0x2   :  { %s17573_s20 = smov 0   ;;  %s17575_s21 = smov 0  }
   0x3 LB: > { %s17590_s22 = sadd.s32 4294967295, %s17533_s21   ;;  %s13678_s23 = sadd.s32 4294967294, %s17533_s21   ;;  %s17533_s21 = sphi %s17575_s21, %s24183_s21   ;;  %s17529_s20 = sphi %s17573_s20, %s24182_s20   ;;  %s17525_s19 = sphi %s17571_s19, %s24181_s19   ;;  %s17521_s18 = sphi %s17569_s18, %s24180_s18  }
   0x4   : > { %s17594_s24 = sadd.s32 1, %s17533_s21   ;;  %s135_s25 = sadd.s32 1, %s17529_s20 }
   0x5   : > { %s132_s26 = ssub.s32 %s17533_s21, %s17594_s24  ;;  %p145_p0 = scmp.ne.s32.totalorder %s17529_s20, %s17525_s19 }
   0x6   : > { %p133_p1 = scmp.eq.s32.totalorder %s132_s26, 0  ;;  %p146_p2 = scmp.eq.s32.totalorder %s17590_s22, 1 }
   0x7   : > { %p151_p3 = scmp.ne.s32.totalorder %s17525_s19, %s17521_s18  ;;  %p152_p4 = scmp.eq.s32.totalorder %s13678_s23, 1 }
   0x8   : > { %s17605_s27 = scalar_select %p133_p1, %s17529_s20, %s135_s25  }
   0x9   : > { %p17607_p5 = por %p146_p2, %p145_p0  ;;  %p17611_p6 = por %p152_p4, %p151_p3 }
   0xa   : > { %p13681_p7 = scmp.ge.s32.totalorder %s17533_s21, 1  ;;  %p190_p8 = scmp.lt.s32.totalorder %s17533_s21, 3 }
   0xc   : > { %p191_p9 = pnand %p13681_p7, %p190_p8 }
   0xe   : > { %194 = sbr.rel (%p191_p9) target bundleno = 2533 (0x9e5), region = 40 }
  0x15   : > { %vm1253_vm0 = vcmask 1041408   ;;  %v13798_v0 = vld [vmem:[%s22720_s1 + $0x8] sm:$0x3]  ;;  %v13684_v1 = vld [vmem:[%s22720_s1 + $0x2] sm:$0x3]  ;;  %p218_p10 = scmp.lt.s32.totalorder %s17590_s22, 1 }
  0x16   : > { %17094 = vmatprep.subr.msk.bf16.mxu0 %vm1253_vm0, %v13798_v0  ;;  %17090 = vmatprep.subr.msk.bf16.mxu1 %vm1253_vm0, %v13684_v1  ;;  %v17627_v2 = vsel %vm1253_vm0, %v13798_v0, 0  ;;  %v1255_v3 = vsel %vm1253_vm0, %v13684_v1, 0  ;;  %v13818_v4 = vld [vmem:[%s22720_s1 + $0xa] sm:$0x3]  ;;  %v952_v5 = vld [vmem:[%s22720_s1] sm:$0x3] }
  0x17   : > { %15315 = vmatpush3.bf16.msra.mxu0 %v17627_v2  ;;  %15163 = vmatpush3.bf16.msra.mxu1 %v1255_v3  ;;  %s219_s9 = scalar_select %p218_p10, %s17590_s22, 1  ;;  %vm22730_vm1 = vsmask.f32 7424  ;;  %v17641_v6 = vsel %vm1253_vm0, %v13818_v4, 0  ;;  %vm1198_vm2 = vcmask 31744   ;;  %v1471_v12 = vsel %vm1253_vm0, %v952_v5, 0 }
  0x18   : > { %17096 = vmatprep.subr.msk.bf16.mxu0 %vm1253_vm0, %v13818_v4  ;;  %17091 = vmatprep.subr.msk.bf16.mxu1 %vm1253_vm0, %v952_v5  ;;  %vm22728_vm3 = vsmask.f32 6400  ;;  %v17691_v39 = vld [vmem:[%s22720_s1 + $0x4] sm:$0x3]  ;;  %v17725_v1 = vld [vmem:[%s22720_s1 + $0xc] sm:$0x3] }
  0x19   : > { %s17100_s14 = smul.u32 164, %s219_s9  ;;  %vm22727_vm4 = vcmask 1045504   ;;  %vm22729_vm5 = vcmask 1046528   ;;  %vm22726_vm6 = vsmask.f32 5376  ;;  %vm22725_vm7 = vcmask 1044480  }
  0x1a   : > { %vm22731_vm8 = vcmask 257024   ;;  %s215_s12 = sand.u32 1, %s17525_s19   ;;  %s14630_s25 = sshll.u32 %s17590_s22, 10 }
  0x1b   : > { %s17646_s17 = scalar_lea.vmem %s22719_s0, %s17100_s14  ;;  %s22410_s13 = sshll.u32 %s215_s12, 6 }
  0x1c   : > { %v916_v7 = vld [vmem:[%s17646_s17] sm:$0xf]  ;;  %v917_v8 = vld [vmem:[%s17646_s17 + $0x4] sm:$0xf]  ;;  %v17653_v10 = vld [vmem:[%s17646_s17 + $0x8] sm:$0xff]   ;;  %s22469_s14 = scalar_lea.vmem [#allocation4], %s22410_s13  ;;  %s22670_s7 = scalar_lea.hbm %s22724_s5, %s14630_s25 }
  0x1d   : > { %v17650_v9 = vcombine.low %v916_v7, %v917_v8  ;;  %v1964_v11 = vld [vmem:[%s17646_s17 + $0x8] sm:$0xe]  ;;  %v17658_v13 = vld [vmem:[%s17646_s17 + $0xc] sm:$0xf]  ;;  %v1058_v16 = vshll.u32 %v17653_v10, 16  ;;  %v1062_v17 = vshrl.u32 %v17653_v10, 16 }
  0x1e   : > { %v17665_v18 = vld [vmem:[%s17646_s17 + $0x10] sm:$0xff]   ;;  %v17671_v20 = vcombine.low %v1964_v11, %v17658_v13  ;;  %v17679_v28 = vld [vmem:[%s17646_s17 + $0x18] sm:$0xff]   ;;  %v17685_v34 = vld [vmem:[%s17646_s17 + $0x20] sm:$0xff]   ;;  %s13616_s26 = sshll.u32 %s22469_s14, 4  ;;  %s22678_s8 = scalar_lea.sflag [#allocation5], %s215_s12  ;;  %s22672_s26 = int_to_ptr.vmem [resolvable:$true] %s13616_s26 }
  0x1f   : > { %v1051_v14 = vshrl.u32 %v17650_v9, 16  ;;  %v1053_v15 = vshll.u32 %v17650_v9, 16  ;;  %v17668_v19 = vld [vmem:[%s17646_s17 + $0x10] sm:$0xff]   ;;  %v1060_v22 = vrot.slane %v1058_v16, 1  ;;  %v2419_v23 = vshrl.u32 %v17665_v18, 16  ;;  %v17682_v33 = vld [vmem:[%s17646_s17 + $0x18] sm:$0xff]  }
  0x20   : > { %v2422_v24 = vshll.u32 %v17665_v18, 16  ;;  %v2411_v25 = vshrl.u32 %v17671_v20, 16  ;;  %v2414_v26 = vshll.u32 %v17671_v20, 16  ;;  %v1066_v27 = vshll.u32 %v17668_v19, 16  ;;  %v17700_v48 = vld [vmem:[%s17646_s17 + $0x20] sm:$0xff]   ;;  %v17703_v49 = vld [vmem:[%s17646_s17 + $0x28] sm:$0xff]  }
  0x21   : > { %v1055_v21 = vrot.slane %v1053_v15, 1  ;;  %v1064_v30 = vor.u32 %v1062_v17, %v1060_v22  ;;  %v2421_v31 = vrot.slane %v2419_v23, 1  ;;  %v2428_v38 = vshrl.u32 %v17679_v28, 16  ;;  %v17709_v54 = vld [vmem:[%s17646_s17 + $0x28] sm:$0xff]   ;;  %v17715_v59 = vld [vmem:[%s17646_s17 + $0x30] sm:$0xff]   ;;  %s17471_s22 = scalar_lea.vmem %s22672_s26, 1024 }
  0x22   : > { %v2424_v32 = vrot.slane %v2422_v24, 2  ;;  %v2413_v35 = vrot.slane %v2411_v25, 1  ;;  %v2416_v36 = vrot.slane %v2414_v26, 2  ;;  %v1068_v37 = vrot.slane %v1066_v27, 1  ;;  %v17720_v0 = vld [vmem:[%s17646_s17 + $0x30] sm:$0xff]   ;;  %p17472_p11 = scmp.ne.s32.totalorder %s22672_s26, %s17471_s22  ;;  %s17536_s9 = smov [#allocation4]  }
  0x23   : > { %v1056_v29 = vor.u32 %v1055_v21, %v1051_v14  ;;  %v2431_v42 = vshll.u32 %v17679_v28, 16  ;;  %v1070_v43 = vshrl.u32 %v17668_v19, 16  ;;  %v2430_v46 = vrot.slane %v2428_v38, 1  ;;  %s17475_s10 = sshll.u32 %s17536_s9, 4  ;;  %s17476_s10 = int_to_ptr.vmem [resolvable:$false] %s17475_s10 }
  0x24   : > { %v2425_v41 = vor.u32 %v2424_v32, %v2421_v31  ;;  %v2417_v44 = vor.u32 %v2416_v36, %v2413_v35  ;;  %v1069_v45 = vsel %vm22730_vm1, %v1064_v30, %v1068_v37  ;;  %v1074_v47 = vshll.u32 %v17682_v33, 16  ;;  %v17748_v32 = vld [vmem:[%s17646_s17 + $0x38] sm:$0xff]   ;;  %p17473_p12 = pnand %p17472_p11, %p17607_p5  ;;  %s17477_s11 = scalar_lea.vmem %s17476_s10, 2048 }
  0x25   : > { %v1061_v40 = vsel %vm22730_vm1, %v1056_v29, %v1060_v22  ;;  %v2433_v50 = vrot.slane %v2431_v42, 2  ;;  %v1072_v51 = vor.u32 %v1070_v43, %v1068_v37  ;;  %v2437_v52 = vshrl.u32 %v17685_v34, 16  ;;  %v17739_v22 = vld [vmem:[%s17646_s17 + $0x38] sm:$0xff]   ;;  %v17759_v43 = vld [vmem:[%s17646_s17 + $0x40] sm:$0xff]   ;;  %p17478_p0 = scmp.lt.s32.totalorder %s22672_s26, %s17476_s10  ;;  %p17479_p1 = scmp.lt.s32.totalorder %s17477_s11, %s17471_s22 }
  0x26   : > { %15164 = vmatprep.mubr.msk.bf16.mxu1 %vm1198_vm2, %v1061_v40  ;;  %v2440_v53 = vshll.u32 %v17685_v34, 16  ;;  %v2426_v55 = vsel %vm22728_vm3, %v2417_v44, %v2425_v41  ;;  %v1076_v56 = vrot.slane %v1074_v47, 1  ;;  %v1078_v57 = vshrl.u32 %v17682_v33, 16  ;;  %p17474_p13 = pneg %p17473_p12 }
  0x27   : > { %15165 = vmatmul.mubr.msk.bf16.vlgmr.msra.gmra.mrb[0].mxu1 %vm1198_vm2, %v1069_v45  ;;  %v1082_v58 = vshll.u32 %v17700_v48, 16  ;;  %15316 = vmatprep.mubr.msk.bf16.mxu0 %vm1198_vm2, %v2426_v55  ;;  %v2434_v60 = vor.u32 %v2433_v50, %v2430_v46  ;;  %v2439_v61 = vrot.slane %v2437_v52, 1  ;;  %v2446_v63 = vshrl.u32 %v17703_v49, 16  ;;  %v17764_v50 = vld [vmem:[%s17646_s17 + $0x40] sm:$0xff]   ;;  %p17480_p2 = por %p17479_p1, %p17478_p0 }
  0x28   : > { %15201 = vmatpush3.bf16.msra.mxu1 %v1471_v12  ;;  %v2442_v62 = vrot.slane %v2440_v53, 2  ;;  %v1077_v3 = vsel %vm22730_vm1, %v1072_v51, %v1076_v56  ;;  %v1080_v4 = vor.u32 %v1078_v57, %v1076_v56  ;;  %v2449_v7 = vshll.u32 %v17703_v49, 16 }
  0x29   : > { %17092 = vmatprep.subr.msk.bf16.mxu1 %vm1253_vm0, %v17691_v39  ;;  %v1084_v5 = vrot.slane %v1082_v58, 1  ;;  %v2435_v8 = vsel %vm22728_vm3, %v2425_v41, %v2434_v60  ;;  %15168 = vmatprep.mubr.msk.bf16.mxu1 %vm1198_vm2, %v1077_v3  ;;  %v2448_v12 = vrot.slane %v2446_v63, 1  ;;  %v1086_v14 = vshrl.u32 %v17700_v48, 16  ;;  %p17481_p3 = pnand %p17480_p2, %p17474_p13 }
  0x2a   : > { %v2443_v11 = vor.u32 %v2442_v62, %v2439_v61  ;;  %15317 = vmatmul.mubr.msk.bf16.vlgmr.msra.gmra.mrb[0].mxu0 %vm1198_vm2, %v2435_v8  ;;  %v2451_v16 = vrot.slane %v2449_v7, 2  ;;  %v1090_v17 = vshll.u32 %v17709_v54, 16  ;;  %v2455_v21 = vshrl.u32 %v17715_v59, 16  ;;  %v17772_v61 = vld [vmem:[%s17646_s17 + $0x48] sm:$0xff]  }
  0x2b   : > { %v1085_v15 = vsel %vm22730_vm1, %v1080_v4, %v1084_v5  ;;  %15353 = vmatpush3.bf16.msra.mxu0 %v17641_v6  ;;  %v1088_v24 = vor.u32 %v1086_v14, %v1084_v5  ;;  %v2458_v25 = vshll.u32 %v17715_v59, 16  ;;  %v1094_v26 = vshrl.u32 %v17709_v54, 16  ;;  %v17775_v62 = vld [vmem:[%s17646_s17 + $0x48] sm:$0xff]  }
  0x2c   : > { %v2444_v23 = vsel %vm22728_vm3, %v2434_v60, %v2443_v11  ;;  %v2452_v27 = vor.u32 %v2451_v16, %v2448_v12  ;;  %v1092_v29 = vrot.slane %v1090_v17, 1  ;;  %v2457_v30 = vrot.slane %v2455_v21, 1  ;;  %17097 = vmatprep.subr.msk.bf16.mxu0 %vm1253_vm0, %v17725_v1 }
  0x2d   : > { %15320 = vmatprep.mubr.msk.bf16.mxu0 %vm1198_vm2, %v2444_v23  ;;  %v1098_v31 = vshll.u32 %v17720_v0, 16  ;;  %v2460_v6 = vrot.slane %v2458_v25, 2  ;;  %v2464_v35 = vshrl.u32 %v17739_v22, 16  ;;  %v2467_v36 = vshll.u32 %v17739_v22, 16  ;;  %v17792_v23 = vld [vmem:[%s17646_s17 + $0x50] sm:$0xff]  }
  0x2e   : > { %v1102_v37 = vshrl.u32 %v17720_v0, 16  ;;  %v2453_v38 = vsel %vm22728_vm3, %v2443_v11, %v2452_v27  ;;  %v1093_v40 = vsel %vm22730_vm1, %v1088_v24, %v1092_v29  ;;  %v1096_v41 = vor.u32 %v1094_v26, %v1092_v29  ;;  %v17784_v11 = vld [vmem:[%s17646_s17 + $0x50] sm:$0xff]   ;;  %v17797_v26 = vld [vmem:[%s17646_s17 + $0x58] sm:$0xff]  }
  0x2f   : > { %15169 = vmatmul.mubr.msk.bf16.gmra.mrb[4].mxu1 %vm1198_vm2, %v1085_v15  ;;  %v1100_v42 = vrot.slane %v1098_v31, 1  ;;  %v2461_v44 = vor.u32 %v2460_v6, %v2457_v30  ;;  %v2466_v45 = vrot.slane %v2464_v35, 1  ;;  %v2469_v46 = vrot.slane %v2467_v36, 2 }
  0x30   : > { %15172 = vmatprep.mubr.msk.bf16.mxu1 %vm1198_vm2, %v1093_v40  ;;  %v1106_v47 = vshll.u32 %v17748_v32, 16  ;;  %v2473_v53 = vshrl.u32 %v17759_v43, 16  ;;  %v2476_v55 = vshll.u32 %v17759_v43, 16  ;;  %v1110_v60 = vshrl.u32 %v17748_v32, 16 }
  0x31   : > { %v1101_v51 = vsel %vm22730_vm1, %v1096_v41, %v1100_v42  ;;  %v1104_v52 = vor.u32 %v1102_v37, %v1100_v42  ;;  %v2462_v56 = vsel %vm22728_vm3, %v2452_v27, %v2461_v44  ;;  %v2470_v57 = vor.u32 %v2469_v46, %v2466_v45 }
  0x32   : > { %v1108_v58 = vrot.slane %v1106_v47, 1  ;;  %15321 = vmatmul.mubr.msk.bf16.gmra.mrb[4].mxu0 %vm1198_vm2, %v2453_v38  ;;  %v2475_v63 = vrot.slane %v2473_v53, 1  ;;  %v2478_v3 = vrot.slane %v2476_v55, 2  ;;  %v1114_v4 = vshll.u32 %v17764_v50, 16  ;;  %v17802_v38 = vld [vmem:[%s17646_s17 + $0x58] sm:$0xff]  }
  0x33   : > { %v1118_v5 = vshrl.u32 %v17764_v50, 16  ;;  %15324 = vmatprep.mubr.msk.bf16.mxu0 %vm1198_vm2, %v2462_v56  ;;  %v2482_v8 = vshrl.u32 %v17772_v61, 16  ;;  %v2485_v14 = vshll.u32 %v17772_v61, 16  ;;  %v1122_v15 = vshll.u32 %v17775_v62, 16  ;;  %v2850_v55 = vld [vmem:[%s17646_s17 + $0x8] sm:$0xc] }
  0x34   : > { %v1109_v7 = vsel %vm22730_vm1, %v1104_v52, %v1108_v58  ;;  %v2479_v12 = vor.u32 %v2478_v3, %v2475_v63  ;;  %v1116_v16 = vrot.slane %v1114_v4, 1  ;;  %v2491_v17 = vshrl.u32 %v17784_v11, 16  ;;  %v17816_v56 = vld [vmem:[%s17646_s17 + $0x60] sm:$0xff]  }
  0x35   : > { %v2494_v21 = vshll.u32 %v17784_v11, 16  ;;  %v2471_v24 = vsel %vm22728_vm3, %v2461_v44, %v2470_v57  ;;  %v1112_v25 = vor.u32 %v1110_v60, %v1108_v58  ;;  %v2484_v27 = vrot.slane %v2482_v8, 1 }
  0x36   : > { %v2487_v29 = vrot.slane %v2485_v14, 2  ;;  %v1120_v30 = vor.u32 %v1118_v5, %v1116_v16  ;;  %v1124_v31 = vrot.slane %v1122_v15, 1  ;;  %v2480_v6 = vsel %vm22728_vm3, %v2470_v57, %v2479_v12  ;;  %v17821_v5 = vld [vmem:[%s17646_s17 + $0x68] sm:$0xff]  }
  0x37   : > { %15173 = vmatmul.mubr.msk.bf16.gmra.mrb[8].mxu1 %vm1198_vm2, %v1101_v51  ;;  %v2493_v35 = vrot.slane %v2491_v17, 1  ;;  %v2496_v36 = vrot.slane %v2494_v21, 2  ;;  %v1130_v37 = vshll.u32 %v17792_v23, 16  ;;  %v1117_v40 = vsel %vm22730_vm1, %v1112_v25, %v1116_v16 }
  0x38   : > { %15176 = vmatprep.mubr.msk.bf16.mxu1 %vm1198_vm2, %v1109_v7  ;;  %v1126_v41 = vshrl.u32 %v17775_v62, 16  ;;  %v2500_v42 = vshrl.u32 %v17797_v26, 16  ;;  %v2503_v44 = vshll.u32 %v17797_v26, 16  ;;  %v2488_v45 = vor.u32 %v2487_v29, %v2484_v27  ;;  %v17838_v29 = vld [vmem:[%s17646_s17 + $0x70] sm:$0xff]  }
  0x39   : > { %v1125_v46 = vsel %vm22730_vm1, %v1120_v30, %v1124_v31  ;;  %v1134_v47 = vshrl.u32 %v17792_v23, 16  ;;  %v1138_v51 = vshll.u32 %v17802_v38, 16  ;;  %v2497_v52 = vor.u32 %v2496_v36, %v2493_v35  ;;  %v17844_v36 = vld [vmem:[%s17646_s17 + $0x78] sm:$0xff]  }
  0x3a   : > { %15325 = vmatmul.mubr.msk.bf16.gmra.mrb[8].mxu0 %vm1198_vm2, %v2471_v24  ;;  %v1132_v53 = vrot.slane %v1130_v37, 1  ;;  %v1128_v57 = vor.u32 %v1126_v41, %v1124_v31  ;;  %v2502_v58 = vrot.slane %v2500_v42, 1  ;;  %v2505_v60 = vrot.slane %v2503_v44, 2 }
  0x3b   : > { %15328 = vmatprep.mubr.msk.bf16.mxu0 %vm1198_vm2, %v2480_v6  ;;  %v2489_v63 = vsel %vm22728_vm3, %v2479_v12, %v2488_v45  ;;  %v1140_v4 = vrot.slane %v1138_v51, 1  ;;  %v2498_v7 = vsel %vm22728_vm3, %v2488_v45, %v2497_v52  ;;  %v13819_v8 = vcombine.low %v2850_v55, %v17658_v13 }
  0x3c   : > { %v1136_v3 = vor.u32 %v1134_v47, %v1132_v53  ;;  %v1146_v14 = vshll.u32 %v17816_v56, 16  ;;  %v1133_v15 = vsel %vm22730_vm1, %v1128_v57, %v1132_v53  ;;  %v1142_v16 = vshrl.u32 %v17802_v38, 16 }
  0x3d   : > { %v17830_v12 = vor.u32 %v2505_v60, %v2502_v58  ;;  %v1150_v21 = vshrl.u32 %v17816_v56, 16  ;;  %v1154_v24 = vshll.u32 %v17821_v5, 16  ;;  %v2857_v13 = vrot.slane %v13819_v8, 2  ;;  %v17866_v60 = vld [vmem:[%s17646_s17 + $0x88] sm:$0xff]  }
  0x3e   : > { %v1141_v17 = vsel %vm22730_vm1, %v1136_v3, %v1140_v4  ;;  %v2858_v25 = vrot.slane %v17665_v18, 2  ;;  %v1148_v27 = vrot.slane %v1146_v14, 1  ;;  %v1144_v30 = vor.u32 %v1142_v16, %v1140_v4 }
  0x3f   : > { %15177 = vmatmul.mubr.msk.bf16.gmra.mrb[12].mxu1 %vm1198_vm2, %v1117_v40  ;;  %v2507_v31 = vsel %vm22728_vm3, %v2497_v52, %v17830_v12  ;;  %v1156_v35 = vrot.slane %v1154_v24, 1  ;;  %v1162_v18 = vshll.u32 %v17838_v29, 16  ;;  %v2860_v41 = vrot.slane %v17679_v28, 2  ;;  %v17859_v52 = vld [vmem:[%s17646_s17 + $0x80] sm:$0xff]  }
  0x40   : > { %15180 = vmatprep.mubr.msk.bf16.mxu1 %vm1198_vm2, %v1125_v46  ;;  %v1152_v6 = vor.u32 %v1150_v21, %v1148_v27  ;;  %v2859_v37 = vsel %vm22727_vm4, %v2857_v13, %v2858_v25  ;;  %v1149_v40 = vsel %vm22730_vm1, %v1144_v30, %v1148_v27  ;;  %v1158_v42 = vshrl.u32 %v17821_v5, 16  ;;  %v17889_v21 = vld [vmem:[%s17646_s17 + $0x90] ss:$0 sps:$4 sm:$0x11]  }
  0x41   : > { %v1166_v45 = vshrl.u32 %v17838_v29, 16  ;;  %v1170_v46 = vshll.u32 %v17844_v36, 16  ;;  %v2862_v47 = vrot.slane %v17685_v34, 2  ;;  %v1164_v51 = vrot.slane %v1162_v18, 1  ;;  %v17872_v34 = vld [vmem:[%s22720_s1 + $0xe] sm:$0x3] }
  0x42   : > { %15329 = vmatmul.mubr.msk.bf16.gmra.mrb[12].mxu0 %vm1198_vm2, %v2489_v63  ;;  %v1157_v44 = vsel %vm22730_vm1, %v1152_v6, %v1156_v35  ;;  %v3388_v28 = vsel %vm1253_vm0, %v17725_v1, 0  ;;  %v1160_v53 = vor.u32 %v1158_v42, %v1156_v35  ;;  %v2861_v55 = vsel %vm22727_vm4, %v2858_v25, %v2860_v41 }
  0x43   : > { %15332 = vmatprep.mubr.msk.bf16.mxu0 %vm1198_vm2, %v2498_v7  ;;  %v1168_v57 = vor.u32 %v1166_v45, %v1164_v51  ;;  %v1172_v58 = vrot.slane %v1170_v46, 1  ;;  %v2863_v63 = vsel %vm22727_vm4, %v2860_v41, %v2862_v47  ;;  %v1178_v3 = vshll.u32 %v17859_v52, 16 }
  0x44   : > { %v1165_v1 = vsel %vm22730_vm1, %v1160_v53, %v1164_v51  ;;  %v2864_v4 = vrot.slane %v17703_v49, 2  ;;  %v1174_v7 = vshrl.u32 %v17844_v36, 16  ;;  %v1182_v14 = vshrl.u32 %v17859_v52, 16  ;;  %v17941_v53 = vld [vmem:[%s17646_s17 + $0x70] sm:$0xff]  }
  0x45   : > { %v1173_v8 = vsel %vm22730_vm1, %v1168_v57, %v1172_v58  ;;  %v2866_v16 = vrot.slane %v17715_v59, 2  ;;  %v1190_v30 = vshrl.u32 %v17866_v60, 16  ;;  %v2868_v6 = vrot.slane %v17739_v22, 2  ;;  %v17955_v57 = vld [vmem:[%s17646_s17 + $0x80] sm:$0xff]  }
  0x46   : > { %v1176_v49 = vor.u32 %v1174_v7, %v1172_v58  ;;  %v2865_v24 = vsel %vm22727_vm4, %v2862_v47, %v2864_v4  ;;  %v2872_v22 = vrot.slane %v17772_v61, 2  ;;  %v17916_v47 = vld [vmem:[%s17646_s17 + $0x60] sm:$0xff]   ;;  %v2876_v61 = vrot.slane %v17797_v26, 2  ;;  %v17971_v7 = vld [vmem:[%s17646_s17 + $0x90] sm:$0xff]  }
  0x47   : > { %15181 = vmatmul.mubr.msk.bf16.gmra.mrb[16].mxu1 %vm1198_vm2, %v1133_v15  ;;  %v1186_v15 = vshll.u32 %v17866_v60, 16  ;;  %v2867_v27 = vsel %vm22727_vm4, %v2864_v4, %v2866_v16  ;;  %v2869_v41 = vsel %vm22727_vm4, %v2866_v16, %v2868_v6  ;;  %v2878_v51 = vrot.slane %v17916_v47, 2  ;;  %v17966_v4 = vld [vmem:[%s17646_s17 + $0x88] sm:$0xff]   ;;  %v3164_v16 = vld [vmem:[%s17646_s17 + $0x10] sm:$0xc] }
  0x48   : > { %15184 = vmatprep.mubr.msk.bf16.mxu1 %vm1198_vm2, %v1141_v17  ;;  %v1180_v17 = vrot.slane %v1178_v3, 1 }
  0x49   : > { %v1188_v25 = vrot.slane %v1186_v15, 1  ;;  %v2888_v15 = vrot.slane %v17966_v4, 2 }
  0x4a   : > { %15333 = vmatmul.mubr.msk.bf16.gmra.mrb[16].mxu0 %vm1198_vm2, %v2507_v31  ;;  %v1184_v13 = vor.u32 %v1182_v14, %v1180_v17  ;;  %v1181_v59 = vsel %vm22730_vm1, %v1176_v49, %v1180_v17  ;;  %v1194_v31 = vshll.u32 %v17889_v21, 16  ;;  %v2890_v17 = vrot.slane %v17971_v7, 2  ;;  %v17983_v49 = vld [vmem:[%s17646_s17 + $0x98] ss:$0 sps:$4 sm:$0x33]  }
  0x4b   : > { %15354 = vmatprep.mubr.msk.bf16.mxu0 %vm1198_vm2, %v2859_v37  ;;  %v2870_v37 = vrot.slane %v17759_v43, 2  ;;  %v1192_v18 = vor.u32 %v1190_v30, %v1188_v25  ;;  %v2874_v43 = vrot.slane %v17784_v11, 2  ;;  %v1749_v11 = vsel %vm1253_vm0, %v17691_v39, 0 }
  0x4c   : > { %v1189_v35 = vsel %vm22730_vm1, %v1184_v13, %v1188_v25  ;;  %v2879_v39 = vsel %vm22727_vm4, %v2876_v61, %v2878_v51  ;;  %v17991_v13 = vld [vmem:[%s17646_s17 + $0x18] sm:$0xff]   ;;  %v2892_v30 = vrot.slane %v17983_v49, 2 }
  0x4d   : > { %v2871_v42 = vsel %vm22727_vm4, %v2868_v6, %v2870_v37  ;;  %v2873_v45 = vsel %vm22727_vm4, %v2870_v37, %v2872_v22  ;;  %v2875_v46 = vsel %vm22727_vm4, %v2872_v22, %v2874_v43  ;;  %v2877_v26 = vsel %vm22727_vm4, %v2874_v43, %v2876_v61  ;;  %v18009_v37 = vld [vmem:[%s17646_s17 + $0x20] sm:$0xff]   ;;  %v18025_v22 = vld [vmem:[%s17646_s17 + $0x30] sm:$0xff]  }
  0x4e   : > { %v3297_v6 = vrot.slane %v17991_v13, 2  ;;  %v3835_v43 = vsel %vm1253_vm0, %v17872_v34, 0  ;;  %v18036_v61 = vld [vmem:[%s22720_s1 + $0x10] sm:$0x3] }
  0x4f   : > { %15185 = vmatmul.mubr.msk.bf16.gmra.mrb[20].mxu1 %vm1198_vm2, %v1149_v40  ;;  %v1196_v40 = vrot.slane %v1194_v31, 1 }
  0x50   : > { %15188 = vmatprep.mubr.msk.bf16.mxu1 %vm1198_vm2, %v1157_v44 }
  0x51   : > { %v1197_v44 = vsel %vm22730_vm1, %v1192_v18, %v1196_v40  ;;  %v18013_v40 = vld [vmem:[%s17646_s17 + $0x28] sm:$0xff]  }
  0x52   : > { %15355 = vmatmul.mubr.msk.bf16.vlgmr.msra.gmra.mrb[0].mxu0 %vm1198_vm2, %v2861_v55  ;;  %v17950_v55 = vld [vmem:[%s17646_s17 + $0x78] sm:$0xff]  }
  0x53   : > { %15391 = vmatpush3.bf16.msra.mxu0 %v3388_v28  ;;  %15358 = vmatprep.mubr.msk.bf16.mxu0 %vm1198_vm2, %v2863_v63  ;;  %v17935_v28 = vld [vmem:[%s17646_s17 + $0x68] sm:$0xff]   ;;  %v2884_v3 = vrot.slane %v17950_v55, 2 }
  0x54   : > { %17098 = vmatprep.subr.msk.bf16.mxu0 %vm1253_vm0, %v17872_v34 }
  0x57   : > { %15189 = vmatmul.mubr.msk.bf16.gmra.mrb[24].mxu1 %vm1198_vm2, %v1165_v1  ;;  %v2886_v1 = vrot.slane %v17955_v57, 2 }
  0x58   : > { %15192 = vmatprep.mubr.msk.bf16.mxu1 %vm1198_vm2, %v1173_v8 }
  0x59   : > { %v2887_v14 = vsel %vm22727_vm4, %v2884_v3, %v2886_v1  ;;  %v2889_v25 = vsel %vm22727_vm4, %v2886_v1, %v2888_v15 }
  0x5a   : > { %15359 = vmatmul.mubr.msk.bf16.gmra.mrb[4].mxu0 %vm1198_vm2, %v2865_v24  ;;  %v17986_v24 = vld [vmem:[%s17646_s17 + $0x14] sm:$0xf] }
  0x5b   : > { %15362 = vmatprep.mubr.msk.bf16.mxu0 %vm1198_vm2, %v2867_v27  ;;  %v2891_v27 = vsel %vm22727_vm4, %v2888_v15, %v2890_v17 }
  0x5f   : > { %15193 = vmatmul.mubr.msk.bf16.gmra.mrb[28].mxu1 %vm1198_vm2, %v1181_v59  ;;  %v17996_v59 = vcombine.low %v3164_v16, %v17986_v24  ;;  %v17435_v16 = vld [vmem:[%s17646_s17 + $0x8] sm:$0xff]  }
  0x60   : > { %15196 = vmatprep.mubr.msk.bf16.mxu1 %vm1198_vm2, %v1189_v35  ;;  %v2893_v35 = vsel %vm22727_vm4, %v2890_v17, %v2892_v30  ;;  %v1658_v17 = vrot.slane %v17435_v16, 1 }
  0x61   : > { %v3296_v31 = vrot.slane %v17996_v59, 2 }
  0x62   : > { %15363 = vmatmul.mubr.msk.bf16.gmra.mrb[8].mxu0 %vm1198_vm2, %v2869_v41  ;;  %v3299_v41 = vrot.slane %v18009_v37, 2 }
  0x63   : > { %15366 = vmatprep.mubr.msk.bf16.mxu0 %vm1198_vm2, %v2871_v42  ;;  %v3298_v18 = vsel %vm22727_vm4, %v3296_v31, %v3297_v6  ;;  %v3301_v42 = vrot.slane %v18013_v40, 2 }
  0x67   : > { %15197 = vmatmul.mubr.msk.bf16.gmra.mrb[32].mxu1 %vm1198_vm2, %v1197_v44  ;;  %v3300_v44 = vsel %vm22727_vm4, %v3297_v6, %v3299_v41 }
  0x68   : > { %15202 = vmatprep.mubr.msk.bf16.mxu1 %vm1198_vm2, %v17650_v9  ;;  %v17927_v9 = vld [vmem:[%s22720_s1 + $0x6] sm:$0x3] }
  0x6a   : > { %15367 = vmatmul.mubr.msk.bf16.gmra.mrb[12].mxu0 %vm1198_vm2, %v2873_v45  ;;  %v3302_v45 = vsel %vm22727_vm4, %v3299_v41, %v3301_v42 }
  0x6b   : > { %15370 = vmatprep.mubr.msk.bf16.mxu0 %vm1198_vm2, %v2875_v46  ;;  %v18031_v46 = vld [vmem:[%s17646_s17 + $0x38] sm:$0xff]  }
  0x6c   : > { %v3305_v34 = vrot.slane %v18031_v46, 2 }
  0x6f   : > { %15203 = vmatmul.mubr.msk.bf16.vlgmr.msra.gmra.mrb[0].mxu1 %vm1198_vm2, %v17653_v10  ;;  %v2880_v10 = vrot.slane %v17935_v28, 2 }
  0x70   : > { %15206 = vmatprep.mubr.msk.bf16.mxu1 %vm1198_vm2, %v17668_v19  ;;  %15239 = vmatpush3.bf16.msra.mxu1 %v1749_v11  ;;  %v2882_v19 = vrot.slane %v17941_v53, 2  ;;  %v3303_v11 = vrot.slane %v18025_v22, 2 }
  0x71   : > { %17093 = vmatprep.subr.msk.bf16.mxu1 %vm1253_vm0, %v17927_v9  ;;  %v2881_v58 = vsel %vm22727_vm4, %v2878_v51, %v2880_v10 }
  0x72   : > { %15371 = vmatmul.mubr.msk.bf16.gmra.mrb[16].mxu0 %vm1198_vm2, %v2877_v26  ;;  %v2883_v63 = vsel %vm22727_vm4, %v2880_v10, %v2882_v19  ;;  %v2885_v8 = vsel %vm22727_vm4, %v2882_v19, %v2884_v3  ;;  %v3304_v51 = vsel %vm22727_vm4, %v3301_v42, %v3303_v11  ;;  %v18050_v26 = vld [vmem:[%s17646_s17 + $0x40] sm:$0xff]   ;;  %v18054_v10 = vld [vmem:[%s17646_s17 + $0x48] sm:$0xff]  }
  0x73   : > { %15374 = vmatprep.mubr.msk.bf16.mxu0 %vm1198_vm2, %v2879_v39  ;;  %v3306_v39 = vsel %vm22727_vm4, %v3303_v11, %v3305_v34  ;;  %v1650_v19 = vld [vmem:[%s17646_s17] sm:$0xe]  ;;  %v3309_v1 = vrot.slane %v18054_v10, 2 }
  0x74   : > { %v18086_v42 = vld [vmem:[%s17646_s17 + $0x60] sm:$0xff]  }
  0x77   : > { %15207 = vmatmul.mubr.msk.bf16.gmra.mrb[4].mxu1 %vm1198_vm2, %v17682_v33 }
  0x78   : > { %15210 = vmatprep.mubr.msk.bf16.mxu1 %vm1198_vm2, %v17700_v48 }
  0x7a   : > { %15375 = vmatmul.mubr.msk.bf16.gmra.mrb[20].mxu0 %vm1198_vm2, %v2881_v58  ;;  %v3307_v58 = vrot.slane %v18050_v26, 2 }
  0x7b   : > { %15378 = vmatprep.mubr.msk.bf16.mxu0 %vm1198_vm2, %v2883_v63  ;;  %v17434_v63 = vld [vmem:[%s17646_s17 + $0x4] sm:$0xf] }
  0x7c   : > { %v13741_v3 = vcombine.low %v1650_v19, %v17434_v63  ;;  %v1664_v19 = vrot.slane %v17700_v48, 1  ;;  %v18106_v63 = vld [vmem:[%s17646_s17 + $0x70] sm:$0xff]  }
  0x7e   : > { %v1657_v15 = vrot.slane %v13741_v3, 1  ;;  %v1666_v3 = vrot.slane %v17709_v54, 1 }
  0x7f   : > { %15211 = vmatmul.mubr.msk.bf16.gmra.mrb[8].mxu1 %vm1198_vm2, %v17709_v54 }
  0x80   : > { %15214 = vmatprep.mubr.msk.bf16.mxu1 %vm1198_vm2, %v17720_v0  ;;  %v1659_v31 = vsel %vm22729_vm5, %v1657_v15, %v1658_v17  ;;  %v3319_v15 = vrot.slane %v18106_v63, 2  ;;  %v1667_v54 = vsel %vm22729_vm5, %v1664_v19, %v1666_v3 }
  0x82   : > { %15379 = vmatmul.mubr.msk.bf16.gmra.mrb[24].mxu0 %vm1198_vm2, %v2885_v8  ;;  %v3308_v8 = vsel %vm22727_vm4, %v3305_v34, %v3307_v58  ;;  %v3315_v34 = vrot.slane %v18086_v42, 2 }
  0x83   : > { %15382 = vmatprep.mubr.msk.bf16.mxu0 %vm1198_vm2, %v2887_v14  ;;  %v18068_v14 = vld [vmem:[%s17646_s17 + $0x50] sm:$0xff]  }
  0x84   : > { %v3311_v30 = vrot.slane %v18068_v14, 2 }
  0x86   : > { %v3312_v41 = vsel %vm22727_vm4, %v3309_v1, %v3311_v30 }
  0x87   : > { %15215 = vmatmul.mubr.msk.bf16.gmra.mrb[12].mxu1 %vm1198_vm2, %v17748_v32 }
  0x88   : > { %15218 = vmatprep.mubr.msk.bf16.mxu1 %vm1198_vm2, %v17764_v50 }
  0x8a   : > { %15383 = vmatmul.mubr.msk.bf16.gmra.mrb[28].mxu0 %vm1198_vm2, %v2889_v25  ;;  %v3310_v25 = vsel %vm22727_vm4, %v3307_v58, %v3309_v1 }
  0x8b   : > { %15386 = vmatprep.mubr.msk.bf16.mxu0 %vm1198_vm2, %v2891_v27  ;;  %v18073_v27 = vld [vmem:[%s17646_s17 + $0x58] sm:$0xff]  }
  0x8c   : > { %v3313_v6 = vrot.slane %v18073_v27, 2 }
  0x8e   : > { %v3316_v58 = vsel %vm22727_vm4, %v3313_v6, %v3315_v34 }
  0x8f   : > { %15219 = vmatmul.mubr.msk.bf16.gmra.mrb[16].mxu1 %vm1198_vm2, %v17775_v62 }
  0x90   : > { %15222 = vmatprep.mubr.msk.bf16.mxu1 %vm1198_vm2, %v17792_v23 }
  0x92   : > { %15387 = vmatmul.mubr.msk.bf16.gmra.mrb[32].mxu0 %vm1198_vm2, %v2893_v35  ;;  %v17436_v35 = vld [vmem:[%s17646_s17 + $0x10] sm:$0xff]  }
  0x93   : > { %15392 = vmatprep.mubr.msk.bf16.mxu0 %vm1198_vm2, %v3298_v18  ;;  %v1660_v18 = vrot.slane %v17436_v35, 1  ;;  %v18133_v35 = vld [vmem:[%s17646_s17 + $0x88] sm:$0xff]  }
  0x95   : > { %v1661_v11 = vsel %vm22729_vm5, %v1658_v17, %v1660_v18  ;;  %v1668_v17 = vrot.slane %v17720_v0, 1 }
  0x97   : > { %15223 = vmatmul.mubr.msk.bf16.gmra.mrb[20].mxu1 %vm1198_vm2, %v17802_v38 }
  0x98   : > { %15226 = vmatprep.mubr.msk.bf16.mxu1 %vm1198_vm2, %v17816_v56 }
  0x9a   : > { %15393 = vmatmul.mubr.msk.bf16.vlgmr.msra.gmra.mrb[0].mxu0 %vm1198_vm2, %v3300_v44  ;;  %v1662_v44 = vrot.slane %v17682_v33, 1 }
  0x9b   : > { %15429 = vmatpush3.bf16.msra.mxu0 %v3835_v43  ;;  %15396 = vmatprep.mubr.msk.bf16.mxu0 %vm1198_vm2, %v3302_v45  ;;  %v3314_v43 = vsel %vm22727_vm4, %v3311_v30, %v3313_v6  ;;  %v18091_v45 = vld [vmem:[%s17646_s17 + $0x68] sm:$0xff]   ;;  %v18128_v30 = vld [vmem:[%s17646_s17 + $0x80] sm:$0xff]  }
  0x9c   : > { %17099 = vmatprep.subr.msk.bf16.mxu0 %vm1253_vm0, %v18036_v61  ;;  %v3317_v33 = vrot.slane %v18091_v45, 2  ;;  %v1665_v48 = vsel %vm22729_vm5, %v1662_v44, %v1664_v19  ;;  %v3323_v0 = vrot.slane %v18128_v30, 2 }
  0x9e   : > { %v3318_v1 = vsel %vm22727_vm4, %v3315_v34, %v3317_v33  ;;  %v1674_v34 = vrot.slane %v17775_v62, 1  ;;  %v3614_v62 = vshll.u32 %v17996_v59, 16 }
  0x9f   : > { %15227 = vmatmul.mubr.msk.bf16.gmra.mrb[24].mxu1 %vm1198_vm2, %v17821_v5 }
  0xa0   : > { %15230 = vmatprep.mubr.msk.bf16.mxu1 %vm1198_vm2, %v17838_v29 }
  0xa2   : > { %15397 = vmatmul.mubr.msk.bf16.gmra.mrb[4].mxu0 %vm1198_vm2, %v3304_v51  ;;  %v1663_v51 = vsel %vm22729_vm5, %v1660_v18, %v1662_v44  ;;  %v1669_v18 = vsel %vm22729_vm5, %v1666_v3, %v1668_v17  ;;  %v3325_v44 = vrot.slane %v18133_v35, 2  ;;  %v3611_v3 = vshrl.u32 %v17996_v59, 16 }
  0xa3   : > { %15400 = vmatprep.mubr.msk.bf16.mxu0 %vm1198_vm2, %v3306_v39  ;;  %v2188_v39 = vsel %vm1253_vm0, %v17927_v9, 0  ;;  %v17437_v9 = vld [vmem:[%s22720_s1 + $0x8] sm:$0x3] }
  0xa7   : > { %15231 = vmatmul.mubr.msk.bf16.gmra.mrb[28].mxu1 %vm1198_vm2, %v17844_v36 }
  0xa8   : > { %15234 = vmatprep.mubr.msk.bf16.mxu1 %vm1198_vm2, %v17859_v52 }
  0xaa   : > { %15401 = vmatmul.mubr.msk.bf16.gmra.mrb[8].mxu0 %vm1198_vm2, %v3308_v8  ;;  %v18115_v8 = vld [vmem:[%s17646_s17 + $0x78] sm:$0xff]  }
  0xab   : > { %15404 = vmatprep.mubr.msk.bf16.mxu0 %vm1198_vm2, %v3310_v25  ;;  %v3321_v16 = vrot.slane %v18115_v8, 2  ;;  %v3320_v25 = vsel %vm22727_vm4, %v3317_v33, %v3319_v15 }
  0xad   : > { %v3322_v6 = vsel %vm22727_vm4, %v3319_v15, %v3321_v16 }
  0xaf   : > { %15235 = vmatmul.mubr.msk.bf16.gmra.mrb[32].mxu1 %vm1198_vm2, %v17866_v60 }
  0xb0   : > { %15240 = vmatprep.mubr.msk.bf16.mxu1 %vm1198_vm2, %v1659_v31  ;;  %v1670_v31 = vrot.slane %v17748_v32, 1  ;;  %v1672_v32 = vrot.slane %v17764_v50, 1 }
  0xb2   : > { %15405 = vmatmul.mubr.msk.bf16.gmra.mrb[12].mxu0 %vm1198_vm2, %v3312_v41  ;;  %v1671_v41 = vsel %vm22729_vm5, %v1668_v17, %v1670_v31  ;;  %v1673_v33 = vsel %vm22729_vm5, %v1670_v31, %v1672_v32  ;;  %v1675_v50 = vsel %vm22729_vm5, %v1672_v32, %v1674_v34  ;;  %v1678_v17 = vrot.slane %v17802_v38, 1 }
  0xb3   : > { %15408 = vmatprep.mubr.msk.bf16.mxu0 %vm1198_vm2, %v3314_v43  ;;  %v3324_v43 = vsel %vm22727_vm4, %v3321_v16, %v3323_v0  ;;  %v17273_v16 = vld [vmem:[%s17646_s17 + $0xa0] ss:$0 sps:$4 sm:$0x33]   ;;  %v3616_v31 = vrot.slane %v3614_v62, 3  ;;  %v3637_v38 = vshrl.u32 %v18013_v40, 16 }
  0xb7   : > { %15241 = vmatmul.mubr.msk.bf16.vlgmr.msra.gmra.mrb[0].mxu1 %vm1198_vm2, %v1661_v11  ;;  %v18146_v11 = vld [vmem:[%s17646_s17 + $0x90] sm:$0xff]  }
  0xb8   : > { %15244 = vmatprep.mubr.msk.bf16.mxu1 %vm1198_vm2, %v1663_v51  ;;  %15277 = vmatpush3.bf16.msra.mxu1 %v2188_v39  ;;  %v18150_v51 = vld [vmem:[%s17646_s17 + $0x98] sm:$0xff]   ;;  %v3326_v39 = vsel %vm22727_vm4, %v3323_v0, %v3325_v44  ;;  %v3327_v19 = vrot.slane %v18146_v11, 2  ;;  %v3331_v0 = vrot.slane %v17273_v16, 2 }
  0xb9   : > { %17095 = vmatprep.subr.msk.bf16.mxu1 %vm1253_vm0, %v17437_v9  ;;  %v3619_v9 = vshrl.u32 %v17991_v13, 16 }
  0xba   : > { %15409 = vmatmul.mubr.msk.bf16.gmra.mrb[16].mxu0 %vm1198_vm2, %v3316_v58  ;;  %v3329_v58 = vrot.slane %v18150_v51, 2  ;;  %v3328_v15 = vsel %vm22727_vm4, %v3325_v44, %v3327_v19  ;;  %v3631_v44 = vshll.u32 %v18009_v37, 16 }
  0xbb   : > { %15412 = vmatprep.mubr.msk.bf16.mxu0 %vm1198_vm2, %v3318_v1  ;;  %v3622_v1 = vshll.u32 %v17991_v13, 16  ;;  %v3621_v59 = vrot.slane %v3619_v9, 2  ;;  %v3639_v9 = vrot.slane %v3637_v38, 2  ;;  %v3664_v38 = vshrl.u32 %v18050_v26, 16 }
  0xbf   : > { %15245 = vmatmul.mubr.msk.bf16.gmra.mrb[4].mxu1 %vm1198_vm2, %v1665_v48  ;;  %v1676_v48 = vrot.slane %v17792_v23, 1 }
  0xc0   : > { %15248 = vmatprep.mubr.msk.bf16.mxu1 %vm1198_vm2, %v1667_v54  ;;  %v3330_v54 = vsel %vm22727_vm4, %v3327_v19, %v3329_v58 }
  0xc1   : > { %v1679_v23 = vsel %vm22729_vm5, %v1676_v48, %v1678_v17 }
  0xc2   : > { %15413 = vmatmul.mubr.msk.bf16.gmra.mrb[20].mxu0 %vm1198_vm2, %v3320_v25  ;;  %v3613_v25 = vrot.slane %v3611_v3, 2  ;;  %v1682_v3 = vrot.slane %v17821_v5, 1  ;;  %v3655_v5 = vshrl.u32 %v18031_v46, 16 }
  0xc3   : > { %15416 = vmatprep.mubr.msk.bf16.mxu0 %vm1198_vm2, %v3322_v6  ;;  %v3624_v6 = vrot.slane %v3622_v1, 3 }
  0xc4   : > { %v3617_v32 = vor.u32 %v3616_v31, %v3613_v25  ;;  %v3658_v25 = vshll.u32 %v18031_v46, 16 }
  0xc7   : > { %15249 = vmatmul.mubr.msk.bf16.gmra.mrb[8].mxu1 %vm1198_vm2, %v1669_v18  ;;  %v1677_v18 = vsel %vm22729_vm5, %v1674_v34, %v1676_v48  ;;  %v1680_v34 = vrot.slane %v17816_v56, 1  ;;  %v3646_v56 = vshrl.u32 %v18025_v22, 16 }
  0xc8   : > { %15252 = vmatprep.mubr.msk.bf16.mxu1 %vm1198_vm2, %v1671_v41  ;;  %v3628_v41 = vshrl.u32 %v18009_v37, 16 }
  0xc9   : > { %v1681_v48 = vsel %vm22729_vm5, %v1678_v17, %v1680_v34  ;;  %v1684_v17 = vrot.slane %v17838_v29, 1  ;;  %v3667_v29 = vshll.u32 %v18050_v26, 16 }
  0xca   : > { %15417 = vmatmul.mubr.msk.bf16.gmra.mrb[24].mxu0 %vm1198_vm2, %v3324_v43  ;;  %v3625_v43 = vor.u32 %v3624_v6, %v3621_v59  ;;  %v3630_v19 = vrot.slane %v3628_v41, 2  ;;  %v3648_v59 = vrot.slane %v3646_v56, 2  ;;  %v3657_v41 = vrot.slane %v3655_v5, 2 }
  0xcb   : > { %15420 = vmatprep.mubr.msk.bf16.mxu0 %vm1198_vm2, %v3326_v39  ;;  %v3640_v39 = vshll.u32 %v18013_v40, 16  ;;  %v3682_v56 = vshrl.u32 %v18068_v14, 16  ;;  %v3694_v5 = vshll.u32 %v18073_v27, 16 }
  0xcc   : > { %v3626_v62 = vsel %vm22726_vm6, %v3617_v32, %v3625_v43  ;;  %v1685_v32 = vsel %vm22729_vm5, %v1682_v3, %v1684_v17 }
  0xcd   : > { %v3642_v1 = vrot.slane %v3640_v39, 3 }
  0xcf   : > { %15253 = vmatmul.mubr.msk.bf16.gmra.mrb[12].mxu1 %vm1198_vm2, %v1673_v33  ;;  %v3332_v33 = vsel %vm22727_vm4, %v3329_v58, %v3331_v0  ;;  %v3649_v58 = vshll.u32 %v18025_v22, 16  ;;  %v3643_v16 = vor.u32 %v3642_v1, %v3639_v9  ;;  %v4149_v0 = vsel %vm1253_vm0, %v18036_v61, 0 }
  0xd0   : > { %15256 = vmatprep.mubr.msk.bf16.mxu1 %vm1198_vm2, %v1675_v50  ;;  %v3633_v50 = vrot.slane %v3631_v44, 3  ;;  %v3660_v44 = vrot.slane %v3658_v25, 3  ;;  %v3673_v61 = vshrl.u32 %v18054_v10, 16 }
  0xd1   : > { %v3651_v6 = vrot.slane %v3649_v58, 3  ;;  %v3685_v58 = vshll.u32 %v18068_v14, 16 }
  0xd2   : > { %15421 = vmatmul.mubr.msk.bf16.gmra.mrb[28].mxu0 %vm1198_vm2, %v3328_v15  ;;  %v3634_v15 = vor.u32 %v3633_v50, %v3630_v19  ;;  %v3661_v39 = vor.u32 %v3660_v44, %v3657_v41  ;;  %v3666_v19 = vrot.slane %v3664_v38, 2  ;;  %v3669_v50 = vrot.slane %v3667_v29, 3 }
  0xd3   : > { %15424 = vmatprep.mubr.msk.bf16.mxu0 %vm1198_vm2, %v3330_v54  ;;  %v1683_v54 = vsel %vm22729_vm5, %v1680_v34, %v1682_v3  ;;  %v3676_v34 = vshll.u32 %v18054_v10, 16  ;;  %v3675_v1 = vrot.slane %v3673_v61, 2  ;;  %v3696_v44 = vrot.slane %v3694_v5, 3  ;;  %v17439_v61 = vld [vmem:[%s17646_s17 + $0x18] sm:$0xff]  }
  0xd4   : > { %v3635_v31 = vsel %vm22726_vm6, %v3625_v43, %v3634_v15  ;;  %v3652_v43 = vor.u32 %v3651_v6, %v3648_v59  ;;  %v3687_v59 = vrot.slane %v3685_v58, 3  ;;  %v2096_v6 = vrot.slane %v17671_v20, 1 }
  0xd5   : > { %v3700_v29 = vshrl.u32 %v18086_v42, 16  ;;  %v3703_v20 = vshll.u32 %v18086_v42, 16  ;;  %v3721_v58 = vshll.u32 %v18106_v63, 16  ;;  %v3730_v5 = vshll.u32 %v18115_v8, 16 }
  0xd6   : > { %v3653_v3 = vsel %vm22726_vm6, %v3643_v16, %v3652_v43  ;;  %v3662_v9 = vsel %vm22726_vm6, %v3652_v43, %v3661_v39 }
  0xd7   : > { %15257 = vmatmul.mubr.msk.bf16.gmra.mrb[16].mxu1 %vm1198_vm2, %v1677_v18  ;;  %v1686_v18 = vrot.slane %v17844_v36, 1 }
  0xd8   : > { %15260 = vmatprep.mubr.msk.bf16.mxu1 %vm1198_vm2, %v1679_v23  ;;  %v3644_v23 = vsel %vm22726_vm6, %v3634_v15, %v3643_v16 }
  0xd9   : > { %v1687_v36 = vsel %vm22729_vm5, %v1684_v17, %v1686_v18  ;;  %v1692_v17 = vrot.slane %v17889_v21, 1 }
  0xda   : > { %15425 = vmatmul.mubr.msk.bf16.gmra.mrb[32].mxu0 %vm1198_vm2, %v3332_v33  ;;  %v1688_v33 = vrot.slane %v17859_v52, 1 }
  0xdb   : > { %15430 = vmatprep.mubr.msk.bf16.mxu0 %vm1198_vm2, %v3626_v62  ;;  %v1690_v62 = vrot.slane %v17866_v60, 1  ;;  %v3691_v60 = vshrl.u32 %v18073_v27, 16 }
  0xdc   : > { %v1689_v15 = vsel %vm22729_vm5, %v1686_v18, %v1688_v33  ;;  %v17438_v18 = vld [vmem:[%s17646_s17 + $0x10] sm:$0xff]  }
  0xdd   : > { %v1691_v52 = vsel %vm22729_vm5, %v1688_v33, %v1690_v62  ;;  %v3693_v41 = vrot.slane %v3691_v60, 2  ;;  %v3727_v60 = vshrl.u32 %v18115_v8, 16 }
  0xdf   : > { %15261 = vmatmul.mubr.msk.bf16.gmra.mrb[20].mxu1 %vm1198_vm2, %v1681_v48  ;;  %v3678_v48 = vrot.slane %v3676_v34, 3  ;;  %v3697_v43 = vor.u32 %v3696_v44, %v3693_v41  ;;  %v2099_v34 = vrot.slane %v17439_v61, 1  ;;  %v3729_v41 = vrot.slane %v3727_v60, 2 }
  0xe0   : > { %15264 = vmatprep.mubr.msk.bf16.mxu1 %vm1198_vm2, %v1683_v54  ;;  %v3670_v54 = vor.u32 %v3669_v50, %v3666_v19  ;;  %v3702_v19 = vrot.slane %v3700_v29, 2  ;;  %v3705_v50 = vrot.slane %v3703_v20, 3  ;;  %v3732_v44 = vrot.slane %v3730_v5, 3  ;;  %v17445_v5 = vld [vmem:[%s17646_s17 + $0x48] sm:$0xff]  }
  0xe1   : > { %v3679_v16 = vor.u32 %v3678_v48, %v3675_v1  ;;  %v3739_v29 = vshll.u32 %v18128_v30, 16  ;;  %v3766_v60 = vshll.u32 %v18150_v51, 16 }
  0xe2   : > { %15431 = vmatmul.mubr.msk.bf16.vlgmr.msra.gmra.mrb[0].mxu0 %vm1198_vm2, %v3635_v31  ;;  %v3671_v25 = vsel %vm22726_vm6, %v3661_v39, %v3670_v54  ;;  %v3684_v31 = vrot.slane %v3682_v56, 2  ;;  %v3712_v39 = vshll.u32 %v18091_v45, 16  ;;  %v3718_v56 = vshrl.u32 %v18106_v63, 16 }
  0xe3   : > { %15467 = vmatpush3.bf16.msra.mxu0 %v4149_v0  ;;  %15434 = vmatprep.mubr.msk.bf16.mxu0 %vm1198_vm2, %v3644_v23  ;;  %v2097_v0 = vrot.slane %v17438_v18, 1  ;;  %v3680_v23 = vsel %vm22726_vm6, %v3670_v54, %v3679_v16  ;;  %v3706_v54 = vor.u32 %v3705_v50, %v3702_v19  ;;  %v17442_v18 = vld [vmem:[%s17646_s17 + $0x30] sm:$0xff]   ;;  %v3733_v20 = vor.u32 %v3732_v44, %v3729_v41  ;;  %v17444_v50 = vld [vmem:[%s17646_s17 + $0x40] sm:$0xff]  }
  0xe4   : > { %v3688_v38 = vor.u32 %v3687_v59, %v3684_v31  ;;  %v3714_v48 = vrot.slane %v3712_v39, 3  ;;  %v3720_v59 = vrot.slane %v3718_v56, 2  ;;  %v17443_v39 = vld [vmem:[%s17646_s17 + $0x38] sm:$0xff]   ;;  %v3741_v19 = vrot.slane %v3739_v29, 3 }
  0xe5   : > { %v2098_v21 = vsel %vm22729_vm5, %v2096_v6, %v2097_v0  ;;  %v3707_v31 = vsel %vm22726_vm6, %v3697_v43, %v3706_v54  ;;  %v3723_v6 = vrot.slane %v3721_v58, 3  ;;  %v2107_v61 = vrot.slane %v17443_v39, 1 }
  0xe6   : > { %v3689_v33 = vsel %vm22726_vm6, %v3679_v16, %v3688_v38  ;;  %v3757_v56 = vshll.u32 %v18146_v11, 16  ;;  %v3768_v44 = vrot.slane %v3766_v60, 3  ;;  %v4062_v60 = vrot.slane %v18013_v40, 3 }
  0xe7   : > { %15265 = vmatmul.mubr.msk.bf16.gmra.mrb[24].mxu1 %vm1198_vm2, %v1685_v32  ;;  %v1693_v32 = vsel %vm22729_vm5, %v1690_v62, %v1692_v17  ;;  %v4064_v40 = vrot.slane %v18025_v22, 3 }
  0xe8   : > { %15268 = vmatprep.mubr.msk.bf16.mxu1 %vm1198_vm2, %v1687_v36  ;;  %v3709_v36 = vshrl.u32 %v18091_v45, 16 }
  0xea   : > { %15435 = vmatmul.mubr.msk.bf16.gmra.mrb[4].mxu0 %vm1198_vm2, %v3653_v3  ;;  %v17440_v3 = vld [vmem:[%s17646_s17 + $0x20] sm:$0xff]   ;;  %v3711_v1 = vrot.slane %v3709_v36, 2  ;;  %v3748_v36 = vshll.u32 %v18133_v35, 16 }
  0xeb   : > { %15438 = vmatprep.mubr.msk.bf16.mxu0 %vm1198_vm2, %v3662_v9  ;;  %v2101_v62 = vrot.slane %v17440_v3, 1  ;;  %v3698_v9 = vsel %vm22726_vm6, %v3688_v38, %v3697_v43  ;;  %v3724_v38 = vor.u32 %v3723_v6, %v3720_v59  ;;  %v3745_v43 = vshrl.u32 %v18133_v35, 16  ;;  %v17446_v6 = vld [vmem:[%s17646_s17 + $0x50] sm:$0xff]  }
  0xec   : > { %v3715_v16 = vor.u32 %v3714_v48, %v3711_v1  ;;  %v2109_v3 = vrot.slane %v17444_v50, 1  ;;  %v3750_v1 = vrot.slane %v3748_v36, 3  ;;  %v3759_v59 = vrot.slane %v3757_v56, 3  ;;  %v17447_v36 = vld [vmem:[%s17646_s17 + $0x58] sm:$0xff]  }
  0xed   : > { %v2115_v39 = vrot.slane %v17447_v36, 1  ;;  %v2518_v36 = vshrl.u32 %v17935_v28, 16 }
  0xef   : > { %15269 = vmatmul.mubr.msk.bf16.gmra.mrb[28].mxu1 %vm1198_vm2, %v1689_v15  ;;  %v2100_v15 = vsel %vm22729_vm5, %v2097_v0, %v2099_v34  ;;  %v2105_v0 = vrot.slane %v17442_v18, 1  ;;  %v2113_v18 = vrot.slane %v17446_v6, 1  ;;  %v4066_v6 = vrot.slane %v18031_v46, 3 }
  0xf0   : > { %15272 = vmatprep.mubr.msk.bf16.mxu1 %vm1198_vm2, %v1691_v52  ;;  %v2102_v52 = vsel %vm22729_vm5, %v2099_v34, %v2101_v62  ;;  %v3725_v34 = vsel %vm22726_vm6, %v3715_v16, %v3724_v38 }
  0xf1   : > { %v2108_v48 = vsel %vm22729_vm5, %v2105_v0, %v2107_v61  ;;  %v4067_v22 = vsel %vm22725_vm7, %v4064_v40, %v4066_v6 }
  0xf2   : > { %15439 = vmatmul.mubr.msk.bf16.gmra.mrb[8].mxu0 %vm1198_vm2, %v3671_v25  ;;  %v17441_v25 = vld [vmem:[%s17646_s17 + $0x28] sm:$0xff]  }
  0xf3   : > { %15442 = vmatprep.mubr.msk.bf16.mxu0 %vm1198_vm2, %v3680_v23  ;;  %v2103_v17 = vrot.slane %v17441_v25, 1  ;;  %v3716_v23 = vsel %vm22726_vm6, %v3706_v54, %v3715_v16  ;;  %v2110_v54 = vsel %vm22729_vm5, %v2107_v61, %v2109_v3  ;;  %v3763_v16 = vshrl.u32 %v18150_v51, 16 }
  0xf4   : > { %v2111_v25 = vrot.slane %v17445_v5, 1  ;;  %v2123_v5 = vrot.slane %v17950_v55, 1 }
  0xf5   : > { %v3765_v41 = vrot.slane %v3763_v16, 2 }
  0xf7   : > { %15273 = vmatmul.mubr.msk.bf16.gmra.mrb[32].mxu1 %vm1198_vm2, %v1693_v32  ;;  %v2104_v32 = vsel %vm22729_vm5, %v2101_v62, %v2103_v17  ;;  %v3734_v62 = vsel %vm22726_vm6, %v3724_v38, %v3733_v20 }
  0xf8   : > { %15278 = vmatprep.mubr.msk.bf16.mxu1 %vm1198_vm2, %v2098_v21  ;;  %v3736_v21 = vshrl.u32 %v18128_v30, 16 }
  0xfa   : > { %15443 = vmatmul.mubr.msk.bf16.gmra.mrb[12].mxu0 %vm1198_vm2, %v3689_v33  ;;  %v3738_v33 = vrot.slane %v3736_v21, 2 }
  0xfb   : > { %15446 = vmatprep.mubr.msk.bf16.mxu0 %vm1198_vm2, %v3698_v9  ;;  %v3747_v9 = vrot.slane %v3745_v43, 2  ;;  %v4050_v43 = vld [vmem:[%s17646_s17 + $0x10] sm:$0x8] }
  0xfd   : > { %v3751_v58 = vor.u32 %v3750_v1, %v3747_v9 }
  0xff   : > { %15279 = vmatmul.mubr.msk.bf16.vlgmr.msra.gmra.mrb[0].mxu1 %vm1198_vm2, %v2100_v15  ;;  %v3742_v15 = vor.u32 %v3741_v19, %v3738_v33  ;;  %v2117_v19 = vrot.slane %v17916_v47, 1 }
 0x100   : > { %15282 = vmatprep.mubr.msk.bf16.mxu1 %vm1198_vm2, %v2102_v52  ;;  %16225 = vmatpush3.bf16.msra.mxu1 %v17627_v2  ;;  %v2106_v2 = vsel %vm22729_vm5, %v2103_v17, %v2105_v0  ;;  %v3754_v52 = vshrl.u32 %v18146_v11, 16  ;;  %v18286_v0 = vld [vmem:[%s17646_s17 + $0xa0] ss:$0 sps:$4 sm:$0x77]  }
 0x101   : > { %v3743_v17 = vsel %vm22726_vm6, %v3733_v20, %v3742_v15  ;;  %v3772_v21 = vshrl.u32 %v18286_v0, 16  ;;  %v3775_v29 = vshll.u32 %v18286_v0, 16  ;;  %v3769_v20 = vor.u32 %v3768_v44, %v3765_v41 }
 0x102   : > { %15447 = vmatmul.mubr.msk.bf16.gmra.mrb[16].mxu0 %vm1198_vm2, %v3707_v31  ;;  %v3756_v31 = vrot.slane %v3754_v52, 2  ;;  %v2118_v1 = vsel %vm22729_vm5, %v2115_v39, %v2117_v19  ;;  %v2121_v52 = vrot.slane %v17941_v53, 1  ;;  %v2129_v41 = vrot.slane %v17971_v7, 1 }
 0x103   : > { %15450 = vmatprep.mubr.msk.bf16.mxu0 %vm1198_vm2, %v3716_v23  ;;  %v3752_v23 = vsel %vm22726_vm6, %v3742_v15, %v3751_v58  ;;  %v3777_v33 = vrot.slane %v3775_v29, 3  ;;  %v4058_v15 = vrot.slane %v17991_v13, 3  ;;  %v4060_v13 = vrot.slane %v18009_v37, 3 }
 0x104   : > { %v3760_v38 = vor.u32 %v3759_v59, %v3756_v31  ;;  %v2124_v37 = vsel %vm22729_vm5, %v2121_v52, %v2123_v5  ;;  %v2509_v44 = vshrl.u32 %v17916_v47, 16 }
 0x105   : > { %v4063_v31 = vsel %vm22725_vm7, %v4060_v13, %v4062_v60 }
 0x106   : > { %v3761_v61 = vsel %vm22726_vm6, %v3751_v58, %v3760_v38  ;;  %v3770_v50 = vsel %vm22726_vm6, %v3760_v38, %v3769_v20  ;;  %v17276_v38 = vld [vmem:[%s17646_s17 + $0x98] ss:$0 sps:$4 sm:$0x11]   ;;  %v2511_v29 = vrot.slane %v2509_v44, 1 }
 0x107   : > { %15283 = vmatmul.mubr.msk.bf16.gmra.mrb[4].mxu1 %vm1198_vm2, %v2104_v32  ;;  %v2112_v32 = vsel %vm22729_vm5, %v2109_v3, %v2111_v25  ;;  %v13897_v3 = vcombine.low %v4050_v43, %v17986_v24  ;;  %v4070_v43 = vrot.slane %v18054_v10, 3 }
 0x108   : > { %15286 = vmatprep.mubr.msk.bf16.mxu1 %vm1198_vm2, %v2106_v2  ;;  %v2114_v2 = vsel %vm22729_vm5, %v2111_v25, %v2113_v18  ;;  %v4061_v25 = vsel %vm22725_vm7, %v4058_v15, %v4060_v13 }
 0x10a   : > { %15451 = vmatmul.mubr.msk.bf16.gmra.mrb[20].mxu0 %vm1198_vm2, %v3725_v34  ;;  %v3774_v34 = vrot.slane %v3772_v21, 2 }
 0x10b   : > { %15454 = vmatprep.mubr.msk.bf16.mxu0 %vm1198_vm2, %v3734_v62  ;;  %v2116_v62 = vsel %vm22729_vm5, %v2113_v18, %v2115_v39  ;;  %v2127_v18 = vrot.slane %v17966_v4, 1  ;;  %v2521_v39 = vshll.u32 %v17935_v28, 16 }
 0x10c   : > { %v3778_v9 = vor.u32 %v3777_v33, %v3774_v34  ;;  %v2530_v33 = vshll.u32 %v17941_v53, 16 }
 0x10d   : > { %v2130_v21 = vsel %vm22729_vm5, %v2127_v18, %v2129_v41 }
 0x10e   : > { %v3779_v24 = vsel %vm22726_vm6, %v3769_v20, %v3778_v9 }
 0x10f   : > { %15287 = vmatmul.mubr.msk.bf16.gmra.mrb[8].mxu1 %vm1198_vm2, %v2108_v48  ;;  %v4057_v48 = vrot.slane %v13897_v3, 3  ;;  %v2523_v3 = vrot.slane %v2521_v39, 2 }
 0x110   : > { %15290 = vmatprep.mubr.msk.bf16.mxu1 %vm1198_vm2, %v2110_v54  ;;  %v2119_v54 = vrot.slane %v17935_v28, 1 }
 0x111   : > { %v4059_v56 = vsel %vm22725_vm7, %v4057_v48, %v4058_v15  ;;  %v4074_v48 = vrot.slane %v18073_v27, 3  ;;  %v2536_v15 = vshrl.u32 %v17950_v55, 16 }
 0x112   : > { %15455 = vmatmul.mubr.msk.bf16.gmra.mrb[24].mxu0 %vm1198_vm2, %v3743_v17  ;;  %v2120_v58 = vsel %vm22729_vm5, %v2117_v19, %v2119_v54  ;;  %v2122_v16 = vsel %vm22729_vm5, %v2119_v54, %v2121_v52  ;;  %v2125_v17 = vrot.slane %v17955_v57, 1  ;;  %v2539_v54 = vshll.u32 %v17950_v55, 16 }
 0x113   : > { %15458 = vmatprep.mubr.msk.bf16.mxu0 %vm1198_vm2, %v3752_v23  ;;  %v4065_v23 = vsel %vm22725_vm7, %v4062_v60, %v4064_v40 }
 0x114   : > { %v2126_v59 = vsel %vm22729_vm5, %v2123_v5, %v2125_v17  ;;  %v2128_v46 = vsel %vm22729_vm5, %v2125_v17, %v2127_v18  ;;  %v2541_v13 = vrot.slane %v2539_v54, 2  ;;  %v2554_v17 = vshrl.u32 %v17966_v4, 16 }
 0x116   : > { %v2556_v18 = vrot.slane %v2554_v17, 1 }
 0x117   : > { %15291 = vmatmul.mubr.msk.bf16.gmra.mrb[12].mxu1 %vm1198_vm2, %v2112_v32  ;;  %v2512_v32 = vshll.u32 %v17916_v47, 16  ;;  %v2131_v47 = vrot.slane %v17276_v38, 1  ;;  %v2575_v38 = vshll.u32 %v17983_v49, 16 }
 0x118   : > { %15294 = vmatprep.mubr.msk.bf16.mxu1 %vm1198_vm2, %v2114_v2  ;;  %v4068_v2 = vrot.slane %v18050_v26, 3  ;;  %v2527_v26 = vshrl.u32 %v17941_v53, 16 }
 0x119   : > { %v2514_v20 = vrot.slane %v2512_v32, 2  ;;  %v2132_v10 = vsel %vm22729_vm5, %v2129_v41, %v2131_v47  ;;  %v4080_v41 = vrot.slane %v18106_v63, 3 }
 0x11a   : > { %15459 = vmatmul.mubr.msk.bf16.gmra.mrb[28].mxu0 %vm1198_vm2, %v3761_v61  ;;  %v4069_v61 = vsel %vm22725_vm7, %v4066_v6, %v4068_v2  ;;  %v4071_v19 = vsel %vm22725_vm7, %v4068_v2, %v4070_v43  ;;  %v2529_v9 = vrot.slane %v2527_v26, 1  ;;  %v4090_v26 = vrot.slane %v18150_v51, 3 }
 0x11b   : > { %15462 = vmatprep.mubr.msk.bf16.mxu0 %vm1198_vm2, %v3770_v50  ;;  %v2515_v34 = vor.u32 %v2514_v20, %v2511_v29  ;;  %v2520_v50 = vrot.slane %v2518_v36, 1  ;;  %v4086_v36 = vrot.slane %v18133_v35, 3  ;;  %v224_v51 = vlaneseq }
 0x11d   : > { %v2516_v28 = vsel %vm22728_vm3, %v17830_v12, %v2515_v34  ;;  %v2524_v53 = vor.u32 %v2523_v3, %v2520_v50  ;;  %v2548_v12 = vshll.u32 %v17955_v57, 16  ;;  %v18502_v50 = vshrl.u32 %v224_v51, 7 }
 0x11f   : > { %15295 = vmatmul.mubr.msk.bf16.gmra.mrb[16].mxu1 %vm1198_vm2, %v2116_v62  ;;  %v4072_v62 = vrot.slane %v18068_v14, 3  ;;  %v2545_v14 = vshrl.u32 %v17955_v57, 16  ;;  %v2525_v27 = vsel %vm22728_vm3, %v2515_v34, %v2524_v53  ;;  %v2550_v5 = vrot.slane %v2548_v12, 2 }
 0x120   : > { %15298 = vmatprep.mubr.msk.bf16.mxu1 %vm1198_vm2, %v2118_v1  ;;  %v2532_v1 = vrot.slane %v2530_v33, 2  ;;  %v227_v3 = vadd.s32 16, %v18502_v50  ;;  %v229_v12 = vadd.s32 32, %v18502_v50 }
 0x121   : > { %v2547_v60 = vrot.slane %v2545_v14, 1 }
 0x122   : > { %15463 = vmatmul.mubr.msk.bf16.gmra.mrb[32].mxu0 %vm1198_vm2, %v3779_v24  ;;  %v4073_v24 = vsel %vm22725_vm7, %v4070_v43, %v4072_v62  ;;  %v2533_v52 = vor.u32 %v2532_v1, %v2529_v9  ;;  %v4084_v43 = vrot.slane %v18128_v30, 3  ;;  %v4088_v30 = vrot.slane %v18146_v11, 3 }
 0x123   : > { %15468 = vmatprep.mubr.msk.bf16.mxu0 %vm1198_vm2, %v4059_v56  ;;  %v4075_v56 = vsel %vm22725_vm7, %v4072_v62, %v4074_v48  ;;  %v2551_v40 = vor.u32 %v2550_v5, %v2547_v60  ;;  %v22732_v11 = vmov 0   ;;  %v228_v62 = vadd.s32 24, %v18502_v50  ;;  %v17278_v5 = vld [vmem:[%s22721_s2 + $0x18] sm:$0xff]  }
 0x124   : > { %v2534_v55 = vsel %vm22728_vm3, %v2524_v53, %v2533_v52  ;;  %v4089_v35 = vsel %vm22725_vm7, %v4086_v36, %v4088_v30  ;;  %v4091_v33 = vsel %vm22725_vm7, %v4088_v30, %v4090_v26  ;;  %876 = vst.msk [vmem:[#allocation2 + $0x8] sm:$0xf] %vm22731_vm8, %v22732_v11  ;;  %874 = vst.msk [vmem:[#allocation2] sm:$0xf] %vm22731_vm8, %v22732_v11  ;;  %v226_v53 = vadd.s32 8, %v18502_v50 }
 0x125   : > { %875 = vst.msk [vmem:[#allocation2 + $0x4] sm:$0xf] %vm22731_vm8, %v22732_v11  ;;  %877 = vst.msk [vmem:[#allocation2 + $0xc] sm:$0xf] %vm22731_vm8, %v22732_v11 }
 0x126   : > { %878 = vst.msk [vmem:[#allocation2 + $0x10] sm:$0xf] %vm22731_vm8, %v22732_v11  ;;  %879 = vst.msk [vmem:[#allocation2 + $0x14] sm:$0xf] %vm22731_vm8, %v22732_v11 }
 0x127   : > { %15299 = vmatmul.mubr.msk.bf16.gmra.mrb[20].mxu1 %vm1198_vm2, %v2120_v58  ;;  %v2538_v58 = vrot.slane %v2536_v15, 1  ;;  %880 = vst.msk [vmem:[#allocation2 + $0x18] sm:$0xf] %vm22731_vm8, %v22732_v11  ;;  %881 = vst.msk [vmem:[#allocation2 + $0x1c] sm:$0xf] %vm22731_vm8, %v22732_v11 }
 0x128   : > { %15302 = vmatprep.mubr.msk.bf16.mxu1 %vm1198_vm2, %v2122_v16  ;;  %v4076_v16 = vrot.slane %v18086_v42, 3  ;;  %v2563_v42 = vshrl.u32 %v17971_v7, 16  ;;  %882 = vst.msk [vmem:[#allocation2 + $0x20] sm:$0xf] %vm22731_vm8, %v22732_v11  ;;  %883 = vst.msk [vmem:[#allocation2 + $0x24] sm:$0xf] %vm22731_vm8, %v22732_v11 }
 0x129   : > { %v2542_v57 = vor.u32 %v2541_v13, %v2538_v58  ;;  %884 = vst.msk [vmem:[#allocation2 + $0x28] sm:$0xf] %vm22731_vm8, %v22732_v11  ;;  %885 = vst.msk [vmem:[#allocation2 + $0x2c] sm:$0xf] %vm22731_vm8, %v22732_v11  ;;  %v18514_v15 = vmul.u32.u64.low 3817748708, %v228_v62  ;;  %v18515_v54 = vmul.u32.u64.high 3817748708, %v228_v62, %v18514_v15 }
 0x12a   : > { %15469 = vmatmul.mubr.msk.bf16.vlgmr.msra.gmra.mrb[0].mxu0 %vm1198_vm2, %v4061_v25  ;;  %v4078_v25 = vrot.slane %v18091_v45, 3  ;;  %v2565_v44 = vrot.slane %v2563_v42, 1  ;;  %886 = vst.msk [vmem:[#allocation2 + $0x30] sm:$0xf] %vm22731_vm8, %v22732_v11  ;;  %887 = vst.msk [vmem:[#allocation2 + $0x34] sm:$0xf] %vm22731_vm8, %v22732_v11 }
 0x12b   : > { %15472 = vmatprep.mubr.msk.bf16.mxu0 %vm1198_vm2, %v4063_v31  ;;  %v2557_v31 = vshll.u32 %v17966_v4, 16  ;;  %v2543_v45 = vsel %vm22728_vm3, %v2533_v52, %v2542_v57  ;;  %v2552_v4 = vsel %vm22728_vm3, %v2542_v57, %v2551_v40  ;;  %888 = vst.msk [vmem:[#allocation2 + $0x38] sm:$0xf] %vm22731_vm8, %v22732_v11  ;;  %889 = vst.msk [vmem:[#allocation2 + $0x3c] sm:$0xf] %vm22731_vm8, %v22732_v11  ;;  %v300_v60 = vshrl.u32 %v18515_v54, 4 }
 0x12c   : > { %v4079_v6 = vsel %vm22725_vm7, %v4076_v16, %v4078_v25  ;;  %v4081_v2 = vsel %vm22725_vm7, %v4078_v25, %v4080_v41  ;;  %890 = vst.msk [vmem:[#allocation2 + $0x40] sm:$0xf] %vm22731_vm8, %v22732_v11  ;;  %891 = vst.msk [vmem:[#allocation2 + $0x44] sm:$0xf] %vm22731_vm8, %v22732_v11  ;;  %v18518_v52 = vmul.u32.u64.low 3817748708, %v226_v53  ;;  %v18519_v14 = vmul.u32.u64.high 3817748708, %v226_v53, %v18518_v52 }
 0x12d   : > { %892 = vst.msk [vmem:[#allocation2 + $0x48] sm:$0xf] %vm22731_vm8, %v22732_v11  ;;  %893 = vst.msk [vmem:[#allocation2 + $0x4c] sm:$0xf] %vm22731_vm8, %v22732_v11  ;;  %v18542_v42 = vadd.s32 80, %v18502_v50 }
 0x12e   : > { %894 = vst.msk [vmem:[#allocation2 + $0x50] sm:$0xf] %vm22731_vm8, %v22732_v11  ;;  %895 = vst.msk [vmem:[#allocation2 + $0x54] sm:$0xf] %vm22731_vm8, %v22732_v11  ;;  %v278_v17 = vshrl.u32 %v18519_v14, 4 }
 0x12f   : > { %15303 = vmatmul.mubr.msk.bf16.gmra.mrb[24].mxu1 %vm1198_vm2, %v2124_v37  ;;  %v4077_v37 = vsel %vm22725_vm7, %v4074_v48, %v4076_v16  ;;  %896 = vst.msk [vmem:[#allocation2 + $0x58] sm:$0xf] %vm22731_vm8, %v22732_v11  ;;  %897 = vst.msk [vmem:[#allocation2 + $0x5c] sm:$0xf] %vm22731_vm8, %v22732_v11  ;;  %v18510_v1 = vmul.u32.u64.low 3817748708, %v18502_v50  ;;  %v18511_v48 = vmul.u32.u64.high 3817748708, %v18502_v50, %v18510_v1 }
 0x130   : > { %15306 = vmatprep.mubr.msk.bf16.mxu1 %vm1198_vm2, %v2126_v59  ;;  %v2566_v59 = vshll.u32 %v17971_v7, 16  ;;  %898 = vst.msk [vmem:[#allocation2 + $0x60] sm:$0xf] %vm22731_vm8, %v22732_v11  ;;  %899 = vst.msk [vmem:[#allocation2 + $0x64] sm:$0xf] %vm22731_vm8, %v22732_v11  ;;  %v23050_v1 = vmov 0 }
 0x131   : > { %900 = vst.msk [vmem:[#allocation2 + $0x68] sm:$0xf] %vm22731_vm8, %v22732_v11  ;;  %901 = vst.msk [vmem:[#allocation2 + $0x6c] sm:$0xf] %vm22731_vm8, %v22732_v11 }
 0x132   : > { %15473 = vmatmul.mubr.msk.bf16.gmra.mrb[4].mxu0 %vm1198_vm2, %v4065_v23  ;;  %v2559_v23 = vrot.slane %v2557_v31, 2  ;;  %v2568_v32 = vrot.slane %v2566_v59, 2  ;;  %902 = vst.msk [vmem:[#allocation2 + $0x70] sm:$0xf] %vm22731_vm8, %v22732_v11  ;;  %903 = vst.msk [vmem:[#allocation2 + $0x74] sm:$0xf] %vm22731_vm8, %v22732_v11 }
 0x133   : > { %15476 = vmatprep.mubr.msk.bf16.mxu0 %vm1198_vm2, %v4067_v22  ;;  %v4082_v22 = vrot.slane %v18115_v8, 3  ;;  %v2577_v8 = vrot.slane %v2575_v38, 2  ;;  %904 = vst.msk [vmem:[#allocation2 + $0x78] sm:$0xf] %vm22731_vm8, %v22732_v11  ;;  %905 = vst.msk [vmem:[#allocation2 + $0x7c] sm:$0xf] %vm22731_vm8, %v22732_v11 }
 0x134   : > { %v2560_v7 = vor.u32 %v2559_v23, %v2556_v18  ;;  %906 = vst.msk [vmem:[#allocation2 + $0x80] sm:$0xf] %vm22731_vm8, %v22732_v11  ;;  %907 = vst.msk [vmem:[#allocation2 + $0x84] sm:$0xf] %vm22731_vm8, %v22732_v11  ;;  %v18536_v31 = vadd.s32 56, %v18502_v50  ;;  %v279_v18 = vmul.u32 18, %v278_v17 }
 0x135   : > { %v4083_v63 = vsel %vm22725_vm7, %v4080_v41, %v4082_v22  ;;  %v4085_v39 = vsel %vm22725_vm7, %v4082_v22, %v4084_v43  ;;  %908 = vst.msk [vmem:[#allocation2 + $0x88] sm:$0xf] %vm22731_vm8, %v22732_v11  ;;  %909 = vst.msk [vmem:[#allocation2 + $0x8c] sm:$0xf] %vm22731_vm8, %v22732_v11 }
 0x136   : > { %v2561_v29 = vsel %vm22728_vm3, %v2551_v40, %v2560_v7  ;;  %910 = vst.msk [vmem:[#allocation2 + $0x90] sm:$0xf] %vm22731_vm8, %v22732_v11  ;;  %911 = vst.msk [vmem:[#allocation2 + $0x94] sm:$0xf] %vm22731_vm8, %v22732_v11  ;;  %v301_v40 = vmul.u32 18, %v300_v60 }
 0x137   : > { %15307 = vmatmul.mubr.msk.bf16.gmra.mrb[28].mxu1 %vm1198_vm2, %v2128_v46  ;;  %v2572_v46 = vshrl.u32 %v17983_v49, 16  ;;  %912 = vst.msk [vmem:[#allocation2 + $0x98] sm:$0xf] %vm22731_vm8, %v22732_v11  ;;  %913 = vst.msk [vmem:[#allocation2 + $0x9c] sm:$0xf] %vm22731_vm8, %v22732_v11 }
 0x138   : > { %15310 = vmatprep.mubr.msk.bf16.mxu1 %vm1198_vm2, %v2130_v21  ;;  %v2569_v21 = vor.u32 %v2568_v32, %v2565_v44  ;;  %v18551_v23 = vmul.u32.u64.low 3817748708, %v18536_v31  ;;  %v18552_v41 = vmul.u32.u64.high 3817748708, %v18536_v31, %v18551_v23  ;;  %v5072_v11 = vld [vmem:[#allocation2 + $0x4] sm:$0xf] }
 0x139   : > { %v2574_v20 = vrot.slane %v2572_v46, 1  ;;  %v18565_v46 = vsub.s32 %v228_v62, %v301_v40  ;;  %v22903_v40 = vmov 0  ;;  %v22951_v23 = vmov 0 }
 0x13a   : > { %15477 = vmatmul.mubr.msk.bf16.gmra.mrb[8].mxu0 %vm1198_vm2, %v4069_v61  ;;  %v2570_v47 = vsel %vm22728_vm3, %v2560_v7, %v2569_v21  ;;  %v4087_v61 = vsel %vm22725_vm7, %v4084_v43, %v4086_v36  ;;  %v18563_v7 = vadd.s32 88, %v18502_v50  ;;  %v18584_v43 = vsub.s32 %v226_v53, %v279_v18 }
 0x13b   : > { %15480 = vmatprep.mubr.msk.bf16.mxu0 %vm1198_vm2, %v4071_v19  ;;  %v2578_v49 = vor.u32 %v2577_v8, %v2574_v20  ;;  %v4092_v19 = vrot.slane %v18286_v0, 3  ;;  %v17277_v0 = vld [vmem:[%s22721_s2 + $0x10] sm:$0xff]   ;;  %vm660_vm13 = vcmp.ne.s32.totalorder %v18565_v46, 0  ;;  %vm696_vm14 = vcmp.lt.s32.totalorder %v18565_v46, 0 }
 0x13c   : > { %15504 = vmatprep.subr.bf16.mxu1 %v17277_v0  ;;  %vm658_vm15 = vcmp.ne.s32.totalorder %v18584_v43, 0  ;;  %vm694_vm0 = vcmp.lt.s32.totalorder %v18584_v43, 0 }
 0x13d   : > { %v2579_v34 = vsel %vm22728_vm3, %v2569_v21, %v2578_v49  ;;  %v18587_v36 = vmul.u32.u64.low 3817748708, %v18563_v7  ;;  %v18588_v49 = vmul.u32.u64.high 3817748708, %v18563_v7, %v18587_v36 }
 0x13f   : > { %15311 = vmatmul.mubr.msk.bf16.gmra.mrb[32].mxu1 %vm1198_vm2, %v2132_v10  ;;  %v4093_v10 = vsel %vm22725_vm7, %v4090_v26, %v4092_v19  ;;  %v344_v19 = vshrl.u32 %v18552_v41, 4 }
 0x140   : > { %15336 = vmatprep.mubr.msk.bf16.mxu1 %vm1198_vm2, %v2516_v28  ;;  %v18506_v28 = vmul.u32.u64.low 3817748708, %v227_v3  ;;  %v18507_v9 = vmul.u32.u64.high 3817748708, %v227_v3, %v18506_v28 }
 0x141   : > { %v345_v54 = vmul.u32 18, %v344_v19 }
 0x142   : > { %15481 = vmatmul.mubr.msk.bf16.gmra.mrb[12].mxu0 %vm1198_vm2, %v4073_v24  ;;  %v231_v24 = vadd.s32 48, %v18502_v50 }
 0x143   : > { %15484 = vmatprep.mubr.msk.bf16.mxu0 %vm1198_vm2, %v4075_v56  ;;  %v289_v56 = vshrl.u32 %v18507_v9, 4 }
 0x144   : > { %v18524_v58 = vmul.u32.u64.low 3817748708, %v231_v24  ;;  %v18525_v13 = vmul.u32.u64.high 3817748708, %v231_v24, %v18524_v58 }
 0x145   : > { %v290_v25 = vmul.u32 18, %v289_v56 }
 0x147   : > { %15337 = vmatmul.mubr.msk.bf16.vlgmr.msra.gmra.mrb[20].mxu1 %vm1198_vm2, %v2525_v27  ;;  %v267_v27 = vshrl.u32 %v18511_v48, 4  ;;  %v18544_v59 = vsub.s32 %v227_v3, %v290_v25  ;;  %v18621_v3 = vadd.s32 18, %v18584_v43 }
 0x148   : > { %15340 = vmatprep.mubr.msk.bf16.mxu1 %vm1198_vm2, %v2534_v55  ;;  %15505 = vmatpush3.bf16.msra.mxu1 %v17277_v0  ;;  %v18527_v16 = vmul.u32.u64.low 3817748708, %v229_v12  ;;  %v18528_v55 = vmul.u32.u64.high 3817748708, %v229_v12, %v18527_v16 }
 0x149   : > { %v268_v57 = vmul.u32 18, %v267_v27  ;;  %15506 = vmatprep.subr.bf16.mxu1 %v17278_v5  ;;  %vm659_vm9 = vcmp.ne.s32.totalorder %v18544_v59, 0  ;;  %vm695_vm10 = vcmp.lt.s32.totalorder %v18544_v59, 0  ;;  %v388_v27 = vshrl.u32 %v18588_v49, 4 }
 0x14a   : > { %15485 = vmatmul.mubr.msk.bf16.gmra.mrb[16].mxu0 %vm1198_vm2, %v4077_v37  ;;  %v18539_v37 = vadd.s32 40, %v18502_v50  ;;  %v311_v44 = vshrl.u32 %v18528_v55, 4  ;;  %v18675_v16 = vadd.s32 104, %v18502_v50 }
 0x14b   : > { %15488 = vmatprep.mubr.msk.bf16.mxu0 %vm1198_vm2, %v4079_v6  ;;  %v18547_v6 = vsub.s32 %v18502_v50, %v268_v57 }
 0x14c   : > { %15507 = vmatpush3.bf16.msra.mxu1 %v17278_v5  ;;  %v18559_v32 = vmul.u32.u64.low 3817748708, %v18539_v37  ;;  %v18560_v22 = vmul.u32.u64.high 3817748708, %v18539_v37, %v18559_v32 }
 0x14d   : > { %vm657_vm11 = vcmp.ne.s32.totalorder %v18547_v6, 0  ;;  %vm693_vm12 = vcmp.lt.s32.totalorder %v18547_v6, 0  ;;  %v389_v32 = vmul.u32 18, %v388_v27 }
 0x14e   : > { %v322_v0 = vshrl.u32 %v18560_v22, 4  ;;  %vm18646_vm4 = vmand %vm693_vm12, %vm657_vm11 }
 0x14f   : > { %15341 = vmatmul.mubr.msk.bf16.gmra.mrb[24].mxu1 %vm1198_vm2, %v2543_v45  ;;  %v333_v45 = vshrl.u32 %v18525_v13, 4  ;;  %vm18670_vm12 = vmand %vm694_vm0, %vm658_vm15  ;;  %v18749_v49 = vsub.s32 %v18563_v7, %v389_v32  ;;  %v22930_v32 = vmov 0 }
 0x150   : > { %15344 = vmatprep.mubr.msk.bf16.mxu1 %vm1198_vm2, %v2552_v4  ;;  %v18555_v4 = vadd.s32 64, %v18502_v50  ;;  %v323_v56 = vmul.u32 18, %v322_v0 }
 0x151   : > { %v334_v21 = vmul.u32 18, %v333_v45  ;;  %v18707_v45 = vsub.s32 %v18536_v31, %v345_v54  ;;  %22911 = vst [vmem:[#allocation15_spill] sm:$0xff] %v18749_v49  ;;  %vm704_vm5 = vcmp.lt.s32.totalorder %v18749_v49, 0  ;;  %v18790_v54 = vadd.s32 18, %v18749_v49 }
 0x152   : > { %15489 = vmatmul.mubr.msk.bf16.gmra.mrb[20].mxu0 %vm1198_vm2, %v4081_v2  ;;  %v18568_v38 = vmul.u32.u64.low 3817748708, %v18542_v42  ;;  %v18569_v2 = vmul.u32.u64.high 3817748708, %v18542_v42, %v18568_v38  ;;  %v18581_v20 = vmul.u32.u64.low 3817748708, %v18555_v4  ;;  %v18582_v8 = vmul.u32.u64.high 3817748708, %v18555_v4, %v18581_v20 }
 0x153   : > { %15492 = vmatprep.mubr.msk.bf16.mxu0 %vm1198_vm2, %v4083_v63  ;;  %v18574_v63 = vadd.s32 72, %v18502_v50  ;;  %22906 = vst [vmem:[#allocation10_spill] sm:$0xff] %v18707_v45  ;;  %v18744_v36 = vadd.s32 18, %v18707_v45  ;;  %22919 = vst [vmem:[#allocation21_spill] sm:$0xff] %v18790_v54 }
 0x154   : > { %v377_v62 = vshrl.u32 %v18569_v2, 4  ;;  %v18725_v38 = vmul.u32.u64.low 3817748708, %v18675_v16  ;;  %v18726_v2 = vmul.u32.u64.high 3817748708, %v18675_v16, %v18725_v38 }
 0x155   : > { %v18601_v30 = vmul.u32.u64.low 3817748708, %v18574_v63  ;;  %v18602_v26 = vmul.u32.u64.high 3817748708, %v18574_v63, %v18601_v30  ;;  %22910 = vst [vmem:[#allocation14_spill] sm:$0xff] %v18744_v36 }
 0x156   : > { %v378_v13 = vmul.u32 18, %v377_v62  ;;  %v18763_v62 = vadd.s32 144, %v18502_v50 }
 0x157   : > { %15345 = vmatmul.mubr.msk.bf16.gmra.mrb[28].mxu1 %vm1198_vm2, %v2561_v29  ;;  %v18577_v29 = vadd.s32 18, %v18544_v59  ;;  %v366_v25 = vshrl.u32 %v18602_v26, 4 }
 0x158   : > { %15348 = vmatprep.mubr.msk.bf16.mxu1 %vm1198_vm2, %v2570_v47  ;;  %v312_v47 = vmul.u32 18, %v311_v44  ;;  %v18718_v44 = vsub.s32 %v18539_v37, %v323_v56  ;;  %v18721_v22 = vsub.s32 %v18542_v42, %v378_v13 }
 0x159   : > { %v367_v20 = vmul.u32 18, %v366_v25  ;;  %v18809_v27 = vmul.u32.u64.low 3817748708, %v18763_v62  ;;  %v18810_v13 = vmul.u32.u64.high 3817748708, %v18763_v62, %v18809_v27 }
 0x15a   : > { %15493 = vmatmul.mubr.msk.bf16.gmra.mrb[24].mxu0 %vm1198_vm2, %v4085_v39  ;;  %v18592_v39 = vadd.s32 18, %v18547_v6  ;;  %v18617_v51 = vsub.s32 %v229_v12, %v312_v47  ;;  %22907 = vst [vmem:[#allocation11_spill] sm:$0xff] %v18718_v44  ;;  %22908 = vst [vmem:[#allocation12_spill] sm:$0xff] %v18721_v22  ;;  %vm662_vm15 = vcmp.ne.s32.totalorder %v18718_v44, 0  ;;  %vm698_vm0 = vcmp.lt.s32.totalorder %v18718_v44, 0 }
 0x15b   : > { %15496 = vmatprep.mubr.msk.bf16.mxu0 %vm1198_vm2, %v4087_v61  ;;  %v18596_v61 = vadd.s32 112, %v18502_v50  ;;  %v18752_v30 = vadd.s32 18, %v18718_v44  ;;  %v18757_v26 = vadd.s32 18, %v18721_v22  ;;  %v18760_v19 = vsub.s32 %v18574_v63, %v367_v20  ;;  %vm18800_vm1 = vmand %vm698_vm0, %vm662_vm15 }
 0x15c   : > { %22891 = vst [vmem:[#allocation7_spill] sm:$0xff] %v18617_v51  ;;  %vm697_vm11 = vcmp.lt.s32.totalorder %v18617_v51, 0  ;;  %v18689_v5 = vadd.s32 18, %v18617_v51  ;;  %v18775_v63 = vadd.s32 152, %v18502_v50  ;;  %v465_v54 = vshrl.u32 %v18810_v13, 4 }
 0x15d   : > { %v18625_v28 = vmul.u32.u64.low 3817748708, %v18596_v61  ;;  %v18626_v9 = vmul.u32.u64.high 3817748708, %v18596_v61, %v18625_v28  ;;  %22912 = vst [vmem:[#allocation16_spill] sm:$0xff] %v18752_v30  ;;  %22913 = vst [vmem:[#allocation17_spill] sm:$0xff] %v18757_v26  ;;  %vm702_vm15 = vcmp.lt.s32.totalorder %v18760_v19, 0  ;;  %v18959_v13 = vadd.s32 184, %v18502_v50 }
 0x15e   : > { %22902 = vst [vmem:[#allocation8_spill] sm:$0xff] %v18689_v5  ;;  %22914 = vst [vmem:[#allocation18_spill] sm:$0xff] %v18760_v19  ;;  %v18768_v28 = vadd.s32 128, %v18502_v50  ;;  %v23001_v5 = vmov 0 }
 0x15f   : > { %15349 = vmatmul.mubr.msk.bf16.gmra.mrb[32].mxu1 %vm1198_vm2, %v2579_v34  ;;  %v18598_v34 = vsub.s32 %v231_v24, %v334_v21  ;;  %v355_v24 = vshrl.u32 %v18582_v8, 4  ;;  %v421_v31 = vshrl.u32 %v18626_v9, 4 }
 0x161   : > { %vm663_vm7 = vcmp.ne.s32.totalorder %v18598_v34, 0  ;;  %vm699_vm6 = vcmp.lt.s32.totalorder %v18598_v34, 0  ;;  %v18686_v60 = vadd.s32 18, %v18598_v34  ;;  %v356_v18 = vmul.u32 18, %v355_v24 }
 0x162   : > { %15497 = vmatmul.mubr.msk.bf16.gmra.mrb[28].mxu0 %vm1198_vm2, %v4089_v35  ;;  %v18605_v35 = vadd.s32 96, %v18502_v50 }
 0x163   : > { %15500 = vmatprep.mubr.msk.bf16.mxu0 %vm1198_vm2, %v4091_v33  ;;  %v18609_v33 = vadd.s32 18, %v18565_v46  ;;  %v18740_v8 = vsub.s32 %v18555_v4, %v356_v18  ;;  %v422_v4 = vmul.u32 18, %v421_v31 }
 0x164   : > { %v18639_v48 = vmul.u32.u64.low 3817748708, %v18605_v35  ;;  %v18640_v53 = vmul.u32.u64.high 3817748708, %v18605_v35, %v18639_v48  ;;  %v18837_v31 = vmul.u32.u64.low 3817748708, %v18775_v63  ;;  %v18838_v38 = vmul.u32.u64.high 3817748708, %v18775_v63, %v18837_v31 }
 0x165   : > { %22909 = vst [vmem:[#allocation13_spill] sm:$0xff] %v18740_v8  ;;  %vm665_vm3 = vcmp.ne.s32.totalorder %v18740_v8, 0  ;;  %v18771_v9 = vadd.s32 18, %v18740_v8  ;;  %v18778_v48 = vadd.s32 136, %v18502_v50  ;;  %v18793_v24 = vsub.s32 %v18596_v61, %v422_v4 }
 0x166   : > { %v399_v42 = vshrl.u32 %v18640_v53, 4  ;;  %v22916_v53 = vmov 0  ;;  %v22925_v61 = vmov 0  ;;  %vm22929_vm0 = vcmp.lt.s32.totalorder %v18740_v8, 0 }
 0x167   : > { %22915 = vst [vmem:[#allocation19_spill] sm:$0xff] %v18771_v9  ;;  %22920 = vst [vmem:[#allocation22_spill] sm:$0xff] %v18793_v24  ;;  %v22934_v4 = vmov 0  ;;  %v22939_v31 = vmov 0  ;;  %v18903_v27 = vadd.s32 18, %v18793_v24 }
 0x168   : > { %v400_v0 = vmul.u32 18, %v399_v42  ;;  %v18847_v42 = vadd.s32 176, %v18502_v50 }
 0x169   : > { %22947 = vst [vmem:[#allocation32_spill] sm:$0xff] %v18903_v27 }
 0x16a   : > { %15501 = vmatmul.mubr.msk.bf16.gmra.mrb[32].mxu0 %vm1198_vm2, %v4093_v10  ;;  %v18613_v10 = vadd.s32 120, %v18502_v50  ;;  %vm18632_vm2 = vmand %vm695_vm10, %vm659_vm9  ;;  %vm661_vm10 = vcmp.ne.s32.totalorder %v18617_v51, 0  ;;  %v18806_v56 = vsub.s32 %v18605_v35, %v400_v0  ;;  %v18862_v0 = vadd.s32 18, %v18760_v19 }
 0x16b   : > { %vm18659_vm9 = vmand %vm696_vm14, %vm660_vm13  ;;  %vm700_vm14 = vcmp.lt.s32.totalorder %v18707_v45, 0  ;;  %v18825_v35 = vmul.u32.u64.low 3817748708, %v18768_v28  ;;  %v18826_v18 = vmul.u32.u64.high 3817748708, %v18768_v28, %v18825_v35 }
 0x16c   : > { %v18652_v52 = vmul.u32.u64.low 3817748708, %v18613_v10  ;;  %v18653_v14 = vmul.u32.u64.high 3817748708, %v18613_v10, %v18652_v52  ;;  %vm18681_vm13 = vmand %vm699_vm6, %vm663_vm7  ;;  %vm664_vm7 = vcmp.ne.s32.totalorder %v18707_v45, 0  ;;  %22924 = vst [vmem:[#allocation24_spill] sm:$0xff] %v18806_v56  ;;  %v22944_v35 = vmov 0 }
 0x16d   : > { %vm18702_vm6 = vmand %vm697_vm11, %vm661_vm10  ;;  %vm667_vm10 = vcmp.ne.s32.totalorder %v18721_v22, 0  ;;  %vm703_vm11 = vcmp.lt.s32.totalorder %v18721_v22, 0  ;;  %v410_v52 = vshrl.u32 %v18726_v2, 4  ;;  %22937 = vst [vmem:[#allocation29_spill] sm:$0xff] %v18862_v0  ;;  %v18906_v37 = vadd.s32 18, %v18806_v56 }
 0x16e   : > { %v22904_v40 = vsel %vm18702_vm6, 4294967295, %v22903_v40  ;;  %v432_v47 = vshrl.u32 %v18653_v14, 4  ;;  %vm18784_vm8 = vmand %vm700_vm14, %vm664_vm7  ;;  %v22921_v14 = vmov 0  ;;  %v476_v0 = vshrl.u32 %v18838_v38, 4 }
 0x16f   : > { %22905 = vst [vmem:[#allocation9_spill] sm:$0xff] %v22904_v40  ;;  %v22917_v53 = vsel %vm18784_vm8, 4294967295, %v22916_v53  ;;  %v22922_v14 = vsel %vm18800_vm1, 4294967295, %v22921_v14  ;;  %vm18816_vm14 = vmand %vm703_vm11, %vm667_vm10  ;;  %v411_v20 = vmul.u32 18, %v410_v52  ;;  %v18890_v52 = vadd.s32 160, %v18502_v50 }
 0x170   : > { %v433_v7 = vmul.u32 18, %v432_v47  ;;  %22918 = vst [vmem:[#allocation20_spill] sm:$0xff] %v22917_v53  ;;  %22923 = vst [vmem:[#allocation23_spill] sm:$0xff] %v22922_v14  ;;  %v22926_v61 = vsel %vm18816_vm14, 4294967295, %v22925_v61  ;;  %vm22942_vm10 = vcmp.ne.s32.totalorder %v18793_v24, 0  ;;  %vm22943_vm11 = vcmp.lt.s32.totalorder %v18793_v24, 0 }
 0x171   : > { %22927 = vst [vmem:[#allocation25_spill] sm:$0xff] %v22926_v61  ;;  %vm18832_vm7 = vmand %vm22929_vm0, %vm665_vm3  ;;  %vm22933_vm3 = vcmp.ne.s32.totalorder %v18749_v49, 0  ;;  %v18925_v17 = vsub.s32 %v18675_v16, %v411_v20  ;;  %v22957_v20 = vmov 0  ;;  %v18992_v24 = vadd.s32 192, %v18502_v50 }
 0x172   : > { %v18822_v25 = vsub.s32 %v18613_v10, %v433_v7  ;;  %v22931_v32 = vsel %vm18832_vm7, 4294967295, %v22930_v32  ;;  %v18841_v2 = vmul.u32.u64.low 3817748708, %v18778_v48  ;;  %v18842_v10 = vmul.u32.u64.high 3817748708, %v18778_v48, %v18841_v2  ;;  %vm18857_vm0 = vmand %vm704_vm5, %vm22933_vm3  ;;  %v17281_v7 = vld [vmem:[%s22721_s2] sm:$0xff]   ;;  %22948 = vst [vmem:[#allocation33_spill] sm:$0xff] %v18906_v37 }
 0x173   : > { %22932 = vst [vmem:[#allocation27_spill] sm:$0xff] %v22931_v32  ;;  %v22935_v4 = vsel %vm18857_vm0, 4294967295, %v22934_v4  ;;  %vm22938_vm5 = vcmp.ne.s32.totalorder %v18760_v19, 0  ;;  %v5071_v2 = vld [vmem:[#allocation2] sm:$0xf]  ;;  %vm18898_vm7 = vmand %vm22943_vm11, %vm22942_vm10  ;;  %15544 = vmatprep.subr.bf16.mxu1 %v17281_v7  ;;  %vm22949_vm10 = vcmp.ne.s32.totalorder %v18806_v56, 0 }
 0x174   : > { %22928 = vst [vmem:[#allocation26_spill] sm:$0xff] %v18822_v25  ;;  %22936 = vst [vmem:[#allocation28_spill] sm:$0xff] %v22935_v4  ;;  %v22945_v35 = vsel %vm18898_vm7, 4294967295, %v22944_v35  ;;  %vm22950_vm11 = vcmp.lt.s32.totalorder %v18806_v56, 0  ;;  %v18928_v7 = vmul.u32.u64.low 3817748708, %v18847_v42  ;;  %v18929_v57 = vmul.u32.u64.high 3817748708, %v18847_v42, %v18928_v7 }
 0x175   : > { %vm18885_vm3 = vmand %vm702_vm15, %vm22938_vm5  ;;  %22946 = vst [vmem:[#allocation31_spill] sm:$0xff] %v22945_v35  ;;  %vm672_vm15 = vcmp.ne.s32.totalorder %v18822_v25, 0  ;;  %vm708_vm5 = vcmp.lt.s32.totalorder %v18822_v25, 0  ;;  %v18938_v49 = vadd.s32 18, %v18822_v25  ;;  %v18941_v4 = vcombine.low %v5071_v2, %v5072_v11 }
 0x176   : > { %v22940_v31 = vsel %vm18885_vm3, 4294967295, %v22939_v31  ;;  %vm18920_vm14 = vmand %vm22950_vm11, %vm22949_vm10  ;;  %22954 = vst [vmem:[#allocation35_spill] sm:$0xff] %v18925_v17  ;;  %v443_v7 = vshrl.u32 %v18826_v18, 4  ;;  %v18955_v41 = vmul.u32.u64.low 3817748708, %v18890_v52  ;;  %v18956_v19 = vmul.u32.u64.high 3817748708, %v18890_v52, %v18955_v41 }
 0x177   : > { %22941 = vst [vmem:[#allocation30_spill] sm:$0xff] %v22940_v31  ;;  %v22952_v23 = vsel %vm18920_vm14, 4294967295, %v22951_v23  ;;  %22955 = vst [vmem:[#allocation36_spill] sm:$0xff] %v18938_v49  ;;  %v454_v18 = vshrl.u32 %v18842_v10, 4  ;;  %v18974_v41 = vadd.s32 18, %v18925_v17  ;;  %v18977_v31 = vadd.s32 168, %v18502_v50 }
 0x178   : > { %22953 = vst [vmem:[#allocation34_spill] sm:$0xff] %v22952_v23  ;;  %22956 = vst [vmem:[#allocation37_spill] sm:$0xff] %v18941_v4  ;;  %v466_v2 = vmul.u32 18, %v465_v54  ;;  %v5213_v38 = vshll.u32 %v18941_v4, 16  ;;  %v18985_v10 = vadd.s32 208, %v18502_v50  ;;  %v444_v56 = vmul.u32 18, %v443_v7 }
 0x179   : > { %vm18949_vm10 = vmand %vm708_vm5, %vm672_vm15  ;;  %vm670_vm15 = vcmp.ne.s32.totalorder %v18925_v17, 0  ;;  %vm706_vm5 = vcmp.lt.s32.totalorder %v18925_v17, 0  ;;  %22960 = vst [vmem:[#allocation39_spill] sm:$0xff] %v18974_v41  ;;  %v18988_v37 = vmul.u32.u64.low 3817748708, %v18959_v13  ;;  %v18989_v23 = vmul.u32.u64.high 3817748708, %v18959_v13, %v18988_v37 }
 0x17a   : > { %v22958_v20 = vsel %vm18949_vm10, 4294967295, %v22957_v20  ;;  %v477_v35 = vmul.u32 18, %v476_v0  ;;  %v455_v9 = vmul.u32 18, %v454_v18  ;;  %v5211_v11 = vshrl.u32 %v18941_v4, 16  ;;  %vm19006_vm11 = vmand %vm706_vm5, %vm670_vm15 }
 0x17b   : > { %22959 = vst [vmem:[#allocation38_spill] sm:$0xff] %v22958_v20  ;;  %v18998_v54 = vadd.s32 216, %v18502_v50  ;;  %v22961_v37 = vmov 0  ;;  %v509_v7 = vshrl.u32 %v18929_v57, 4  ;;  %v19016_v4 = vadd.s32 200, %v18502_v50 }
 0x17c   : > { %v22962_v37 = vsel %vm19006_vm11, 4294967295, %v22961_v37  ;;  %v19012_v0 = vmul.u32.u64.low 3817748708, %v18977_v31  ;;  %v19013_v18 = vmul.u32.u64.high 3817748708, %v18977_v31, %v19012_v0  ;;  %v19021_v20 = vsub.s32 %v18763_v62, %v466_v2 }
 0x17d   : > { %22963 = vst [vmem:[#allocation40_spill] sm:$0xff] %v22962_v37  ;;  %v5215_v32 = vrot.slane %v5213_v38, 1  ;;  %v19024_v22 = vmul.u32.u64.low 3817748708, %v18985_v10  ;;  %v19025_v26 = vmul.u32.u64.high 3817748708, %v18985_v10, %v19024_v22  ;;  %v19030_v57 = vsub.s32 %v18768_v28, %v444_v56 }
 0x17e   : > { %22964 = vst [vmem:[#allocation41_spill] sm:$0xff] %v19021_v20  ;;  %v487_v0 = vshrl.u32 %v18956_v19, 4  ;;  %v19034_v44 = vmul.u32.u64.low 3817748708, %v18992_v24  ;;  %v19035_v30 = vmul.u32.u64.high 3817748708, %v18992_v24, %v19034_v44  ;;  %v19042_v2 = vsub.s32 %v18775_v63, %v477_v35 }
 0x17f   : > { %22966 = vst [vmem:[#allocation43_spill] sm:$0xff] %v19030_v57  ;;  %v19045_v22 = vmul.u32.u64.low 3817748708, %v18998_v54  ;;  %v19046_v38 = vmul.u32.u64.high 3817748708, %v18998_v54, %v19045_v22  ;;  %v19049_v28 = vsub.s32 %v18778_v48, %v455_v9  ;;  %v510_v19 = vmul.u32 18, %v509_v7 }
 0x180   : > { %22967 = vst [vmem:[#allocation44_spill] sm:$0xff] %v19042_v2  ;;  %v19058_v44 = vadd.s32 18, %v19021_v20  ;;  %v19060_v63 = vor.u32 %v5215_v32, %v5211_v11  ;;  %v488_v9 = vmul.u32 18, %v487_v0  ;;  %v520_v48 = vshrl.u32 %v18989_v23, 4 }
 0x181   : > { %22968 = vst [vmem:[#allocation45_spill] sm:$0xff] %v19049_v28  ;;  %v19068_v7 = vadd.s32 18, %v19030_v57  ;;  %v19073_v22 = vadd.s32 18, %v19042_v2  ;;  %v19079_v11 = vsub.s32 %v18847_v42, %v510_v19  ;;  %v498_v23 = vshrl.u32 %v19013_v18, 4 }
 0x182   : > { %22969 = vst [vmem:[#allocation46_spill] sm:$0xff] %v19058_v44  ;;  %22970 = vst [vmem:[#allocation47_spill] sm:$0xff] %v19060_v63  ;;  %v19083_v0 = vadd.s32 240, %v18502_v50  ;;  %v19089_v62 = vadd.s32 18, %v19049_v28  ;;  %v553_v63 = vshrl.u32 %v19025_v26, 4  ;;  %v19093_v17 = vadd.s32 224, %v18502_v50 }
 0x183   : > { %22972 = vst [vmem:[#allocation49_spill] sm:$0xff] %v19068_v7  ;;  %22973 = vst [vmem:[#allocation50_spill] sm:$0xff] %v19073_v22  ;;  %v19098_v42 = vsub.s32 %v18890_v52, %v488_v9  ;;  %v521_v18 = vmul.u32 18, %v520_v48  ;;  %v531_v19 = vshrl.u32 %v19035_v30, 4  ;;  %v19102_v37 = vadd.s32 248, %v18502_v50 }
 0x184   : > { %22975 = vst [vmem:[#allocation52_spill] sm:$0xff] %v19079_v11  ;;  %22977 = vst [vmem:[#allocation54_spill] sm:$0xff] %v19089_v62  ;;  %vm22979_vm15 = vcmp.ne.s32.totalorder %v19021_v20, 0  ;;  %vm22980_vm11 = vcmp.lt.s32.totalorder %v19021_v20, 0  ;;  %v22981_v26 = vmov 0  ;;  %v19118_v9 = vadd.s32 232, %v18502_v50 }
 0x185   : > { %vm19108_vm5 = vmand %vm22980_vm11, %vm22979_vm15  ;;  %vm22984_vm10 = vcmp.ne.s32.totalorder %v19030_v57, 0  ;;  %vm22985_vm14 = vcmp.lt.s32.totalorder %v19030_v57, 0  ;;  %v22986_v30 = vmov 0  ;;  %vm679_vm11 = vcmp.ne.s32.totalorder %v19079_v11, 0 }
 0x186   : > { %v22982_v26 = vsel %vm19108_vm5, 4294967295, %v22981_v26  ;;  %vm19124_vm7 = vmand %vm22985_vm14, %vm22984_vm10  ;;  %vm715_vm15 = vcmp.lt.s32.totalorder %v19079_v11, 0  ;;  %vm22989_vm3 = vcmp.ne.s32.totalorder %v19042_v2, 0  ;;  %vm22990_vm0 = vcmp.lt.s32.totalorder %v19042_v2, 0 }
 0x187   : > { %22983 = vst [vmem:[#allocation56_spill] sm:$0xff] %v22982_v26  ;;  %v22987_v30 = vsel %vm19124_vm7, 4294967295, %v22986_v30  ;;  %vm19135_vm1 = vmand %vm22990_vm0, %vm22989_vm3  ;;  %v19143_v14 = vmul.u32.u64.low 3817748708, %v19093_v17  ;;  %v19144_v45 = vmul.u32.u64.high 3817748708, %v19093_v17, %v19143_v14  ;;  %vm22995_vm14 = vcmp.ne.s32.totalorder %v19049_v28, 0 }
 0x188   : > { %22988 = vst [vmem:[#allocation57_spill] sm:$0xff] %v22987_v30  ;;  %vm22996_vm10 = vcmp.lt.s32.totalorder %v19049_v28, 0  ;;  %v532_v36 = vmul.u32 18, %v531_v19  ;;  %v19158_v53 = vmul.u32.u64.low 3817748708, %v19102_v37  ;;  %v19159_v51 = vmul.u32.u64.high 3817748708, %v19102_v37, %v19158_v53  ;;  %vm19167_vm0 = vmand %vm715_vm15, %vm679_vm11 }
 0x189   : > { %vm19150_vm8 = vmand %vm22996_vm10, %vm22995_vm14  ;;  %v23002_v5 = vsel %vm19167_vm0, 4294967295, %v23001_v5  ;;  %vm677_vm3 = vcmp.ne.s32.totalorder %v19098_v42, 0  ;;  %vm23008_vm10 = vcmp.lt.s32.totalorder %v19098_v42, 0  ;;  %v23024_v28 = vmov 0 }
 0x18a   : > { %23003 = vst [vmem:[#allocation62_spill] sm:$0xff] %v23002_v5  ;;  %vm19238_vm11 = vmand %vm23008_vm10, %vm677_vm3  ;;  %v257_v2 = vadd.s32 256, %v18502_v50  ;;  %v260_v22 = vadd.s32 280, %v18502_v50 }
 0x1d2   : > { %v18892_v47 = vpop.f32.mrb[0].mxu1 }
 0x1d3   : > { %v18910_v21 = vpop.f32.mrb[1].mxu1 }
 0x1d4   : > { %v18931_v8 = vpop.f32.mrb[2].mxu1 }
 0x1d5   : > { %v18943_v16 = vpop.f32.mrb[3].mxu1 }
 0x1da   : > { %v18994_v27 = vpop.f32.mrb[4].mxu1 }
 0x1db   : > { %v19000_v25 = vpop.f32.mrb[5].mxu1 }
 0x1dc   : > { %v19018_v49 = vpop.f32.mrb[6].mxu1 }
 0x1dd   : > { %v19027_v61 = vpop.f32.mrb[7].mxu1 }
 0x1de   : > { %22965 = vst [vmem:[#allocation42_spill] sm:$0xff] %v19027_v61  ;;  %v19052_v56 = vmul.u32.u64.low 3817748708, %v19016_v4  ;;  %v19053_v61 = vmul.u32.u64.high 3817748708, %v19016_v4, %v19052_v56 }
 0x1e0   : > { %v542_v48 = vshrl.u32 %v19053_v61, 4  ;;  %v22997_v61 = vmov 0 }
 0x1e1   : > { %v22998_v61 = vsel %vm19150_vm8, 4294967295, %v22997_v61 }
 0x1e2   : > { %v19065_v35 = vpop.f32.mrb[8].mxu1  ;;  %22999 = vst [vmem:[#allocation60_spill] sm:$0xff] %v22998_v61 }
 0x1e3   : > { %22971 = vst [vmem:[#allocation48_spill] sm:$0xff] %v19065_v35  ;;  %v19075_v32 = vpop.f32.mrb[9].mxu1  ;;  %v554_v35 = vmul.u32 18, %v553_v63 }
 0x1e4   : > { %22974 = vst [vmem:[#allocation51_spill] sm:$0xff] %v19075_v32  ;;  %v19085_v56 = vpop.f32.mrb[10].mxu1  ;;  %v19140_v32 = vadd.s32 18, %v19079_v11 }
 0x1e5   : > { %22976 = vst [vmem:[#allocation53_spill] sm:$0xff] %v19085_v56  ;;  %v19095_v41 = vpop.f32.mrb[11].mxu1  ;;  %v564_v56 = vshrl.u32 %v19046_v38, 4  ;;  %v499_v38 = vmul.u32 18, %v498_v23  ;;  %v19155_v23 = vsub.s32 %v18959_v13, %v521_v18  ;;  %v19197_v53 = vsub.s32 %v18985_v10, %v554_v35 }
 0x1e6   : > { %22978 = vst [vmem:[#allocation55_spill] sm:$0xff] %v19095_v41  ;;  %v19114_v41 = vmul.u32.u64.low 3817748708, %v19083_v0  ;;  %v19115_v52 = vmul.u32.u64.high 3817748708, %v19083_v0, %v19114_v41  ;;  %22994 = vst [vmem:[#allocation59_spill] sm:$0xff] %v19140_v32  ;;  %v19172_v13 = vmul.u32.u64.low 3817748708, %v19118_v9  ;;  %v19173_v18 = vmul.u32.u64.high 3817748708, %v19118_v9, %v19172_v13 }
 0x1e7   : > { %v22991_v41 = vmov 0  ;;  %v565_v40 = vmul.u32 18, %v564_v56  ;;  %v19186_v20 = vsub.s32 %v18977_v31, %v499_v38  ;;  %v543_v56 = vmul.u32 18, %v542_v48 }
 0x1e8   : > { %v22992_v41 = vsel %vm19135_vm1, 4294967295, %v22991_v41  ;;  %v19206_v38 = vadd.s32 18, %v19098_v42  ;;  %v19210_v48 = vsub.s32 %v18992_v24, %v532_v36  ;;  %v19214_v10 = vadd.s32 18, %v19155_v23 }
 0x1e9   : > { %22993 = vst [vmem:[#allocation58_spill] sm:$0xff] %v22992_v41  ;;  %v19217_v35 = vsub.s32 %v18998_v54, %v565_v40  ;;  %v597_v13 = vshrl.u32 %v19115_v52, 4  ;;  %v19223_v31 = vadd.s32 18, %v19186_v20  ;;  %v19226_v36 = vsub.s32 %v19016_v4, %v543_v56 }
 0x1ea   : > { %v19161_v63 = vpop.f32.mrb[12].mxu1  ;;  %v19231_v24 = vadd.s32 18, %v19197_v53  ;;  %v575_v40 = vshrl.u32 %v19144_v45, 4  ;;  %v23009_v54 = vmov 0  ;;  %v19245_v4 = vadd.s32 18, %v19210_v48 }
 0x1eb   : > { %23000 = vst [vmem:[#allocation61_spill] sm:$0xff] %v19161_v63  ;;  %v19175_v19 = vpop.f32.mrb[13].mxu1  ;;  %23007 = vst [vmem:[#allocation66_spill] sm:$0xff] %v19226_v36  ;;  %v23010_v54 = vsel %vm19238_vm11, 4294967295, %v23009_v54  ;;  %v608_v52 = vshrl.u32 %v19159_v51, 4  ;;  %vm23012_vm15 = vcmp.ne.s32.totalorder %v19155_v23, 0 }
 0x1ec   : > { %23004 = vst [vmem:[#allocation63_spill] sm:$0xff] %v19175_v19  ;;  %v19188_v44 = vpop.f32.mrb[14].mxu1  ;;  %vm23013_vm14 = vcmp.lt.s32.totalorder %v19155_v23, 0  ;;  %v23014_v45 = vmov 0  ;;  %v598_v14 = vmul.u32 18, %v597_v13  ;;  %v586_v11 = vshrl.u32 %v19173_v18, 4 }
 0x1ed   : > { %23005 = vst [vmem:[#allocation64_spill] sm:$0xff] %v19188_v44  ;;  %v19199_v41 = vpop.f32.mrb[15].mxu1  ;;  %vm19254_vm1 = vmand %vm23013_vm14, %vm23012_vm15  ;;  %vm23017_vm8 = vcmp.ne.s32.totalorder %v19186_v20, 0  ;;  %vm23018_vm0 = vcmp.lt.s32.totalorder %v19186_v20, 0  ;;  %v23019_v51 = vmov 0  ;;  %v19272_v5 = vadd.s32 18, %v19217_v35 }
 0x1ee   : > { %23006 = vst [vmem:[#allocation65_spill] sm:$0xff] %v19199_v41  ;;  %v23015_v45 = vsel %vm19254_vm1, 4294967295, %v23014_v45  ;;  %vm19267_vm7 = vmand %vm23018_vm0, %vm23017_vm8  ;;  %v259_v13 = vadd.s32 272, %v18502_v50  ;;  %vm23022_vm10 = vcmp.ne.s32.totalorder %v19197_v53, 0  ;;  %vm23023_vm3 = vcmp.lt.s32.totalorder %v19197_v53, 0 }
 0x1ef   : > { %v23020_v51 = vsel %vm19267_vm7, 4294967295, %v23019_v51  ;;  %vm19283_vm5 = vmand %vm23023_vm3, %vm23022_vm10  ;;  %v19288_v62 = vadd.s32 18, %v19226_v36  ;;  %v576_v61 = vmul.u32 18, %v575_v40  ;;  %vm23028_vm8 = vcmp.ne.s32.totalorder %v19210_v48, 0 }
 0x1f0   : > { %v23025_v28 = vsel %vm19283_vm5, 4294967295, %v23024_v28  ;;  %vm23029_vm0 = vcmp.lt.s32.totalorder %v19210_v48, 0  ;;  %v19302_v57 = vmul.u32.u64.low 3817748708, %v259_v13  ;;  %v19303_v7 = vmul.u32.u64.high 3817748708, %v259_v13, %v19302_v57 }
 0x1f1   : > { %23026 = vst [vmem:[#allocation70_spill] sm:$0xff] %v19288_v62  ;;  %vm19298_vm14 = vmand %vm23029_vm0, %vm23028_vm8  ;;  %v19306_v40 = vadd.s32 264, %v18502_v50  ;;  %vm23032_vm3 = vcmp.ne.s32.totalorder %v19217_v35, 0  ;;  %vm23033_vm10 = vcmp.lt.s32.totalorder %v19217_v35, 0  ;;  %v19317_v30 = vsub.s32 %v19083_v0, %v598_v14  ;;  %v23261_v62 = vld [vmem:[#allocation60_spill] sm:$0xff] }
 0x1f2   : > { %v19248_v56 = vpop.f32.mrb[16].mxu1  ;;  %vm19312_vm15 = vmand %vm23033_vm10, %vm23032_vm3  ;;  %v587_v26 = vmul.u32 18, %v586_v11  ;;  %vm23037_vm8 = vcmp.ne.s32.totalorder %v19226_v36, 0  ;;  %vm23038_vm0 = vcmp.lt.s32.totalorder %v19226_v36, 0  ;;  %v23039_v50 = vmov 0 }
 0x1f3   : > { %23011 = vst [vmem:[#allocation67_spill] sm:$0xff] %v19248_v56  ;;  %v19261_v32 = vpop.f32.mrb[17].mxu1  ;;  %v609_v56 = vmul.u32 18, %v608_v52  ;;  %23036 = vst [vmem:[#allocation72_spill] sm:$0xff] %v19317_v30  ;;  %v19319_v41 = vmul.u32.u64.low 3817748708, %v257_v2  ;;  %v19320_v52 = vmul.u32.u64.high 3817748708, %v257_v2, %v19319_v41  ;;  %v19350_v14 = vsub.s32 %v19093_v17, %v576_v61 }
 0x1f4   : > { %23016 = vst [vmem:[#allocation68_spill] sm:$0xff] %v19261_v32  ;;  %v19277_v18 = vpop.f32.mrb[18].mxu1  ;;  %vm19326_vm6 = vmand %vm23038_vm0, %vm23037_vm8  ;;  %v19330_v57 = vmul.u32.u64.low 3817748708, %v260_v22  ;;  %v19331_v44 = vmul.u32.u64.high 3817748708, %v260_v22, %v19330_v57  ;;  %v19334_v19 = vmul.u32.u64.low 3817748708, %v19306_v40  ;;  %v19335_v63 = vmul.u32.u64.high 3817748708, %v19306_v40, %v19334_v19 }
 0x1f5   : > { %23021 = vst [vmem:[#allocation69_spill] sm:$0xff] %v19277_v18  ;;  %v19292_v32 = vpop.f32.mrb[19].mxu1  ;;  %v23030_v18 = vmov 0  ;;  %v23040_v50 = vsel %vm19326_vm6, 4294967295, %v23039_v50  ;;  %23041 = vst [vmem:[#allocation73_spill] sm:$0xff] %v19350_v14  ;;  %v19361_v0 = vsub.s32 %v19102_v37, %v609_v56  ;;  %v641_v11 = vshrl.u32 %v19303_v7, 4 }
 0x1f6   : > { %23027 = vst [vmem:[#allocation71_spill] sm:$0xff] %v19292_v32  ;;  %v23031_v18 = vsel %vm19298_vm14, 4294967295, %v23030_v18  ;;  %v23034_v32 = vmov 0  ;;  %v19373_v19 = vsub.s32 %v19118_v9, %v587_v26  ;;  %v619_v57 = vshrl.u32 %v19320_v52, 4 }
 0x1f7   : > { %v23035_v32 = vsel %vm19312_vm15, 4294967295, %v23034_v32  ;;  %23042 = vst [vmem:[#allocation74_spill] sm:$0xff] %v19361_v0  ;;  %vm687_vm3 = vcmp.ne.s32.totalorder %v19317_v30, 0  ;;  %vm723_vm10 = vcmp.lt.s32.totalorder %v19317_v30, 0  ;;  %v642_v37 = vmul.u32 18, %v641_v11 }
 0x1f8   : > { %23043 = vst [vmem:[#allocation75_spill] sm:$0xff] %v19373_v19  ;;  %v652_v7 = vshrl.u32 %v19331_v44, 4  ;;  %vm685_vm8 = vcmp.ne.s32.totalorder %v19350_v14, 0  ;;  %v620_v56 = vmul.u32 18, %v619_v57  ;;  %v630_v17 = vshrl.u32 %v19335_v63, 4 }
 0x1f9   : > { %v23044_v26 = vsel %vm18632_vm2, %v18577_v29, %v18544_v59  ;;  %v23045_v9 = vmov 0  ;;  %v19393_v44 = vsub.s32 %v259_v13, %v642_v37  ;;  %v23049_v63 = vsel %vm18646_vm4, %v18592_v39, %v18547_v6  ;;  %vm19404_vm2 = vmand %vm723_vm10, %vm687_vm3  ;;  %v19418_v6 = vld [vmem:[%s22723_s4] ss:$0 sm:$0xff] }
 0x1fa   : > { %vm19387_vm6 = vcmp.lt.s32.totalorder %v23044_v26, 16  ;;  %v653_v52 = vmul.u32 18, %v652_v7  ;;  %vm19400_vm0 = vcmp.lt.s32.totalorder %v23049_v63, 16  ;;  %v23053_v59 = vmov 0 }
 0x1fb   : > { %v23046_v9 = vsel %vm19387_vm6, 4294967295, %v23045_v9  ;;  %23048 = vst [vmem:[#allocation77_spill] sm:$0xff] %v19393_v44  ;;  %v23051_v1 = vsel %vm19400_vm0, 4294967295, %v23050_v1  ;;  %v23054_v59 = vsel %vm19404_vm2, 4294967295, %v23053_v59  ;;  %v19409_v29 = vadd.s32 18, %v19317_v30 }
 0x1fc   : > { %23047 = vst [vmem:[#allocation76_spill] sm:$0xff] %v23046_v9  ;;  %23052 = vst [vmem:[#allocation78_spill] sm:$0xff] %v23051_v1  ;;  %v19413_v13 = vsub.s32 %v257_v2, %v620_v56  ;;  %v23058_v39 = vsel %vm18659_vm9, %v18609_v33, %v18565_v46  ;;  %v23059_v11 = vmov 0  ;;  %vm23062_vm3 = vcmp.lt.s32.totalorder %v19350_v14, 0 }
 0x1fd   : > { %23055 = vst [vmem:[#allocation79_spill] sm:$0xff] %v23054_v59  ;;  %23056 = vst [vmem:[#allocation80_spill] sm:$0xff] %v19409_v29  ;;  %v15470_v15 = vpop.f32.mrb[0].mxu0  ;;  %vm19425_vm4 = vcmp.lt.s32.totalorder %v23058_v39, 16  ;;  %v23063_v2 = vmov 0  ;;  %v19438_v57 = vadd.s32 18, %v19350_v14  ;;  %v19442_v46 = vsub.s32 %v260_v22, %v653_v52 }
 0x1fe   : > { %23057 = vst [vmem:[#allocation81_spill] sm:$0xff] %v19413_v13  ;;  %v23060_v11 = vsel %vm19425_vm4, 4294967295, %v23059_v11  ;;  %vm19433_vm10 = vmand %vm23062_vm3, %vm685_vm8  ;;  %v16226_v33 = vadd.f32 %v15470_v15, %v18892_v47  ;;  %v4185_v12 = vpop.f32.mrb[1].mxu0  ;;  %v23068_v37 = vsel %vm18670_vm12, %v18621_v3, %v18584_v43  ;;  %v23069_v7 = vmov 0  ;;  %v19467_v43 = vld [vmem:[%s22723_s4 + $0x1] ss:$0 sm:$0xff] }
 0x1ff   : > { %23061 = vst [vmem:[#allocation82_spill] sm:$0xff] %v23060_v11  ;;  %v23064_v2 = vsel %vm19433_vm10, 4294967295, %v23063_v2  ;;  %23066 = vst [vmem:[#allocation84_spill] sm:$0xff] %v19438_v57  ;;  %vm19450_vm9 = vcmp.lt.s32.totalorder %v23068_v37, 16  ;;  %vm23072_vm8 = vcmp.ne.s32.totalorder %v19361_v0, 0  ;;  %vm23073_vm3 = vcmp.lt.s32.totalorder %v19361_v0, 0 }
 0x200   : > { %23065 = vst [vmem:[#allocation83_spill] sm:$0xff] %v23064_v2  ;;  %23067 = vst [vmem:[#allocation85_spill] sm:$0xff] %v19442_v46  ;;  %v23070_v7 = vsel %vm19450_vm9, 4294967295, %v23069_v7  ;;  %v23074_v56 = vmov 0  ;;  %v631_v58 = vmul.u32 18, %v630_v17  ;;  %v16227_v3 = vadd.f32 %v4185_v12, %v18910_v21  ;;  %v15471_v47 = vpop.f32.mrb[2].mxu0 }
 0x201   : > { %23071 = vst [vmem:[#allocation86_spill] sm:$0xff] %v23070_v7  ;;  %vm19458_vm15 = vmand %vm23073_vm3, %vm23072_vm8  ;;  %v19471_v22 = vadd.s32 18, %v19361_v0  ;;  %vm23078_vm12 = vcmp.ne.s32.totalorder %v19373_v19, 0  ;;  %vm23079_vm8 = vcmp.lt.s32.totalorder %v19373_v19, 0  ;;  %v23080_v26 = vmov 0  ;;  %v4188_v52 = vpop.f32.mrb[3].mxu0 }
 0x202   : > { %v23075_v56 = vsel %vm19458_vm15, 4294967295, %v23074_v56  ;;  %vm19477_vm3 = vmand %vm23079_vm8, %vm23078_vm12  ;;  %v4371_v17 = vmul.f32 %v16226_v33, %v19418_v6  ;;  %v16228_v21 = vadd.f32 %v15471_v47, %v18931_v8  ;;  %v19486_v63 = vadd.s32 18, %v19373_v19 }
 0x203   : > { %23076 = vst [vmem:[#allocation87_spill] sm:$0xff] %v23075_v56  ;;  %23077 = vst [vmem:[#allocation88_spill] sm:$0xff] %v19471_v22  ;;  %v23081_v26 = vsel %vm19477_vm3, 4294967295, %v23080_v26  ;;  %vm23084_vm7 = vcmp.ne.s32.totalorder %v19393_v44, 0  ;;  %vm23085_vm1 = vcmp.lt.s32.totalorder %v19393_v44, 0  ;;  %v23086_v15 = vmov 0 }
 0x204   : > { %23082 = vst [vmem:[#allocation89_spill] sm:$0xff] %v23081_v26  ;;  %23083 = vst [vmem:[#allocation90_spill] sm:$0xff] %v19486_v63  ;;  %v19497_v39 = vadd.s32 18, %v19393_v44  ;;  %v4369_v12 = vmul.f32 %v16227_v3, %v19418_v6  ;;  %v16229_v33 = vadd.f32 %v4188_v52, %v18943_v16  ;;  %vm23090_vm8 = vcmp.ne.s32.totalorder %v19413_v13, 0  ;;  %v23175_v26 = vld [vmem:[#allocation18_spill] sm:$0xff] }
 0x205   : > { %vm19492_vm12 = vmand %vm23085_vm1, %vm23084_vm7  ;;  %vm23091_vm14 = vcmp.lt.s32.totalorder %v19413_v13, 0  ;;  %v23092_v8 = vmov 0  ;;  %v19510_v37 = vadd.s32 18, %v19413_v13  ;;  %v19513_v47 = vadd.s32 18, %v19442_v46  ;;  %v15474_v30 = vpop.f32.mrb[4].mxu0 }
 0x206   : > { %v23087_v15 = vsel %vm19492_vm12, 4294967295, %v23086_v15  ;;  %23089 = vst [vmem:[#allocation92_spill] sm:$0xff] %v19497_v39  ;;  %vm19505_vm5 = vmand %vm23091_vm14, %vm23090_vm8  ;;  %v4412_v61 = vadd.f32 %v19467_v43, %v4371_v17  ;;  %v4372_v16 = vmul.f32 %v16228_v21, %v19418_v6  ;;  %vm23097_vm14 = vcmp.ne.s32.totalorder %v19442_v46, 0 }
 0x207   : > { %23088 = vst [vmem:[#allocation91_spill] sm:$0xff] %v23087_v15  ;;  %v23093_v8 = vsel %vm19505_vm5, 4294967295, %v23092_v8  ;;  %23095 = vst [vmem:[#allocation94_spill] sm:$0xff] %v19510_v37  ;;  %vm23098_vm8 = vcmp.lt.s32.totalorder %v19442_v46, 0  ;;  %v23099_v52 = vmov 0  ;;  %v19530_v41 = vsub.s32 %v19306_v40, %v631_v58 }
 0x208   : > { %23094 = vst [vmem:[#allocation93_spill] sm:$0xff] %v23093_v8  ;;  %23096 = vst [vmem:[#allocation95_spill] sm:$0xff] %v19513_v47  ;;  %v4410_v17 = vadd.f32 %v19467_v43, %v4369_v12  ;;  %v4370_v21 = vmul.f32 %v16229_v33, %v19418_v6  ;;  %v4448_v29 = vmax.f32 %v4412_v61, 0.0  ;;  %v4413_v40 = vadd.f32 %v19467_v43, %v4372_v16 }
 0x209   : > { %vm19525_vm11 = vmand %vm23098_vm8, %vm23097_vm14  ;;  %23102 = vst [vmem:[#allocation97_spill] sm:$0xff] %v19530_v41  ;;  %v23103_v58 = vsel %vm18681_vm13, %v18686_v60, %v18598_v34  ;;  %v23104_v12 = vmov 0  ;;  %v16230_v61 = vadd.f32 %v15474_v30, %v18994_v27  ;;  %v23146_v19 = vmov 0 }
 0x20a   : > { %v23100_v52 = vsel %vm19525_vm11, 4294967295, %v23099_v52  ;;  %vm19548_vm14 = vcmp.lt.s32.totalorder %v23103_v58, 16  ;;  %v4446_v16 = vmax.f32 %v4410_v17, 0.0  ;;  %v4411_v55 = vadd.f32 %v19467_v43, %v4370_v21  ;;  %v4201_v17 = vpop.f32.mrb[5].mxu0 }
 0x20b   : > { %23101 = vst [vmem:[#allocation96_spill] sm:$0xff] %v23100_v52  ;;  %v23105_v12 = vsel %vm19548_vm14, 4294967295, %v23104_v12  ;;  %v4484_v58 = vsel %vm19387_vm6, %v4448_v29, 0.0  ;;  %v4449_v33 = vmax.f32 %v4413_v40, 0.0  ;;  %v19573_v21 = vadd.s32 18, %v19530_v41  ;;  %v15475_v37 = vpop.f32.mrb[6].mxu0 }
 0x20c   : > { %23106 = vst [vmem:[#allocation98_spill] sm:$0xff] %v23105_v12  ;;  %v14560_v3 = vpack.c.bf16 %v4484_v58, %v4484_v58  ;;  %v4482_v8 = vsel %vm19400_vm0, %v4446_v16, 0.0  ;;  %v4447_v34 = vmax.f32 %v4411_v55, 0.0  ;;  %v16231_v13 = vadd.f32 %v4201_v17, %v19000_v25  ;;  %v4204_v30 = vpop.f32.mrb[7].mxu0  ;;  %v23110_v17 = vld [vmem:[#allocation8_spill] sm:$0xff] }
 0x20d   : > { %23107 = vst [vmem:[#allocation99_spill] sm:$0xff] %v19573_v21  ;;  %v14558_v52 = vpack.c.bf16 %v4482_v8, %v4482_v8  ;;  %v4485_v60 = vsel %vm19425_vm4, %v4449_v33, 0.0  ;;  %v4375_v29 = vmul.f32 %v16230_v61, %v19418_v6  ;;  %v16232_v27 = vadd.f32 %v15475_v37, %v19018_v49  ;;  %v23108_v8 = vld [vmem:[#allocation9_spill] sm:$0xff]  ;;  %v23111_v33 = vld [vmem:[#allocation7_spill] sm:$0xff]  ;;  %v23116_v49 = vld [vmem:[#allocation20_spill] sm:$0xff]  ;;  %v15478_v44 = vpop.f32.mrb[8].mxu0 }
 0x20e   : > { %v4649_v40 = vshrl.u32 %v14560_v3, 16  ;;  %v4652_v9 = vshll.u32 %v14560_v3, 16  ;;  %v14561_v21 = vpack.c.bf16 %v4485_v60, %v4485_v60  ;;  %v4483_v58 = vsel %vm19450_vm9, %v4447_v34, 0.0  ;;  %v23118_v37 = vld [vmem:[#allocation14_spill] sm:$0xff] }
 0x20f   : > { %v4630_v16 = vshrl.u32 %v14558_v52, 16  ;;  %v4633_v55 = vshll.u32 %v14558_v52, 16  ;;  %v14559_v1 = vpack.c.bf16 %v4483_v58, %v4483_v58  ;;  %v4416_v25 = vadd.f32 %v19467_v43, %v4375_v29  ;;  %v23119_v3 = vld [vmem:[#allocation10_spill] sm:$0xff] }
 0x210   : > { %vm23109_vm13 = vnez %v23108_v8  ;;  %v23113_v61 = vmov 0  ;;  %vm23117_vm1 = vnez %v23116_v49  ;;  %v23121_v34 = vmov 0 }
 0x211   : > { %v23112_v11 = vsel %vm23109_vm13, %v23110_v17, %v23111_v33  ;;  %v23120_v60 = vsel %vm23117_vm1, %v23118_v37, %v23119_v3  ;;  %v4651_v52 = vrot.slane %v4649_v40, 6  ;;  %v4654_v29 = vrot.slane %v4652_v9, 7  ;;  %v5028_v37 = vld [vmem:[#allocation2 + $0x8] sm:$0xe] }
 0x212   : > { %vm19590_vm8 = vcmp.lt.s32.totalorder %v23112_v11, 16  ;;  %vm19599_vm7 = vcmp.lt.s32.totalorder %v23120_v60, 16  ;;  %v4659_v58 = vshrl.u32 %v14561_v21, 16  ;;  %v4662_v8 = vshll.u32 %v14561_v21, 16 }
 0x213   : > { %v23114_v61 = vsel %vm19590_vm8, 4294967295, %v23113_v61  ;;  %v23122_v34 = vsel %vm19599_vm7, 4294967295, %v23121_v34  ;;  %v4632_v7 = vrot.slane %v4630_v16, 6  ;;  %v4635_v46 = vrot.slane %v4633_v55, 7  ;;  %v4217_v55 = vpop.f32.mrb[9].mxu0 }
 0x214   : > { %23115 = vst [vmem:[#allocation9_spill] sm:$0xff] %v23114_v61  ;;  %23123 = vst [vmem:[#allocation8_spill] sm:$0xff] %v23122_v34  ;;  %v4639_v17 = vshrl.u32 %v14559_v1, 16  ;;  %v4642_v11 = vshll.u32 %v14559_v1, 16  ;;  %v4655_v33 = vor.u32 %v4654_v29, %v4651_v52  ;;  %vm23124_vm13 = vsmask.f32 7942 }
 0x215   : > { %vm23125_vm9 = vcmask 257025   ;;  %v23126_v49 = vmov 0  ;;  %v4661_v3 = vrot.slane %v4659_v58, 6  ;;  %v4664_v60 = vrot.slane %v4662_v8, 7  ;;  %v23172_v61 = vld [vmem:[#allocation30_spill] sm:$0xff] }
 0x216   : > { %vm19605_vm4 = vmand %vm23125_vm9, %vm23124_vm13  ;;  %v4452_v47 = vmax.f32 %v4416_v25, 0.0  ;;  %v4636_v40 = vor.u32 %v4635_v46, %v4632_v7  ;;  %vm23129_vm1 = vsmask.f32 5392  ;;  %vm23130_vm0 = vsmask.f32 1280  ;;  %v15479_v46 = vpop.f32.mrb[10].mxu0 }
 0x217   : > { %v23127_v49 = vsel %vm19605_vm4, 4294967295, %v23126_v49  ;;  %vm19611_vm6 = vmor %vm23130_vm0, %vm23129_vm1  ;;  %v4641_v1 = vrot.slane %v4639_v17, 6  ;;  %v4644_v21 = vrot.slane %v4642_v11, 7  ;;  %v4373_v16 = vmul.f32 %v16231_v13, %v19418_v6  ;;  %v23133_v17 = vld [vmem:[#allocation23_spill] sm:$0xff]  ;;  %v23135_v11 = vld [vmem:[#allocation16_spill] sm:$0xff] }
 0x218   : > { %23128 = vst [vmem:[#allocation7_spill] sm:$0xff] %v23127_v49  ;;  %v4657_v52 = vrot.slane %v4655_v33, 4  ;;  %v19616_v29 = vor.u32 %v4664_v60, %v4661_v3  ;;  %v4488_v58 = vsel %vm19548_vm14, %v4452_v47, 0.0  ;;  %v4376_v25 = vmul.f32 %v16232_v27, %v19418_v6  ;;  %v23136_v13 = vld [vmem:[#allocation11_spill] sm:$0xff]  ;;  %v23141_v60 = vld [vmem:[#allocation25_spill] sm:$0xff]  ;;  %v23144_v27 = vld [vmem:[#allocation12_spill] sm:$0xff] }
 0x219   : > { %v4637_v7 = vrot.slane %v4636_v40, 4  ;;  %v5029_v8 = vsel %vm19605_vm4, %v4636_v40, %v5028_v37  ;;  %v4645_v39 = vor.u32 %v4644_v21, %v4641_v1  ;;  %v14564_v15 = vpack.c.bf16 %v4488_v58, %v4488_v58  ;;  %v23143_v47 = vld [vmem:[#allocation17_spill] sm:$0xff]  ;;  %v4220_v37 = vpop.f32.mrb[11].mxu0  ;;  %v23161_v49 = vld [vmem:[#allocation51_spill] sm:$0xff] }
 0x21a   : > { %vm23134_vm0 = vnez %v23133_v17  ;;  %v23138_v3 = vmov 0  ;;  %vm23142_vm13 = vnez %v23141_v60  ;;  %5030 = vst [vmem:[#allocation2 + $0x8] sm:$0xe] %v5029_v8  ;;  %v4666_v40 = vsel %vm19611_vm6, %v4657_v52, %v19616_v29  ;;  %v23152_v8 = vld [vmem:[#allocation19_spill] sm:$0xff]  ;;  %v23153_v60 = vld [vmem:[#allocation13_spill] sm:$0xff] }
 0x21b   : > { %v23137_v41 = vsel %vm23134_vm0, %v23135_v11, %v23136_v13  ;;  %v23145_v12 = vsel %vm23142_vm13, %v23143_v47, %v23144_v27  ;;  %v4414_v1 = vadd.f32 %v19467_v43, %v4373_v16  ;;  %v4417_v21 = vadd.f32 %v19467_v43, %v4376_v25  ;;  %v23150_v13 = vld [vmem:[#allocation27_spill] sm:$0xff]  ;;  %v23159_v27 = vld [vmem:[#allocation42_spill] sm:$0xff] }
 0x21c   : > { %vm19628_vm9 = vcmp.lt.s32.totalorder %v23137_v41, 16  ;;  %vm19637_vm1 = vcmp.lt.s32.totalorder %v23145_v12, 16  ;;  %vm23149_vm0 = vcmask 257024   ;;  %v4646_v12 = vsel %vm19611_vm6, %v4637_v7, %v4645_v39  ;;  %v23160_v41 = vld [vmem:[#allocation48_spill] sm:$0xff] }
 0x21d   : > { %v23139_v3 = vsel %vm19628_vm9, 4294967295, %v23138_v3  ;;  %v23147_v19 = vsel %vm19637_vm1, 4294967295, %v23146_v19  ;;  %5033 = vst.msk [vmem:[#allocation2 + $0x14] sm:$0xf] %vm23149_vm0, %v4666_v40  ;;  %v4647_v58 = vrot.slane %v4645_v39, 4  ;;  %v4689_v17 = vshrl.u32 %v14564_v15, 16  ;;  %vm23158_vm14 = vmmov %vm23149_vm0 }
 0x21e   : > { %23140 = vst [vmem:[#allocation20_spill] sm:$0xff] %v23139_v3  ;;  %23148 = vst [vmem:[#allocation14_spill] sm:$0xff] %v23147_v19  ;;  %v4692_v11 = vshll.u32 %v14564_v15, 16  ;;  %vm23151_vm13 = vnez %v23150_v13  ;;  %v23155_v52 = vmov 0  ;;  %v4450_v16 = vmax.f32 %v4414_v1, 0.0  ;;  %v23180_v3 = vld [vmem:[#allocation61_spill] sm:$0xff] }
 0x21f   : > { %v23154_v47 = vsel %vm23151_vm13, %v23152_v8, %v23153_v60  ;;  %5031 = vst.msk [vmem:[#allocation2 + $0xc] sm:$0xf] %vm23158_vm14, %v4646_v12  ;;  %v4453_v25 = vmax.f32 %v4417_v21, 0.0  ;;  %v16233_v40 = vadd.f32 %v4204_v30, %v23159_v27  ;;  %v16234_v7 = vadd.f32 %v15478_v44, %v23160_v41  ;;  %v15482_v44 = vpop.f32.mrb[12].mxu0  ;;  %v23164_v60 = vld [vmem:[#allocation21_spill] sm:$0xff] }
 0x220   : > { %vm19655_vm4 = vcmp.lt.s32.totalorder %v23154_v47, 16  ;;  %v4656_v15 = vsel %vm19611_vm6, %v4647_v58, %v4655_v33  ;;  %v4691_v39 = vrot.slane %v4689_v17, 6  ;;  %v4694_v13 = vrot.slane %v4692_v11, 7  ;;  %v23162_v11 = vld [vmem:[#allocation28_spill] sm:$0xff]  ;;  %v23165_v47 = vld [vmem:[#allocation15_spill] sm:$0xff]  ;;  %v23170_v27 = vld [vmem:[#allocation53_spill] sm:$0xff] }
 0x221   : > { %v23156_v52 = vsel %vm19655_vm4, 4294967295, %v23155_v52  ;;  %v16235_v63 = vadd.f32 %v4217_v55, %v23161_v49  ;;  %5032 = vst.msk [vmem:[#allocation2 + $0x10] sm:$0xf] %vm23149_vm0, %v4656_v15  ;;  %v4486_v8 = vsel %vm19590_vm8, %v4450_v16, 0.0  ;;  %v4489_v1 = vsel %vm19599_vm7, %v4453_v25, 0.0  ;;  %v19675_v49 = vpop.f32.mrb[13].mxu0 }
 0x222   : > { %23157 = vst [vmem:[#allocation10_spill] sm:$0xff] %v23156_v52  ;;  %v4374_v21 = vmul.f32 %v16233_v40, %v19418_v6  ;;  %v4379_v30 = vmul.f32 %v16234_v7, %v19418_v6  ;;  %v19672_v41 = vor.u32 %v4694_v13, %v4691_v39  ;;  %v14562_v33 = vpack.c.bf16 %v4486_v8, %v4486_v8  ;;  %v23171_v7 = vld [vmem:[#allocation55_spill] sm:$0xff] }
 0x223   : > { %v14565_v12 = vpack.c.bf16 %v4489_v1, %v4489_v1  ;;  %v4377_v58 = vmul.f32 %v16235_v63, %v19418_v6  ;;  %vm23163_vm14 = vnez %v23162_v11  ;;  %v23167_v25 = vmov 0  ;;  %v19690_v63 = vpop.f32.mrb[14].mxu0 }
 0x224   : > { %v4415_v55 = vadd.f32 %v19467_v43, %v4374_v21  ;;  %v4420_v17 = vadd.f32 %v19467_v43, %v4379_v30  ;;  %v23166_v16 = vsel %vm23163_vm14, %v23164_v60, %v23165_v47  ;;  %v16236_v40 = vadd.f32 %v15479_v46, %v23170_v27  ;;  %v19693_v21 = vpop.f32.mrb[15].mxu0  ;;  %v19695_v30 = vpop.f32.mrb[20].mxu1 }
 0x225   : > { %vm19684_vm13 = vcmp.lt.s32.totalorder %v23166_v16, 16  ;;  %v16237_v15 = vadd.f32 %v4220_v37, %v23171_v7  ;;  %v4697_v39 = vrot.slane %v19672_v41, 4  ;;  %v4669_v13 = vshrl.u32 %v14562_v33, 16  ;;  %v19698_v34 = vpop.f32.mrb[21].mxu1  ;;  %v19725_v56 = vpop.f32.mrb[16].mxu0 }
 0x226   : > { %v23168_v25 = vsel %vm19684_vm13, 4294967295, %v23167_v25  ;;  %v4672_v8 = vshll.u32 %v14562_v33, 16  ;;  %v4699_v1 = vshrl.u32 %v14565_v12, 16  ;;  %v4702_v11 = vshll.u32 %v14565_v12, 16  ;;  %v23174_v33 = vld [vmem:[#allocation29_spill] sm:$0xff]  ;;  %v19710_v12 = vpop.f32.mrb[22].mxu1 }
 0x227   : > { %23169 = vst [vmem:[#allocation23_spill] sm:$0xff] %v23168_v25  ;;  %v4451_v60 = vmax.f32 %v4415_v55, 0.0  ;;  %v4456_v47 = vmax.f32 %v4420_v17, 0.0  ;;  %v4418_v16 = vadd.f32 %v19467_v43, %v4377_v58  ;;  %v4671_v46 = vrot.slane %v4669_v13, 6  ;;  %v23196_v25 = vld [vmem:[#allocation33_spill] sm:$0xff] }
 0x228   : > { %v4674_v37 = vrot.slane %v4672_v8, 7  ;;  %v4701_v27 = vrot.slane %v4699_v1, 6  ;;  %v4380_v7 = vmul.f32 %v16236_v40, %v19418_v6  ;;  %vm23173_vm0 = vnez %v23172_v61  ;;  %v19716_v40 = vpop.f32.mrb[23].mxu1 }
 0x229   : > { %v23176_v0 = vsel %vm23173_vm0, %v23174_v33, %v23175_v26  ;;  %v23177_v22 = vmov 0  ;;  %v4704_v55 = vrot.slane %v4702_v11, 7  ;;  %v4487_v58 = vsel %vm19628_vm9, %v4451_v60, 0.0  ;;  %v19752_v52 = vpop.f32.mrb[24].mxu1 }
 0x22a   : > { %vm19706_vm14 = vcmp.lt.s32.totalorder %v23176_v0, 16  ;;  %v4492_v17 = vsel %vm19637_vm1, %v4456_v47, 0.0  ;;  %v4454_v13 = vmax.f32 %v4418_v16, 0.0  ;;  %v4675_v61 = vor.u32 %v4674_v37, %v4671_v46  ;;  %v19756_v14 = vpop.f32.mrb[25].mxu1 }
 0x22b   : > { %v23178_v22 = vsel %vm19706_vm14, 4294967295, %v23177_v22  ;;  %v14563_v8 = vpack.c.bf16 %v4487_v58, %v4487_v58  ;;  %v14568_v1 = vpack.c.bf16 %v4492_v17, %v4492_v17  ;;  %v4421_v0 = vadd.f32 %v19467_v43, %v4380_v7  ;;  %v23182_v7 = vld [vmem:[#allocation31_spill] sm:$0xff] }
 0x22c   : > { %23179 = vst [vmem:[#allocation16_spill] sm:$0xff] %v23178_v22  ;;  %v19719_v26 = vor.u32 %v4704_v55, %v4701_v27  ;;  %v4490_v33 = vsel %vm19655_vm4, %v4454_v13, 0.0  ;;  %v4378_v11 = vmul.f32 %v16237_v15, %v19418_v6  ;;  %v16238_v60 = vadd.f32 %v15482_v44, %v23180_v3  ;;  %v23184_v27 = vld [vmem:[#allocation32_spill] sm:$0xff]  ;;  %v23185_v55 = vld [vmem:[#allocation22_spill] sm:$0xff]  ;;  %v19740_v3 = vpop.f32.mrb[17].mxu0 }
 0x22d   : > { %v23181_v47 = vrot.slane %v19616_v29, 4  ;;  %v4677_v46 = vrot.slane %v4675_v61, 4  ;;  %v4679_v37 = vshrl.u32 %v14563_v8, 16  ;;  %v4682_v58 = vshll.u32 %v14563_v8, 16  ;;  %v19747_v8 = vpop.f32.mrb[18].mxu0  ;;  %v23213_v22 = vld [vmem:[#allocation64_spill] sm:$0xff] }
 0x22e   : > { %vm23183_vm0 = vnez %v23182_v7  ;;  %v23187_v13 = vmov 0  ;;  %vm23190_vm1 = vcmask 257024   ;;  %v4706_v29 = vsel %vm19611_vm6, %v4697_v39, %v19719_v26 }
 0x22f   : > { %v4676_v16 = vsel %vm19611_vm6, %v23181_v47, %v4675_v61  ;;  %v23186_v17 = vsel %vm23183_vm0, %v23184_v27, %v23185_v55  ;;  %v4707_v44 = vrot.slane %v19719_v26, 4  ;;  %v4729_v15 = vshrl.u32 %v14568_v1, 16  ;;  %vm23191_vm9 = vmmov %vm23190_vm1 }
 0x230   : > { %vm19736_vm4 = vcmp.lt.s32.totalorder %v23186_v17, 16  ;;  %5034 = vst.msk [vmem:[#allocation2 + $0x18] sm:$0xf] %vm23190_vm1, %v4676_v16  ;;  %v4732_v61 = vshll.u32 %v14568_v1, 16  ;;  %v4681_v47 = vrot.slane %v4679_v37, 6  ;;  %v4684_v7 = vrot.slane %v4682_v58, 7 }
 0x231   : > { %v23188_v13 = vsel %vm19736_vm4, 4294967295, %v23187_v13  ;;  %5037 = vst.msk [vmem:[#allocation2 + $0x24] sm:$0xf] %vm23191_vm9, %v4706_v29  ;;  %v14566_v27 = vpack.c.bf16 %v4490_v33, %v4490_v33  ;;  %v4457_v55 = vmax.f32 %v4421_v0, 0.0  ;;  %v19750_v17 = vpop.f32.mrb[19].mxu0  ;;  %v4731_v16 = vrot.slane %v4729_v15, 6 }
 0x232   : > { %23189 = vst [vmem:[#allocation11_spill] sm:$0xff] %v23188_v13  ;;  %v4734_v19 = vrot.slane %v4732_v61, 7  ;;  %v4419_v39 = vadd.f32 %v19467_v43, %v4378_v11  ;;  %v4383_v26 = vmul.f32 %v16238_v60, %v19418_v6  ;;  %v4685_v1 = vor.u32 %v4684_v7, %v4681_v47  ;;  %v19760_v33 = vpop.f32.mrb[26].mxu1 }
 0x233   : > { %v4709_v57 = vshrl.u32 %v14566_v27, 16  ;;  %v4712_v2 = vshll.u32 %v14566_v27, 16  ;;  %v4493_v37 = vsel %vm19684_vm13, %v4457_v55, 0.0  ;;  %23192 = vst [vmem:[#allocation25_spill] sm:$0xff] %v19760_v33  ;;  %v19765_v61 = vpop.f32.mrb[27].mxu1  ;;  %v23194_v27 = vld [vmem:[#allocation34_spill] sm:$0xff] }
 0x234   : > { %v19762_v0 = vor.u32 %v4734_v19, %v4731_v16  ;;  %v14569_v58 = vpack.c.bf16 %v4493_v37, %v4493_v37  ;;  %v4455_v29 = vmax.f32 %v4419_v39, 0.0  ;;  %v4424_v15 = vadd.f32 %v19467_v43, %v4383_v26  ;;  %23193 = vst [vmem:[#allocation17_spill] sm:$0xff] %v19765_v61  ;;  %v23197_v55 = vld [vmem:[#allocation24_spill] sm:$0xff]  ;;  %v23202_v16 = vld [vmem:[#allocation38_spill] sm:$0xff] }
 0x235   : > { %v4686_v11 = vsel %vm19611_vm6, %v4677_v46, %v4685_v1  ;;  %v4687_v60 = vrot.slane %v4685_v1, 4  ;;  %v4711_v47 = vrot.slane %v4709_v57, 6  ;;  %v4714_v7 = vrot.slane %v4712_v2, 7  ;;  %v23204_v39 = vld [vmem:[#allocation36_spill] sm:$0xff]  ;;  %v23205_v26 = vld [vmem:[#allocation26_spill] sm:$0xff] }
 0x236   : > { %vm23195_vm9 = vnez %v23194_v27  ;;  %v23199_v19 = vmov 0  ;;  %vm23203_vm0 = vnez %v23202_v16  ;;  %v23207_v61 = vmov 0 }
 0x237   : > { %v23198_v59 = vsel %vm23195_vm9, %v23196_v25, %v23197_v55  ;;  %v23206_v37 = vsel %vm23203_vm0, %v23204_v39, %v23205_v26  ;;  %vm23210_vm7 = vcmask 257024   ;;  %v4737_v2 = vrot.slane %v19762_v0, 4  ;;  %v19791_v25 = vpop.f32.mrb[20].mxu0 }
 0x238   : > { %vm19774_vm1 = vcmp.lt.s32.totalorder %v23198_v59, 16  ;;  %vm19783_vm13 = vcmp.lt.s32.totalorder %v23206_v37, 16  ;;  %5035 = vst.msk [vmem:[#allocation2 + $0x1c] sm:$0xf] %vm23210_vm7, %v4686_v11  ;;  %v4739_v57 = vshrl.u32 %v14569_v58, 16  ;;  %v4742_v46 = vshll.u32 %v14569_v58, 16  ;;  %vm23211_vm9 = vmmov %vm23210_vm7 }
 0x239   : > { %v23200_v19 = vsel %vm19774_vm1, 4294967295, %v23199_v19  ;;  %v23208_v61 = vsel %vm19783_vm13, 4294967295, %v23207_v61  ;;  %v4491_v59 = vsel %vm19706_vm14, %v4455_v29, 0.0  ;;  %v4696_v1 = vsel %vm19611_vm6, %v4687_v60, %v19672_v41  ;;  %v19796_v39 = vpop.f32.mrb[21].mxu0  ;;  %v23212_v37 = vld [vmem:[#allocation63_spill] sm:$0xff] }
 0x23a   : > { %23201 = vst [vmem:[#allocation12_spill] sm:$0xff] %v23200_v19  ;;  %23209 = vst [vmem:[#allocation27_spill] sm:$0xff] %v23208_v61  ;;  %v4715_v27 = vor.u32 %v4714_v7, %v4711_v47  ;;  %v14567_v55 = vpack.c.bf16 %v4491_v59, %v4491_v59  ;;  %v4460_v16 = vmax.f32 %v4424_v15, 0.0  ;;  %v4741_v11 = vrot.slane %v4739_v57, 6  ;;  %v19803_v33 = vpop.f32.mrb[22].mxu0  ;;  %v23214_v7 = vld [vmem:[#allocation40_spill] sm:$0xff] }
 0x23b   : > { %5036 = vst.msk [vmem:[#allocation2 + $0x20] sm:$0xf] %vm23211_vm9, %v4696_v1  ;;  %v4744_v26 = vrot.slane %v4742_v46, 7  ;;  %v16239_v58 = vadd.f32 %v19675_v49, %v23212_v37  ;;  %v16240_v29 = vadd.f32 %v19690_v63, %v23213_v22  ;;  %vm23215_vm7 = vnez %v23214_v7  ;;  %v23216_v59 = vld [vmem:[#allocation39_spill] sm:$0xff]  ;;  %v19816_v49 = vpop.f32.mrb[23].mxu0  ;;  %v19818_v22 = vpop.f32.mrb[28].mxu1 }
 0x23c   : > { %v4716_v41 = vsel %vm19611_vm6, %v4707_v44, %v4715_v27  ;;  %v4717_v60 = vrot.slane %v4715_v27, 4  ;;  %v4719_v47 = vshrl.u32 %v14567_v55, 16  ;;  %v4722_v15 = vshll.u32 %v14567_v55, 16  ;;  %v23217_v1 = vld [vmem:[#allocation35_spill] sm:$0xff]  ;;  %23222 = vst [vmem:[#allocation13_spill] sm:$0xff] %v19818_v22  ;;  %v19827_v37 = vpop.f32.mrb[29].mxu1 }
 0x23d   : > { %v23218_v57 = vsel %vm23215_vm7, %v23216_v59, %v23217_v1  ;;  %v23219_v46 = vmov 0  ;;  %5038 = vst.msk [vmem:[#allocation2 + $0x28] sm:$0xf] %vm23211_vm9, %v4716_v41  ;;  %v19821_v63 = vor.u32 %v4744_v26, %v4741_v11  ;;  %v4496_v44 = vsel %vm19736_vm4, %v4460_v16, 0.0  ;;  %23223 = vst [vmem:[#allocation42_spill] sm:$0xff] %v19827_v37  ;;  %v23225_v22 = vld [vmem:[#allocation56_spill] sm:$0xff] }
 0x23e   : > { %vm19812_vm0 = vcmp.lt.s32.totalorder %v23218_v57, 16  ;;  %v4381_v27 = vmul.f32 %v16239_v58, %v19418_v6  ;;  %v4384_v55 = vmul.f32 %v16240_v29, %v19418_v6  ;;  %v4721_v7 = vrot.slane %v4719_v47, 6  ;;  %v23224_v57 = vld [vmem:[#allocation65_spill] sm:$0xff]  ;;  %v23227_v41 = vld [vmem:[#allocation46_spill] sm:$0xff]  ;;  %v19840_v16 = vpop.f32.mrb[30].mxu1  ;;  %v23244_v37 = vld [vmem:[#allocation67_spill] sm:$0xff] }
 0x23f   : > { %v23220_v46 = vsel %vm19812_vm0, 4294967295, %v23219_v46  ;;  %v4724_v59 = vrot.slane %v4722_v15, 7  ;;  %v14572_v1 = vpack.c.bf16 %v4496_v44, %v4496_v44  ;;  %v16241_v36 = vadd.f32 %v19693_v21, %v23224_v57  ;;  %v23228_v11 = vld [vmem:[#allocation41_spill] sm:$0xff]  ;;  %23233 = vst [vmem:[#allocation51_spill] sm:$0xff] %v19840_v16  ;;  %v19848_v15 = vpop.f32.mrb[31].mxu1  ;;  %v23239_v16 = vld [vmem:[#allocation43_spill] sm:$0xff] }
 0x240   : > { %23221 = vst [vmem:[#allocation19_spill] sm:$0xff] %v23220_v46  ;;  %vm23226_vm7 = vnez %v23225_v22  ;;  %v23230_v13 = vmov 0  ;;  %v4746_v58 = vsel %vm19611_vm6, %v4737_v2, %v19821_v63  ;;  %v4422_v47 = vadd.f32 %v19467_v43, %v4381_v27  ;;  %23234 = vst [vmem:[#allocation28_spill] sm:$0xff] %v19848_v15 }
 0x241   : > { %v23229_v26 = vsel %vm23226_vm7, %v23227_v41, %v23228_v11  ;;  %v4425_v21 = vadd.f32 %v19467_v43, %v4384_v55  ;;  %vm23235_vm4 = vcmask 257024   ;;  %v4725_v22 = vor.u32 %v4724_v59, %v4721_v7  ;;  %v23236_v11 = vld [vmem:[#allocation57_spill] sm:$0xff]  ;;  %v19865_v59 = vpop.f32.mrb[24].mxu0 }
 0x242   : > { %vm19836_vm9 = vcmp.lt.s32.totalorder %v23229_v26, 16  ;;  %5041 = vst.msk [vmem:[#allocation2 + $0x34] sm:$0xf] %vm23235_vm4, %v4746_v58  ;;  %v4769_v44 = vshrl.u32 %v14572_v1, 16  ;;  %v4772_v57 = vshll.u32 %v14572_v1, 16  ;;  %v4382_v41 = vmul.f32 %v16241_v36, %v19418_v6  ;;  %v23238_v26 = vld [vmem:[#allocation49_spill] sm:$0xff] }
 0x243   : > { %v23231_v13 = vsel %vm19836_vm9, 4294967295, %v23230_v13  ;;  %vm23237_vm7 = vnez %v23236_v11  ;;  %v23241_v29 = vmov 0  ;;  %v4458_v27 = vmax.f32 %v4422_v47, 0.0  ;;  %v23245_v58 = vld [vmem:[#allocation68_spill] sm:$0xff] }
 0x244   : > { %23232 = vst [vmem:[#allocation48_spill] sm:$0xff] %v23231_v13  ;;  %v23240_v2 = vsel %vm23237_vm7, %v23238_v26, %v23239_v16  ;;  %v4461_v55 = vmax.f32 %v4425_v21, 0.0  ;;  %v16242_v15 = vadd.f32 %v19725_v56, %v23244_v37  ;;  %v16243_v7 = vadd.f32 %v19740_v3, %v23245_v58  ;;  %v19876_v37 = vpop.f32.mrb[25].mxu0  ;;  %vm23248_vm7 = vmmov %vm23235_vm4 }
 0x245   : > { %vm19857_vm14 = vcmp.lt.s32.totalorder %v23240_v2, 16  ;;  %v4726_v36 = vsel %vm19611_vm6, %v4717_v60, %v4725_v22  ;;  %v4727_v1 = vrot.slane %v4725_v22, 4  ;;  %v4771_v11 = vrot.slane %v4769_v44, 6  ;;  %v19883_v26 = vpop.f32.mrb[26].mxu0  ;;  %v19885_v2 = vpop.f32.mrb[32].mxu1 }
 0x246   : > { %v23242_v29 = vsel %vm19857_vm14, 4294967295, %v23241_v29  ;;  %v4774_v16 = vrot.slane %v4772_v57, 7  ;;  %5039 = vst.msk [vmem:[#allocation2 + $0x2c] sm:$0xf] %vm23235_vm4, %v4726_v36  ;;  %v4494_v47 = vsel %vm19774_vm1, %v4458_v27, 0.0  ;;  %v4497_v21 = vsel %vm19783_vm13, %v4461_v55, 0.0 }
 0x247   : > { %23243 = vst [vmem:[#allocation21_spill] sm:$0xff] %v23242_v29  ;;  %v4423_v56 = vadd.f32 %v19467_v43, %v4382_v41  ;;  %v4387_v3 = vmul.f32 %v16242_v15, %v19418_v6  ;;  %v4736_v60 = vsel %vm19611_vm6, %v4727_v1, %v19762_v0  ;;  %v14570_v44 = vpack.c.bf16 %v4494_v47, %v4494_v47  ;;  %v23249_v55 = vld [vmem:[#allocation69_spill] sm:$0xff]  ;;  %v19892_v36 = vpop.f32.mrb[27].mxu0  ;;  %v19894_v0 = vpop.f32.mrb[33].mxu1 }
 0x248   : > { %v19881_v22 = vor.u32 %v4774_v16, %v4771_v11  ;;  %v14573_v57 = vpack.c.bf16 %v4497_v21, %v4497_v21  ;;  %23246 = vst [vmem:[#allocation15_spill] sm:$0xff] %v19883_v26  ;;  %23247 = vst [vmem:[#allocation53_spill] sm:$0xff] %v19885_v2  ;;  %v4385_v15 = vmul.f32 %v16243_v7, %v19418_v6  ;;  %v23252_v21 = vld [vmem:[#allocation58_spill] sm:$0xff]  ;;  %v19906_v7 = vpop.f32.mrb[34].mxu1  ;;  %vm23287_vm1 = vnez %v23015_v45 }
 0x249   : > { %5040 = vst.msk [vmem:[#allocation2 + $0x30] sm:$0xf] %vm23248_vm7, %v4736_v60  ;;  %v4459_v27 = vmax.f32 %v4423_v56, 0.0  ;;  %v4428_v41 = vadd.f32 %v19467_v43, %v4387_v3  ;;  %v16244_v58 = vadd.f32 %v19747_v8, %v23249_v55  ;;  %23250 = vst [vmem:[#allocation55_spill] sm:$0xff] %v19892_v36  ;;  %v4749_v11 = vshrl.u32 %v14570_v44, 16  ;;  %v23254_v60 = vld [vmem:[#allocation50_spill] sm:$0xff] }
 0x24a   : > { %23251 = vst [vmem:[#allocation30_spill] sm:$0xff] %v19894_v0  ;;  %v4777_v1 = vrot.slane %v19881_v22, 4  ;;  %v4752_v16 = vshll.u32 %v14570_v44, 16  ;;  %v4779_v47 = vshrl.u32 %v14573_v57, 16  ;;  %vm23253_vm4 = vnez %v23252_v21  ;;  %v23255_v56 = vld [vmem:[#allocation44_spill] sm:$0xff]  ;;  %23259 = vst [vmem:[#allocation29_spill] sm:$0xff] %v19906_v7 }
 0x24b   : > { %v23256_v61 = vsel %vm23253_vm4, %v23254_v60, %v23255_v56  ;;  %v23257_v3 = vmov 0  ;;  %v4782_v8 = vshll.u32 %v14573_v57, 16  ;;  %v4495_v55 = vsel %vm19812_vm0, %v4459_v27, 0.0  ;;  %v19911_v44 = vpop.f32.mrb[35].mxu1  ;;  %v19916_v57 = vpop.f32.mrb[28].mxu0 }
 0x24c   : > { %vm19902_vm7 = vcmp.lt.s32.totalorder %v23256_v61, 16  ;;  %v4464_v19 = vmax.f32 %v4428_v41, 0.0  ;;  %v4426_v0 = vadd.f32 %v19467_v43, %v4385_v15  ;;  %23260 = vst [vmem:[#allocation18_spill] sm:$0xff] %v19911_v44  ;;  %v4751_v2 = vrot.slane %v4749_v11, 6  ;;  %v23263_v11 = vld [vmem:[#allocation54_spill] sm:$0xff] }
 0x24d   : > { %v23258_v3 = vsel %vm19902_vm7, 4294967295, %v23257_v3  ;;  %v4754_v21 = vrot.slane %v4752_v16, 7  ;;  %v4781_v36 = vrot.slane %v4779_v47, 6  ;;  %v14571_v26 = vpack.c.bf16 %v4495_v55, %v4495_v55  ;;  %v23264_v16 = vld [vmem:[#allocation45_spill] sm:$0xff]  ;;  %v23268_v55 = vld [vmem:[#allocation71_spill] sm:$0xff] }
 0x24e   : > { %v4784_v60 = vrot.slane %v4782_v8, 7  ;;  %v4500_v61 = vsel %vm19836_vm9, %v4464_v19, 0.0  ;;  %v4462_v56 = vmax.f32 %v4426_v0, 0.0  ;;  %v4388_v7 = vmul.f32 %v16244_v58, %v19418_v6  ;;  %v19927_v19 = vpop.f32.mrb[29].mxu0 }
 0x24f   : > { %v4755_v27 = vor.u32 %v4754_v21, %v4751_v2  ;;  %v4759_v41 = vshrl.u32 %v14571_v26, 16  ;;  %v4762_v46 = vshll.u32 %v14571_v26, 16  ;;  %v14576_v15 = vpack.c.bf16 %v4500_v61, %v4500_v61  ;;  %v17280_v21 = vld [vmem:[#allocation2 + $0x8] sm:$0xff]  }
 0x250   : > { %vm23262_vm0 = vnez %v23261_v62  ;;  %v23266_v8 = vmov 0  ;;  %v4785_v0 = vor.u32 %v4784_v60, %v4781_v36  ;;  %v4498_v58 = vsel %vm19857_vm14, %v4462_v56, 0.0  ;;  %v19934_v62 = vpop.f32.mrb[30].mxu0 }
 0x251   : > { %v23265_v47 = vsel %vm23262_vm0, %v23263_v11, %v23264_v16  ;;  %v4429_v2 = vadd.f32 %v19467_v43, %v4388_v7  ;;  %v16245_v26 = vadd.f32 %v19750_v17, %v23268_v55  ;;  %23269 = vst [vmem:[#allocation61_spill] sm:$0xff] %v19934_v62  ;;  %v23270_v61 = vrot.slane %v19821_v63, 4  ;;  %v19943_v17 = vpop.f32.mrb[31].mxu0 }
 0x252   : > { %vm19923_vm13 = vcmp.lt.s32.totalorder %v23265_v47, 16  ;;  %v4757_v16 = vrot.slane %v4755_v27, 4  ;;  %v4761_v47 = vrot.slane %v4759_v41, 6  ;;  %v4764_v13 = vrot.slane %v4762_v46, 7 }
 0x253   : > { %v23267_v8 = vsel %vm19923_vm13, 4294967295, %v23266_v8  ;;  %v4756_v11 = vsel %vm19611_vm6, %v23270_v61, %v4755_v27  ;;  %vm23271_vm0 = vcmask 257024   ;;  %v4786_v36 = vsel %vm19611_vm6, %v4777_v1, %v4785_v0 }
 0x254   : > { %5042 = vst.msk [vmem:[#allocation2 + $0x38] sm:$0xf] %vm23271_vm0, %v4756_v11  ;;  %v4787_v7 = vrot.slane %v4785_v0, 4  ;;  %v4809_v60 = vshrl.u32 %v14576_v15, 16  ;;  %v4812_v56 = vshll.u32 %v14576_v15, 16  ;;  %vm23272_vm4 = vmmov %vm23271_vm0  ;;  %v4765_v55 = vor.u32 %v4764_v13, %v4761_v47  ;;  %v19949_v15 = vld [vmem:[#allocation2 + $0x10] sm:$0xff]  }
 0x255   : > { %5045 = vst.msk [vmem:[#allocation2 + $0x44] sm:$0xf] %vm23272_vm4, %v4786_v36  ;;  %v14574_v63 = vpack.c.bf16 %v4498_v58, %v4498_v58  ;;  %v4465_v29 = vmax.f32 %v4429_v2, 0.0  ;;  %v4386_v61 = vmul.f32 %v16245_v26, %v19418_v6  ;;  %v5218_v46 = vshll.u32 %v17280_v21, 16  ;;  %v19957_v26 = vpop.f32.mrb[32].mxu0 }
 0x256   : > { %v4811_v27 = vrot.slane %v4809_v60, 6  ;;  %v4814_v41 = vrot.slane %v4812_v56, 7  ;;  %v5222_v44 = vshrl.u32 %v17280_v21, 16  ;;  %v4766_v11 = vsel %vm19611_vm6, %v4757_v16, %v4765_v55  ;;  %v23273_v56 = vld [vmem:[#allocation62_spill] sm:$0xff] }
 0x257   : > { %v4767_v1 = vrot.slane %v4765_v55, 4  ;;  %v4789_v0 = vshrl.u32 %v14574_v63, 16  ;;  %v4792_v62 = vshll.u32 %v14574_v63, 16  ;;  %5043 = vst.msk [vmem:[#allocation2 + $0x3c] sm:$0xf] %vm23271_vm0, %v4766_v11  ;;  %v4501_v13 = vsel %vm19902_vm7, %v4465_v29, 0.0 }
 0x258   : > { %v19952_v36 = vor.u32 %v4814_v41, %v4811_v27  ;;  %v4427_v58 = vadd.f32 %v19467_v43, %v4386_v61  ;;  %v5220_v2 = vrot.slane %v5218_v46, 1  ;;  %v14577_v60 = vpack.c.bf16 %v4501_v13, %v4501_v13  ;;  %v23275_v55 = vld [vmem:[#allocation59_spill] sm:$0xff]  ;;  %v23276_v63 = vld [vmem:[#allocation52_spill] sm:$0xff]  ;;  %v19971_v29 = vpop.f32.mrb[33].mxu0 }
 0x259   : > { %v4776_v21 = vsel %vm19611_vm6, %v4767_v1, %v19881_v22  ;;  %v4791_v16 = vrot.slane %v4789_v0, 6  ;;  %v4794_v47 = vrot.slane %v4792_v62, 7  ;;  %vm23274_vm4 = vnez %v23273_v56  ;;  %v23281_v22 = vld [vmem:[#allocation47_spill] sm:$0xff] }
 0x25a   : > { %v23277_v27 = vsel %vm23274_vm4, %v23275_v55, %v23276_v63  ;;  %v23278_v41 = vmov 0  ;;  %vm23280_vm7 = vcmask 257024   ;;  %v4817_v61 = vrot.slane %v19952_v36, 4 }
 0x25b   : > { %vm19967_vm0 = vcmp.lt.s32.totalorder %v23277_v27, 16  ;;  %5044 = vst.msk [vmem:[#allocation2 + $0x40] sm:$0xf] %vm23280_vm7, %v4776_v21  ;;  %v4463_v46 = vmax.f32 %v4427_v58, 0.0  ;;  %vm23282_vm14 = vsmask.f32 7424  ;;  %v5224_v11 = vor.u32 %v5222_v44, %v5220_v2 }
 0x25c   : > { %v23279_v41 = vsel %vm19967_vm0, 4294967295, %v23278_v41  ;;  %v5221_v62 = vsel %vm23282_vm14, %v23281_v22, %v5220_v2  ;;  %vm23283_vm9 = vnez %v23010_v54  ;;  %v23285_v0 = vmov 0  ;;  %v19995_v21 = vpop.f32.mrb[34].mxu0  ;;  %v20031_v22 = vld [vmem:[#allocation2 + $0x18] sm:$0xff]  }
 0x25d   : > { %v23284_v1 = vsel %vm23283_vm9, %v19206_v38, %v19098_v42  ;;  %v23288_v13 = vsel %vm23287_vm1, %v19214_v10, %v19155_v23  ;;  %v23289_v58 = vmov 0  ;;  %v4795_v44 = vor.u32 %v4794_v47, %v4791_v16  ;;  %v19999_v38 = vpop.f32.mrb[35].mxu0 }
 0x25e   : > { %vm19982_vm4 = vcmp.lt.s32.totalorder %v23284_v1, 16  ;;  %vm19991_vm7 = vcmp.lt.s32.totalorder %v23288_v13, 16  ;;  %v4819_v54 = vshrl.u32 %v14577_v60, 16  ;;  %v4822_v2 = vshll.u32 %v14577_v60, 16 }
 0x25f   : > { %v23286_v0 = vsel %vm19982_vm4, 4294967295, %v23285_v0  ;;  %v23290_v58 = vsel %vm19991_vm7, 4294967295, %v23289_v58  ;;  %vm23291_vm14 = vcmask 261120   ;;  %v5226_v42 = vshll.u32 %v19949_v15, 16 }
 0x260   : > { %15508 = vmatprep.mubr.msk.bf16.mxu1 %vm23291_vm14, %v5221_v62  ;;  %v4499_v45 = vsel %vm19923_vm13, %v4463_v46, 0.0  ;;  %v16246_v23 = vadd.f32 %v19791_v25, %v19695_v30  ;;  %v16247_v10 = vadd.f32 %v19796_v39, %v19698_v34  ;;  %v16248_v16 = vadd.f32 %v19803_v33, %v19710_v12  ;;  %v17291_v33 = vld [vmem:[%s22721_s2 + $0x8] sm:$0xff]  }
 0x261   : > { %v4796_v47 = vsel %vm19611_vm6, %v4787_v7, %v4795_v44  ;;  %v4797_v60 = vrot.slane %v4795_v44, 4  ;;  %v4821_v56 = vrot.slane %v4819_v54, 6  ;;  %v4824_v55 = vrot.slane %v4822_v2, 7 }
 0x262   : > { %vm23292_vm1 = vcmask 257024   ;;  %v14575_v63 = vpack.c.bf16 %v4499_v45, %v4499_v45  ;;  %v5228_v27 = vrot.slane %v5226_v42, 1  ;;  %v4391_v46 = vmul.f32 %v16246_v23, %v19418_v6 }
 0x263   : > { %5046 = vst.msk [vmem:[#allocation2 + $0x48] sm:$0xf] %vm23292_vm1, %v4796_v47  ;;  %v4389_v30 = vmul.f32 %v16247_v10, %v19418_v6  ;;  %vm23293_vm9 = vnez %v23020_v51  ;;  %v23295_v12 = vmov 0  ;;  %v20026_v25 = vor.u32 %v4824_v55, %v4821_v56  ;;  %v20052_v47 = vld [vmem:[%s22721_s2 + $0x20] sm:$0xff]  }
 0x264   : > { %v23294_v34 = vsel %vm23293_vm9, %v19223_v31, %v19186_v20  ;;  %v4392_v39 = vmul.f32 %v16248_v16, %v19418_v6  ;;  %v16249_v7 = vadd.f32 %v19816_v49, %v19716_v40  ;;  %v5230_v51 = vshrl.u32 %v19949_v15, 16 }
 0x265   : > { %vm20019_vm14 = vcmp.lt.s32.totalorder %v23294_v34, 16  ;;  %v4799_v20 = vshrl.u32 %v14575_v63, 16  ;;  %v4802_v31 = vshll.u32 %v14575_v63, 16  ;;  %vm23297_vm1 = vsmask.f32 7424 }
 0x266   : > { %v23296_v12 = vsel %vm20019_vm14, 4294967295, %v23295_v12  ;;  %v5229_v62 = vsel %vm23297_vm1, %v5224_v11, %v5228_v27  ;;  %v4432_v1 = vadd.f32 %v19467_v43, %v4391_v46  ;;  %v4826_v13 = vsel %vm19611_vm6, %v4817_v61, %v20026_v25  ;;  %v17448_v11 = vld [vmem:[%s22721_s2] sm:$0xff]  }
 0x267   : > { %v4827_v44 = vrot.slane %v20026_v25, 4  ;;  %vm23298_vm9 = vcmask 261120   ;;  %v4430_v40 = vadd.f32 %v19467_v43, %v4389_v30  ;;  %v4433_v49 = vadd.f32 %v19467_v43, %v4392_v39 }
 0x268   : > { %15509 = vmatmul.mubr.msk.bf16.vlgmr.msra.gmra.mrb[36].mxu1 %vm23298_vm9, %v5229_v62  ;;  %vm23299_vm13 = vcmask 257024   ;;  %v4801_v54 = vrot.slane %v4799_v20, 6  ;;  %v4804_v2 = vrot.slane %v4802_v31, 7  ;;  %v4468_v42 = vmax.f32 %v4432_v1, 0.0 }
 0x269   : > { %5049 = vst.msk [vmem:[#allocation2 + $0x54] sm:$0xf] %vm23299_vm13, %v4826_v13  ;;  %15545 = vmatpush3.bf16.msra.mxu1 %v17448_v11  ;;  %v4390_v61 = vmul.f32 %v16249_v7, %v19418_v6  ;;  %v4466_v45 = vmax.f32 %v4430_v40, 0.0  ;;  %v4469_v23 = vmax.f32 %v4433_v49, 0.0  ;;  %v5232_v10 = vor.u32 %v5230_v51, %v5228_v27  ;;  %v20066_v13 = vld [vmem:[#allocation2 + $0x20] sm:$0xff]  }
 0x26a   : > { %v5234_v16 = vshll.u32 %v20031_v22, 16  ;;  %15546 = vmatprep.subr.bf16.mxu1 %v17291_v33  ;;  %v4805_v56 = vor.u32 %v4804_v2, %v4801_v54  ;;  %v4504_v55 = vsel %vm19967_vm0, %v4468_v42, 0.0  ;;  %v5238_v46 = vshrl.u32 %v20031_v22, 16 }
 0x26b   : > { %v4431_v63 = vadd.f32 %v19467_v43, %v4390_v61  ;;  %v14580_v6 = vpack.c.bf16 %v4504_v55, %v4504_v55  ;;  %v4502_v27 = vsel %vm19982_vm4, %v4466_v45, 0.0  ;;  %v4505_v30 = vsel %vm19991_vm7, %v4469_v23, 0.0  ;;  %vm23300_vm7 = vmmov %vm23299_vm13 }
 0x26c   : > { %v5236_v34 = vrot.slane %v5234_v16, 1  ;;  %v4806_v39 = vsel %vm19611_vm6, %v4797_v60, %v4805_v56  ;;  %v4807_v7 = vrot.slane %v4805_v56, 4  ;;  %v14578_v51 = vpack.c.bf16 %v4502_v27, %v4502_v27 }
 0x26d   : > { %v14581_v20 = vpack.c.bf16 %v4505_v30, %v4505_v30  ;;  %15547 = vmatpush3.bf16.msra.mxu1 %v17291_v33  ;;  %5047 = vst.msk [vmem:[#allocation2 + $0x4c] sm:$0xf] %vm23299_vm13, %v4806_v39  ;;  %v4849_v43 = vshrl.u32 %v14580_v6, 16  ;;  %v4852_v31 = vshll.u32 %v14580_v6, 16  ;;  %v4467_v62 = vmax.f32 %v4431_v63, 0.0 }
 0x26e   : > { %v5237_v1 = vsel %vm23297_vm1, %v5232_v10, %v5236_v34  ;;  %15584 = vmatprep.subr.bf16.mxu1 %v20052_v47  ;;  %v4816_v40 = vsel %vm19611_vm6, %v4807_v7, %v19952_v36  ;;  %v4829_v60 = vshrl.u32 %v14578_v51, 16  ;;  %v4832_v49 = vshll.u32 %v14578_v51, 16 }
 0x26f   : > { %v4859_v54 = vshrl.u32 %v14581_v20, 16  ;;  %15512 = vmatprep.mubr.msk.bf16.mxu1 %vm23298_vm9, %v5237_v1  ;;  %5048 = vst.msk [vmem:[#allocation2 + $0x50] sm:$0xf] %vm23300_vm7, %v4816_v40  ;;  %v4851_v33 = vrot.slane %v4849_v43, 6  ;;  %v4854_v2 = vrot.slane %v4852_v31, 7  ;;  %v4862_v11 = vshll.u32 %v14581_v20, 16 }
 0x270   : > { %v4503_v42 = vsel %vm20019_vm14, %v4467_v62, 0.0  ;;  %v4831_v61 = vrot.slane %v4829_v60, 6  ;;  %v4834_v45 = vrot.slane %v4832_v49, 7  ;;  %vm23301_vm13 = vnez %v23025_v28  ;;  %v23323_v40 = vld [vmem:[#allocation25_spill] sm:$0xff]  ;;  %v23324_v60 = vld [vmem:[#allocation15_spill] sm:$0xff] }
 0x271   : > { %v4861_v23 = vrot.slane %v4859_v54, 6  ;;  %v14579_v10 = vpack.c.bf16 %v4503_v42, %v4503_v42  ;;  %v23302_v36 = vsel %vm23301_vm13, %v19231_v24, %v19197_v53  ;;  %v4855_v56 = vor.u32 %v4854_v2, %v4851_v33  ;;  %v23325_v54 = vld [vmem:[#allocation17_spill] sm:$0xff]  ;;  %v23326_v33 = vld [vmem:[#allocation55_spill] sm:$0xff]  ;;  %v20149_v42 = vld [vmem:[%s22723_s4 + $0x1] ss:$0 sm:$0xff] }
 0x272   : > { %vm20081_vm1 = vcmp.lt.s32.totalorder %v23302_v36, 16  ;;  %v4864_v55 = vrot.slane %v4862_v11, 7  ;;  %v5240_v63 = vor.u32 %v5238_v46, %v5236_v34  ;;  %v5242_v6 = vshll.u32 %v20066_v13, 16  ;;  %v20110_v34 = vld [vmem:[#allocation2 + $0x28] sm:$0xff]   ;;  %v20144_v11 = vld [vmem:[#allocation2 + $0x30] sm:$0xff]  }
 0x273   : > { %vm23305_vm7 = vnez %v23031_v18  ;;  %v4835_v28 = vor.u32 %v4834_v45, %v4831_v61  ;;  %v4839_v53 = vshrl.u32 %v14579_v10, 16  ;;  %v4842_v24 = vshll.u32 %v14579_v10, 16 }
 0x274   : > { %v23306_v27 = vsel %vm23305_vm7, %v19245_v4, %v19210_v48  ;;  %v16250_v39 = vadd.f32 %v19865_v59, %v19752_v52  ;;  %v4857_v7 = vrot.slane %v4855_v56, 4  ;;  %v20097_v51 = vor.u32 %v4864_v55, %v4861_v23 }
 0x275   : > { %vm20091_vm9 = vcmp.lt.s32.totalorder %v23306_v27, 16  ;;  %v5244_v46 = vrot.slane %v5242_v6, 1  ;;  %v16251_v18 = vadd.f32 %v19876_v37, %v19756_v14  ;;  %vm23309_vm13 = vnez %v23035_v32  ;;  %v23314_v32 = vld [vmem:[#allocation70_spill] sm:$0xff] }
 0x276   : > { %v23310_v48 = vsel %vm23309_vm13, %v19272_v5, %v19217_v35  ;;  %v4836_v52 = vsel %vm19611_vm6, %v4827_v44, %v4835_v28  ;;  %v4837_v59 = vrot.slane %v4835_v28, 4  ;;  %v4841_v20 = vrot.slane %v4839_v53, 6  ;;  %v23315_v14 = vld [vmem:[#allocation66_spill] sm:$0xff] }
 0x277   : > { %vm20106_vm7 = vcmp.lt.s32.totalorder %v23310_v48, 16  ;;  %v4844_v43 = vrot.slane %v4842_v24, 7  ;;  %vm23313_vm14 = vnez %v23040_v50  ;;  %vm23319_vm4 = vcmask 257024   ;;  %v20134_v50 = vld [vmem:[%s22723_s4] ss:$0 sm:$0xff] }
 0x278   : > { %v23316_v37 = vsel %vm23313_vm14, %v23314_v32, %v23315_v14  ;;  %5050 = vst.msk [vmem:[#allocation2 + $0x58] sm:$0xf] %vm23319_vm4, %v4836_v52  ;;  %v4866_v35 = vsel %vm19611_vm6, %v4857_v7, %v20097_v51  ;;  %v4867_v25 = vrot.slane %v20097_v51, 4  ;;  %vm23320_vm0 = vsmask.f32 7424  ;;  %vm23321_vm14 = vmmov %vm23319_vm4  ;;  %v23331_v32 = vld [vmem:[#allocation80_spill] sm:$0xff] }
 0x279   : > { %vm20121_vm13 = vcmp.lt.s32.totalorder %v23316_v37, 16  ;;  %v5245_v44 = vsel %vm23320_vm0, %v5240_v63, %v5244_v46  ;;  %v4395_v31 = vmul.f32 %v20134_v50, %v16250_v39  ;;  %5053 = vst.msk [vmem:[#allocation2 + $0x64] sm:$0xf] %vm23321_vm14, %v4866_v35  ;;  %v4845_v62 = vor.u32 %v4844_v43, %v4841_v20  ;;  %vm23328_vm0 = vmmov %vm23319_vm4  ;;  %v23332_v14 = vld [vmem:[#allocation72_spill] sm:$0xff] }
 0x27a   : > { %vm23322_vm8 = vcmask 261120   ;;  %v4393_v1 = vmul.f32 %v20134_v50, %v16251_v18  ;;  %v16252_v49 = vadd.f32 %v23324_v60, %v23323_v40  ;;  %v16253_v2 = vadd.f32 %v23326_v33, %v23325_v54  ;;  %v23337_v60 = vld [vmem:[#allocation13_spill] sm:$0xff]  ;;  %v23338_v54 = vld [vmem:[#allocation42_spill] sm:$0xff] }
 0x27b   : > { %15513 = vmatmul.mubr.msk.bf16.gmra.mrb[40].mxu1 %vm23322_vm8, %v5245_v44  ;;  %v4436_v61 = vadd.f32 %v20149_v42, %v4395_v31  ;;  %v5246_v45 = vshrl.u32 %v20066_v13, 16  ;;  %v5250_v23 = vshll.u32 %v20110_v34, 16  ;;  %v5254_v10 = vshrl.u32 %v20110_v34, 16  ;;  %vm23327_vm8 = vmmov %vm23319_vm4 }
 0x27c   : > { %v4846_v36 = vsel %vm19611_vm6, %v4837_v59, %v4845_v62  ;;  %v4847_v55 = vrot.slane %v4845_v62, 4  ;;  %v4434_v63 = vadd.f32 %v20149_v42, %v4393_v1  ;;  %v4396_v6 = vmul.f32 %v20134_v50, %v16252_v49 }
 0x27d   : > { %5051 = vst.msk [vmem:[#allocation2 + $0x5c] sm:$0xf] %vm23327_vm8, %v4846_v36  ;;  %v4472_v27 = vmax.f32 %v4436_v61, 0.0  ;;  %v4394_v28 = vmul.f32 %v20134_v50, %v16253_v2  ;;  %v5248_v53 = vor.u32 %v5246_v45, %v5244_v46  ;;  %v5252_v24 = vrot.slane %v5250_v23, 1  ;;  %v23341_v36 = vld [vmem:[#allocation84_spill] sm:$0xff] }
 0x27e   : > { %v4856_v39 = vsel %vm19611_vm6, %v4847_v55, %v4855_v56  ;;  %v4470_v7 = vmax.f32 %v4434_v63, 0.0  ;;  %v4437_v18 = vadd.f32 %v20149_v42, %v4396_v6  ;;  %v5258_v48 = vshll.u32 %v20144_v11, 16  ;;  %v23342_v55 = vld [vmem:[#allocation73_spill] sm:$0xff] }
 0x27f   : > { %5052 = vst.msk [vmem:[#allocation2 + $0x60] sm:$0xf] %vm23328_vm0, %v4856_v39  ;;  %v4508_v52 = vsel %vm20081_vm1, %v4472_v27, 0.0  ;;  %v4435_v59 = vadd.f32 %v20149_v42, %v4394_v28  ;;  %vm23329_vm4 = vsmask.f32 7424  ;;  %v5256_v43 = vor.u32 %v5254_v10, %v5252_v24 }
 0x280   : > { %v5253_v20 = vsel %vm23329_vm4, %v5248_v53, %v5252_v24  ;;  %v23333_v56 = vsel %vm19404_vm2, %v23331_v32, %v23332_v14  ;;  %v14584_v35 = vpack.c.bf16 %v4508_v52, %v4508_v52  ;;  %v4506_v44 = vsel %vm20091_vm9, %v4470_v7, 0.0  ;;  %vm23339_vm2 = vmmov %vm23329_vm4 }
 0x281   : > { %vm20175_vm14 = vcmp.lt.s32.totalorder %v23333_v56, 16  ;;  %v4473_v31 = vmax.f32 %v4437_v18, 0.0  ;;  %vm23336_vm8 = vcmask 261120   ;;  %v20182_v62 = vrot.slane %v5258_v48, 1 }
 0x282   : > { %15516 = vmatprep.mubr.msk.bf16.mxu1 %vm23336_vm8, %v5253_v20  ;;  %v14582_v1 = vpack.c.bf16 %v4506_v44, %v4506_v44  ;;  %v4471_v40 = vmax.f32 %v4435_v59, 0.0  ;;  %v16254_v49 = vadd.f32 %v19916_v57, %v23337_v60  ;;  %v16255_v33 = vadd.f32 %v19927_v19, %v23338_v54  ;;  %vm23346_vm4 = vmmov %vm23336_vm8 }
 0x283   : > { %v4889_v2 = vshrl.u32 %v14584_v35, 16  ;;  %v4892_v61 = vshll.u32 %v14584_v35, 16  ;;  %v4509_v45 = vsel %vm20106_vm7, %v4473_v31, 0.0  ;;  %v5261_v23 = vsel %vm23339_vm2, %v5256_v43, %v20182_v62 }
 0x284   : > { %v23343_v63 = vsel %vm19433_vm10, %v23341_v36, %v23342_v55  ;;  %v4869_v57 = vshrl.u32 %v14582_v1, 16  ;;  %v4872_v27 = vshll.u32 %v14582_v1, 16  ;;  %v14585_v19 = vpack.c.bf16 %v4509_v45, %v4509_v45  ;;  %15517 = vmatmul.mubr.msk.bf16.gmra.mrb[44].mxu1 %vm23346_vm4, %v5261_v23  ;;  %v23348_v1 = vld [vmem:[#allocation88_spill] sm:$0xff] }
 0x285   : > { %vm20197_vm0 = vcmp.lt.s32.totalorder %v23343_v63, 16  ;;  %v4507_v28 = vsel %vm20121_vm13, %v4471_v40, 0.0  ;;  %v4891_v53 = vrot.slane %v4889_v2, 6  ;;  %v4894_v24 = vrot.slane %v4892_v61, 7  ;;  %v23349_v40 = vld [vmem:[#allocation74_spill] sm:$0xff]  ;;  %v23355_v61 = vld [vmem:[#allocation75_spill] sm:$0xff] }
 0x286   : > { %v14583_v39 = vpack.c.bf16 %v4507_v28, %v4507_v28  ;;  %v4399_v7 = vmul.f32 %v20134_v50, %v16254_v49  ;;  %v4871_v18 = vrot.slane %v4869_v57, 6  ;;  %v4874_v48 = vrot.slane %v4872_v27, 7  ;;  %v23354_v2 = vld [vmem:[#allocation90_spill] sm:$0xff] }
 0x287   : > { %v4899_v52 = vshrl.u32 %v14585_v19, 16  ;;  %v4902_v59 = vshll.u32 %v14585_v19, 16  ;;  %v4895_v20 = vor.u32 %v4894_v24, %v4891_v53  ;;  %v4397_v44 = vmul.f32 %v20134_v50, %v16255_v33  ;;  %v23360_v24 = vld [vmem:[#allocation51_spill] sm:$0xff] }
 0x288   : > { %v4879_v43 = vshrl.u32 %v14583_v39, 16  ;;  %v4882_v46 = vshll.u32 %v14583_v39, 16  ;;  %v4440_v32 = vadd.f32 %v20149_v42, %v4399_v7  ;;  %v4875_v14 = vor.u32 %v4874_v48, %v4871_v18  ;;  %v23361_v39 = vld [vmem:[#allocation61_spill] sm:$0xff]  ;;  %v23362_v18 = vld [vmem:[#allocation28_spill] sm:$0xff] }
 0x289   : > { %v4901_v56 = vrot.slane %v4899_v52, 6  ;;  %v4904_v35 = vrot.slane %v4902_v59, 7  ;;  %v23350_v60 = vsel %vm19458_vm15, %v23348_v1, %v23349_v40  ;;  %v23351_v49 = vmov 0  ;;  %v23363_v48 = vld [vmem:[#allocation97_spill] sm:$0xff]  ;;  %v20256_v40 = vld [vmem:[#allocation2 + $0x40] sm:$0xff]  }
 0x28a   : > { %vm20212_vm10 = vcmp.lt.s32.totalorder %v23350_v60, 16  ;;  %v23356_v45 = vsel %vm19477_vm3, %v23354_v2, %v23355_v61  ;;  %v23357_v23 = vmov 0  ;;  %v4897_v10 = vrot.slane %v4895_v20, 4 }
 0x28b   : > { %v23352_v49 = vsel %vm20212_vm10, 4294967295, %v23351_v49  ;;  %vm20221_vm8 = vcmp.lt.s32.totalorder %v23356_v45, 16  ;;  %v4881_v33 = vrot.slane %v4879_v43, 6  ;;  %v4884_v36 = vrot.slane %v4882_v46, 7  ;;  %v20245_v46 = vld [vmem:[#allocation2 + $0x38] sm:$0xff]  }
 0x28c   : > { %v23358_v23 = vsel %vm20221_vm8, 4294967295, %v23357_v23  ;;  %v4476_v55 = vmax.f32 %v4440_v32, 0.0  ;;  %v4876_v63 = vsel %vm19611_vm6, %v4867_v25, %v4875_v14  ;;  %v4877_v57 = vrot.slane %v4875_v14, 4 }
 0x28d   : > { %v20229_v27 = vor.u32 %v4904_v35, %v4901_v56  ;;  %v4438_v19 = vadd.f32 %v20149_v42, %v4397_v44  ;;  %vm23359_vm15 = vcmask 257024   ;;  %v4885_v28 = vor.u32 %v4884_v36, %v4881_v33 }
 0x28e   : > { %5054 = vst.msk [vmem:[#allocation2 + $0x68] sm:$0xf] %vm23359_vm15, %v4876_v63  ;;  %v4512_v53 = vsel %vm20175_vm14, %v4476_v55, 0.0  ;;  %v16256_v7 = vadd.f32 %v23361_v39, %v23360_v24  ;;  %v16257_v51 = vadd.f32 %v19943_v17, %v23362_v18  ;;  %vm690_vm3 = vcmp.ne.s32.totalorder %v23363_v48, 0  ;;  %vm23364_vm4 = vmmov %vm23359_vm15  ;;  %v23367_v39 = vld [vmem:[#allocation92_spill] sm:$0xff] }
 0x28f   : > { %v4906_v25 = vsel %vm19611_vm6, %v4897_v10, %v20229_v27  ;;  %v4907_v52 = vrot.slane %v20229_v27, 4  ;;  %v14588_v59 = vpack.c.bf16 %v4512_v53, %v4512_v53  ;;  %v4474_v43 = vmax.f32 %v4438_v19, 0.0  ;;  %vm23365_vm15 = vmmov %vm23364_vm4 }
 0x290   : > { %5057 = vst.msk [vmem:[#allocation2 + $0x74] sm:$0xf] %vm23364_vm4, %v4906_v25  ;;  %v4886_v32 = vsel %vm19611_vm6, %v4877_v57, %v4885_v28  ;;  %v4887_v17 = vrot.slane %v4885_v28, 4  ;;  %v4400_v14 = vmul.f32 %v20134_v50, %v16256_v7  ;;  %v4398_v56 = vmul.f32 %v20134_v50, %v16257_v51  ;;  %v23368_v7 = vld [vmem:[#allocation77_spill] sm:$0xff] }
 0x291   : > { %5055 = vst.msk [vmem:[#allocation2 + $0x6c] sm:$0xf] %vm23365_vm15, %v4886_v32  ;;  %v4929_v35 = vshrl.u32 %v14588_v59, 16  ;;  %v4932_v44 = vshll.u32 %v14588_v59, 16  ;;  %v4510_v31 = vsel %vm20197_vm0, %v4474_v43, 0.0  ;;  %v5262_v1 = vshrl.u32 %v20144_v11, 16 }
 0x292   : > { %v4896_v60 = vsel %vm19611_vm6, %v4887_v17, %v4895_v20  ;;  %v14586_v54 = vpack.c.bf16 %v4510_v31, %v4510_v31  ;;  %v4441_v2 = vadd.f32 %v20149_v42, %v4400_v14  ;;  %v4439_v61 = vadd.f32 %v20149_v42, %v4398_v56 }
 0x293   : > { %5056 = vst.msk [vmem:[#allocation2 + $0x70] sm:$0xf] %vm23364_vm4, %v4896_v60  ;;  %v4931_v45 = vrot.slane %v4929_v35, 6  ;;  %v4934_v10 = vrot.slane %v4932_v44, 7  ;;  %v5264_v33 = vor.u32 %v5262_v1, %v20182_v62  ;;  %v5266_v36 = vshll.u32 %v20245_v46, 16  ;;  %vm23372_vm4 = vmmov %vm23339_vm2  ;;  %v23374_v1 = vld [vmem:[#allocation53_spill] sm:$0xff] }
 0x294   : > { %v4909_v55 = vshrl.u32 %v14586_v54, 16  ;;  %v4912_v63 = vshll.u32 %v14586_v54, 16  ;;  %v4477_v57 = vmax.f32 %v4441_v2, 0.0  ;;  %v4475_v27 = vmax.f32 %v4439_v61, 0.0 }
 0x295   : > { %v4935_v19 = vor.u32 %v4934_v10, %v4931_v45  ;;  %v5268_v28 = vrot.slane %v5266_v36, 1  ;;  %v5270_v20 = vshrl.u32 %v20245_v46, 16  ;;  %v5274_v53 = vshll.u32 %v20256_v40, 16  ;;  %v23376_v36 = vld [vmem:[#allocation94_spill] sm:$0xff]  ;;  %v20333_v10 = vld [vmem:[#allocation2 + $0x48] sm:$0xff]  }
 0x296   : > { %v23369_v18 = vsel %vm19492_vm12, %v23367_v39, %v23368_v7  ;;  %v4911_v62 = vrot.slane %v4909_v55, 6  ;;  %v4914_v25 = vrot.slane %v4912_v63, 7  ;;  %v4513_v59 = vsel %vm20212_vm10, %v4477_v57, 0.0  ;;  %v23377_v55 = vld [vmem:[#allocation81_spill] sm:$0xff] }
 0x297   : > { %vm20272_vm15 = vcmp.lt.s32.totalorder %v23369_v18, 16  ;;  %v4511_v43 = vsel %vm20221_vm8, %v4475_v27, 0.0  ;;  %v4937_v32 = vrot.slane %v4935_v19, 4  ;;  %v14589_v17 = vpack.c.bf16 %v4513_v59, %v4513_v59  ;;  %v23382_v27 = vld [vmem:[#allocation95_spill] sm:$0xff] }
 0x298   : > { %v14587_v14 = vpack.c.bf16 %v4511_v43, %v4511_v43  ;;  %v5269_v56 = vsel %vm23372_vm4, %v5264_v33, %v5268_v28  ;;  %v4915_v35 = vor.u32 %v4914_v25, %v4911_v62  ;;  %vm23373_vm2 = vcmask 261120  }
 0x299   : > { %15520 = vmatprep.mubr.msk.bf16.mxu1 %vm23373_vm2, %v5269_v56  ;;  %v5272_v44 = vor.u32 %v5270_v20, %v5268_v28  ;;  %v5276_v31 = vrot.slane %v5274_v53, 1  ;;  %v16258_v60 = vadd.f32 %v19957_v26, %v23374_v1  ;;  %v4939_v54 = vshrl.u32 %v14589_v17, 16  ;;  %v23383_v28 = vld [vmem:[#allocation85_spill] sm:$0xff] }
 0x29a   : > { %v4942_v2 = vshll.u32 %v14589_v17, 16  ;;  %v4919_v61 = vshrl.u32 %v14587_v14, 16  ;;  %v4922_v45 = vshll.u32 %v14587_v14, 16  ;;  %v23378_v63 = vsel %vm19505_vm5, %v23376_v36, %v23377_v55  ;;  %v23393_v14 = vld [vmem:[#allocation30_spill] sm:$0xff]  ;;  %v23394_v1 = vld [vmem:[#allocation29_spill] sm:$0xff] }
 0x29b   : > { %vm20289_vm12 = vcmp.lt.s32.totalorder %v23378_v63, 16  ;;  %v23379_v57 = vmov 0  ;;  %v23384_v20 = vsel %vm19525_vm11, %v23382_v27, %v23383_v28  ;;  %v23385_v26 = vmov 0 }
 0x29c   : > { %v23380_v57 = vsel %vm20289_vm12, 4294967295, %v23379_v57  ;;  %vm20298_vm2 = vcmp.lt.s32.totalorder %v23384_v20, 16  ;;  %vm23387_vm4 = vcmp.lt.s32.totalorder %v23363_v48, 0  ;;  %v4916_v24 = vsel %vm19611_vm6, %v4907_v52, %v4915_v35 }
 0x29d   : > { %v23386_v26 = vsel %vm20298_vm2, 4294967295, %v23385_v26  ;;  %vm20306_vm8 = vmand %vm23387_vm4, %vm690_vm3  ;;  %v4917_v39 = vrot.slane %v4915_v35, 4  ;;  %vm23390_vm5 = vsmask.f32 7424  ;;  %v4403_v18 = vmul.f32 %v20134_v50, %v16258_v60  ;;  %v23395_v35 = vld [vmem:[#allocation99_spill] sm:$0xff] }
 0x29e   : > { %v5277_v7 = vsel %vm23390_vm5, %v5272_v44, %v5276_v31  ;;  %vm23391_vm11 = vcmask 257024   ;;  %v4941_v62 = vrot.slane %v4939_v54, 6  ;;  %v4944_v25 = vrot.slane %v4942_v2, 7 }
 0x29f   : > { %5058 = vst.msk [vmem:[#allocation2 + $0x78] sm:$0xf] %vm23391_vm11, %v4916_v24  ;;  %v4921_v59 = vrot.slane %v4919_v61, 6  ;;  %v4924_v43 = vrot.slane %v4922_v45, 7  ;;  %vm23392_vm10 = vcmask 261120   ;;  %v4444_v17 = vadd.f32 %v20149_v42, %v4403_v18  ;;  %v23398_v61 = vld [vmem:[#allocation18_spill] sm:$0xff] }
 0x2a0   : > { %15521 = vmatmul.mubr.msk.bf16.gmra.mrb[48].mxu1 %vm23392_vm10, %v5277_v7  ;;  %v16259_v56 = vadd.f32 %v19971_v29, %v23393_v14  ;;  %v16260_v52 = vadd.f32 %v19995_v21, %v23394_v1  ;;  %v834_v44 = vsel %vm20306_vm8, %v23395_v35, %v23363_v48  ;;  %v20325_v60 = vor.u32 %v4944_v25, %v4941_v62  ;;  %vm23399_vm10 = vmmov %vm23391_vm11 }
 0x2a1   : > { %v4925_v54 = vor.u32 %v4924_v43, %v4921_v59  ;;  %vm20327_vm3 = vcmp.lt.s32.totalorder %v834_v44, 16  ;;  %v23396_v2 = vmov 0  ;;  %v16261_v45 = vadd.f32 %v19999_v38, %v23398_v61  ;;  %v20344_v38 = vld [vmem:[#allocation2 + $0x50] sm:$0xff]   ;;  %vm23400_vm8 = vmmov %vm23399_vm10 }
 0x2a2   : > { %v23397_v2 = vsel %vm20327_vm3, 4294967295, %v23396_v2  ;;  %v4480_v29 = vmax.f32 %v4444_v17, 0.0  ;;  %v4401_v21 = vmul.f32 %v20134_v50, %v16259_v56  ;;  %v4404_v36 = vmul.f32 %v20134_v50, %v16260_v52  ;;  %vm23401_vm4 = vmmov %vm23400_vm8 }
 0x2a3   : > { %v5278_v55 = vshrl.u32 %v20256_v40, 16  ;;  %v4946_v48 = vsel %vm19611_vm6, %v4937_v32, %v20325_v60  ;;  %v4947_v63 = vrot.slane %v20325_v60, 4  ;;  %v4926_v33 = vsel %vm19611_vm6, %v4917_v39, %v4925_v54 }
 0x2a4   : > { %v4927_v27 = vrot.slane %v4925_v54, 4  ;;  %5061 = vst.msk [vmem:[#allocation2 + $0x84] sm:$0xf] %vm23399_vm10, %v4946_v48  ;;  %v4516_v28 = vsel %vm20272_vm15, %v4480_v29, 0.0  ;;  %v4442_v20 = vadd.f32 %v20149_v42, %v4401_v21  ;;  %v4445_v53 = vadd.f32 %v20149_v42, %v4404_v36  ;;  %v20368_v36 = vld [vmem:[#allocation2 + $0x58] sm:$0xff]  }
 0x2a5   : > { %5059 = vst.msk [vmem:[#allocation2 + $0x7c] sm:$0xf] %vm23400_vm8, %v4926_v33  ;;  %v4402_v32 = vmul.f32 %v20134_v50, %v16261_v45  ;;  %v14592_v39 = vpack.c.bf16 %v4516_v28, %v4516_v28  ;;  %v5280_v7 = vor.u32 %v5278_v55, %v5276_v31  ;;  %v5282_v18 = vshll.u32 %v20333_v10, 16  ;;  %v20371_v28 = vld [vmem:[#allocation2 + $0x60] sm:$0xff]  }
 0x2a6   : > { %v4936_v24 = vsel %vm19611_vm6, %v4927_v27, %v4935_v19  ;;  %v4478_v62 = vmax.f32 %v4442_v20, 0.0  ;;  %v4481_v25 = vmax.f32 %v4445_v53, 0.0  ;;  %vm22877_vm5 = vcmask 254976  }
 0x2a7   : > { %5060 = vst.msk [vmem:[#allocation2 + $0x80] sm:$0xf] %vm23401_vm4, %v4936_v24  ;;  %v4443_v59 = vadd.f32 %v20149_v42, %v4402_v32  ;;  %v5286_v43 = vshrl.u32 %v20333_v10, 16  ;;  %v4969_v17 = vshrl.u32 %v14592_v39, 16  ;;  %v4972_v14 = vshll.u32 %v14592_v39, 16  ;;  %v20374_v39 = vld [vmem:[#allocation2 + $0x68] sm:$0xff]  }
 0x2a8   : > { %v5284_v56 = vrot.slane %v5282_v18, 1  ;;  %v5290_v50 = vshll.u32 %v20344_v38, 16  ;;  %v4514_v19 = vsel %vm20289_vm12, %v4478_v62, 0.0  ;;  %v4517_v31 = vsel %vm20298_vm2, %v4481_v25, 0.0 }
 0x2a9   : > { %v4479_v1 = vmax.f32 %v4443_v59, 0.0  ;;  %v5294_v52 = vshrl.u32 %v20344_v38, 16  ;;  %v4971_v35 = vrot.slane %v4969_v17, 6  ;;  %v4974_v44 = vrot.slane %v4972_v14, 7 }
 0x2aa   : > { %v14590_v54 = vpack.c.bf16 %v4514_v19, %v4514_v19  ;;  %v14593_v42 = vpack.c.bf16 %v4517_v31, %v4517_v31  ;;  %vm23402_vm11 = vsmask.f32 7424  ;;  %v5288_v29 = vor.u32 %v5286_v43, %v5284_v56 }
 0x2ab   : > { %v4515_v61 = vsel %vm20327_vm3, %v4479_v1, 0.0  ;;  %v5285_v45 = vsel %vm23402_vm11, %v5280_v7, %v5284_v56  ;;  %v5292_v21 = vrot.slane %v5290_v50, 1  ;;  %v4975_v55 = vor.u32 %v4974_v44, %v4971_v35  ;;  %vm23404_vm8 = vmmov %vm23402_vm11  ;;  %v5068_v50 = vld [vmem:[#allocation2 + $0x98] sm:$0x3] }
 0x2ac   : > { %v4949_v48 = vshrl.u32 %v14590_v54, 16  ;;  %v4952_v33 = vshll.u32 %v14590_v54, 16  ;;  %v4979_v27 = vshrl.u32 %v14593_v42, 16  ;;  %vm23403_vm10 = vcmask 261120  }
 0x2ad   : > { %15524 = vmatprep.mubr.msk.bf16.mxu1 %vm23403_vm10, %v5285_v45  ;;  %v4982_v20 = vshll.u32 %v14593_v42, 16  ;;  %v14591_v53 = vpack.c.bf16 %v4515_v61, %v4515_v61  ;;  %v5293_v32 = vsel %vm23404_vm8, %v5288_v29, %v5292_v21  ;;  %v5296_v24 = vor.u32 %v5294_v52, %v5292_v21  ;;  %vm23405_vm4 = vmmov %vm23403_vm10  ;;  %v20381_v42 = vld [vmem:[#allocation2 + $0x70] sm:$0xff]  }
 0x2ae   : > { %v4977_v7 = vrot.slane %v4975_v55, 4  ;;  %v4951_v18 = vrot.slane %v4949_v48, 6  ;;  %v4954_v62 = vrot.slane %v4952_v33, 7  ;;  %v4981_v25 = vrot.slane %v4979_v27, 6  ;;  %15525 = vmatmul.mubr.msk.bf16.gmra.mrb[52].mxu1 %vm23405_vm4, %v5293_v32 }
 0x2af   : > { %v4984_v59 = vrot.slane %v4982_v20, 7  ;;  %v4959_v43 = vshrl.u32 %v14591_v53, 16  ;;  %v4962_v17 = vshll.u32 %v14591_v53, 16  ;;  %v5298_v14 = vshll.u32 %v20368_v36, 16 }
 0x2b0   : > { %v4955_v56 = vor.u32 %v4954_v62, %v4951_v18  ;;  %v5302_v19 = vshrl.u32 %v20368_v36, 16  ;;  %v5306_v31 = vshll.u32 %v20371_v28, 16  ;;  %v5310_v1 = vshrl.u32 %v20371_v28, 16 }
 0x2b1   : > { %v4985_v52 = vor.u32 %v4984_v59, %v4981_v25  ;;  %v4961_v35 = vrot.slane %v4959_v43, 6  ;;  %v4964_v44 = vrot.slane %v4962_v17, 7  ;;  %v5300_v54 = vrot.slane %v5298_v14, 1 }
 0x2b2   : > { %v4956_v61 = vsel %vm19611_vm6, %v4947_v63, %v4955_v56  ;;  %v4957_v45 = vrot.slane %v4955_v56, 4  ;;  %vm23406_vm11 = vsmask.f32 1280  ;;  %v23407_v29 = vmov 0  ;;  %v20398_v63 = vld [vmem:[#allocation2 + $0x78] sm:$0xff]  }
 0x2b3   : > { %vm20389_vm10 = vmand %vm22877_vm5, %vm23406_vm11  ;;  %v5308_v21 = vrot.slane %v5306_v31, 1  ;;  %v5314_v48 = vshll.u32 %v20374_v39, 16  ;;  %vm23409_vm8 = vcmask 257024   ;;  %v4986_v33 = vsel %vm19611_vm6, %v4977_v7, %v4985_v52 }
 0x2b4   : > { %v23408_v29 = vsel %vm20389_vm10, 4294967295, %v23407_v29  ;;  %5062 = vst.msk [vmem:[#allocation2 + $0x88] sm:$0xf] %vm23409_vm8, %v4956_v61  ;;  %v4987_v27 = vrot.slane %v4985_v52, 4  ;;  %v4965_v60 = vor.u32 %v4964_v44, %v4961_v35  ;;  %vm23410_vm4 = vsmask.f32 7424  ;;  %vm23411_vm3 = vmmov %vm23409_vm8 }
 0x2b5   : > { %v5301_v20 = vsel %vm23410_vm4, %v5296_v24, %v5300_v54  ;;  %5065 = vst.msk [vmem:[#allocation2 + $0x94] sm:$0xf] %vm23411_vm3, %v4986_v33  ;;  %vm23412_vm11 = vcmask 261120   ;;  %v5304_v53 = vor.u32 %v5302_v19, %v5300_v54  ;;  %v5312_v32 = vor.u32 %v5310_v1, %v5308_v21  ;;  %vm23413_vm8 = vmmov %vm23411_vm3  ;;  %v20415_v19 = vld [vmem:[#allocation2 + $0x80] sm:$0xff]  }
 0x2b6   : > { %15528 = vmatprep.mubr.msk.bf16.mxu1 %vm23412_vm11, %v5301_v20  ;;  %v5316_v18 = vrot.slane %v5314_v48, 1  ;;  %v5069_v62 = vsel %vm20389_vm10, %v4987_v27, %v5068_v50  ;;  %v4966_v25 = vsel %vm19611_vm6, %v4957_v45, %v4965_v60  ;;  %v4967_v7 = vrot.slane %v4965_v60, 4  ;;  %vm23414_vm3 = vmmov %vm23410_vm4 }
 0x2b7   : > { %v5322_v59 = vshll.u32 %v20381_v42, 16  ;;  %5070 = vst [vmem:[#allocation2 + $0x98] sm:$0x3] %v5069_v62  ;;  %5063 = vst.msk [vmem:[#allocation2 + $0x8c] sm:$0xf] %vm23413_vm8, %v4966_v25  ;;  %v5309_v24 = vsel %vm23410_vm4, %v5304_v53, %v5308_v21  ;;  %v5318_v17 = vshrl.u32 %v20374_v39, 16 }
 0x2b8   : > { %v5317_v43 = vsel %vm23414_vm3, %v5312_v32, %v5316_v18  ;;  %v4976_v14 = vsel %vm19611_vm6, %v4967_v7, %v4975_v55  ;;  %15529 = vmatmul.mubr.msk.bf16.gmra.mrb[56].mxu1 %vm23412_vm11, %v5309_v24  ;;  %v5330_v50 = vshll.u32 %v20398_v63, 16  ;;  %vm23415_vm5 = vmmov %vm23413_vm8  ;;  %v5326_v1 = vshrl.u32 %v20381_v42, 16 }
 0x2b9   : > { %v5324_v56 = vrot.slane %v5322_v59, 1  ;;  %5064 = vst.msk [vmem:[#allocation2 + $0x90] sm:$0xf] %vm23415_vm5, %v4976_v14  ;;  %vm23416_vm10 = vmmov %vm23412_vm11  ;;  %v5320_v31 = vor.u32 %v5318_v17, %v5316_v18  ;;  %v5338_v44 = vshll.u32 %v20415_v19, 16  ;;  %v5334_v45 = vshrl.u32 %v20398_v63, 16  ;;  %v17301_v17 = vld [vmem:[%s22721_s2 + $0x28] sm:$0xff]  }
 0x2ba   : > { %15532 = vmatprep.mubr.msk.bf16.mxu1 %vm23416_vm10, %v5317_v43  ;;  %v5332_v52 = vrot.slane %v5330_v50, 1  ;;  %vm23417_vm8 = vmmov %vm23414_vm3  ;;  %v5342_v60 = vshrl.u32 %v20415_v19, 16  ;;  %v23427_v43 = vld [vmem:[#allocation37_spill] sm:$0xff]  ;;  %v17451_v14 = vld [vmem:[#allocation2 + $0x8] sm:$0xff]   ;;  %vm914_vm12 = vcmask 256000  }
 0x2bb   : > { %v5328_v35 = vor.u32 %v5326_v1, %v5324_v56  ;;  %v5325_v55 = vsel %vm23417_vm8, %v5320_v31, %v5324_v56  ;;  %vm23418_vm4 = vmmov %vm23414_vm3  ;;  %v5340_v21 = vrot.slane %v5338_v44, 1  ;;  %v17302_v56 = vld [vmem:[%s22721_s2 + $0x30] sm:$0xff]   ;;  %v17452_v50 = vld [vmem:[#allocation2 + $0x4] sm:$0xf] }
 0x2bc   : > { %vm23419_vm3 = vmmov %vm23416_vm10  ;;  %v5336_v33 = vor.u32 %v5334_v45, %v5332_v52  ;;  %v17453_v44 = vld [vmem:[#allocation2 + $0x10] sm:$0xff]   ;;  %v17303_v45 = vld [vmem:[%s22721_s2 + $0x38] sm:$0xff]  }
 0x2bd   : > { %v5333_v54 = vsel %vm23418_vm4, %v5328_v35, %v5332_v52  ;;  %vm23420_vm5 = vmmov %vm23419_vm3  ;;  %v5344_v53 = vor.u32 %v5342_v60, %v5340_v21  ;;  %v5837_v52 = vrot.slane %v17451_v14, 1  ;;  %v5845_v60 = vrot.slane %v20110_v34, 1 }
 0x2be   : > { %v20423_v61 = vld [vmem:[#allocation2 + $0x88] sm:$0xff]   ;;  %vm23421_vm10 = vmmov %vm23418_vm4 }
 0x2bf   : > { %v5346_v48 = vshll.u32 %v20423_v61, 16  ;;  %v5341_v32 = vsel %vm23421_vm10, %v5336_v33, %v5340_v21  ;;  %vm23422_vm11 = vmmov %vm23418_vm4  ;;  %v5350_v25 = vshrl.u32 %v20423_v61, 16  ;;  %v20496_v33 = vld [vmem:[%s22721_s2 + $0x40] sm:$0xff]  }
 0x2c0   : > { %15533 = vmatmul.mubr.msk.bf16.gmra.mrb[60].mxu1 %vm23419_vm3, %v5325_v55  ;;  %v20429_v27 = vld [vmem:[#allocation2 + $0x90] ss:$0 sps:$4 sm:$0x11]   ;;  %vm23423_vm8 = vmmov %vm23419_vm3  ;;  %v5839_v55 = vrot.slane %v17453_v44, 1  ;;  %v20552_v44 = vld [vmem:[#allocation2 + $0x18] sm:$0xff]  }
 0x2c1   : > { %15536 = vmatprep.mubr.msk.bf16.mxu1 %vm23420_vm5, %v5333_v54  ;;  %v5348_v20 = vrot.slane %v5346_v48, 1  ;;  %v5354_v18 = vshll.u32 %v20429_v27, 16  ;;  %vm23424_vm4 = vmmov %vm23419_vm3  ;;  %v5841_v54 = vrot.slane %v20031_v22, 1 }
 0x2c2   : > { %vm23425_vm3 = vmmov %vm23421_vm10 }
 0x2c3   : > { %v5349_v62 = vsel %vm23422_vm11, %v5344_v53, %v5348_v20  ;;  %v5352_v7 = vor.u32 %v5350_v25, %v5348_v20  ;;  %v5356_v59 = vrot.slane %v5354_v18, 1  ;;  %vm23426_vm5 = vmmov %vm23424_vm4  ;;  %v5849_v18 = vrot.slane %v20245_v46, 1 }
 0x2c4   : > { %vm23428_vm2 = vmmov %vm23424_vm4  ;;  %v5853_v25 = vrot.slane %v20333_v10, 1 }
 0x2c5   : > { %v5357_v24 = vsel %vm23425_vm3, %v5352_v7, %v5356_v59  ;;  %vm23429_vm10 = vmmov %vm23428_vm2  ;;  %v5857_v59 = vrot.slane %v20368_v36, 1 }
 0x2c6   : > { %vm23430_vm11 = vmmov %vm23428_vm2 }
 0x2c7   : > { %vm23433_vm3 = vmmov %vm23428_vm2 }
 0x2c8   : > { %15537 = vmatmul.mubr.msk.bf16.gmra.mrb[64].mxu1 %vm23423_vm8, %v5341_v32  ;;  %vm23431_vm8 = vmmov %vm23428_vm2  ;;  %v5847_v32 = vrot.slane %v20144_v11, 1 }
 0x2c9   : > { %15540 = vmatprep.mubr.msk.bf16.mxu1 %vm23424_vm4, %v5349_v62  ;;  %vm23432_vm4 = vmmov %vm23428_vm2 }
 0x2d0   : > { %15541 = vmatmul.mubr.msk.bf16.gmra.mrb[68].mxu1 %vm23426_vm5, %v5357_v24  ;;  %vm23434_vm5 = vmmov %vm23428_vm2 }
 0x2d1   : > { %15548 = vmatprep.mubr.msk.bf16.mxu1 %vm23428_vm2, %v23427_v43  ;;  %v5861_v43 = vrot.slane %v20374_v39, 1 }
 0x2d8   : > { %15549 = vmatmul.mubr.msk.bf16.vlgmr.msra.gmra.mrb[36].mxu1 %vm23429_vm10, %v17451_v14  ;;  %vm23435_vm10 = vmmov %vm23428_vm2  ;;  %v5865_v14 = vrot.slane %v20398_v63, 1 }
 0x2d9   : > { %15585 = vmatpush3.bf16.msra.mxu1 %v20052_v47  ;;  %15552 = vmatprep.mubr.msk.bf16.mxu1 %vm23430_vm11, %v19949_v15  ;;  %vm23436_vm11 = vmmov %vm23428_vm2  ;;  %v23437_v15 = vmov 0   ;;  %v5827_v47 = vld [vmem:[#allocation2] sm:$0xe] }
 0x2da   : > { %15586 = vmatprep.subr.bf16.mxu1 %v17301_v17  ;;  %915 = vst.msk [vmem:[#allocation2 + $0xa0] sm:$0x7] %vm914_vm12, %v23437_v15  ;;  %v14021_v31 = vcombine.low %v5827_v47, %v17452_v50  ;;  %vm23443_vm12 = vmmov %vm23428_vm2  ;;  %v5869_v15 = vrot.slane %v20423_v61, 1  ;;  %v20537_v47 = vld [vmem:[#allocation2 + $0xc] sm:$0xf] }
 0x2dc   : > { %v5836_v1 = vrot.slane %v14021_v31, 1  ;;  %v6152_v31 = vld [vmem:[#allocation2 + $0x8] sm:$0xe] }
 0x2dd   : > { %15587 = vmatpush3.bf16.msra.mxu1 %v17301_v17 }
 0x2de   : > { %15624 = vmatprep.subr.bf16.mxu1 %v17302_v56 }
 0x2e0   : > { %15553 = vmatmul.mubr.msk.bf16.gmra.mrb[40].mxu1 %vm23428_vm2, %v20031_v22  ;;  %v5843_v22 = vrot.slane %v20066_v13, 1 }
 0x2e1   : > { %15556 = vmatprep.mubr.msk.bf16.mxu1 %vm23431_vm8, %v20066_v13  ;;  %vm23438_vm8 = vmmov %vm23428_vm2 }
 0x2e8   : > { %15557 = vmatmul.mubr.msk.bf16.gmra.mrb[44].mxu1 %vm23432_vm4, %v20110_v34  ;;  %vm23439_vm4 = vmmov %vm23428_vm2  ;;  %v5851_v34 = vrot.slane %v20256_v40, 1 }
 0x2e9   : > { %15560 = vmatprep.mubr.msk.bf16.mxu1 %vm23433_vm3, %v20144_v11  ;;  %vm23440_vm3 = vmmov %vm23428_vm2 }
 0x2f0   : > { %15561 = vmatmul.mubr.msk.bf16.gmra.mrb[48].mxu1 %vm23434_vm5, %v20245_v46  ;;  %vm23441_vm5 = vmmov %vm23428_vm2  ;;  %v5855_v46 = vrot.slane %v20344_v38, 1 }
 0x2f1   : > { %15564 = vmatprep.mubr.msk.bf16.mxu1 %vm23435_vm10, %v20256_v40  ;;  %vm23442_vm10 = vmmov %vm23428_vm2 }
 0x2f8   : > { %15565 = vmatmul.mubr.msk.bf16.gmra.mrb[52].mxu1 %vm23436_vm11, %v20333_v10  ;;  %vm23444_vm11 = vmmov %vm23428_vm2  ;;  %v5859_v10 = vrot.slane %v20371_v28, 1 }
 0x2f9   : > { %15568 = vmatprep.mubr.msk.bf16.mxu1 %vm23428_vm2, %v20344_v38  ;;  %vm23445_vm2 = vcmask 1046528  }
 0x2fa   : > { %v5838_v35 = vsel %vm23445_vm2, %v5836_v1, %v5837_v52  ;;  %v5846_v53 = vsel %vm23445_vm2, %v5843_v22, %v5845_v60  ;;  %v5854_v11 = vsel %vm23445_vm2, %v5851_v34, %v5853_v25  ;;  %v5862_v38 = vsel %vm23445_vm2, %v5859_v10, %v5861_v43  ;;  %v20545_v1 = vld [vmem:[#allocation2 + $0x10] sm:$0xff]  }
 0x300   : > { %15569 = vmatmul.mubr.msk.bf16.gmra.mrb[56].mxu1 %vm23438_vm8, %v20368_v36  ;;  %vm23446_vm8 = vmmov %vm23440_vm3  ;;  %v5863_v36 = vrot.slane %v20381_v42, 1 }
 0x301   : > { %15572 = vmatprep.mubr.msk.bf16.mxu1 %vm23439_vm4, %v20371_v28  ;;  %vm23447_vm4 = vmmov %vm23445_vm2 }
 0x302   : > { %v5840_v21 = vsel %vm23447_vm4, %v5837_v52, %v5839_v55  ;;  %vm23453_vm4 = vmmov %vm23445_vm2  ;;  %v6288_v52 = vrot.slane %v20545_v1, 1 }
 0x303   : > { %v5848_v62 = vsel %vm23453_vm4, %v5845_v60, %v5847_v32  ;;  %vm23459_vm4 = vmmov %vm23445_vm2 }
 0x304   : > { %v5856_v24 = vsel %vm23459_vm4, %v5853_v25, %v5855_v46  ;;  %vm23465_vm4 = vmmov %vm23445_vm2 }
 0x308   : > { %15573 = vmatmul.mubr.msk.bf16.gmra.mrb[60].mxu1 %vm23440_vm3, %v20374_v39  ;;  %v5867_v39 = vrot.slane %v20415_v19, 1 }
 0x309   : > { %15576 = vmatprep.mubr.msk.bf16.mxu1 %vm23441_vm5, %v20381_v42  ;;  %vm23448_vm5 = vmmov %vm23445_vm2 }
 0x30a   : > { %v5842_v48 = vsel %vm23448_vm5, %v5839_v55, %v5841_v54  ;;  %vm23454_vm5 = vmmov %vm23445_vm2  ;;  %v5870_v42 = vsel %vm23445_vm2, %v5867_v39, %v5869_v15 }
 0x30b   : > { %v5850_v13 = vsel %vm23454_vm5, %v5847_v32, %v5849_v18  ;;  %vm23460_vm5 = vmmov %vm23445_vm2 }
 0x30c   : > { %v5858_v40 = vsel %vm23460_vm5, %v5855_v46, %v5857_v59  ;;  %vm23466_vm5 = vmmov %vm23445_vm2  ;;  %v20592_v46 = vld [vmem:[#allocation2 + $0x48] sm:$0xff]  }
 0x30d   : > { %v5866_v28 = vsel %vm23466_vm5, %v5863_v36, %v5865_v14  ;;  %vm23472_vm5 = vmmov %vm23445_vm2 }
 0x310   : > { %15577 = vmatmul.mubr.msk.bf16.gmra.mrb[64].mxu1 %vm23442_vm10, %v20398_v63  ;;  %vm23449_vm10 = vmmov %vm23440_vm3  ;;  %v20543_v63 = vcombine.low %v6152_v31, %v20537_v47 }
 0x311   : > { %15580 = vmatprep.mubr.msk.bf16.mxu1 %vm23443_vm12, %v20415_v19  ;;  %vm23450_vm12 = vmmov %vm23445_vm2  ;;  %v5871_v19 = vrot.slane %v20429_v27, 1 }
 0x312   : > { %v5844_v20 = vsel %vm23450_vm12, %v5841_v54, %v5843_v22  ;;  %vm23456_vm12 = vmmov %vm23445_vm2  ;;  %v20556_v54 = vld [vmem:[#allocation2 + $0x20] sm:$0xff]   ;;  %v20565_v22 = vld [vmem:[#allocation2 + $0x28] sm:$0xff]  }
 0x313   : > { %v5852_v7 = vsel %vm23456_vm12, %v5849_v18, %v5851_v34  ;;  %vm23462_vm12 = vmmov %vm23445_vm2  ;;  %v6292_v27 = vrot.slane %v20556_v54, 1  ;;  %v6294_v32 = vrot.slane %v20565_v22, 1  ;;  %v20586_v34 = vld [vmem:[#allocation2 + $0x40] sm:$0xff]  }
 0x314   : > { %v5860_v17 = vsel %vm23462_vm12, %v5857_v59, %v5859_v10  ;;  %vm23468_vm12 = vmmov %vm23445_vm2 }
 0x315   : > { %v5868_v50 = vsel %vm23468_vm12, %v5865_v14, %v5867_v39  ;;  %vm23474_vm12 = vmmov %vm23445_vm2  ;;  %v20612_v39 = vld [vmem:[#allocation2 + $0x68] sm:$0xff]  }
 0x316   : > { %v6310_v31 = vrot.slane %v20612_v39, 1 }
 0x318   : > { %15581 = vmatmul.mubr.msk.bf16.gmra.mrb[68].mxu1 %vm23444_vm11, %v20423_v61  ;;  %vm23451_vm11 = vmmov %vm23440_vm3  ;;  %v6287_v61 = vrot.slane %v20543_v63, 1 }
 0x319   : > { %15588 = vmatprep.mubr.msk.bf16.mxu1 %vm23446_vm8, %v5838_v35  ;;  %vm23452_vm8 = vmmov %vm23440_vm3 }
 0x31a   : > { %v6289_v55 = vsel %vm23472_vm5, %v6287_v61, %v6288_v52  ;;  %vm23478_vm5 = vmmov %vm23445_vm2  ;;  %v20622_v61 = vld [vmem:[#allocation2 + $0x78] sm:$0xff]  }
 0x320   : > { %15589 = vmatmul.mubr.msk.bf16.vlgmr.msra.gmra.mrb[36].mxu1 %vm23440_vm3, %v5840_v21  ;;  %v17317_v21 = vld [vmem:[%s22721_s2 + $0x48] sm:$0xff]  }
 0x321   : > { %15625 = vmatpush3.bf16.msra.mxu1 %v17302_v56  ;;  %15592 = vmatprep.mubr.msk.bf16.mxu1 %vm23449_vm10, %v5842_v48  ;;  %vm23455_vm10 = vmmov %vm23440_vm3  ;;  %v5864_v56 = vsel %vm23465_vm4, %v5861_v43, %v5863_v36  ;;  %v20606_v36 = vld [vmem:[#allocation2 + $0x60] sm:$0xff]  }
 0x322   : > { %15626 = vmatprep.subr.bf16.mxu1 %v17303_v45  ;;  %vm23471_vm4 = vmmov %vm23445_vm2 }
 0x323   : > { %v5872_v35 = vsel %vm23471_vm4, %v5869_v15, %v5871_v19  ;;  %vm23477_vm4 = vmmov %vm23445_vm2 }
 0x325   : > { %15627 = vmatpush3.bf16.msra.mxu1 %v17303_v45  ;;  %v6290_v45 = vrot.slane %v20552_v44, 1 }
 0x326   : > { %15664 = vmatprep.subr.bf16.mxu1 %v20496_v33 }
 0x327   : > { %v6291_v48 = vsel %vm23474_vm12, %v6288_v52, %v6290_v45  ;;  %v6293_v60 = vsel %vm23445_vm2, %v6290_v45, %v6292_v27  ;;  %vm23480_vm12 = vmmov %vm23445_vm2 }
 0x328   : > { %15593 = vmatmul.mubr.msk.bf16.gmra.mrb[40].mxu1 %vm23451_vm11, %v5844_v20  ;;  %vm23457_vm11 = vmmov %vm23440_vm3  ;;  %v20569_v20 = vld [vmem:[#allocation2 + $0x30] sm:$0xff]  }
 0x329   : > { %15596 = vmatprep.mubr.msk.bf16.mxu1 %vm23452_vm8, %v5846_v53  ;;  %vm23458_vm8 = vmmov %vm23440_vm3  ;;  %v20576_v53 = vld [vmem:[%s22721_s2 + $0x50] sm:$0xff]   ;;  %v6296_v18 = vrot.slane %v20569_v20, 1 }
 0x330   : > { %15597 = vmatmul.mubr.msk.bf16.gmra.mrb[44].mxu1 %vm23440_vm3, %v5848_v62  ;;  %v6295_v62 = vsel %vm23477_vm4, %v6292_v27, %v6294_v32  ;;  %vm23483_vm4 = vmmov %vm23445_vm2 }
 0x331   : > { %15600 = vmatprep.mubr.msk.bf16.mxu1 %vm23455_vm10, %v5850_v13  ;;  %vm23461_vm10 = vmmov %vm23440_vm3  ;;  %v20582_v13 = vld [vmem:[#allocation2 + $0x38] sm:$0xff]  }
 0x332   : > { %v6298_v25 = vrot.slane %v20582_v13, 1 }
 0x338   : > { %15601 = vmatmul.mubr.msk.bf16.gmra.mrb[48].mxu1 %vm23457_vm11, %v5852_v7  ;;  %vm23463_vm11 = vmmov %vm23440_vm3  ;;  %v6300_v7 = vrot.slane %v20586_v34, 1 }
 0x339   : > { %15604 = vmatprep.mubr.msk.bf16.mxu1 %vm23458_vm8, %v5854_v11  ;;  %vm23464_vm8 = vmmov %vm23440_vm3  ;;  %v6299_v11 = vsel %vm23480_vm12, %v6296_v18, %v6298_v25 }
 0x33a   : > { %v6301_v59 = vsel %vm23445_vm2, %v6298_v25, %v6300_v7  ;;  %vm23486_vm12 = vmmov %vm23445_vm2  ;;  %v6621_v25 = vshrl.u32 %v20545_v1, 16 }
 0x340   : > { %15605 = vmatmul.mubr.msk.bf16.gmra.mrb[52].mxu1 %vm23440_vm3, %v5856_v24  ;;  %v20596_v24 = vld [vmem:[#allocation2 + $0x50] sm:$0xff]  }
 0x341   : > { %15608 = vmatprep.mubr.msk.bf16.mxu1 %vm23461_vm10, %v5858_v40  ;;  %vm23467_vm10 = vmmov %vm23440_vm3  ;;  %v6302_v40 = vrot.slane %v20592_v46, 1  ;;  %v6304_v10 = vrot.slane %v20596_v24, 1 }
 0x343   : > { %v6303_v43 = vsel %vm23483_vm4, %v6300_v7, %v6302_v40  ;;  %vm23489_vm4 = vmmov %vm23445_vm2  ;;  %v6624_v7 = vshll.u32 %v20545_v1, 16 }
 0x348   : > { %15609 = vmatmul.mubr.msk.bf16.gmra.mrb[56].mxu1 %vm23463_vm11, %v5860_v17  ;;  %vm23469_vm11 = vmmov %vm23440_vm3  ;;  %v20602_v17 = vld [vmem:[#allocation2 + $0x58] sm:$0xff]  }
 0x349   : > { %15612 = vmatprep.mubr.msk.bf16.mxu1 %vm23464_vm8, %v5862_v38  ;;  %vm23470_vm8 = vmmov %vm23440_vm3  ;;  %v6306_v14 = vrot.slane %v20602_v17, 1 }
 0x350   : > { %15613 = vmatmul.mubr.msk.bf16.gmra.mrb[60].mxu1 %vm23440_vm3, %v5864_v56  ;;  %v6308_v56 = vrot.slane %v20606_v36, 1 }
 0x351   : > { %15616 = vmatprep.mubr.msk.bf16.mxu1 %vm23467_vm10, %v5866_v28  ;;  %vm23473_vm10 = vmmov %vm23440_vm3  ;;  %v6307_v28 = vsel %vm23486_vm12, %v6304_v10, %v6306_v14 }
 0x352   : > { %v6309_v15 = vsel %vm23445_vm2, %v6306_v14, %v6308_v56  ;;  %v6311_v19 = vsel %vm23489_vm4, %v6308_v56, %v6310_v31  ;;  %vm23492_vm12 = vmmov %vm23445_vm2  ;;  %v6626_v14 = vrot.slane %v6624_v7, 2 }
 0x353   : > { %vm23495_vm4 = vmmov %vm23445_vm2 }
 0x358   : > { %15617 = vmatmul.mubr.msk.bf16.gmra.mrb[64].mxu1 %vm23469_vm11, %v5868_v50  ;;  %vm23475_vm11 = vmmov %vm23440_vm3  ;;  %v20616_v50 = vld [vmem:[#allocation2 + $0x70] sm:$0xff]  }
 0x359   : > { %15620 = vmatprep.mubr.msk.bf16.mxu1 %vm23470_vm8, %v5870_v42  ;;  %vm23476_vm8 = vmmov %vm23440_vm3  ;;  %v6312_v42 = vrot.slane %v20616_v50, 1 }
 0x360   : > { %15621 = vmatmul.mubr.msk.bf16.gmra.mrb[68].mxu1 %vm23440_vm3, %v5872_v35  ;;  %v20626_v35 = vld [vmem:[#allocation2 + $0x80] sm:$0xff]  }
 0x361   : > { %15628 = vmatprep.mubr.msk.bf16.mxu1 %vm23473_vm10, %v6289_v55  ;;  %vm23479_vm10 = vmmov %vm23440_vm3  ;;  %v6314_v55 = vrot.slane %v20622_v61, 1  ;;  %v6316_v45 = vrot.slane %v20626_v35, 1 }
 0x363   : > { %v6315_v27 = vsel %vm23492_vm12, %v6312_v42, %v6314_v55  ;;  %vm23499_vm12 = vmmov %vm23445_vm2 }
 0x368   : > { %15629 = vmatmul.mubr.msk.bf16.vlgmr.msra.gmra.mrb[36].mxu1 %vm23475_vm11, %v6291_v48  ;;  %vm23481_vm11 = vmmov %vm23440_vm3  ;;  %v20634_v48 = vld [vmem:[#allocation2 + $0x90] sm:$0xff]  }
 0x369   : > { %15665 = vmatpush3.bf16.msra.mxu1 %v20496_v33  ;;  %15632 = vmatprep.mubr.msk.bf16.mxu1 %vm23476_vm8, %v6293_v60  ;;  %v6297_v33 = vsel %vm23478_vm5, %v6294_v32, %v6296_v18  ;;  %vm23482_vm8 = vmmov %vm23440_vm3  ;;  %v6317_v60 = vsel %vm23445_vm2, %v6314_v55, %v6316_v45  ;;  %v6320_v18 = vrot.slane %v20634_v48, 1 }
 0x36a   : > { %15666 = vmatprep.subr.bf16.mxu1 %v17317_v21  ;;  %vm23484_vm5 = vmmov %vm23445_vm2 }
 0x36b   : > { %v6305_v38 = vsel %vm23484_vm5, %v6302_v40, %v6304_v10  ;;  %vm23490_vm5 = vmmov %vm23445_vm2  ;;  %v17324_v40 = vld [vmem:[#allocation2 + $0x98] ss:$0 sps:$4 sm:$0x11]  }
 0x36c   : > { %v6313_v52 = vsel %vm23490_vm5, %v6310_v31, %v6312_v42  ;;  %v6322_v56 = vrot.slane %v17324_v40, 1  ;;  %v6639_v42 = vshrl.u32 %v20556_v54, 16 }
 0x36d   : > { %15667 = vmatpush3.bf16.msra.mxu1 %v17317_v21  ;;  %v20632_v21 = vld [vmem:[#allocation2 + $0x88] sm:$0xff]  }
 0x36e   : > { %15704 = vmatprep.subr.bf16.mxu1 %v20576_v53  ;;  %v6318_v32 = vrot.slane %v20632_v21, 1 }
 0x370   : > { %15633 = vmatmul.mubr.msk.bf16.gmra.mrb[40].mxu1 %vm23440_vm3, %v6295_v62  ;;  %v6613_v62 = vshrl.u32 %v20543_v63, 16 }
 0x371   : > { %15636 = vmatprep.mubr.msk.bf16.mxu1 %vm23479_vm10, %v6297_v33  ;;  %vm23485_vm10 = vmmov %vm23440_vm3  ;;  %v6616_v33 = vshll.u32 %v20543_v63, 16  ;;  %v6630_v63 = vshrl.u32 %v20552_v44, 16 }
 0x372   : > { %v6615_v10 = vrot.slane %v6613_v62, 1 }
 0x373   : > { %v6632_v55 = vrot.slane %v6630_v63, 1  ;;  %v20672_v63 = vld [vmem:[%s22721_s2 + $0x60] sm:$0xff]  }
 0x378   : > { %15637 = vmatmul.mubr.msk.bf16.gmra.mrb[44].mxu1 %vm23481_vm11, %v6299_v11  ;;  %vm23487_vm11 = vmmov %vm23440_vm3  ;;  %v6319_v11 = vsel %vm23495_vm4, %v6316_v45, %v6318_v32 }
 0x379   : > { %15640 = vmatprep.mubr.msk.bf16.mxu1 %vm23482_vm8, %v6301_v59  ;;  %vm23488_vm8 = vmmov %vm23440_vm3 }
 0x380   : > { %15641 = vmatmul.mubr.msk.bf16.gmra.mrb[48].mxu1 %vm23440_vm3, %v6303_v43  ;;  %v6618_v43 = vrot.slane %v6616_v33, 2  ;;  %v6648_v33 = vshrl.u32 %v20565_v22, 16 }
 0x381   : > { %15644 = vmatprep.mubr.msk.bf16.mxu1 %vm23485_vm10, %v6305_v38  ;;  %vm23491_vm10 = vmmov %vm23440_vm3  ;;  %v6623_v38 = vrot.slane %v6621_v25, 1  ;;  %v6651_v25 = vshll.u32 %v20565_v22, 16 }
 0x383   : > { %v6627_v31 = vor.u32 %v6626_v14, %v6623_v38 }
 0x388   : > { %15645 = vmatmul.mubr.msk.bf16.gmra.mrb[52].mxu1 %vm23487_vm11, %v6307_v28  ;;  %vm23493_vm11 = vmmov %vm23440_vm3  ;;  %v6633_v28 = vshll.u32 %v20552_v44, 16 }
 0x389   : > { %15648 = vmatprep.mubr.msk.bf16.mxu1 %vm23488_vm8, %v6309_v15  ;;  %vm23494_vm8 = vmmov %vm23440_vm3  ;;  %v6619_v15 = vor.u32 %v6618_v43, %v6615_v10  ;;  %v6650_v10 = vrot.slane %v6648_v33, 1  ;;  %v6653_v43 = vrot.slane %v6651_v25, 2  ;;  %v6684_v33 = vshrl.u32 %v20592_v46, 16 }
 0x38a   : > { %vm23497_vm5 = vmmov %vm23494_vm8  ;;  %v6635_v45 = vrot.slane %v6633_v28, 2  ;;  %v6687_v25 = vshll.u32 %v20592_v46, 16 }
 0x38b   : > { %v6654_v28 = vor.u32 %v6653_v43, %v6650_v10 }
 0x38c   : > { %v6636_v62 = vor.u32 %v6635_v45, %v6632_v55  ;;  %v6689_v10 = vrot.slane %v6687_v25, 2 }
 0x390   : > { %15649 = vmatmul.mubr.msk.bf16.gmra.mrb[56].mxu1 %vm23440_vm3, %v6311_v19  ;;  %vm23496_vm3 = vmmov %vm23445_vm2  ;;  %v6642_v19 = vshll.u32 %v20556_v54, 16  ;;  %vm23501_vm2 = vsmask.f32 6400 }
 0x391   : > { %15652 = vmatprep.mubr.msk.bf16.mxu1 %vm23491_vm10, %v6313_v52  ;;  %v6321_v59 = vsel %vm23496_vm3, %v6318_v32, %v6320_v18  ;;  %vm23498_vm10 = vmmov %vm23497_vm5  ;;  %v6323_v52 = vsel %vm23499_vm12, %v6320_v18, %v6322_v56  ;;  %v6660_v18 = vshll.u32 %v20569_v20, 16 }
 0x392   : > { %v6644_v32 = vrot.slane %v6642_v19, 2  ;;  %vm23503_vm4 = vmmov %vm23501_vm2  ;;  %v6675_v19 = vshrl.u32 %v20586_v34, 16 }
 0x393   : > { %v6637_v40 = vsel %vm23503_vm4, %v6627_v31, %v6636_v62  ;;  %vm23504_vm3 = vmmov %vm23497_vm5  ;;  %v6662_v56 = vrot.slane %v6660_v18, 2  ;;  %v6693_v18 = vshrl.u32 %v20596_v24, 16 }
 0x394   : > { %vm23507_vm12 = vmmov %vm23501_vm2 }
 0x395   : > { %vm23510_vm4 = vmmov %vm23501_vm2 }
 0x398   : > { %15653 = vmatmul.mubr.msk.bf16.gmra.mrb[60].mxu1 %vm23493_vm11, %v6315_v27  ;;  %vm23500_vm11 = vmmov %vm23497_vm5  ;;  %v6628_v27 = vsel %vm23501_vm2, %v6619_v15, %v6627_v31  ;;  %v6666_v15 = vshrl.u32 %v20582_v13, 16  ;;  %v6669_v31 = vshll.u32 %v20582_v13, 16 }
 0x399   : > { %15656 = vmatprep.mubr.msk.bf16.mxu1 %vm23494_vm8, %v6317_v60  ;;  %v6641_v60 = vrot.slane %v6639_v42, 1  ;;  %vm23502_vm8 = vmmov %vm23497_vm5 }
 0x39a   : > { %v6668_v55 = vrot.slane %v6666_v15, 1  ;;  %v6671_v45 = vrot.slane %v6669_v31, 2  ;;  %v6705_v15 = vshll.u32 %v20602_v17, 16 }
 0x39b   : > { %v6645_v7 = vor.u32 %v6644_v32, %v6641_v60  ;;  %v6677_v60 = vrot.slane %v6675_v19, 1  ;;  %v6711_v19 = vshrl.u32 %v20606_v36, 16 }
 0x3a0   : > { %15657 = vmatmul.mubr.msk.bf16.gmra.mrb[64].mxu1 %vm23497_vm5, %v6319_v11  ;;  %v6657_v11 = vshrl.u32 %v20569_v20, 16  ;;  %vm23505_vm5 = vmmov %vm23501_vm2 }
 0x3a1   : > { %15660 = vmatprep.mubr.msk.bf16.mxu1 %vm23498_vm10, %v6321_v59  ;;  %v17326_v59 = vld [vmem:[%s22721_s2 + $0x58] sm:$0xff]   ;;  %v6646_v38 = vsel %vm23505_vm5, %v6636_v62, %v6645_v7  ;;  %vm23506_vm10 = vmmov %vm23504_vm3  ;;  %v6672_v62 = vor.u32 %v6671_v45, %v6668_v55  ;;  %v6707_v55 = vrot.slane %v6705_v15, 2 }
 0x3a2   : > { %v6659_v14 = vrot.slane %v6657_v11, 1  ;;  %vm23511_vm5 = vmmov %vm23501_vm2 }
 0x3a4   : > { %v6663_v42 = vor.u32 %v6662_v56, %v6659_v14 }
 0x3a8   : > { %15661 = vmatmul.mubr.msk.bf16.gmra.mrb[68].mxu1 %vm23500_vm11, %v6323_v52  ;;  %v6678_v52 = vshll.u32 %v20586_v34, 16  ;;  %vm23508_vm11 = vmmov %vm23504_vm3 }
 0x3a9   : > { %15668 = vmatprep.mubr.msk.bf16.mxu1 %vm23502_vm8, %v6628_v27  ;;  %v6664_v27 = vsel %vm23501_vm2, %v6654_v28, %v6663_v42  ;;  %vm23509_vm8 = vmmov %vm23504_vm3 }
 0x3aa   : > { %v6680_v32 = vrot.slane %v6678_v52, 2 }
 0x3ac   : > { %v6681_v11 = vor.u32 %v6680_v32, %v6677_v60 }
 0x3ae   : > { %v6682_v43 = vsel %vm23511_vm5, %v6672_v62, %v6681_v11  ;;  %vm23517_vm5 = vmmov %vm23501_vm2 }
 0x3b0   : > { %15669 = vmatmul.mubr.msk.bf16.vlgmr.msra.gmra.mrb[36].mxu1 %vm23504_vm3, %v6637_v40  ;;  %v6686_v40 = vrot.slane %v6684_v33, 1  ;;  %v6723_v33 = vshll.u32 %v20612_v39, 16 }
 0x3b1   : > { %15705 = vmatpush3.bf16.msra.mxu1 %v20576_v53  ;;  %15672 = vmatprep.mubr.msk.bf16.mxu1 %vm23506_vm10, %v6646_v38  ;;  %v6655_v53 = vsel %vm23507_vm12, %v6645_v7, %v6654_v28  ;;  %v6696_v7 = vshll.u32 %v20596_v24, 16  ;;  %v6695_v38 = vrot.slane %v6693_v18, 1  ;;  %vm23512_vm10 = vmmov %vm23504_vm3  ;;  %v6702_v28 = vshrl.u32 %v20602_v17, 16 }
 0x3b2   : > { %15706 = vmatprep.subr.bf16.mxu1 %v17326_v59  ;;  %v6690_v56 = vor.u32 %v6689_v10, %v6686_v40  ;;  %vm23513_vm12 = vmmov %vm23501_vm2  ;;  %v6729_v18 = vshrl.u32 %v20616_v50, 16  ;;  %v6725_v40 = vrot.slane %v6723_v33, 2 }
 0x3b3   : > { %v6698_v14 = vrot.slane %v6696_v7, 2 }
 0x3b4   : > { %v6691_v52 = vsel %vm23513_vm12, %v6681_v11, %v6690_v56  ;;  %v6732_v11 = vshll.u32 %v20616_v50, 16  ;;  %vm23519_vm12 = vmmov %vm23501_vm2 }
 0x3b5   : > { %15707 = vmatpush3.bf16.msra.mxu1 %v17326_v59  ;;  %v6673_v59 = vsel %vm23510_vm4, %v6663_v42, %v6672_v62  ;;  %v6699_v31 = vor.u32 %v6698_v14, %v6695_v38  ;;  %v6714_v42 = vshll.u32 %v20606_v36, 16  ;;  %v6720_v62 = vshrl.u32 %v20612_v39, 16  ;;  %vm23516_vm4 = vmmov %vm23501_vm2 }
 0x3b6   : > { %15744 = vmatprep.subr.bf16.mxu1 %v20672_v63  ;;  %v6734_v38 = vrot.slane %v6732_v11, 2 }
 0x3b7   : > { %v6700_v45 = vsel %vm23501_vm2, %v6690_v56, %v6699_v31  ;;  %v6716_v60 = vrot.slane %v6714_v42, 2  ;;  %v6738_v56 = vshrl.u32 %v20622_v61, 16 }
 0x3b8   : > { %15673 = vmatmul.mubr.msk.bf16.gmra.mrb[40].mxu1 %vm23508_vm11, %v6655_v53  ;;  %v6704_v53 = vrot.slane %v6702_v28, 1  ;;  %vm23514_vm11 = vmmov %vm23504_vm3  ;;  %v6741_v28 = vshll.u32 %v20622_v61, 16 }
 0x3b9   : > { %15676 = vmatprep.mubr.msk.bf16.mxu1 %vm23509_vm8, %v6664_v27  ;;  %v6713_v27 = vrot.slane %v6711_v19, 1  ;;  %vm23515_vm8 = vmmov %vm23504_vm3  ;;  %v6747_v19 = vshrl.u32 %v20626_v35, 16 }
 0x3ba   : > { %v6708_v32 = vor.u32 %v6707_v55, %v6704_v53  ;;  %v6743_v53 = vrot.slane %v6741_v28, 2 }
 0x3bb   : > { %v6717_v25 = vor.u32 %v6716_v60, %v6713_v27 }
 0x3bc   : > { %v6709_v7 = vsel %vm23516_vm4, %v6699_v31, %v6708_v32  ;;  %v6750_v31 = vshll.u32 %v20626_v35, 16  ;;  %vm23522_vm4 = vmmov %vm23501_vm2 }
 0x3bd   : > { %v6718_v10 = vsel %vm23517_vm5, %v6708_v32, %v6717_v25  ;;  %v6756_v32 = vshrl.u32 %v20632_v21, 16  ;;  %vm23523_vm5 = vmmov %vm23501_vm2 }
 0x3be   : > { %v6752_v27 = vrot.slane %v6750_v31, 2 }
 0x3c0   : > { %15677 = vmatmul.mubr.msk.bf16.gmra.mrb[44].mxu1 %vm23504_vm3, %v6673_v59  ;;  %v6722_v59 = vrot.slane %v6720_v62, 1  ;;  %v6759_v62 = vshll.u32 %v20632_v21, 16 }
 0x3c1   : > { %15680 = vmatprep.mubr.msk.bf16.mxu1 %vm23512_vm10, %v6682_v43  ;;  %v6731_v43 = vrot.slane %v6729_v18, 1  ;;  %vm23518_vm10 = vmmov %vm23504_vm3  ;;  %v6765_v18 = vshrl.u32 %v20634_v48, 16 }
 0x3c2   : > { %v6726_v14 = vor.u32 %v6725_v40, %v6722_v59  ;;  %v6761_v59 = vrot.slane %v6759_v62, 2  ;;  %v20720_v40 = vld [vmem:[#allocation2 + $0x98] ss:$0 sps:$4 sm:$0x33]  }
 0x3c3   : > { %v6735_v15 = vor.u32 %v6734_v38, %v6731_v43  ;;  %v6767_v43 = vrot.slane %v6765_v18, 1  ;;  %v6777_v28 = vshll.u32 %v20720_v40, 16  ;;  %v7075_v18 = vrot.slane %v20556_v54, 2 }
 0x3c4   : > { %v6727_v42 = vsel %vm23519_vm12, %v6717_v25, %v6726_v14  ;;  %v6768_v25 = vshll.u32 %v20634_v48, 16  ;;  %vm23525_vm12 = vmmov %vm23501_vm2  ;;  %v7077_v54 = vrot.slane %v20565_v22, 2 }
 0x3c5   : > { %v6736_v55 = vsel %vm23501_vm2, %v6726_v14, %v6735_v15 }
 0x3c6   : > { %v6770_v38 = vrot.slane %v6768_v25, 2 }
 0x3c8   : > { %15681 = vmatmul.mubr.msk.bf16.gmra.mrb[48].mxu1 %vm23514_vm11, %v6691_v52  ;;  %v6740_v52 = vrot.slane %v6738_v56, 1  ;;  %vm23520_vm11 = vmmov %vm23504_vm3  ;;  %v6774_v56 = vshrl.u32 %v20720_v40, 16 }
 0x3c9   : > { %15684 = vmatprep.mubr.msk.bf16.mxu1 %vm23515_vm8, %v6700_v45  ;;  %v6749_v45 = vrot.slane %v6747_v19, 1  ;;  %vm23521_vm8 = vmmov %vm23504_vm3  ;;  %v6771_v19 = vor.u32 %v6770_v38, %v6767_v43  ;;  %v7087_v38 = vrot.slane %v20596_v24, 2  ;;  %v7093_v24 = vrot.slane %v20612_v39, 2 }
 0x3ca   : > { %v6744_v60 = vor.u32 %v6743_v53, %v6740_v52  ;;  %v6776_v31 = vrot.slane %v6774_v56, 1  ;;  %v7061_v52 = vld [vmem:[#allocation2 + $0x8] sm:$0xc]  ;;  %v7091_v56 = vrot.slane %v20606_v36, 2  ;;  %v7097_v36 = vrot.slane %v20622_v61, 2 }
 0x3cb   : > { %v6753_v33 = vor.u32 %v6752_v27, %v6749_v45 }
 0x3cc   : > { %v6745_v11 = vsel %vm23522_vm4, %v6735_v15, %v6744_v60  ;;  %vm23528_vm4 = vmmov %vm23501_vm2 }
 0x3d0   : > { %15685 = vmatmul.mubr.msk.bf16.gmra.mrb[52].mxu1 %vm23504_vm3, %v6709_v7  ;;  %v6758_v7 = vrot.slane %v6756_v32, 1 }
 0x3d1   : > { %15688 = vmatprep.mubr.msk.bf16.mxu1 %vm23518_vm10, %v6718_v10  ;;  %v6754_v10 = vsel %vm23523_vm5, %v6744_v60, %v6753_v33  ;;  %vm23524_vm10 = vmmov %vm23504_vm3  ;;  %v7071_v60 = vrot.slane %v20545_v1, 2  ;;  %vm23529_vm5 = vcmask 1045504  }
 0x3d2   : > { %v6762_v14 = vor.u32 %v6761_v59, %v6758_v7  ;;  %v7081_v59 = vrot.slane %v20582_v13, 2 }
 0x3d4   : > { %v6763_v15 = vsel %vm23525_vm12, %v6753_v33, %v6762_v14  ;;  %v6772_v53 = vsel %vm23501_vm2, %v6762_v14, %v6771_v19  ;;  %v7073_v33 = vrot.slane %v20552_v44, 2  ;;  %vm23531_vm12 = vmmov %vm23529_vm5  ;;  %v20750_v44 = vld [vmem:[%s22721_s2 + $0x70] sm:$0xff]  }
 0x3d5   : > { %vm23533_vm2 = vmmov %vm23529_vm5 }
 0x3d6   : > { %v7074_v25 = vsel %vm23531_vm12, %v7071_v60, %v7073_v33  ;;  %v7076_v1 = vsel %vm23533_vm2, %v7073_v33, %v7075_v18  ;;  %vm23538_vm12 = vmmov %vm23533_vm2 }
 0x3d8   : > { %15689 = vmatmul.mubr.msk.bf16.gmra.mrb[56].mxu1 %vm23520_vm11, %v6727_v42  ;;  %v6779_v42 = vrot.slane %v6777_v28, 2  ;;  %vm23526_vm11 = vmmov %vm23504_vm3 }
 0x3d9   : > { %15692 = vmatprep.mubr.msk.bf16.mxu1 %vm23521_vm8, %v6736_v55  ;;  %v14114_v55 = vcombine.low %v7061_v52, %v20537_v47  ;;  %vm23527_vm8 = vmmov %vm23504_vm3  ;;  %v17330_v47 = vld [vmem:[%s22721_s2 + $0x68] sm:$0xff]   ;;  %v7103_v52 = vrot.slane %v20634_v48, 2 }
 0x3da   : > { %v6780_v45 = vor.u32 %v6779_v42, %v6776_v31  ;;  %v7099_v31 = vrot.slane %v20626_v35, 2  ;;  %v20794_v35 = vld [vmem:[#allocation2 + $0x18] sm:$0xff]  }
 0x3db   : > { %v7070_v27 = vrot.slane %v14114_v55, 2  ;;  %v7386_v55 = vld [vmem:[#allocation2 + $0x10] sm:$0xc]  ;;  %v7522_v48 = vrot.slane %v20794_v35, 2 }
 0x3dc   : > { %v6781_v32 = vsel %vm23528_vm4, %v6771_v19, %v6780_v45  ;;  %vm23535_vm4 = vmmov %vm23533_vm2  ;;  %v7095_v19 = vrot.slane %v20616_v50, 2  ;;  %v7100_v39 = vsel %vm23533_vm2, %v7097_v36, %v7099_v31  ;;  %v7101_v50 = vrot.slane %v20632_v21, 2  ;;  %v20797_v45 = vld [vmem:[#allocation2 + $0x14] sm:$0xf] }
 0x3dd   : > { %v7072_v62 = vsel %vm23529_vm5, %v7070_v27, %v7071_v60  ;;  %v7078_v7 = vsel %vm23535_vm4, %v7075_v18, %v7077_v54  ;;  %vm23536_vm5 = vmmov %vm23533_vm2  ;;  %v20800_v27 = vcombine.low %v7386_v55, %v20797_v45  ;;  %v7105_v21 = vrot.slane %v20720_v40, 2  ;;  %v20810_v18 = vld [vmem:[#allocation2 + $0x28] sm:$0xff]  }
 0x3de   : > { %vm23541_vm4 = vmmov %vm23533_vm2  ;;  %v7526_v40 = vrot.slane %v20810_v18, 2 }
 0x3df   : > { %v7521_v60 = vrot.slane %v20800_v27, 2 }
 0x3e0   : > { %15693 = vmatmul.mubr.msk.bf16.gmra.mrb[60].mxu1 %vm23504_vm3, %v6745_v11  ;;  %v7079_v11 = vrot.slane %v20569_v20, 2  ;;  %v7085_v20 = vrot.slane %v20592_v46, 2 }
 0x3e1   : > { %15696 = vmatprep.mubr.msk.bf16.mxu1 %vm23524_vm10, %v6754_v10  ;;  %vm23530_vm10 = vmmov %vm23504_vm3  ;;  %v7083_v10 = vrot.slane %v20586_v34, 2  ;;  %v7089_v34 = vrot.slane %v20602_v17, 2  ;;  %v7523_v33 = vsel %vm23533_vm2, %v7521_v60, %v7522_v48 }
 0x3e2   : > { %v7082_v43 = vsel %vm23538_vm12, %v7079_v11, %v7081_v59  ;;  %vm23544_vm12 = vmmov %vm23533_vm2 }
 0x3e3   : > { %v7084_v22 = vsel %vm23533_vm2, %v7081_v59, %v7083_v10  ;;  %v7086_v14 = vsel %vm23541_vm4, %v7083_v10, %v7085_v20  ;;  %v7090_v28 = vsel %vm23544_vm12, %v7087_v38, %v7089_v34  ;;  %v7092_v46 = vsel %vm23533_vm2, %v7089_v34, %v7091_v56  ;;  %vm23547_vm4 = vmmov %vm23533_vm2  ;;  %v20846_v34 = vld [vmem:[#allocation2 + $0x50] sm:$0xff]  }
 0x3e4   : > { %vm23550_vm12 = vmmov %vm23533_vm2 }
 0x3e5   : > { %v7098_v42 = vsel %vm23550_vm12, %v7095_v19, %v7097_v36  ;;  %vm23556_vm12 = vmmov %vm23533_vm2  ;;  %v20860_v36 = vld [vmem:[#allocation2 + $0x68] sm:$0xff]  }
 0x3e8   : > { %15697 = vmatmul.mubr.msk.bf16.gmra.mrb[64].mxu1 %vm23526_vm11, %v6763_v15  ;;  %vm23532_vm11 = vmmov %vm23504_vm3  ;;  %v7094_v15 = vsel %vm23547_vm4, %v7091_v56, %v7093_v24 }
 0x3e9   : > { %15700 = vmatprep.mubr.msk.bf16.mxu1 %vm23527_vm8, %v6772_v53  ;;  %vm23534_vm8 = vmmov %vm23504_vm3 }
 0x3ea   : > { %vm23553_vm4 = vmmov %vm23533_vm2 }
 0x3eb   : > { %v7102_v53 = vsel %vm23553_vm4, %v7099_v31, %v7101_v50  ;;  %vm23559_vm4 = vmmov %vm23533_vm2 }
 0x3f0   : > { %15701 = vmatmul.mubr.msk.bf16.gmra.mrb[68].mxu1 %vm23504_vm3, %v6781_v32  ;;  %v7106_v32 = vsel %vm23556_vm12, %v7103_v52, %v7105_v21  ;;  %vm23562_vm12 = vmmov %vm23533_vm2 }
 0x3f1   : > { %15708 = vmatprep.mubr.msk.bf16.mxu1 %vm23530_vm10, %v7072_v62  ;;  %vm23537_vm10 = vmmov %vm23504_vm3  ;;  %v20806_v62 = vld [vmem:[#allocation2 + $0x20] sm:$0xff]  }
 0x3f8   : > { %15709 = vmatmul.mubr.msk.bf16.vlgmr.msra.gmra.mrb[36].mxu1 %vm23532_vm11, %v7074_v25  ;;  %vm23539_vm11 = vmmov %vm23504_vm3  ;;  %v17344_v25 = vld [vmem:[%s22721_s2 + $0x78] sm:$0xff]  }
 0x3f9   : > { %15745 = vmatpush3.bf16.msra.mxu1 %v20672_v63  ;;  %15712 = vmatprep.mubr.msk.bf16.mxu1 %vm23534_vm8, %v7076_v1  ;;  %v7080_v63 = vsel %vm23536_vm5, %v7077_v54, %v7079_v11  ;;  %vm23540_vm8 = vmmov %vm23504_vm3  ;;  %v20819_v54 = vld [vmem:[#allocation2 + $0x30] sm:$0xff]  }
 0x3fa   : > { %15746 = vmatprep.subr.bf16.mxu1 %v17330_v47  ;;  %vm23542_vm5 = vmmov %vm23533_vm2  ;;  %v7528_v59 = vrot.slane %v20819_v54, 2 }
 0x3fb   : > { %v7088_v13 = vsel %vm23542_vm5, %v7085_v20, %v7087_v38  ;;  %vm23548_vm5 = vmmov %vm23533_vm2  ;;  %v20840_v20 = vld [vmem:[#allocation2 + $0x48] sm:$0xff]  }
 0x3fc   : > { %v7096_v17 = vsel %vm23548_vm5, %v7093_v24, %v7095_v19  ;;  %vm23554_vm5 = vmmov %vm23533_vm2 }
 0x3fd   : > { %15747 = vmatpush3.bf16.msra.mxu1 %v17330_v47  ;;  %v7104_v61 = vsel %vm23554_vm5, %v7101_v50, %v7103_v52  ;;  %v7524_v47 = vrot.slane %v20806_v62, 2  ;;  %vm23560_vm5 = vmmov %vm23533_vm2  ;;  %v20866_v50 = vld [vmem:[#allocation2 + $0x70] sm:$0xff]  }
 0x3fe   : > { %15784 = vmatprep.subr.bf16.mxu1 %v20750_v44  ;;  %v7544_v55 = vrot.slane %v20866_v50, 2 }
 0x3ff   : > { %v7525_v1 = vsel %vm23559_vm4, %v7522_v48, %v7524_v47  ;;  %v7527_v11 = vsel %vm23560_vm5, %v7524_v47, %v7526_v40  ;;  %vm23565_vm4 = vmmov %vm23533_vm2  ;;  %v20876_v48 = vld [vmem:[#allocation2 + $0x80] sm:$0xff]  }
 0x400   : > { %15713 = vmatmul.mubr.msk.bf16.gmra.mrb[40].mxu1 %vm23504_vm3, %v7078_v7  ;;  %v20823_v7 = vld [vmem:[#allocation2 + $0x38] sm:$0xff]   ;;  %vm23566_vm5 = vmmov %vm23533_vm2 }
 0x401   : > { %15716 = vmatprep.mubr.msk.bf16.mxu1 %vm23537_vm10, %v7080_v63  ;;  %vm23543_vm10 = vmmov %vm23504_vm3  ;;  %v20830_v63 = vld [vmem:[%s22721_s2 + $0x80] sm:$0xff]   ;;  %v7530_v10 = vrot.slane %v20823_v7, 2 }
 0x408   : > { %15717 = vmatmul.mubr.msk.bf16.gmra.mrb[44].mxu1 %vm23539_vm11, %v7082_v43  ;;  %vm23545_vm11 = vmmov %vm23504_vm3  ;;  %v7529_v43 = vsel %vm23562_vm12, %v7526_v40, %v7528_v59 }
 0x409   : > { %15720 = vmatprep.mubr.msk.bf16.mxu1 %vm23540_vm8, %v7084_v22  ;;  %vm23546_vm8 = vmmov %vm23504_vm3  ;;  %v20836_v22 = vld [vmem:[#allocation2 + $0x40] sm:$0xff]  }
 0x40a   : > { %v7532_v38 = vrot.slane %v20836_v22, 2  ;;  %vm23568_vm12 = vmmov %vm23533_vm2 }
 0x410   : > { %15721 = vmatmul.mubr.msk.bf16.gmra.mrb[48].mxu1 %vm23504_vm3, %v7086_v14  ;;  %v7534_v14 = vrot.slane %v20840_v20, 2 }
 0x411   : > { %15724 = vmatprep.mubr.msk.bf16.mxu1 %vm23543_vm10, %v7088_v13  ;;  %vm23549_vm10 = vmmov %vm23504_vm3  ;;  %v7533_v13 = vsel %vm23565_vm4, %v7530_v10, %v7532_v38 }
 0x412   : > { %v7535_v56 = vsel %vm23566_vm5, %v7532_v38, %v7534_v14  ;;  %vm23571_vm4 = vmmov %vm23533_vm2  ;;  %v7847_v38 = vshrl.u32 %v20800_v27, 16 }
 0x413   : > { %vm23572_vm5 = vmmov %vm23533_vm2 }
 0x418   : > { %15725 = vmatmul.mubr.msk.bf16.gmra.mrb[52].mxu1 %vm23545_vm11, %v7090_v28  ;;  %vm23551_vm11 = vmmov %vm23504_vm3  ;;  %v20850_v28 = vld [vmem:[#allocation2 + $0x58] sm:$0xff]  }
 0x419   : > { %15728 = vmatprep.mubr.msk.bf16.mxu1 %vm23546_vm8, %v7092_v46  ;;  %vm23552_vm8 = vmmov %vm23504_vm3  ;;  %v7536_v46 = vrot.slane %v20846_v34, 2  ;;  %v7538_v24 = vrot.slane %v20850_v28, 2 }
 0x41b   : > { %v7537_v19 = vsel %vm23568_vm12, %v7534_v14, %v7536_v46  ;;  %vm23574_vm12 = vmmov %vm23533_vm2  ;;  %v7850_v14 = vshll.u32 %v20800_v27, 16  ;;  %v7873_v27 = vshrl.u32 %v20810_v18, 16 }
 0x420   : > { %15729 = vmatmul.mubr.msk.bf16.gmra.mrb[56].mxu1 %vm23504_vm3, %v7094_v15  ;;  %v20856_v15 = vld [vmem:[#allocation2 + $0x60] sm:$0xff]  }
 0x421   : > { %15732 = vmatprep.mubr.msk.bf16.mxu1 %vm23549_vm10, %v7096_v17  ;;  %vm23555_vm10 = vmmov %vm23504_vm3  ;;  %v7539_v17 = vsel %vm23533_vm2, %v7536_v46, %v7538_v24  ;;  %v7540_v31 = vrot.slane %v20856_v15, 2 }
 0x428   : > { %15733 = vmatmul.mubr.msk.bf16.gmra.mrb[60].mxu1 %vm23551_vm11, %v7098_v42  ;;  %vm23557_vm11 = vmmov %vm23504_vm3  ;;  %v7542_v42 = vrot.slane %v20860_v36, 2 }
 0x429   : > { %15736 = vmatprep.mubr.msk.bf16.mxu1 %vm23552_vm8, %v7100_v39  ;;  %vm23558_vm8 = vmmov %vm23504_vm3  ;;  %v7541_v39 = vsel %vm23571_vm4, %v7538_v24, %v7540_v31 }
 0x42a   : > { %v7543_v52 = vsel %vm23572_vm5, %v7540_v31, %v7542_v42  ;;  %v7545_v21 = vsel %vm23574_vm12, %v7542_v42, %v7544_v55  ;;  %vm23577_vm4 = vmmov %vm23533_vm2  ;;  %v7852_v31 = vrot.slane %v7850_v14, 3 }
 0x42b   : > { %vm23578_vm5 = vmmov %vm23533_vm2 }
 0x42c   : > { %vm23580_vm12 = vmmov %vm23533_vm2 }
 0x430   : > { %15737 = vmatmul.mubr.msk.bf16.gmra.mrb[64].mxu1 %vm23504_vm3, %v7102_v53  ;;  %v20870_v53 = vld [vmem:[#allocation2 + $0x78] sm:$0xff]  }
 0x431   : > { %15740 = vmatprep.mubr.msk.bf16.mxu1 %vm23555_vm10, %v7104_v61  ;;  %vm23561_vm10 = vmmov %vm23504_vm3  ;;  %v7546_v61 = vrot.slane %v20870_v53, 2 }
 0x433   : > { %v7547_v60 = vsel %vm23533_vm2, %v7544_v55, %v7546_v61 }
 0x438   : > { %15741 = vmatmul.mubr.msk.bf16.gmra.mrb[68].mxu1 %vm23557_vm11, %v7106_v32  ;;  %vm23563_vm11 = vmmov %vm23504_vm3  ;;  %v20880_v32 = vld [vmem:[#allocation2 + $0x88] sm:$0xff]  }
 0x439   : > { %15748 = vmatprep.mubr.msk.bf16.mxu1 %vm23558_vm8, %v7523_v33  ;;  %vm23564_vm8 = vmmov %vm23504_vm3  ;;  %v7548_v33 = vrot.slane %v20876_v48, 2  ;;  %v7550_v47 = vrot.slane %v20880_v32, 2 }
 0x43b   : > { %v7549_v40 = vsel %vm23577_vm4, %v7546_v61, %v7548_v33  ;;  %v7876_v61 = vshll.u32 %v20810_v18, 16  ;;  %vm23583_vm4 = vmmov %vm23533_vm2 }
 0x440   : > { %15749 = vmatmul.mubr.msk.bf16.vlgmr.msra.gmra.mrb[36].mxu1 %vm23504_vm3, %v7525_v1  ;;  %v7551_v1 = vsel %vm23578_vm5, %v7548_v33, %v7550_v47  ;;  %vm23584_vm5 = vsmask.f32 5376 }
 0x441   : > { %15785 = vmatpush3.bf16.msra.mxu1 %v20750_v44  ;;  %15752 = vmatprep.mubr.msk.bf16.mxu1 %vm23561_vm10, %v7527_v11  ;;  %v7531_v44 = vsel %vm23533_vm2, %v7528_v59, %v7530_v10  ;;  %vm23567_vm10 = vmmov %vm23504_vm3  ;;  %v20890_v11 = vld [vmem:[#allocation2 + $0x98] sm:$0xff]  }
 0x442   : > { %15786 = vmatprep.subr.bf16.mxu1 %v17344_v25  ;;  %v7554_v10 = vrot.slane %v20890_v11, 2 }
 0x445   : > { %15787 = vmatpush3.bf16.msra.mxu1 %v17344_v25  ;;  %v20886_v25 = vld [vmem:[#allocation2 + $0x90] sm:$0xff]  }
 0x446   : > { %15824 = vmatprep.subr.bf16.mxu1 %v20830_v63  ;;  %v7552_v59 = vrot.slane %v20886_v25, 2 }
 0x448   : > { %15753 = vmatmul.mubr.msk.bf16.gmra.mrb[40].mxu1 %vm23563_vm11, %v7529_v43  ;;  %vm23569_vm11 = vmmov %vm23504_vm3  ;;  %v7855_v43 = vshrl.u32 %v20794_v35, 16  ;;  %v7555_v46 = vsel %vm23533_vm2, %v7552_v59, %v7554_v10 }
 0x449   : > { %15756 = vmatprep.mubr.msk.bf16.mxu1 %vm23564_vm8, %v7531_v44  ;;  %vm23570_vm8 = vmmov %vm23504_vm3  ;;  %v7858_v44 = vshll.u32 %v20794_v35, 16 }
 0x44a   : > { %v7857_v24 = vrot.slane %v7855_v43, 2  ;;  %vm23588_vm2 = vmmov %vm23584_vm5 }
 0x450   : > { %15757 = vmatmul.mubr.msk.bf16.gmra.mrb[44].mxu1 %vm23504_vm3, %v7533_v13  ;;  %v7553_v13 = vsel %vm23580_vm12, %v7550_v47, %v7552_v59  ;;  %v7878_v59 = vrot.slane %v7876_v61, 3  ;;  %vm23586_vm12 = vmmov %vm23584_vm5 }
 0x451   : > { %15760 = vmatprep.mubr.msk.bf16.mxu1 %vm23567_vm10, %v7535_v56  ;;  %vm23573_vm10 = vmmov %vm23504_vm3  ;;  %v17351_v56 = vld [vmem:[#allocation2 + $0xa0] ss:$0 sps:$4 sm:$0x33]  }
 0x452   : > { %v7556_v42 = vrot.slane %v17351_v56, 2  ;;  %v17353_v56 = vld [vmem:[%s22721_s2 + $0x88] sm:$0xff]  }
 0x458   : > { %15761 = vmatmul.mubr.msk.bf16.gmra.mrb[48].mxu1 %vm23569_vm11, %v7537_v19  ;;  %vm23575_vm11 = vmmov %vm23504_vm3  ;;  %v7860_v19 = vrot.slane %v7858_v44, 3  ;;  %v7882_v44 = vshrl.u32 %v20819_v54, 16 }
 0x459   : > { %15764 = vmatprep.mubr.msk.bf16.mxu1 %vm23570_vm8, %v7539_v17  ;;  %vm23576_vm8 = vmmov %vm23504_vm3  ;;  %v7849_v17 = vrot.slane %v7847_v38, 2  ;;  %v7885_v38 = vshll.u32 %v20819_v54, 16 }
 0x45a   : > { %v7861_v55 = vor.u32 %v7860_v19, %v7857_v24  ;;  %v7884_v24 = vrot.slane %v7882_v44, 2  ;;  %v7918_v44 = vshrl.u32 %v20846_v34, 16 }
 0x45b   : > { %v7887_v19 = vrot.slane %v7885_v38, 3  ;;  %v7921_v38 = vshll.u32 %v20846_v34, 16 }
 0x460   : > { %15765 = vmatmul.mubr.msk.bf16.gmra.mrb[52].mxu1 %vm23504_vm3, %v7541_v39  ;;  %v7864_v39 = vshrl.u32 %v20806_v62, 16 }
 0x461   : > { %15768 = vmatprep.mubr.msk.bf16.mxu1 %vm23573_vm10, %v7543_v52  ;;  %vm23579_vm10 = vmmov %vm23504_vm3  ;;  %v7867_v52 = vshll.u32 %v20806_v62, 16 }
 0x462   : > { %v7866_v33 = vrot.slane %v7864_v39, 2  ;;  %v7888_v39 = vor.u32 %v7887_v19, %v7884_v24  ;;  %v7923_v24 = vrot.slane %v7921_v38, 3  ;;  %v7963_v38 = vshrl.u32 %v20870_v53, 16 }
 0x463   : > { %v7869_v47 = vrot.slane %v7867_v52, 3  ;;  %v7900_v52 = vshrl.u32 %v20836_v22, 16 }
 0x465   : > { %v7870_v43 = vor.u32 %v7869_v47, %v7866_v33  ;;  %v7902_v33 = vrot.slane %v7900_v52, 2  ;;  %v7939_v52 = vshll.u32 %v20856_v15, 16 }
 0x468   : > { %15769 = vmatmul.mubr.msk.bf16.gmra.mrb[56].mxu1 %vm23575_vm11, %v7545_v21  ;;  %vm23581_vm11 = vmmov %vm23504_vm3  ;;  %v7853_v21 = vor.u32 %v7852_v31, %v7849_v17 }
 0x469   : > { %15772 = vmatprep.mubr.msk.bf16.mxu1 %vm23576_vm8, %v7547_v60  ;;  %vm23582_vm8 = vmmov %vm23504_vm3  ;;  %v7557_v60 = vsel %vm23583_vm4, %v7554_v10, %v7556_v42  ;;  %v7894_v10 = vshll.u32 %v20823_v7, 16 }
 0x46a   : > { %vm23590_vm4 = vmmov %vm23588_vm2 }
 0x46b   : > { %v7896_v42 = vrot.slane %v7894_v10, 3  ;;  %v7930_v10 = vshll.u32 %v20850_v28, 16 }
 0x470   : > { %15773 = vmatmul.mubr.msk.bf16.gmra.mrb[60].mxu1 %vm23504_vm3, %v7549_v40  ;;  %v7862_v40 = vsel %vm23584_vm5, %v7853_v21, %v7861_v55  ;;  %v7912_v21 = vshll.u32 %v20840_v20, 16  ;;  %vm23591_vm5 = vmmov %vm23588_vm2 }
 0x471   : > { %15776 = vmatprep.mubr.msk.bf16.mxu1 %vm23579_vm10, %v7551_v1  ;;  %v7875_v1 = vrot.slane %v7873_v27, 2  ;;  %vm23585_vm10 = vmmov %vm23504_vm3  ;;  %v7903_v27 = vshll.u32 %v20836_v22, 16 }
 0x473   : > { %v7879_v14 = vor.u32 %v7878_v59, %v7875_v1  ;;  %v7905_v47 = vrot.slane %v7903_v27, 3  ;;  %v7914_v1 = vrot.slane %v7912_v21, 3  ;;  %v17355_v59 = vld [vmem:[%s22722_s3 + $0x10] sm:$0xff]  }
 0x474   : > { %15864 = vmatprep.subr.bf16.mxu0 %v17355_v59 }
 0x475   : > { %v7880_v17 = vsel %vm23588_vm2, %v7870_v43, %v7879_v14  ;;  %15865 = vmatpush3.bf16.msra.mxu0 %v17355_v59  ;;  %v7954_v59 = vshrl.u32 %v20866_v50, 16 }
 0x478   : > { %15777 = vmatmul.mubr.msk.bf16.gmra.mrb[64].mxu1 %vm23581_vm11, %v7553_v13  ;;  %v7891_v13 = vshrl.u32 %v20823_v7, 16  ;;  %vm23587_vm11 = vmmov %vm23504_vm3 }
 0x479   : > { %15780 = vmatprep.mubr.msk.bf16.mxu1 %vm23582_vm8, %v7555_v46  ;;  %v7871_v46 = vsel %vm23586_vm12, %v7861_v55, %v7870_v43  ;;  %vm23589_vm8 = vmmov %vm23504_vm3  ;;  %v7909_v55 = vshrl.u32 %v20840_v20, 16  ;;  %v7906_v43 = vor.u32 %v7905_v47, %v7902_v33  ;;  %v7941_v33 = vrot.slane %v7939_v52, 3 }
 0x47a   : > { %v7893_v31 = vrot.slane %v7891_v13, 2  ;;  %v7927_v13 = vshrl.u32 %v20850_v28, 16  ;;  %vm23593_vm12 = vmmov %vm23588_vm2  ;;  %v7981_v52 = vshrl.u32 %v20880_v32, 16 }
 0x47c   : > { %v7897_v61 = vor.u32 %v7896_v42, %v7893_v31  ;;  %v7932_v31 = vrot.slane %v7930_v10, 3  ;;  %v7956_v10 = vrot.slane %v7954_v59, 2 }
 0x480   : > { %15781 = vmatmul.mubr.msk.bf16.gmra.mrb[68].mxu1 %vm23504_vm3, %v7557_v60  ;;  %v7889_v60 = vsel %vm23590_vm4, %v7879_v14, %v7888_v39  ;;  %vm23596_vm4 = vmmov %vm23588_vm2 }
 0x481   : > { %15788 = vmatprep.mubr.msk.bf16.mxu1 %vm23585_vm10, %v7862_v40  ;;  %v7911_v40 = vrot.slane %v7909_v55, 2  ;;  %vm23592_vm10 = vmmov %vm23504_vm3  ;;  %v7945_v55 = vshrl.u32 %v20860_v36, 16 }
 0x483   : > { %v7915_v14 = vor.u32 %v7914_v1, %v7911_v40 }
 0x485   : > { %v7916_v19 = vsel %vm23588_vm2, %v7906_v43, %v7915_v14 }
 0x488   : > { %15789 = vmatmul.mubr.msk.bf16.vlgmr.msra.gmra.mrb[36].mxu1 %vm23587_vm11, %v7871_v46  ;;  %v7920_v46 = vrot.slane %v7918_v44, 2  ;;  %vm23594_vm11 = vmmov %vm23504_vm3 }
 0x489   : > { %15825 = vmatpush3.bf16.msra.mxu1 %v20830_v63  ;;  %15792 = vmatprep.mubr.msk.bf16.mxu1 %vm23589_vm8, %v7880_v17  ;;  %v7898_v63 = vsel %vm23591_vm5, %v7888_v39, %v7897_v61  ;;  %v7929_v17 = vrot.slane %v7927_v13, 2  ;;  %vm23595_vm8 = vmmov %vm23504_vm3  ;;  %v7936_v39 = vshrl.u32 %v20856_v15, 16 }
 0x48a   : > { %15826 = vmatprep.subr.bf16.mxu1 %v17353_v56  ;;  %v7924_v42 = vor.u32 %v7923_v24, %v7920_v46  ;;  %vm23597_vm5 = vmmov %vm23588_vm2  ;;  %v7965_v24 = vrot.slane %v7963_v38, 2 }
 0x48b   : > { %v7933_v27 = vor.u32 %v7932_v31, %v7929_v17  ;;  %v7972_v31 = vshrl.u32 %v20876_v48, 16 }
 0x48c   : > { %v7925_v21 = vsel %vm23596_vm4, %v7915_v14, %v7924_v42  ;;  %v7966_v14 = vshll.u32 %v20870_v53, 16  ;;  %vm23602_vm4 = vmmov %vm23588_vm2 }
 0x48d   : > { %15827 = vmatpush3.bf16.msra.mxu1 %v17353_v56  ;;  %v7907_v56 = vsel %vm23593_vm12, %v7897_v61, %v7906_v43  ;;  %v7948_v61 = vshll.u32 %v20860_v36, 16  ;;  %v7934_v47 = vsel %vm23597_vm5, %v7924_v42, %v7933_v27  ;;  %v7957_v43 = vshll.u32 %v20866_v50, 16  ;;  %vm23599_vm12 = vmmov %vm23588_vm2 }
 0x48e   : > { %v7975_v42 = vshll.u32 %v20876_v48, 16  ;;  %vm23603_vm5 = vmmov %vm23588_vm2 }
 0x48f   : > { %v7950_v40 = vrot.slane %v7948_v61, 3  ;;  %v7974_v61 = vrot.slane %v7972_v31, 2 }
 0x490   : > { %15793 = vmatmul.mubr.msk.bf16.gmra.mrb[40].mxu1 %vm23504_vm3, %v7889_v60  ;;  %v7938_v60 = vrot.slane %v7936_v39, 2 }
 0x491   : > { %15796 = vmatprep.mubr.msk.bf16.mxu1 %vm23592_vm10, %v7898_v63  ;;  %v7947_v63 = vrot.slane %v7945_v55, 2  ;;  %vm23598_vm10 = vmmov %vm23504_vm3 }
 0x492   : > { %v7942_v1 = vor.u32 %v7941_v33, %v7938_v60  ;;  %v7983_v33 = vrot.slane %v7981_v52, 2 }
 0x493   : > { %v7951_v44 = vor.u32 %v7950_v40, %v7947_v63  ;;  %v7990_v40 = vshrl.u32 %v20886_v25, 16 }
 0x494   : > { %v7943_v13 = vsel %vm23599_vm12, %v7933_v27, %v7942_v1  ;;  %v7984_v27 = vshll.u32 %v20880_v32, 16  ;;  %vm23605_vm12 = vmmov %vm23588_vm2 }
 0x495   : > { %v7952_v46 = vsel %vm23588_vm2, %v7942_v1, %v7951_v44  ;;  %v7993_v1 = vshll.u32 %v20886_v25, 16 }
 0x498   : > { %15797 = vmatmul.mubr.msk.bf16.gmra.mrb[44].mxu1 %vm23594_vm11, %v7907_v56  ;;  %v7959_v56 = vrot.slane %v7957_v43, 3  ;;  %vm23600_vm11 = vmmov %vm23504_vm3  ;;  %v7999_v43 = vshrl.u32 %v20890_v11, 16 }
 0x499   : > { %15800 = vmatprep.mubr.msk.bf16.mxu1 %vm23595_vm8, %v7916_v19  ;;  %v7968_v19 = vrot.slane %v7966_v14, 3  ;;  %vm23601_vm8 = vmmov %vm23504_vm3  ;;  %v7992_v14 = vrot.slane %v7990_v40, 2 }
 0x49a   : > { %v7960_v17 = vor.u32 %v7959_v56, %v7956_v10  ;;  %v20971_v10 = vld [vmem:[#allocation2 + $0xa0] ss:$0 sps:$4 sm:$0x77]  }
 0x49b   : > { %v7969_v39 = vor.u32 %v7968_v19, %v7965_v24  ;;  %v8011_v31 = vshll.u32 %v20971_v10, 16 }
 0x49c   : > { %v7961_v55 = vsel %vm23602_vm4, %v7951_v44, %v7960_v17  ;;  %v8002_v44 = vshll.u32 %v20890_v11, 16  ;;  %vm23608_vm4 = vmmov %vm23588_vm2 }
 0x49d   : > { %v7970_v60 = vsel %vm23603_vm5, %v7960_v17, %v7969_v39  ;;  %v8008_v17 = vshrl.u32 %v20971_v10, 16  ;;  %vm23609_vm5 = vmmov %vm23588_vm2 }
 0x49e   : > { %v8004_v24 = vrot.slane %v8002_v44, 3  ;;  %v8313_v44 = vrot.slane %v20823_v7, 3  ;;  %v8319_v7 = vrot.slane %v20846_v34, 3 }
 0x49f   : > { %v8010_v52 = vrot.slane %v8008_v17, 2  ;;  %v8329_v17 = vrot.slane %v20870_v53, 3  ;;  %v8335_v53 = vrot.slane %v20886_v25, 3  ;;  %v17356_v25 = vld [vmem:[%s22722_s3 + $0x18] sm:$0xff]  }
 0x4a0   : > { %15801 = vmatmul.mubr.msk.bf16.gmra.mrb[48].mxu1 %vm23504_vm3, %v7925_v21  ;;  %v7977_v21 = vrot.slane %v7975_v42, 3  ;;  %15866 = vmatprep.subr.bf16.mxu0 %v17356_v25 }
 0x4a1   : > { %15804 = vmatprep.mubr.msk.bf16.mxu1 %vm23598_vm10, %v7934_v47  ;;  %v7986_v47 = vrot.slane %v7984_v27, 3  ;;  %vm23604_vm10 = vmmov %vm23504_vm3  ;;  %v8013_v27 = vrot.slane %v8011_v31, 3  ;;  %15867 = vmatpush3.bf16.msra.mxu0 %v17356_v25 }
 0x4a2   : > { %v7978_v63 = vor.u32 %v7977_v21, %v7974_v61 }
 0x4a3   : > { %v7987_v59 = vor.u32 %v7986_v47, %v7983_v33  ;;  %v8305_v33 = vrot.slane %v20794_v35, 3  ;;  %v8311_v35 = vrot.slane %v20819_v54, 3 }
 0x4a4   : > { %v7979_v38 = vsel %vm23605_vm12, %v7969_v39, %v7978_v63  ;;  %vm23611_vm12 = vmmov %vm23588_vm2 }
 0x4a5   : > { %v7988_v56 = vsel %vm23588_vm2, %v7978_v63, %v7987_v59  ;;  %vm23613_vm2 = vcmask 1044480  }
 0x4a8   : > { %15805 = vmatmul.mubr.msk.bf16.gmra.mrb[52].mxu1 %vm23600_vm11, %v7943_v13  ;;  %v7995_v13 = vrot.slane %v7993_v1, 3  ;;  %vm23606_vm11 = vmmov %vm23504_vm3  ;;  %v8307_v1 = vrot.slane %v20806_v62, 3  ;;  %v8314_v62 = vsel %vm23613_vm2, %v8311_v35, %v8313_v44 }
 0x4a9   : > { %15808 = vmatprep.mubr.msk.bf16.mxu1 %vm23601_vm8, %v7952_v46  ;;  %v8001_v46 = vrot.slane %v7999_v43, 2  ;;  %vm23607_vm8 = vmmov %vm23504_vm3 }
 0x4aa   : > { %v7996_v19 = vor.u32 %v7995_v13, %v7992_v14  ;;  %v8317_v14 = vrot.slane %v20840_v20, 3  ;;  %v8323_v20 = vrot.slane %v20856_v15, 3 }
 0x4ab   : > { %v8005_v42 = vor.u32 %v8004_v24, %v8001_v46  ;;  %v8325_v24 = vrot.slane %v20860_v36, 3  ;;  %v8331_v36 = vrot.slane %v20876_v48, 3 }
 0x4ac   : > { %v7997_v39 = vsel %vm23608_vm4, %v7987_v59, %v7996_v19  ;;  %v8309_v59 = vrot.slane %v20810_v18, 3  ;;  %vm23615_vm4 = vmmov %vm23613_vm2  ;;  %v8315_v18 = vrot.slane %v20836_v22, 3 }
 0x4ad   : > { %v8006_v61 = vsel %vm23609_vm5, %v7996_v19, %v8005_v42  ;;  %v8308_v43 = vsel %vm23615_vm4, %v8305_v33, %v8307_v1  ;;  %vm23616_vm5 = vmmov %vm23613_vm2 }
 0x4ae   : > { %vm23621_vm4 = vmmov %vm23613_vm2 }
 0x4af   : > { %v8316_v13 = vsel %vm23621_vm4, %v8313_v44, %v8315_v18  ;;  %vm23627_vm4 = vmmov %vm23613_vm2 }
 0x4b0   : > { %15809 = vmatmul.mubr.msk.bf16.gmra.mrb[56].mxu1 %vm23504_vm3, %v7961_v55  ;;  %v8295_v55 = vld [vmem:[#allocation2 + $0x10] sm:$0x8] }
 0x4b1   : > { %15812 = vmatprep.mubr.msk.bf16.mxu1 %vm23604_vm10, %v7970_v60  ;;  %vm23610_vm10 = vmmov %vm23504_vm3  ;;  %v14207_v21 = vcombine.low %v8295_v55, %v20797_v45  ;;  %v8014_v60 = vor.u32 %v8013_v27, %v8010_v52  ;;  %v8310_v45 = vsel %vm23616_vm5, %v8307_v1, %v8309_v59  ;;  %v8337_v52 = vrot.slane %v20890_v11, 3  ;;  %v21045_v11 = vld [vmem:[%s22722_s3] sm:$0xff]  }
 0x4b2   : > { %vm23622_vm5 = vmmov %vm23613_vm2  ;;  %15904 = vmatprep.subr.bf16.mxu0 %v21045_v11 }
 0x4b3   : > { %v8304_v47 = vrot.slane %v14207_v21, 3  ;;  %v8015_v63 = vsel %vm23611_vm12, %v8005_v42, %v8014_v60  ;;  %vm23618_vm12 = vmmov %vm23613_vm2  ;;  %v8318_v54 = vsel %vm23622_vm5, %v8315_v18, %v8317_v14  ;;  %v8333_v42 = vrot.slane %v20880_v32, 3  ;;  %v9320_v21 = vld [vmem:[#allocation2 + $0x4] sm:$0xf]  ;;  %v21053_v60 = vld [vmem:[%s22723_s4 + $0x2] ss:$0 sm:$0xff] }
 0x4b4   : > { %vm23628_vm5 = vmmov %vm23613_vm2  ;;  %v8338_v48 = vsel %vm23613_vm2, %v8335_v53, %v8337_v52  ;;  %v8339_v32 = vrot.slane %v20971_v10, 3 }
 0x4b5   : > { %v8306_v40 = vsel %vm23613_vm2, %v8304_v47, %v8305_v33  ;;  %v8326_v34 = vsel %vm23628_vm5, %v8323_v20, %v8325_v24  ;;  %vm23634_vm5 = vmmov %vm23613_vm2  ;;  %v21058_v47 = vld [vmem:[%s22723_s4 + $0x3] ss:$0 sm:$0xff] }
 0x4b8   : > { %15813 = vmatmul.mubr.msk.bf16.gmra.mrb[60].mxu1 %vm23606_vm11, %v7979_v38  ;;  %vm23612_vm11 = vmmov %vm23504_vm3  ;;  %v8312_v38 = vsel %vm23618_vm12, %v8309_v59, %v8311_v35 }
 0x4b9   : > { %15816 = vmatprep.mubr.msk.bf16.mxu1 %vm23607_vm8, %v7988_v56  ;;  %vm23614_vm8 = vmmov %vm23504_vm3  ;;  %v8321_v56 = vrot.slane %v20850_v28, 3  ;;  %v8327_v28 = vrot.slane %v20866_v50, 3  ;;  %v8334_v50 = vsel %vm23634_vm5, %v8331_v36, %v8333_v42 }
 0x4ba   : > { %vm23624_vm12 = vmmov %vm23613_vm2 }
 0x4bb   : > { %v8320_v46 = vsel %vm23624_vm12, %v8317_v14, %v8319_v7  ;;  %v8322_v22 = vsel %vm23613_vm2, %v8319_v7, %v8321_v56  ;;  %v8324_v19 = vsel %vm23627_vm4, %v8321_v56, %v8323_v20  ;;  %vm23630_vm12 = vmmov %vm23613_vm2  ;;  %v8330_v15 = vsel %vm23613_vm2, %v8327_v28, %v8329_v17 }
 0x4bc   : > { %v8328_v31 = vsel %vm23630_vm12, %v8325_v24, %v8327_v28  ;;  %vm23633_vm4 = vmmov %vm23613_vm2 }
 0x4bd   : > { %vm23636_vm12 = vmmov %vm23613_vm2 }
 0x4be   : > { %v8336_v27 = vsel %vm23636_vm12, %v8333_v42, %v8335_v53 }
 0x4c0   : > { %15817 = vmatmul.mubr.msk.bf16.gmra.mrb[64].mxu1 %vm23504_vm3, %v7997_v39  ;;  %v8332_v39 = vsel %vm23633_vm4, %v8329_v17, %v8331_v36  ;;  %vm23639_vm4 = vmmov %vm23613_vm2 }
 0x4c1   : > { %15820 = vmatprep.mubr.msk.bf16.mxu1 %vm23610_vm10, %v8006_v61  ;;  %vm23617_vm10 = vmmov %vm23504_vm3  ;;  %v8340_v55 = vsel %vm23639_vm4, %v8337_v52, %v8339_v32  ;;  %v9319_v61 = vld [vmem:[#allocation2] sm:$0xf]  ;;  %vm23652_vm4 = vcmask 257024  }
 0x4c2   : > { %v21048_v10 = vcombine.low %v9319_v61, %v9320_v21 }
 0x4c4   : > { %v9461_v1 = vshll.u32 %v21048_v10, 16 }
 0x4c8   : > { %15821 = vmatmul.mubr.msk.bf16.gmra.mrb[68].mxu1 %vm23612_vm11, %v8015_v63  ;;  %vm23619_vm11 = vmmov %vm23504_vm3 }
 0x4c9   : > { %15828 = vmatprep.mubr.msk.bf16.mxu1 %vm23614_vm8, %v8306_v40  ;;  %vm23620_vm8 = vmmov %vm23504_vm3 }
 0x4d0   : > { %15829 = vmatmul.mubr.msk.bf16.vlgmr.msra.gmra.mrb[36].mxu1 %vm23504_vm3, %v8308_v43 }
 0x4d1   : > { %15832 = vmatprep.mubr.msk.bf16.mxu1 %vm23617_vm10, %v8310_v45  ;;  %vm23623_vm10 = vmmov %vm23504_vm3 }
 0x4d8   : > { %15833 = vmatmul.mubr.msk.bf16.gmra.mrb[40].mxu1 %vm23619_vm11, %v8312_v38  ;;  %vm23625_vm11 = vmmov %vm23504_vm3 }
 0x4d9   : > { %15836 = vmatprep.mubr.msk.bf16.mxu1 %vm23620_vm8, %v8314_v62  ;;  %vm23626_vm8 = vmmov %vm23504_vm3 }
 0x4e0   : > { %15837 = vmatmul.mubr.msk.bf16.gmra.mrb[44].mxu1 %vm23504_vm3, %v8316_v13  ;;  %v9459_v13 = vshrl.u32 %v21048_v10, 16 }
 0x4e1   : > { %15840 = vmatprep.mubr.msk.bf16.mxu1 %vm23623_vm10, %v8318_v54  ;;  %vm23629_vm10 = vmmov %vm23504_vm3  ;;  %v9463_v54 = vrot.slane %v9461_v1, 1 }
 0x4e8   : > { %15841 = vmatmul.mubr.msk.bf16.gmra.mrb[48].mxu1 %vm23625_vm11, %v8320_v46  ;;  %vm23631_vm11 = vmmov %vm23504_vm3  ;;  %v23640_v46 = vld [vmem:[#allocation76_spill] sm:$0xff] }
 0x4e9   : > { %15844 = vmatprep.mubr.msk.bf16.mxu1 %vm23626_vm8, %v8322_v22  ;;  %vm23632_vm8 = vmmov %vm23504_vm3  ;;  %vm23641_vm5 = vnez %v23640_v46 }
 0x4f0   : > { %15845 = vmatmul.mubr.msk.bf16.gmra.mrb[52].mxu1 %vm23504_vm3, %v8324_v19  ;;  %v23642_v19 = vld [vmem:[#allocation78_spill] sm:$0xff] }
 0x4f1   : > { %15848 = vmatprep.mubr.msk.bf16.mxu1 %vm23629_vm10, %v8326_v34  ;;  %vm23635_vm10 = vmmov %vm23504_vm3 }
 0x4f8   : > { %15849 = vmatmul.mubr.msk.bf16.gmra.mrb[56].mxu1 %vm23631_vm11, %v8328_v31  ;;  %vm23637_vm11 = vmmov %vm23504_vm3 }
 0x4f9   : > { %15852 = vmatprep.mubr.msk.bf16.mxu1 %vm23632_vm8, %v8330_v15  ;;  %vm23638_vm8 = vmmov %vm23504_vm3  ;;  %v23644_v15 = vld [vmem:[#allocation82_spill] sm:$0xff] }
 0x4fa   : > { %vm23645_vm12 = vnez %v23644_v15  ;;  %v23650_v15 = vld [vmem:[#allocation7_spill] sm:$0xff] }
 0x500   : > { %15853 = vmatmul.mubr.msk.bf16.gmra.mrb[60].mxu1 %vm23504_vm3, %v8332_v39 }
 0x501   : > { %15856 = vmatprep.mubr.msk.bf16.mxu1 %vm23635_vm10, %v8334_v50  ;;  %vm23643_vm10 = vnez %v23642_v19  ;;  %v21077_v50 = vor.u32 %v9463_v54, %v9459_v13 }
 0x508   : > { %15857 = vmatmul.mubr.msk.bf16.gmra.mrb[64].mxu1 %vm23637_vm11, %v8336_v27 }
 0x509   : > { %15860 = vmatprep.mubr.msk.bf16.mxu1 %vm23638_vm8, %v8338_v48  ;;  %v23646_v48 = vld [vmem:[#allocation86_spill] sm:$0xff]  ;;  %vm23651_vm8 = vnez %v23650_v15 }
 0x50a   : > { %vm23647_vm11 = vnez %v23646_v48 }
 0x510   : > { %15861 = vmatmul.mubr.msk.bf16.gmra.mrb[68].mxu1 %vm23504_vm3, %v8340_v55  ;;  %vm23653_vm3 = vmmov %vm23652_vm4 }
 0x5a3   : > { %v15830_v33 = vpop.f32.mrb[36].mxu1 }
 0x5a4   : > { %v8628_v63 = vmul.f32 %v15830_v33, %v21053_v60  ;;  %v8441_v40 = vpop.f32.mrb[37].mxu1 }
 0x5a5   : > { %v8626_v59 = vmul.f32 %v21053_v60, %v8441_v40  ;;  %v15831_v43 = vpop.f32.mrb[38].mxu1 }
 0x5a6   : > { %v8669_v45 = vadd.f32 %v21058_v47, %v8628_v63  ;;  %v8629_v35 = vmul.f32 %v15831_v43, %v21053_v60  ;;  %v8444_v44 = vpop.f32.mrb[39].mxu1 }
 0x5a7   : > { %v8667_v38 = vadd.f32 %v21058_v47, %v8626_v59  ;;  %v8627_v62 = vmul.f32 %v21053_v60, %v8444_v44 }
 0x5a8   : > { %v8705_v18 = vmax.f32 %v8669_v45, 0.0  ;;  %v8670_v14 = vadd.f32 %v21058_v47, %v8629_v35 }
 0x5a9   : > { %v8703_v7 = vmax.f32 %v8667_v38, 0.0  ;;  %v8668_v56 = vadd.f32 %v21058_v47, %v8627_v62 }
 0x5aa   : > { %v8741_v22 = vsel %vm23641_vm5, %v8705_v18, 0.0  ;;  %v8706_v20 = vmax.f32 %v8670_v14, 0.0  ;;  %vm23654_vm5 = vmmov %vm23653_vm3 }
 0x5ab   : > { %v14596_v24 = vpack.c.bf16 %v8741_v22, %v8741_v22  ;;  %v8739_v34 = vsel %vm23643_vm10, %v8703_v7, 0.0  ;;  %v8704_v28 = vmax.f32 %v8668_v56, 0.0  ;;  %v15834_v17 = vpop.f32.mrb[40].mxu1 }
 0x5ac   : > { %v14594_v31 = vpack.c.bf16 %v8739_v34, %v8739_v34  ;;  %v8742_v36 = vsel %vm23645_vm12, %v8706_v20, 0.0  ;;  %v8632_v42 = vmul.f32 %v15834_v17, %v21053_v60  ;;  %v8457_v39 = vpop.f32.mrb[41].mxu1 }
 0x5ad   : > { %v8903_v53 = vshrl.u32 %v14596_v24, 16  ;;  %v8906_v52 = vshll.u32 %v14596_v24, 16  ;;  %v14597_v27 = vpack.c.bf16 %v8742_v36, %v8742_v36  ;;  %v8740_v32 = vsel %vm23647_vm11, %v8704_v28, 0.0  ;;  %v15835_v55 = vpop.f32.mrb[42].mxu1  ;;  %v23648_v24 = vld [vmem:[#allocation98_spill] sm:$0xff] }
 0x5ae   : > { %v8884_v25 = vshrl.u32 %v14594_v31, 16  ;;  %v8887_v61 = vshll.u32 %v14594_v31, 16  ;;  %v14595_v21 = vpack.c.bf16 %v8740_v32, %v8740_v32  ;;  %v8673_v33 = vadd.f32 %v21058_v47, %v8632_v42  ;;  %v8460_v63 = vpop.f32.mrb[43].mxu1  ;;  %v17454_v31 = vld [vmem:[#allocation2 + $0x8] sm:$0xe] }
 0x5af   : > { %v8905_v40 = vrot.slane %v8903_v53, 6  ;;  %v8908_v1 = vrot.slane %v8906_v52, 7  ;;  %v8913_v59 = vshrl.u32 %v14597_v27, 16  ;;  %v8916_v43 = vshll.u32 %v14597_v27, 16 }
 0x5b0   : > { %v8886_v45 = vrot.slane %v8884_v25, 6  ;;  %v8889_v35 = vrot.slane %v8887_v61, 7  ;;  %v8893_v44 = vshrl.u32 %v14595_v21, 16  ;;  %v8896_v38 = vshll.u32 %v14595_v21, 16 }
 0x5b1   : > { %v8909_v62 = vor.u32 %v8908_v1, %v8905_v40  ;;  %v8915_v18 = vrot.slane %v8913_v59, 6  ;;  %v8918_v14 = vrot.slane %v8916_v43, 7  ;;  %v8709_v13 = vmax.f32 %v8673_v33, 0.0 }
 0x5b2   : > { %v8890_v54 = vor.u32 %v8889_v35, %v8886_v45  ;;  %v8895_v7 = vrot.slane %v8893_v44, 6  ;;  %v8898_v56 = vrot.slane %v8896_v38, 7  ;;  %v8630_v46 = vmul.f32 %v21053_v60, %v8457_v39 }
 0x5b3   : > { %v8911_v22 = vrot.slane %v8909_v62, 4  ;;  %v21083_v20 = vor.u32 %v8918_v14, %v8915_v18  ;;  %vm23649_vm2 = vnez %v23648_v24  ;;  %v8633_v34 = vmul.f32 %v15835_v55, %v21053_v60  ;;  %v15838_v28 = vpop.f32.mrb[44].mxu1  ;;  %v23655_v14 = vld [vmem:[#allocation9_spill] sm:$0xff] }
 0x5b4   : > { %v8745_v19 = vsel %vm23649_vm2, %v8709_v13, 0.0  ;;  %v8891_v17 = vrot.slane %v8890_v54, 4  ;;  %v9279_v36 = vsel %vm23651_vm8, %v8890_v54, %v17454_v31  ;;  %v8899_v42 = vor.u32 %v8898_v56, %v8895_v7  ;;  %v8473_v52 = vpop.f32.mrb[45].mxu1  ;;  %v23657_v54 = vld [vmem:[#allocation8_spill] sm:$0xff] }
 0x5b5   : > { %v14600_v53 = vpack.c.bf16 %v8745_v19, %v8745_v19  ;;  %9280 = vst [vmem:[#allocation2 + $0x8] sm:$0xe] %v9279_v36  ;;  %v8920_v39 = vsel %vm19611_vm6, %v8911_v22, %v21083_v20  ;;  %v8921_v27 = vrot.slane %v21083_v20, 4  ;;  %v8671_v48 = vadd.f32 %v21058_v47, %v8630_v46  ;;  %v15839_v55 = vpop.f32.mrb[46].mxu1 }
 0x5b6   : > { %v8674_v32 = vadd.f32 %v21058_v47, %v8633_v34  ;;  %9283 = vst.msk [vmem:[#allocation2 + $0x14] sm:$0xf] %vm23652_vm4, %v8920_v39  ;;  %v8900_v25 = vsel %vm19611_vm6, %v8891_v17, %v8899_v42  ;;  %v8901_v61 = vrot.slane %v8899_v42, 4  ;;  %v8476_v40 = vpop.f32.mrb[47].mxu1  ;;  %v8631_v43 = vmul.f32 %v21053_v60, %v8460_v63  ;;  %v23659_v39 = vld [vmem:[#allocation20_spill] sm:$0xff]  ;;  %vm23665_vm4 = vmmov %vm23653_vm3 }
 0x5b7   : > { %v8943_v21 = vshrl.u32 %v14600_v53, 16  ;;  %v8946_v33 = vshll.u32 %v14600_v53, 16  ;;  %9281 = vst.msk [vmem:[#allocation2 + $0xc] sm:$0xf] %vm23653_vm3, %v8900_v25  ;;  %v8707_v1 = vmax.f32 %v8671_v48, 0.0  ;;  %v8636_v45 = vmul.f32 %v15838_v28, %v21053_v60 }
 0x5b8   : > { %v8710_v59 = vmax.f32 %v8674_v32, 0.0  ;;  %v8910_v35 = vsel %vm19611_vm6, %v8901_v61, %v8909_v62  ;;  %v8634_v18 = vmul.f32 %v21053_v60, %v8473_v52  ;;  %vm23656_vm10 = vnez %v23655_v14  ;;  %v23661_v32 = vld [vmem:[#allocation14_spill] sm:$0xff] }
 0x5b9   : > { %v8945_v44 = vrot.slane %v8943_v21, 6  ;;  %v8948_v38 = vrot.slane %v8946_v33, 7  ;;  %9282 = vst.msk [vmem:[#allocation2 + $0x10] sm:$0xf] %vm23654_vm5, %v8910_v35  ;;  %v8743_v13 = vsel %vm23656_vm10, %v8707_v1, 0.0  ;;  %vm23658_vm12 = vnez %v23657_v54  ;;  %v23663_v35 = vld [vmem:[#allocation10_spill] sm:$0xff]  ;;  %vm23668_vm10 = vmmov %vm23653_vm3 }
 0x5ba   : > { %v8746_v7 = vsel %vm23658_vm12, %v8710_v59, 0.0  ;;  %v8672_v56 = vadd.f32 %v21058_v47, %v8631_v43  ;;  %v8677_v63 = vadd.f32 %v21058_v47, %v8636_v45  ;;  %v14598_v22 = vpack.c.bf16 %v8743_v13, %v8743_v13  ;;  %vm23669_vm12 = vmmov %vm23653_vm3 }
 0x5bb   : > { %v21112_v46 = vor.u32 %v8948_v38, %v8945_v44  ;;  %v14601_v62 = vpack.c.bf16 %v8746_v7, %v8746_v7  ;;  %v8675_v20 = vadd.f32 %v21058_v47, %v8634_v18  ;;  %v8637_v34 = vmul.f32 %v15839_v55, %v21053_v60  ;;  %v15842_v17 = vpop.f32.mrb[48].mxu1 }
 0x5bc   : > { %v8708_v24 = vmax.f32 %v8672_v56, 0.0  ;;  %v8713_v19 = vmax.f32 %v8677_v63, 0.0  ;;  %v8635_v28 = vmul.f32 %v21053_v60, %v8476_v40  ;;  %v8923_v15 = vshrl.u32 %v14598_v22, 16  ;;  %v8489_v53 = vpop.f32.mrb[49].mxu1 }
 0x5bd   : > { %v8951_v31 = vrot.slane %v21112_v46, 4  ;;  %v8926_v36 = vshll.u32 %v14598_v22, 16  ;;  %v8953_v42 = vshrl.u32 %v14601_v62, 16  ;;  %v8956_v52 = vshll.u32 %v14601_v62, 16  ;;  %v15843_v21 = vpop.f32.mrb[50].mxu1 }
 0x5be   : > { %vm23660_vm11 = vnez %v23659_v39  ;;  %vm23662_vm2 = vnez %v23661_v32  ;;  %v8711_v61 = vmax.f32 %v8675_v20, 0.0  ;;  %v8925_v33 = vrot.slane %v8923_v15, 6  ;;  %v8492_v59 = vpop.f32.mrb[51].mxu1 }
 0x5bf   : > { %v8744_v48 = vsel %vm23660_vm11, %v8708_v24, 0.0  ;;  %v8749_v25 = vsel %vm23662_vm2, %v8713_v19, 0.0  ;;  %v8928_v55 = vrot.slane %v8926_v36, 7  ;;  %v8955_v1 = vrot.slane %v8953_v42, 6  ;;  %vm23672_vm2 = vmmov %vm23653_vm3 }
 0x5c0   : > { %v14599_v40 = vpack.c.bf16 %v8744_v48, %v8744_v48  ;;  %v8958_v43 = vrot.slane %v8956_v52, 7  ;;  %v14604_v45 = vpack.c.bf16 %v8749_v25, %v8749_v25  ;;  %vm23664_vm8 = vnez %v23663_v35  ;;  %v23666_v25 = vld [vmem:[#allocation23_spill] sm:$0xff] }
 0x5c1   : > { %v8747_v44 = vsel %vm23664_vm8, %v8711_v61, 0.0  ;;  %v8678_v38 = vadd.f32 %v21058_v47, %v8637_v34  ;;  %v8929_v18 = vor.u32 %v8928_v55, %v8925_v33  ;;  %vm23667_vm5 = vnez %v23666_v25 }
 0x5c2   : > { %v8933_v14 = vshrl.u32 %v14599_v40, 16  ;;  %v8936_v13 = vshll.u32 %v14599_v40, 16  ;;  %v14602_v54 = vpack.c.bf16 %v8747_v44, %v8747_v44  ;;  %v8959_v7 = vor.u32 %v8958_v43, %v8955_v1 }
 0x5c3   : > { %v8983_v56 = vshrl.u32 %v14604_v45, 16  ;;  %v8986_v63 = vshll.u32 %v14604_v45, 16  ;;  %v8714_v22 = vmax.f32 %v8678_v38, 0.0  ;;  %v8930_v62 = vsel %vm19611_vm6, %v8921_v27, %v8929_v18  ;;  %v15846_v52 = vpop.f32.mrb[52].mxu1 }
 0x5c4   : > { %v8931_v20 = vrot.slane %v8929_v18, 4  ;;  %v8935_v24 = vrot.slane %v8933_v14, 6  ;;  %v8938_v19 = vrot.slane %v8936_v13, 7  ;;  %9284 = vst.msk [vmem:[#allocation2 + $0x18] sm:$0xf] %vm23665_vm4, %v8930_v62  ;;  %v8960_v15 = vsel %vm19611_vm6, %v8951_v31, %v8959_v7  ;;  %v21133_v61 = vpop.f32.mrb[53].mxu1  ;;  %vm23675_vm4 = vmmov %vm23672_vm2 }
 0x5c5   : > { %v8961_v34 = vrot.slane %v8959_v7, 4  ;;  %v8985_v36 = vrot.slane %v8983_v56, 6  ;;  %v8988_v42 = vrot.slane %v8986_v63, 7  ;;  %9287 = vst.msk [vmem:[#allocation2 + $0x24] sm:$0xf] %vm23653_vm3, %v8960_v15  ;;  %v8963_v48 = vshrl.u32 %v14602_v54, 16 }
 0x5c6   : > { %v8939_v39 = vor.u32 %v8938_v19, %v8935_v24  ;;  %v8966_v32 = vshll.u32 %v14602_v54, 16  ;;  %v8750_v27 = vsel %vm23667_vm5, %v8714_v22, 0.0  ;;  %v8676_v1 = vadd.f32 %v21058_v47, %v8635_v28  ;;  %v21139_v40 = vpop.f32.mrb[54].mxu1  ;;  %v23670_v62 = vld [vmem:[#allocation16_spill] sm:$0xff] }
 0x5c7   : > { %v21135_v33 = vor.u32 %v8988_v42, %v8985_v36  ;;  %v14605_v55 = vpack.c.bf16 %v8750_v27, %v8750_v27  ;;  %v8640_v31 = vmul.f32 %v15842_v17, %v21053_v60  ;;  %v8965_v35 = vrot.slane %v8963_v48, 6  ;;  %v21143_v38 = vpop.f32.mrb[55].mxu1  ;;  %v23673_v27 = vld [vmem:[#allocation11_spill] sm:$0xff] }
 0x5c8   : > { %v8940_v43 = vsel %vm19611_vm6, %v8931_v20, %v8939_v39  ;;  %v8941_v45 = vrot.slane %v8939_v39, 4  ;;  %v8968_v44 = vrot.slane %v8966_v32, 7  ;;  %v8712_v54 = vmax.f32 %v8676_v1, 0.0 }
 0x5c9   : > { %9285 = vst.msk [vmem:[#allocation2 + $0x1c] sm:$0xf] %vm23668_vm10, %v8940_v43  ;;  %v8991_v18 = vrot.slane %v21135_v33, 4  ;;  %v8993_v14 = vshrl.u32 %v14605_v55, 16  ;;  %v8996_v13 = vshll.u32 %v14605_v55, 16  ;;  %v8681_v7 = vadd.f32 %v21058_v47, %v8640_v31  ;;  %vm23680_vm10 = vmmov %vm23672_vm2 }
 0x5ca   : > { %v8950_v28 = vsel %vm19611_vm6, %v8941_v45, %v21112_v46  ;;  %v8969_v17 = vor.u32 %v8968_v44, %v8965_v35  ;;  %v8638_v56 = vmul.f32 %v21053_v60, %v8489_v53  ;;  %vm23671_vm11 = vnez %v23670_v62  ;;  %v23678_v62 = vld [vmem:[#allocation27_spill] sm:$0xff] }
 0x5cb   : > { %9286 = vst.msk [vmem:[#allocation2 + $0x20] sm:$0xf] %vm23669_vm12, %v8950_v28  ;;  %v8995_v63 = vrot.slane %v8993_v14, 6  ;;  %v8998_v22 = vrot.slane %v8996_v13, 7  ;;  %v8748_v20 = vsel %vm23671_vm11, %v8712_v54, 0.0  ;;  %v8641_v24 = vmul.f32 %v15843_v21, %v21053_v60  ;;  %v21164_v32 = vpop.f32.mrb[56].mxu1  ;;  %vm23683_vm11 = vmmov %vm23672_vm2 }
 0x5cc   : > { %v8970_v19 = vsel %vm19611_vm6, %v8961_v34, %v8969_v17  ;;  %v8971_v15 = vrot.slane %v8969_v17, 4  ;;  %v14603_v36 = vpack.c.bf16 %v8748_v20, %v8748_v20  ;;  %v8717_v46 = vmax.f32 %v8681_v7, 0.0  ;;  %v21169_v1 = vpop.f32.mrb[57].mxu1  ;;  %v23676_v7 = vld [vmem:[#allocation12_spill] sm:$0xff] }
 0x5cd   : > { %9288 = vst.msk [vmem:[#allocation2 + $0x28] sm:$0xf] %vm23672_vm2, %v8970_v19  ;;  %v21159_v42 = vor.u32 %v8998_v22, %v8995_v63  ;;  %v8679_v53 = vadd.f32 %v21058_v47, %v8638_v56  ;;  %v8682_v39 = vadd.f32 %v21058_v47, %v8641_v24  ;;  %v8639_v48 = vmul.f32 %v21053_v60, %v8492_v59  ;;  %v21175_v59 = vpop.f32.mrb[58].mxu1 }
 0x5ce   : > { %v8973_v25 = vshrl.u32 %v14603_v36, 16  ;;  %v8976_v21 = vshll.u32 %v14603_v36, 16  ;;  %vm23674_vm8 = vnez %v23673_v27  ;;  %v8644_v55 = vmul.f32 %v15846_v52, %v21053_v60  ;;  %v21179_v52 = vpop.f32.mrb[59].mxu1 }
 0x5cf   : > { %v8753_v34 = vsel %vm23674_vm8, %v8717_v46, 0.0  ;;  %v9000_v31 = vsel %vm19611_vm6, %v8991_v18, %v21159_v42  ;;  %v9001_v43 = vrot.slane %v21159_v42, 4  ;;  %v8715_v35 = vmax.f32 %v8679_v53, 0.0  ;;  %vm23686_vm8 = vmmov %vm23675_vm4 }
 0x5d0   : > { %v14608_v45 = vpack.c.bf16 %v8753_v34, %v8753_v34  ;;  %9291 = vst.msk [vmem:[#allocation2 + $0x34] sm:$0xf] %vm23675_vm4, %v9000_v31  ;;  %v8975_v44 = vrot.slane %v8973_v25, 6  ;;  %v8978_v14 = vrot.slane %v8976_v21, 7  ;;  %v8718_v13 = vmax.f32 %v8682_v39, 0.0 }
 0x5d1   : > { %v8680_v54 = vadd.f32 %v21058_v47, %v8639_v48  ;;  %vm23677_vm3 = vnez %v23676_v7  ;;  %v8685_v56 = vadd.f32 %v21058_v47, %v8644_v55  ;;  %vm23679_vm5 = vnez %v23678_v62  ;;  %v23681_v55 = vld [vmem:[#allocation19_spill] sm:$0xff]  ;;  %v23684_v7 = vld [vmem:[#allocation48_spill] sm:$0xff] }
 0x5d2   : > { %v9023_v28 = vshrl.u32 %v14608_v45, 16  ;;  %v9026_v17 = vshll.u32 %v14608_v45, 16  ;;  %v8751_v18 = vsel %vm23677_vm3, %v8715_v35, 0.0  ;;  %v8979_v63 = vor.u32 %v8978_v14, %v8975_v44  ;;  %vm23687_vm3 = vmmov %vm23675_vm4 }
 0x5d3   : > { %v14606_v22 = vpack.c.bf16 %v8751_v18, %v8751_v18  ;;  %v8754_v20 = vsel %vm23679_vm5, %v8718_v13, 0.0  ;;  %v8716_v24 = vmax.f32 %v8680_v54, 0.0  ;;  %v8721_v42 = vmax.f32 %v8685_v56, 0.0  ;;  %v21191_v45 = vpop.f32.mrb[60].mxu1 }
 0x5d4   : > { %v9025_v19 = vrot.slane %v9023_v28, 6  ;;  %v9028_v36 = vrot.slane %v9026_v17, 7  ;;  %v14609_v46 = vpack.c.bf16 %v8754_v20, %v8754_v20  ;;  %v8980_v53 = vsel %vm19611_vm6, %v8971_v15, %v8979_v63  ;;  %v21196_v13 = vpop.f32.mrb[61].mxu1 }
 0x5d5   : > { %v8981_v39 = vrot.slane %v8979_v63, 4  ;;  %v9003_v48 = vshrl.u32 %v14606_v22, 16  ;;  %v9006_v25 = vshll.u32 %v14606_v22, 16  ;;  %9289 = vst.msk [vmem:[#allocation2 + $0x2c] sm:$0xf] %vm23680_vm10, %v8980_v53  ;;  %vm23682_vm12 = vnez %v23681_v55  ;;  %v21201_v56 = vpop.f32.mrb[62].mxu1 }
 0x5d6   : > { %v9029_v21 = vor.u32 %v9028_v36, %v9025_v19  ;;  %v9033_v27 = vshrl.u32 %v14609_v46, 16  ;;  %v9036_v34 = vshll.u32 %v14609_v46, 16  ;;  %v8752_v31 = vsel %vm23682_vm12, %v8716_v24, 0.0  ;;  %v21220_v55 = vld [vmem:[#allocation2 + $0x10] sm:$0xff]   ;;  %vm23691_vm12 = vmmov %vm23687_vm3 }
 0x5d7   : > { %v8990_v35 = vsel %vm19611_vm6, %v8981_v39, %v21135_v33  ;;  %v9005_v44 = vrot.slane %v9003_v48, 6  ;;  %v9008_v14 = vrot.slane %v9006_v25, 7  ;;  %v14607_v15 = vpack.c.bf16 %v8752_v31, %v8752_v31  ;;  %v21203_v33 = vpop.f32.mrb[63].mxu1 }
 0x5d8   : > { %9290 = vst.msk [vmem:[#allocation2 + $0x30] sm:$0xf] %vm23683_vm11, %v8990_v35  ;;  %v9031_v54 = vrot.slane %v9029_v21, 4  ;;  %v9035_v28 = vrot.slane %v9033_v27, 6  ;;  %v9038_v17 = vrot.slane %v9036_v34, 7  ;;  %vm23685_vm2 = vnez %v23684_v7 }
 0x5d9   : > { %v8757_v18 = vsel %vm23685_vm2, %v8721_v42, 0.0  ;;  %v9009_v63 = vor.u32 %v9008_v14, %v9005_v44  ;;  %v9013_v22 = vshrl.u32 %v14607_v15, 16  ;;  %v9016_v62 = vshll.u32 %v14607_v15, 16  ;;  %v17358_v42 = vld [vmem:[#allocation2 + $0x8] sm:$0xff]  }
 0x5da   : > { %v14612_v20 = vpack.c.bf16 %v8757_v18, %v8757_v18  ;;  %v21205_v24 = vor.u32 %v9038_v17, %v9035_v28  ;;  %v8642_v19 = vmul.f32 %v21053_v60, %v21133_v61  ;;  %v8645_v36 = vmul.f32 %v21139_v40, %v21053_v60 }
 0x5db   : > { %v8643_v46 = vmul.f32 %v21053_v60, %v21143_v38  ;;  %v9010_v53 = vsel %vm19611_vm6, %v9001_v43, %v9009_v63  ;;  %v9011_v39 = vrot.slane %v9009_v63, 4  ;;  %v9015_v48 = vrot.slane %v9013_v22, 6 }
 0x5dc   : > { %v9018_v25 = vrot.slane %v9016_v62, 7  ;;  %9292 = vst.msk [vmem:[#allocation2 + $0x38] sm:$0xf] %vm23686_vm8, %v9010_v53  ;;  %v9040_v27 = vsel %vm19611_vm6, %v9031_v54, %v21205_v24  ;;  %v9041_v61 = vrot.slane %v21205_v24, 4  ;;  %v9063_v34 = vshrl.u32 %v14612_v20, 16  ;;  %v21226_v54 = vpop.f32.mrb[64].mxu1 }
 0x5dd   : > { %v9066_v40 = vshll.u32 %v14612_v20, 16  ;;  %9295 = vst.msk [vmem:[#allocation2 + $0x44] sm:$0xf] %vm23675_vm4, %v9040_v27  ;;  %v8683_v43 = vadd.f32 %v21058_v47, %v8642_v19  ;;  %v8686_v31 = vadd.f32 %v21058_v47, %v8645_v36  ;;  %v8684_v35 = vadd.f32 %v21058_v47, %v8643_v46  ;;  %v21234_v36 = vpop.f32.mrb[65].mxu1 }
 0x5de   : > { %v9019_v38 = vor.u32 %v9018_v25, %v9015_v48  ;;  %v9065_v44 = vrot.slane %v9063_v34, 6  ;;  %v9466_v15 = vshll.u32 %v17358_v42, 16  ;;  %v9470_v28 = vshrl.u32 %v17358_v42, 16  ;;  %v23688_v42 = vld [vmem:[#allocation21_spill] sm:$0xff]  ;;  %v21244_v25 = vpop.f32.mrb[66].mxu1 }
 0x5df   : > { %v9068_v14 = vrot.slane %v9066_v40, 7  ;;  %v8719_v18 = vmax.f32 %v8683_v43, 0.0  ;;  %v8722_v63 = vmax.f32 %v8686_v31, 0.0  ;;  %v8720_v62 = vmax.f32 %v8684_v35, 0.0 }
 0x5e0   : > { %v9020_v17 = vsel %vm19611_vm6, %v9011_v39, %v9019_v38  ;;  %v9021_v7 = vrot.slane %v9019_v38, 4  ;;  %v9468_v20 = vrot.slane %v9466_v15, 1  ;;  %v9474_v19 = vshll.u32 %v21220_v55, 16  ;;  %v21250_v38 = vpop.f32.mrb[67].mxu1 }
 0x5e1   : > { %9293 = vst.msk [vmem:[#allocation2 + $0x3c] sm:$0xf] %vm23687_vm3, %v9020_v17  ;;  %v21231_v22 = vor.u32 %v9068_v14, %v9065_v44  ;;  %vm23689_vm5 = vnez %v23688_v42  ;;  %vm23690_vm10 = vnez %v23258_v3  ;;  %v8648_v48 = vmul.f32 %v21164_v32, %v21053_v60  ;;  %v17369_v32 = vld [vmem:[%s22722_s3 + $0x8] sm:$0xff]  }
 0x5e2   : > { %v9030_v46 = vsel %vm19611_vm6, %v9021_v7, %v9029_v21  ;;  %v8755_v53 = vsel %vm23689_vm5, %v8719_v18, 0.0  ;;  %v8758_v39 = vsel %vm23690_vm10, %v8722_v63, 0.0  ;;  %vm23692_vm11 = vnez %v23267_v8  ;;  %vm23698_vm10 = vmmov %vm23691_vm12 }
 0x5e3   : > { %9294 = vst.msk [vmem:[#allocation2 + $0x40] sm:$0xf] %vm23691_vm12, %v9030_v46  ;;  %v9071_v27 = vrot.slane %v21231_v22, 4  ;;  %v14610_v34 = vpack.c.bf16 %v8755_v53, %v8755_v53  ;;  %v14613_v40 = vpack.c.bf16 %v8758_v39, %v8758_v39  ;;  %v8756_v21 = vsel %vm23692_vm11, %v8720_v62, 0.0  ;;  %vm23699_vm12 = vmmov %vm23698_vm10 }
 0x5e4   : > { %v14611_v43 = vpack.c.bf16 %v8756_v21, %v8756_v21  ;;  %vm23693_vm2 = vsmask.f32 7424  ;;  %v9472_v31 = vor.u32 %v9470_v28, %v9468_v20  ;;  %v9476_v35 = vrot.slane %v9474_v19, 1  ;;  %v21261_v19 = vpop.f32.mrb[68].mxu1  ;;  %vm23700_vm11 = vmmov %vm23698_vm10 }
 0x5e5   : > { %v9469_v3 = vsel %vm23693_vm2, %v21077_v50, %v9468_v20  ;;  %v9043_v44 = vshrl.u32 %v14610_v34, 16  ;;  %v9046_v14 = vshll.u32 %v14610_v34, 16  ;;  %v9073_v15 = vshrl.u32 %v14613_v40, 16  ;;  %vm23695_vm4 = vmmov %vm23693_vm2 }
 0x5e6   : > { %v9076_v17 = vshll.u32 %v14613_v40, 16  ;;  %vm23694_vm8 = vcmask 261120   ;;  %v9053_v8 = vshrl.u32 %v14611_v43, 16  ;;  %v9056_v7 = vshll.u32 %v14611_v43, 16 }
 0x5e7   : > { %15868 = vmatprep.mubr.msk.bf16.mxu0 %vm23694_vm8, %v9469_v3  ;;  %v9477_v18 = vsel %vm23695_vm4, %v9472_v31, %v9476_v35  ;;  %v8689_v63 = vadd.f32 %v21058_v47, %v8648_v48  ;;  %v9045_v62 = vrot.slane %v9043_v44, 6  ;;  %v9048_v50 = vrot.slane %v9046_v14, 7  ;;  %vm23696_vm3 = vmmov %vm23694_vm8  ;;  %v21269_v48 = vld [vmem:[%s22722_s3 + $0x20] sm:$0xff]   ;;  %v21277_v3 = vld [vmem:[#allocation2 + $0x18] sm:$0xff]  }
 0x5e8   : > { %v9075_v28 = vrot.slane %v9073_v15, 6  ;;  %v9078_v20 = vrot.slane %v9076_v17, 7  ;;  %15869 = vmatmul.mubr.msk.bf16.vlgmr.msra.gmra.mrb[36].mxu0 %vm23696_vm3, %v9477_v18  ;;  %v9055_v46 = vrot.slane %v9053_v8, 6  ;;  %v9058_v42 = vrot.slane %v9056_v7, 7  ;;  %vm23702_vm8 = vmmov %vm23698_vm10 }
 0x5e9   : > { %15905 = vmatpush3.bf16.msra.mxu0 %v21045_v11  ;;  %v8725_v53 = vmax.f32 %v8689_v63, 0.0  ;;  %v8646_v39 = vmul.f32 %v21053_v60, %v21169_v1  ;;  %v9049_v34 = vor.u32 %v9048_v50, %v9045_v62  ;;  %v8649_v21 = vmul.f32 %v21175_v59, %v21053_v60  ;;  %v21279_v11 = vpop.f32.mrb[69].mxu1  ;;  %v21300_v63 = vld [vmem:[#allocation2 + $0x20] sm:$0xff]  }
 0x5ea   : > { %v21271_v40 = vor.u32 %v9078_v20, %v9075_v28  ;;  %v8647_v43 = vmul.f32 %v21053_v60, %v21179_v52  ;;  %15906 = vmatprep.subr.bf16.mxu0 %v17369_v32  ;;  %v9059_v1 = vor.u32 %v9058_v42, %v9055_v46  ;;  %vm23697_vm5 = vnez %v23279_v41  ;;  %v21285_v15 = vpop.f32.mrb[70].mxu1 }
 0x5eb   : > { %v8761_v31 = vsel %vm23697_vm5, %v8725_v53, 0.0  ;;  %v8687_v44 = vadd.f32 %v21058_v47, %v8646_v39  ;;  %v9478_v14 = vshrl.u32 %v21220_v55, 16  ;;  %v9050_v59 = vsel %vm19611_vm6, %v9041_v61, %v9049_v34  ;;  %v21295_v41 = vpop.f32.mrb[71].mxu1 }
 0x5ec   : > { %v9051_v52 = vrot.slane %v9049_v34, 4  ;;  %v9080_v17 = vsel %vm19611_vm6, %v9071_v27, %v21271_v40  ;;  %v9081_v8 = vrot.slane %v21271_v40, 4  ;;  %9296 = vst.msk [vmem:[#allocation2 + $0x48] sm:$0xf] %vm23698_vm10, %v9050_v59  ;;  %v9061_v55 = vrot.slane %v9059_v1, 4 }
 0x5ed   : > { %9299 = vst.msk [vmem:[#allocation2 + $0x54] sm:$0xf] %vm23699_vm12, %v9080_v17  ;;  %v14616_v7 = vpack.c.bf16 %v8761_v31, %v8761_v31  ;;  %v8723_v18 = vmax.f32 %v8687_v44, 0.0  ;;  %v8690_v24 = vadd.f32 %v21058_v47, %v8649_v21  ;;  %15907 = vmatpush3.bf16.msra.mxu0 %v17369_v32  ;;  %v8688_v27 = vadd.f32 %v21058_v47, %v8647_v43 }
 0x5ee   : > { %v9060_v61 = vsel %vm19611_vm6, %v9051_v52, %v9059_v1  ;;  %v9480_v62 = vor.u32 %v9478_v14, %v9476_v35  ;;  %v9482_v50 = vshll.u32 %v21277_v3, 16  ;;  %15944 = vmatprep.subr.bf16.mxu0 %v21269_v48  ;;  %v9070_v28 = vsel %vm19611_vm6, %v9061_v55, %v21231_v22 }
 0x5ef   : > { %9297 = vst.msk [vmem:[#allocation2 + $0x4c] sm:$0xf] %vm23700_vm11, %v9060_v61  ;;  %v9103_v20 = vshrl.u32 %v14616_v7, 16  ;;  %v9106_v46 = vshll.u32 %v14616_v7, 16  ;;  %vm23701_vm2 = vnez %v23286_v0  ;;  %v8726_v53 = vmax.f32 %v8690_v24, 0.0 }
 0x5f0   : > { %v8759_v32 = vsel %vm23701_vm2, %v8723_v18, 0.0  ;;  %9298 = vst.msk [vmem:[#allocation2 + $0x50] sm:$0xf] %vm23702_vm8, %v9070_v28  ;;  %v8724_v35 = vmax.f32 %v8688_v27, 0.0  ;;  %v9484_v39 = vrot.slane %v9482_v50, 1  ;;  %v9486_v21 = vshrl.u32 %v21277_v3, 16  ;;  %vm23709_vm2 = vmmov %vm23702_vm8 }
 0x5f1   : > { %v14614_v42 = vpack.c.bf16 %v8759_v32, %v8759_v32  ;;  %v9105_v34 = vrot.slane %v9103_v20, 6  ;;  %v9108_v40 = vrot.slane %v9106_v46, 7  ;;  %v9490_v43 = vshll.u32 %v21300_v63, 16  ;;  %v21325_v46 = vld [vmem:[#allocation2 + $0x28] sm:$0xff]   ;;  %vm23710_vm8 = vmmov %vm23709_vm2 }
 0x5f2   : > { %vm23703_vm4 = vnez %v23290_v58  ;;  %vm23704_vm3 = vnez %v23296_v12  ;;  %vm23705_vm5 = vsmask.f32 7424  ;;  %vm23706_vm10 = vcmask 261120  }
 0x5f3   : > { %v9083_v22 = vshrl.u32 %v14614_v42, 16  ;;  %v9086_v1 = vshll.u32 %v14614_v42, 16  ;;  %v8762_v31 = vsel %vm23703_vm4, %v8726_v53, 0.0  ;;  %v8760_v0 = vsel %vm23704_vm3, %v8724_v35, 0.0  ;;  %vm23707_vm12 = vmmov %vm23705_vm5 }
 0x5f4   : > { %v9109_v44 = vor.u32 %v9108_v40, %v9105_v34  ;;  %v14617_v14 = vpack.c.bf16 %v8762_v31, %v8762_v31  ;;  %v14615_v59 = vpack.c.bf16 %v8760_v0, %v8760_v0  ;;  %v9485_v52 = vsel %vm23705_vm5, %v9480_v62, %v9484_v39  ;;  %vm23708_vm11 = vmmov %vm23706_vm10 }
 0x5f5   : > { %v9085_v17 = vrot.slane %v9083_v22, 6  ;;  %v9088_v55 = vrot.slane %v9086_v1, 7  ;;  %15872 = vmatprep.mubr.msk.bf16.mxu0 %vm23706_vm10, %v9485_v52  ;;  %v9488_v7 = vor.u32 %v9486_v21, %v9484_v39  ;;  %v9492_v18 = vrot.slane %v9490_v43, 1  ;;  %vm23711_vm4 = vmmov %vm23709_vm2 }
 0x5f6   : > { %v9111_v24 = vrot.slane %v9109_v44, 4  ;;  %v9113_v61 = vshrl.u32 %v14617_v14, 16  ;;  %v9116_v27 = vshll.u32 %v14617_v14, 16  ;;  %v9093_v50 = vshrl.u32 %v14615_v59, 16  ;;  %vm23712_vm3 = vmmov %vm23709_vm2 }
 0x5f7   : > { %v9089_v58 = vor.u32 %v9088_v55, %v9085_v17  ;;  %v9096_v28 = vshll.u32 %v14615_v59, 16  ;;  %v9493_v12 = vsel %vm23707_vm12, %v9488_v7, %v9492_v18  ;;  %v8652_v20 = vmul.f32 %v21191_v45, %v21053_v60  ;;  %vm23719_vm12 = vmmov %vm23709_vm2 }
 0x5f8   : > { %v9115_v62 = vrot.slane %v9113_v61, 6  ;;  %v9118_v32 = vrot.slane %v9116_v27, 7  ;;  %v9095_v42 = vrot.slane %v9093_v50, 6  ;;  %15873 = vmatmul.mubr.msk.bf16.gmra.mrb[40].mxu0 %vm23708_vm11, %v9493_v12  ;;  %v8650_v53 = vmul.f32 %v21053_v60, %v21196_v13  ;;  %vm23720_vm11 = vmmov %vm23709_vm2 }
 0x5f9   : > { %v9090_v35 = vsel %vm19611_vm6, %v9081_v8, %v9089_v58  ;;  %v9091_v39 = vrot.slane %v9089_v58, 4  ;;  %v9098_v34 = vrot.slane %v9096_v28, 7  ;;  %v8693_v40 = vadd.f32 %v21058_v47, %v8652_v20 }
 0x5fa   : > { %9300 = vst.msk [vmem:[#allocation2 + $0x58] sm:$0xf] %vm23709_vm2, %v9090_v35  ;;  %v9119_v45 = vor.u32 %v9118_v32, %v9115_v62  ;;  %v8691_v21 = vadd.f32 %v21058_v47, %v8650_v53  ;;  %v8653_v43 = vmul.f32 %v21201_v56, %v21053_v60  ;;  %v8651_v22 = vmul.f32 %v21053_v60, %v21203_v33  ;;  %v21361_v35 = vld [vmem:[#allocation2 + $0x30] sm:$0xff]  }
 0x5fb   : > { %v9099_v1 = vor.u32 %v9098_v34, %v9095_v42  ;;  %v8729_v13 = vmax.f32 %v8693_v40, 0.0  ;;  %v9494_v31 = vshrl.u32 %v21300_v63, 16  ;;  %v9498_v8 = vshll.u32 %v21325_v46, 16 }
 0x5fc   : > { %v9120_v0 = vsel %vm19611_vm6, %v9111_v24, %v9119_v45  ;;  %v9121_v14 = vrot.slane %v9119_v45, 4  ;;  %v8727_v59 = vmax.f32 %v8691_v21, 0.0  ;;  %v8694_v52 = vadd.f32 %v21058_v47, %v8653_v43 }
 0x5fd   : > { %9303 = vst.msk [vmem:[#allocation2 + $0x64] sm:$0xf] %vm23710_vm8, %v9120_v0  ;;  %v9100_v56 = vsel %vm19611_vm6, %v9091_v39, %v9099_v1  ;;  %v9101_v17 = vrot.slane %v9099_v1, 4  ;;  %v8765_v33 = vsel %vm20081_vm1, %v8729_v13, 0.0  ;;  %v8692_v55 = vadd.f32 %v21058_v47, %v8651_v22  ;;  %vm23713_vm1 = vmmov %vm23705_vm5 }
 0x5fe   : > { %9301 = vst.msk [vmem:[#allocation2 + $0x5c] sm:$0xf] %vm23711_vm4, %v9100_v56  ;;  %v14620_v7 = vpack.c.bf16 %v8765_v33, %v8765_v33  ;;  %v8763_v24 = vsel %vm20091_vm9, %v8727_v59, 0.0  ;;  %v8730_v61 = vmax.f32 %v8694_v52, 0.0  ;;  %v9496_v27 = vor.u32 %v9494_v31, %v9492_v18  ;;  %vm23714_vm9 = vmmov %vm23706_vm10 }
 0x5ff   : > { %v9110_v50 = vsel %vm19611_vm6, %v9101_v17, %v9109_v44  ;;  %v14618_v58 = vpack.c.bf16 %v8763_v24, %v8763_v24  ;;  %v8728_v28 = vmax.f32 %v8692_v55, 0.0  ;;  %v9500_v12 = vrot.slane %v9498_v8, 1  ;;  %vm23717_vm5 = vmmov %vm23709_vm2 }
 0x600   : > { %9302 = vst.msk [vmem:[#allocation2 + $0x60] sm:$0xf] %vm23712_vm3, %v9110_v50  ;;  %v9143_v16 = vshrl.u32 %v14620_v7, 16  ;;  %v9146_v20 = vshll.u32 %v14620_v7, 16  ;;  %v8766_v62 = vsel %vm20106_vm7, %v8730_v61, 0.0  ;;  %v9502_v32 = vshrl.u32 %v21325_v46, 16  ;;  %vm23715_vm7 = vmmov %vm23709_vm2 }
 0x601   : > { %v9123_v42 = vshrl.u32 %v14618_v58, 16  ;;  %v9126_v30 = vshll.u32 %v14618_v58, 16  ;;  %v14621_v53 = vpack.c.bf16 %v8766_v62, %v8766_v62  ;;  %v8764_v18 = vsel %vm20121_vm13, %v8728_v28, 0.0  ;;  %vm23716_vm13 = vmmov %vm23713_vm1  ;;  %v21399_v62 = vld [vmem:[%s22723_s4 + $0x3] ss:$0 sm:$0xff] }
 0x602   : > { %v9145_v44 = vrot.slane %v9143_v16, 6  ;;  %v9148_v39 = vrot.slane %v9146_v20, 7  ;;  %v14619_v34 = vpack.c.bf16 %v8764_v18, %v8764_v18  ;;  %v9501_v40 = vsel %vm23713_vm1, %v9496_v27, %v9500_v12  ;;  %v21372_v27 = vld [vmem:[#allocation2 + $0x38] sm:$0xff]   ;;  %v21388_v20 = vld [vmem:[%s22723_s4 + $0x2] ss:$0 sm:$0xff]  ;;  %vm23718_vm10 = vmmov %vm23714_vm9 }
 0x603   : > { %v9125_v45 = vrot.slane %v9123_v42, 6  ;;  %v9128_v21 = vrot.slane %v9126_v30, 7  ;;  %v9153_v43 = vshrl.u32 %v14621_v53, 16  ;;  %v9156_v4 = vshll.u32 %v14621_v53, 16  ;;  %15876 = vmatprep.mubr.msk.bf16.mxu0 %vm23714_vm9, %v9501_v40  ;;  %v21402_v42 = vld [vmem:[#allocation2 + $0x40] sm:$0xff]   ;;  %vm23723_vm8 = vmmov %vm23713_vm1 }
 0x604   : > { %v9149_v22 = vor.u32 %v9148_v39, %v9145_v44  ;;  %v9133_v1 = vshrl.u32 %v14619_v34, 16  ;;  %v9136_v13 = vshll.u32 %v14619_v34, 16  ;;  %v9504_v31 = vor.u32 %v9502_v32, %v9500_v12  ;;  %vm23725_vm4 = vmmov %vm23713_vm1 }
 0x605   : > { %v9129_v8 = vor.u32 %v9128_v21, %v9125_v45  ;;  %v9155_v5 = vrot.slane %v9153_v43, 6  ;;  %v9158_v0 = vrot.slane %v9156_v4, 7  ;;  %v9506_v59 = vshll.u32 %v21361_v35, 16  ;;  %vm23727_vm1 = vmmov %vm23717_vm5 }
 0x606   : > { %v9151_v52 = vrot.slane %v9149_v22, 4  ;;  %v9135_v56 = vrot.slane %v9133_v1, 6  ;;  %v9138_v17 = vrot.slane %v9136_v13, 7  ;;  %v8656_v33 = vmul.f32 %v21226_v54, %v21053_v60 }
 0x607   : > { %v9130_v55 = vsel %vm19611_vm6, %v9121_v14, %v9129_v8  ;;  %v9131_v7 = vrot.slane %v9129_v8, 4  ;;  %v21370_v24 = vor.u32 %v9158_v0, %v9155_v5  ;;  %v9508_v61 = vrot.slane %v9506_v59, 1 }
 0x608   : > { %9304 = vst.msk [vmem:[#allocation2 + $0x68] sm:$0xf] %vm23715_vm7, %v9130_v55  ;;  %v9139_v50 = vor.u32 %v9138_v17, %v9135_v56  ;;  %v8697_v58 = vadd.f32 %v21058_v47, %v8656_v33  ;;  %v8654_v28 = vmul.f32 %v21053_v60, %v21234_v36  ;;  %v8657_v54 = vmul.f32 %v21244_v25, %v21053_v60  ;;  %vm23730_vm7 = vmmov %vm23727_vm1 }
 0x609   : > { %v9160_v14 = vsel %vm19611_vm6, %v9151_v52, %v21370_v24  ;;  %v9161_v12 = vrot.slane %v21370_v24, 4  ;;  %v9509_v16 = vsel %vm23716_vm13, %v9504_v31, %v9508_v61  ;;  %v8655_v47 = vmul.f32 %v21388_v20, %v21250_v38 }
 0x60a   : > { %9307 = vst.msk [vmem:[#allocation2 + $0x74] sm:$0xf] %vm23717_vm5, %v9160_v14  ;;  %v9140_v60 = vsel %vm19611_vm6, %v9131_v7, %v9139_v50  ;;  %v9141_v36 = vrot.slane %v9139_v50, 4  ;;  %15877 = vmatmul.mubr.msk.bf16.gmra.mrb[44].mxu0 %vm23718_vm10, %v9509_v16  ;;  %v8733_v25 = vmax.f32 %v8697_v58, 0.0  ;;  %v8695_v32 = vadd.f32 %v21399_v62, %v8654_v28 }
 0x60b   : > { %9305 = vst.msk [vmem:[#allocation2 + $0x6c] sm:$0xf] %vm23719_vm12, %v9140_v60  ;;  %v8698_v38 = vadd.f32 %v21399_v62, %v8657_v54  ;;  %v8696_v30 = vadd.f32 %v21399_v62, %v8655_v47  ;;  %v9510_v53 = vshrl.u32 %v21361_v35, 16  ;;  %v9514_v18 = vshll.u32 %v21372_v27, 16  ;;  %vm23734_vm12 = vmmov %vm23725_vm4 }
 0x60c   : > { %v9150_v44 = vsel %vm19611_vm6, %v9141_v36, %v9149_v22  ;;  %v8769_v39 = vsel %vm20175_vm14, %v8733_v25, 0.0  ;;  %v8731_v34 = vmax.f32 %v8695_v32, 0.0  ;;  %v9518_v40 = vshrl.u32 %v21372_v27, 16 }
 0x60d   : > { %9306 = vst.msk [vmem:[#allocation2 + $0x70] sm:$0xf] %vm23720_vm11, %v9150_v44  ;;  %v14624_v45 = vpack.c.bf16 %v8769_v39, %v8769_v39  ;;  %v8734_v21 = vmax.f32 %v8698_v38, 0.0  ;;  %v8732_v43 = vmax.f32 %v8696_v30, 0.0  ;;  %v9512_v4 = vor.u32 %v9510_v53, %v9508_v61 }
 0x60e   : > { %v8767_v1 = vsel %vm20197_vm0, %v8731_v34, 0.0  ;;  %v9516_v13 = vrot.slane %v9514_v18, 1  ;;  %v9522_v31 = vshll.u32 %v21402_v42, 16  ;;  %v8660_v22 = vmul.f32 %v21388_v20, %v21261_v19  ;;  %vm23724_vm0 = vmmov %vm23714_vm9 }
 0x60f   : > { %v9183_v37 = vshrl.u32 %v14624_v45, 16  ;;  %v9186_v8 = vshll.u32 %v14624_v45, 16  ;;  %v14622_v5 = vpack.c.bf16 %v8767_v1, %v8767_v1  ;;  %vm23721_vm14 = vnez %v23352_v49  ;;  %vm23726_vm3 = vmmov %vm23724_vm0 }
 0x610   : > { %v8770_v0 = vsel %vm23721_vm14, %v8734_v21, 0.0  ;;  %vm23722_vm2 = vnez %v23358_v23  ;;  %v9517_v56 = vsel %vm23723_vm8, %v9512_v4, %v9516_v13  ;;  %v9520_v6 = vor.u32 %v9518_v40, %v9516_v13  ;;  %v21446_v4 = vld [vmem:[#allocation2 + $0x48] sm:$0xff]   ;;  %vm23728_vm9 = vmmov %vm23727_vm1 }
 0x611   : > { %v14625_v59 = vpack.c.bf16 %v8770_v0, %v8770_v0  ;;  %v8768_v52 = vsel %vm23722_vm2, %v8732_v43, 0.0  ;;  %v9185_v17 = vrot.slane %v9183_v37, 6  ;;  %v9188_v33 = vrot.slane %v9186_v8, 7  ;;  %15880 = vmatprep.mubr.msk.bf16.mxu0 %vm23724_vm0, %v9517_v56  ;;  %v21460_v56 = vld [vmem:[#allocation2 + $0x58] sm:$0xff]   ;;  %vm23735_vm11 = vmmov %vm23724_vm0 }
 0x612   : > { %v9163_v55 = vshrl.u32 %v14622_v5, 16  ;;  %v9166_v7 = vshll.u32 %v14622_v5, 16  ;;  %v14623_v50 = vpack.c.bf16 %v8768_v52, %v8768_v52  ;;  %v9524_v58 = vrot.slane %v9522_v31, 1  ;;  %v21458_v52 = vld [vmem:[#allocation2 + $0x50] sm:$0xff]   ;;  %vm23736_vm14 = vmmov %vm23725_vm4 }
 0x613   : > { %v9193_v19 = vshrl.u32 %v14625_v59, 16  ;;  %v9196_v61 = vshll.u32 %v14625_v59, 16  ;;  %v9189_v28 = vor.u32 %v9188_v33, %v9185_v17  ;;  %v8701_v14 = vadd.f32 %v21399_v62, %v8660_v22  ;;  %vm23737_vm2 = vmmov %vm23724_vm0 }
 0x614   : > { %v9165_v49 = vrot.slane %v9163_v55, 6  ;;  %v9168_v54 = vrot.slane %v9166_v7, 7  ;;  %v9173_v47 = vshrl.u32 %v14623_v50, 16  ;;  %v9176_v60 = vshll.u32 %v14623_v50, 16  ;;  %vm23738_vm8 = vmmov %vm23725_vm4 }
 0x615   : > { %v9195_v23 = vrot.slane %v9193_v19, 6  ;;  %v9198_v16 = vrot.slane %v9196_v61, 7  ;;  %v9191_v36 = vrot.slane %v9189_v28, 4  ;;  %v9525_v32 = vsel %vm23725_vm4, %v9520_v6, %v9524_v58  ;;  %vm23739_vm0 = vmmov %vm23727_vm1 }
 0x616   : > { %v9169_v25 = vor.u32 %v9168_v54, %v9165_v49  ;;  %v8737_v38 = vmax.f32 %v8701_v14, 0.0  ;;  %v9175_v53 = vrot.slane %v9173_v47, 6  ;;  %v9178_v18 = vrot.slane %v9176_v60, 7  ;;  %15881 = vmatmul.mubr.msk.bf16.gmra.mrb[48].mxu0 %vm23726_vm3, %v9525_v32  ;;  %v21477_v32 = vld [vmem:[#allocation2 + $0x60] sm:$0xff]   ;;  %vm23740_vm4 = vmmov %vm23737_vm2 }
 0x617   : > { %v21428_v30 = vor.u32 %v9198_v16, %v9195_v23  ;;  %v8658_v44 = vmul.f32 %v21388_v20, %v21279_v11  ;;  %v8661_v45 = vmul.f32 %v21388_v20, %v21285_v15  ;;  %v8659_v15 = vmul.f32 %v21388_v20, %v21295_v41  ;;  %vm23741_vm3 = vmmov %vm23739_vm0 }
 0x618   : > { %v9170_v39 = vsel %vm19611_vm6, %v9161_v12, %v9169_v25  ;;  %v9171_v34 = vrot.slane %v9169_v25, 4  ;;  %v8773_v40 = vsel %vm20272_vm15, %v8737_v38, 0.0  ;;  %v9179_v43 = vor.u32 %v9178_v18, %v9175_v53  ;;  %vm23729_vm15 = vmmov %vm23727_vm1 }
 0x619   : > { %9308 = vst.msk [vmem:[#allocation2 + $0x78] sm:$0xf] %vm23727_vm1, %v9170_v39  ;;  %v9200_v21 = vsel %vm19611_vm6, %v9191_v36, %v21428_v30  ;;  %v9201_v11 = vrot.slane %v21428_v30, 4  ;;  %v14628_v24 = vpack.c.bf16 %v8773_v40, %v8773_v40  ;;  %v8699_v51 = vadd.f32 %v21399_v62, %v8658_v44  ;;  %v9316_v30 = vld [vmem:[#allocation2 + $0x98] sm:$0x3] }
 0x61a   : > { %9311 = vst.msk [vmem:[#allocation2 + $0x84] sm:$0xf] %vm23728_vm9, %v9200_v21  ;;  %v8702_v12 = vadd.f32 %v21399_v62, %v8661_v45  ;;  %v9526_v1 = vshrl.u32 %v21402_v42, 16  ;;  %v9180_v13 = vsel %vm19611_vm6, %v9171_v34, %v9179_v43  ;;  %v9181_v31 = vrot.slane %v9179_v43, 4  ;;  %vm23743_vm9 = vmmov %vm23739_vm0 }
 0x61b   : > { %v9223_v22 = vshrl.u32 %v14628_v24, 16  ;;  %v9226_v37 = vshll.u32 %v14628_v24, 16  ;;  %9309 = vst.msk [vmem:[#allocation2 + $0x7c] sm:$0xf] %vm23729_vm15, %v9180_v13  ;;  %v8735_v8 = vmax.f32 %v8699_v51, 0.0  ;;  %v8700_v0 = vadd.f32 %v21399_v62, %v8659_v15  ;;  %v21482_v51 = vld [vmem:[#allocation2 + $0x68] sm:$0xff]   ;;  %vm23744_vm15 = vmmov %vm23738_vm8 }
 0x61c   : > { %v8738_v5 = vmax.f32 %v8702_v12, 0.0  ;;  %v9528_v59 = vor.u32 %v9526_v1, %v9524_v58  ;;  %v9190_v41 = vsel %vm19611_vm6, %v9181_v31, %v9189_v28  ;;  %v9530_v17 = vshll.u32 %v21446_v4, 16  ;;  %v21486_v31 = vld [vmem:[#allocation2 + $0x70] sm:$0xff]  }
 0x61d   : > { %v9225_v20 = vrot.slane %v9223_v22, 6  ;;  %v9228_v6 = vrot.slane %v9226_v37, 7  ;;  %9310 = vst.msk [vmem:[#allocation2 + $0x80] sm:$0xf] %vm23730_vm7, %v9190_v41  ;;  %vm23731_vm13 = vnez %v23380_v57  ;;  %vm23732_vm5 = vnez %v23386_v26  ;;  %vm23745_vm7 = vmmov %vm23739_vm0 }
 0x61e   : > { %v8771_v33 = vsel %vm23731_vm13, %v8735_v8, 0.0  ;;  %v8774_v62 = vsel %vm23732_vm5, %v8738_v5, 0.0  ;;  %v8736_v55 = vmax.f32 %v8700_v0, 0.0  ;;  %v9534_v7 = vshrl.u32 %v21446_v4, 16  ;;  %vm23746_vm13 = vmmov %vm23738_vm8 }
 0x61f   : > { %v9229_v19 = vor.u32 %v9228_v6, %v9225_v20  ;;  %v14626_v61 = vpack.c.bf16 %v8771_v33, %v8771_v33  ;;  %v14629_v50 = vpack.c.bf16 %v8774_v62, %v8774_v62  ;;  %v9532_v58 = vrot.slane %v9530_v17, 1  ;;  %vm23747_vm5 = vmmov %vm23737_vm2 }
 0x620   : > { %vm23733_vm10 = vnez %v23397_v2  ;;  %v9538_v49 = vshll.u32 %v21458_v52, 16  ;;  %v9542_v54 = vshrl.u32 %v21458_v52, 16  ;;  %v9546_v57 = vshll.u32 %v21460_v56, 16 }
 0x621   : > { %v8772_v28 = vsel %vm23733_vm10, %v8736_v55, 0.0  ;;  %v9231_v14 = vrot.slane %v9229_v19, 4  ;;  %v9203_v23 = vshrl.u32 %v14626_v61, 16  ;;  %v9206_v26 = vshll.u32 %v14626_v61, 16  ;;  %vm23748_vm10 = vmmov %vm23737_vm2 }
 0x622   : > { %v9233_v16 = vshrl.u32 %v14629_v50, 16  ;;  %v9236_v47 = vshll.u32 %v14629_v50, 16  ;;  %v14627_v60 = vpack.c.bf16 %v8772_v28, %v8772_v28  ;;  %v9533_v36 = vsel %vm23734_vm12, %v9528_v59, %v9532_v58  ;;  %v21493_v0 = vld [vmem:[#allocation2 + $0x78] sm:$0xff]  }
 0x623   : > { %v9536_v25 = vor.u32 %v9534_v7, %v9532_v58  ;;  %v9205_v38 = vrot.slane %v9203_v23, 6  ;;  %v9208_v2 = vrot.slane %v9206_v26, 7  ;;  %15884 = vmatprep.mubr.msk.bf16.mxu0 %vm23735_vm11, %v9533_v36  ;;  %v9540_v18 = vrot.slane %v9538_v49, 1  ;;  %vm23751_vm11 = vmmov %vm23737_vm2 }
 0x624   : > { %v9235_v53 = vrot.slane %v9233_v16, 6  ;;  %v9238_v44 = vrot.slane %v9236_v47, 7  ;;  %v9213_v39 = vshrl.u32 %v14627_v60, 16  ;;  %v9216_v34 = vshll.u32 %v14627_v60, 16 }
 0x625   : > { %v9548_v40 = vrot.slane %v9546_v57, 1  ;;  %v9209_v45 = vor.u32 %v9208_v2, %v9205_v38  ;;  %v9541_v21 = vsel %vm23736_vm14, %v9536_v25, %v9540_v18  ;;  %v9544_v43 = vor.u32 %v9542_v54, %v9540_v18  ;;  %vm23752_vm14 = vmmov %vm23737_vm2 }
 0x626   : > { %v9550_v24 = vshrl.u32 %v21460_v56, 16  ;;  %v9239_v12 = vor.u32 %v9238_v44, %v9235_v53  ;;  %v9215_v15 = vrot.slane %v9213_v39, 6  ;;  %v9218_v1 = vrot.slane %v9216_v34, 7  ;;  %15885 = vmatmul.mubr.msk.bf16.gmra.mrb[52].mxu0 %vm23737_vm2, %v9541_v21 }
 0x627   : > { %v9554_v13 = vshll.u32 %v21477_v32, 16  ;;  %v9210_v22 = vsel %vm19611_vm6, %v9201_v11, %v9209_v45  ;;  %v9211_v37 = vrot.slane %v9209_v45, 4  ;;  %v9549_v8 = vsel %vm23738_vm8, %v9544_v43, %v9548_v40  ;;  %v21535_v43 = vld [vmem:[#allocation2 + $0xc] sm:$0xf] }
 0x628   : > { %v9552_v5 = vor.u32 %v9550_v24, %v9548_v40  ;;  %9312 = vst.msk [vmem:[#allocation2 + $0x88] sm:$0xf] %vm23739_vm0, %v9210_v22  ;;  %v9240_v59 = vsel %vm19611_vm6, %v9231_v14, %v9239_v12  ;;  %v9241_v41 = vrot.slane %v9239_v12, 4  ;;  %v9219_v20 = vor.u32 %v9218_v1, %v9215_v15  ;;  %15888 = vmatprep.mubr.msk.bf16.mxu0 %vm23740_vm4, %v9549_v8  ;;  %v21516_v14 = vld [vmem:[#allocation2 + $0x80] sm:$0xff]   ;;  %vm23755_vm0 = vmmov %vm23740_vm4  ;;  %v10399_v12 = vld [vmem:[#allocation2 + $0x8] sm:$0xe] }
 0x629   : > { %v9556_v6 = vrot.slane %v9554_v13, 1  ;;  %9315 = vst.msk [vmem:[#allocation2 + $0x94] sm:$0xf] %vm23741_vm3, %v9240_v59  ;;  %v9558_v11 = vshrl.u32 %v21477_v32, 16  ;;  %v9562_v17 = vshll.u32 %v21482_v51, 16  ;;  %vm23742_vm1 = vnez %v23408_v29  ;;  %vm23756_vm4 = vmmov %vm23755_vm0  ;;  %v21543_v22 = vld [vmem:[#allocation2 + $0x10] sm:$0xff]  }
 0x62a   : > { %v9317_v33 = vsel %vm23742_vm1, %v9241_v41, %v9316_v30  ;;  %v9220_v62 = vsel %vm19611_vm6, %v9211_v37, %v9219_v20  ;;  %v9221_v55 = vrot.slane %v9219_v20, 4  ;;  %v9570_v7 = vshll.u32 %v21486_v31, 16  ;;  %v21545_v37 = vld [vmem:[#allocation2 + $0x18] sm:$0xff]   ;;  %v21550_v59 = vld [vmem:[#allocation2 + $0x28] sm:$0xff]   ;;  %vm23758_vm1 = vmmov %vm23755_vm0 }
 0x62b   : > { %9318 = vst [vmem:[#allocation2 + $0x98] sm:$0x3] %v9317_v33  ;;  %9313 = vst.msk [vmem:[#allocation2 + $0x8c] sm:$0xf] %vm23743_vm9, %v9220_v62  ;;  %v9557_v61 = vsel %vm23744_vm15, %v9552_v5, %v9556_v6  ;;  %v9560_v50 = vor.u32 %v9558_v11, %v9556_v6  ;;  %v9564_v58 = vrot.slane %v9562_v17, 1  ;;  %v9578_v49 = vshll.u32 %v21493_v0, 16 }
 0x62c   : > { %v9230_v28 = vsel %vm19611_vm6, %v9221_v55, %v9229_v19  ;;  %v9566_v54 = vshrl.u32 %v21482_v51, 16  ;;  %v9572_v57 = vrot.slane %v9570_v7, 1  ;;  %v9574_v26 = vshrl.u32 %v21486_v31, 16  ;;  %vm23749_vm6 = vmmov %vm23738_vm8  ;;  %v21548_v5 = vld [vmem:[#allocation2 + $0x20] sm:$0xff]   ;;  %v21557_v17 = vld [vmem:[#allocation2 + $0x30] sm:$0xff]  }
 0x62d   : > { %9314 = vst.msk [vmem:[#allocation2 + $0x90] sm:$0xf] %vm23745_vm7, %v9230_v28  ;;  %v9565_v29 = vsel %vm23746_vm13, %v9560_v50, %v9564_v58  ;;  %v9580_v9 = vrot.slane %v9578_v49, 1  ;;  %v9586_v16 = vshll.u32 %v21516_v14, 16  ;;  %vm23750_vm12 = vmmov %vm23749_vm6  ;;  %v9582_v38 = vshrl.u32 %v21493_v0, 16 }
 0x62e   : > { %15889 = vmatmul.mubr.msk.bf16.gmra.mrb[56].mxu0 %vm23747_vm5, %v9557_v61  ;;  %v9568_v23 = vor.u32 %v9566_v54, %v9564_v58  ;;  %v9576_v19 = vor.u32 %v9574_v26, %v9572_v57  ;;  %v9590_v44 = vshrl.u32 %v21516_v14, 16  ;;  %vm23753_vm2 = vmmov %vm23749_vm6  ;;  %v21541_v13 = vcombine.low %v10399_v12, %v21535_v43  ;;  %v21563_v61 = vld [vmem:[#allocation2 + $0x38] sm:$0xff]   ;;  %v21569_v26 = vld [vmem:[#allocation2 + $0x40] sm:$0xff]  }
 0x62f   : > { %15892 = vmatprep.mubr.msk.bf16.mxu0 %vm23748_vm10, %v9565_v29  ;;  %v9588_v2 = vrot.slane %v9586_v16, 1  ;;  %v9584_v53 = vor.u32 %v9582_v38, %v9580_v9  ;;  %vm23754_vm8 = vmmov %vm23753_vm2  ;;  %v10868_v6 = vshrl.u32 %v21543_v22, 16  ;;  %v10871_v11 = vshll.u32 %v21543_v22, 16 }
 0x630   : > { %v9573_v60 = vsel %vm23749_vm6, %v9568_v23, %v9572_v57  ;;  %v9581_v36 = vsel %vm23750_vm12, %v9576_v19, %v9580_v9  ;;  %vm23757_vm3 = vmmov %vm23753_vm2  ;;  %v10860_v41 = vshrl.u32 %v21541_v13, 16  ;;  %v10863_v20 = vshll.u32 %v21541_v13, 16 }
 0x631   : > { %v9592_v34 = vor.u32 %v9590_v44, %v9588_v2  ;;  %v9589_v40 = vsel %vm23753_vm2, %v9584_v53, %v9588_v2  ;;  %v10870_v62 = vrot.slane %v10868_v6, 1  ;;  %v10877_v55 = vshrl.u32 %v21545_v37, 16  ;;  %vm23759_vm9 = vmmov %vm23755_vm0  ;;  %v21575_v53 = vld [vmem:[#allocation2 + $0x50] sm:$0xff]  }
 0x632   : > { %v21521_v47 = vld [vmem:[#allocation2 + $0x88] sm:$0xff]   ;;  %v10862_v30 = vrot.slane %v10860_v41, 1  ;;  %v10865_v33 = vrot.slane %v10863_v20, 2  ;;  %v10880_v7 = vshll.u32 %v21545_v37, 16  ;;  %v10873_v50 = vrot.slane %v10871_v11, 2  ;;  %vm23766_vm5 = vmmov %vm23755_vm0  ;;  %v21598_v11 = vld [vmem:[#allocation2 + $0x60] sm:$0xff]  }
 0x633   : > { %v9594_v25 = vshll.u32 %v21521_v47, 16  ;;  %v9598_v24 = vshrl.u32 %v21521_v47, 16  ;;  %v10886_v58 = vshrl.u32 %v21548_v5, 16  ;;  %v10889_v28 = vshll.u32 %v21548_v5, 16  ;;  %vm23769_vm6 = vmmov %vm23755_vm0 }
 0x634   : > { %v21529_v18 = vld [vmem:[#allocation2 + $0x90] ss:$0 sps:$4 sm:$0x11]   ;;  %v10895_v49 = vshrl.u32 %v21550_v59, 16  ;;  %v10866_v29 = vor.u32 %v10865_v33, %v10862_v30  ;;  %v10879_v54 = vrot.slane %v10877_v55, 1  ;;  %v10882_v57 = vrot.slane %v10880_v7, 2 }
 0x635   : > { %v9596_v39 = vrot.slane %v9594_v25, 1  ;;  %v9602_v45 = vshll.u32 %v21529_v18, 16  ;;  %v10898_v23 = vshll.u32 %v21550_v59, 16  ;;  %v10874_v9 = vor.u32 %v10873_v50, %v10870_v62  ;;  %v21594_v30 = vld [vmem:[#allocation2 + $0x8] sm:$0xff]   ;;  %v21606_v50 = vld [vmem:[#allocation2 + $0x10] sm:$0xff]  }
 0x636   : > { %15893 = vmatmul.mubr.msk.bf16.gmra.mrb[60].mxu0 %vm23751_vm11, %v9573_v60  ;;  %v10888_v19 = vrot.slane %v10886_v58, 1  ;;  %v10891_v16 = vrot.slane %v10889_v28, 2  ;;  %v21571_v60 = vld [vmem:[#allocation2 + $0x48] sm:$0xff]   ;;  %v10904_v38 = vshrl.u32 %v21557_v17, 16  ;;  %v10907_v2 = vshll.u32 %v21557_v17, 16 }
 0x637   : > { %15896 = vmatprep.mubr.msk.bf16.mxu0 %vm23752_vm14, %v9581_v36  ;;  %v9597_v21 = vsel %vm23754_vm8, %v9592_v34, %v9596_v39  ;;  %v9600_v15 = vor.u32 %v9598_v24, %v9596_v39  ;;  %v9604_v1 = vrot.slane %v9602_v45, 1  ;;  %v10883_v36 = vor.u32 %v10882_v57, %v10879_v54  ;;  %v17379_v45 = vld [vmem:[%s22722_s3 + $0x28] sm:$0xff]   ;;  %v21617_v57 = vld [vmem:[%s22722_s3 + $0x30] sm:$0xff]   ;;  %vm23780_vm8 = vmmov %vm23755_vm0 }
 0x638   : > { %v10900_v25 = vrot.slane %v10898_v23, 2  ;;  %vm23760_vm15 = vsmask.f32 6400  ;;  %v10892_v39 = vor.u32 %v10891_v16, %v10888_v19  ;;  %v10913_v34 = vshrl.u32 %v21563_v61, 16  ;;  %v21610_v58 = vld [vmem:[#allocation2 + $0x68] sm:$0xff]  }
 0x639   : > { %v9605_v8 = vsel %vm23757_vm3, %v9600_v15, %v9604_v1  ;;  %v21578_v44 = vsel %vm23760_vm15, %v10866_v29, %v10874_v9  ;;  %vm23762_vm7 = vmmov %vm23760_vm15  ;;  %v10906_v12 = vrot.slane %v10904_v38, 1  ;;  %v10909_v15 = vrot.slane %v10907_v2, 2  ;;  %v21588_v1 = vld [vmem:[#allocation2 + $0x58] sm:$0xff]   ;;  %v21627_v38 = vld [vmem:[#allocation2 + $0x70] sm:$0xff]  }
 0x63a   : > { %23761 = vst [vmem:[#allocation31_spill] sm:$0xff] %v21578_v44  ;;  %vm23764_vm13 = vmmov %vm23762_vm7  ;;  %v10915_v41 = vrot.slane %v10913_v34, 1  ;;  %v10922_v6 = vshrl.u32 %v21569_v26, 16  ;;  %v10925_v55 = vshll.u32 %v21569_v26, 16  ;;  %v10931_v7 = vshrl.u32 %v21571_v60, 16 }
 0x63b   : > { %vm23767_vm10 = vmmov %vm23762_vm7  ;;  %v10910_v62 = vor.u32 %v10909_v15, %v10906_v12  ;;  %v10934_v29 = vshll.u32 %v21571_v60, 16  ;;  %v10940_v54 = vshrl.u32 %v21575_v53, 16  ;;  %v10943_v19 = vshll.u32 %v21575_v53, 16 }
 0x63c   : > { %vm23770_vm12 = vmmov %vm23762_vm7  ;;  %v10927_v23 = vrot.slane %v10925_v55, 2  ;;  %v10952_v34 = vshll.u32 %v21588_v1, 16 }
 0x63d   : > { %vm23772_vm11 = vmmov %vm23762_vm7 }
 0x63e   : > { %15897 = vmatmul.mubr.msk.bf16.gmra.mrb[64].mxu0 %vm23755_vm0, %v9589_v40  ;;  %v10916_v40 = vshll.u32 %v21563_v61, 16  ;;  %vm23776_vm14 = vmmov %vm23762_vm7 }
 0x63f   : > { %15900 = vmatprep.mubr.msk.bf16.mxu0 %vm23756_vm4, %v9597_v21  ;;  %v21586_v21 = vsel %vm23762_vm7, %v10874_v9, %v10883_v36  ;;  %v10933_v9 = vrot.slane %v10931_v7, 1  ;;  %v10954_v7 = vrot.slane %v10952_v34, 2  ;;  %vm23778_vm2 = vmmov %vm23762_vm7 }
 0x640   : > { %23763 = vst [vmem:[#allocation32_spill] sm:$0xff] %v21586_v21  ;;  %v10918_v20 = vrot.slane %v10916_v40, 2  ;;  %v10958_v40 = vshrl.u32 %v21598_v11, 16  ;;  %vm23782_vm0 = vmmov %vm23778_vm2 }
 0x641   : > { %vm23784_vm4 = vmmov %vm23758_vm1 }
 0x642   : > { %v10919_v28 = vor.u32 %v10918_v20, %v10915_v41  ;;  %v10961_v41 = vshll.u32 %v21598_v11, 16  ;;  %v10967_v20 = vshrl.u32 %v21610_v58, 16  ;;  %vm23786_vm3 = vmmov %vm23782_vm0 }
 0x643   : > { %vm23792_vm15 = vmmov %vm23782_vm0 }
 0x644   : > { %v21624_v16 = vsel %vm23772_vm11, %v10910_v62, %v10919_v28  ;;  %vm23794_vm7 = vmmov %vm23782_vm0 }
 0x645   : > { %23773 = vst [vmem:[#allocation24_spill] sm:$0xff] %v21624_v16  ;;  %vm23805_vm11 = vmmov %vm23782_vm0 }
 0x646   : > { %15901 = vmatmul.mubr.msk.bf16.gmra.mrb[68].mxu0 %vm23758_vm1, %v9605_v8  ;;  %v21591_v8 = vsel %vm23764_vm13, %v10883_v36, %v10892_v39  ;;  %v10942_v36 = vrot.slane %v10940_v54, 1  ;;  %v10969_v54 = vrot.slane %v10967_v20, 1  ;;  %vm23788_vm1 = vmmov %vm23782_vm0 }
 0x647   : > { %15908 = vmatprep.mubr.msk.bf16.mxu0 %vm23759_vm9, %v21048_v10  ;;  %v10897_v10 = vrot.slane %v10895_v49, 1  ;;  %23765 = vst [vmem:[#allocation22_spill] sm:$0xff] %v21591_v8  ;;  %v10924_v49 = vrot.slane %v10922_v6, 1  ;;  %v21636_v6 = vld [vmem:[#allocation2 + $0x80] sm:$0xff]   ;;  %vm23790_vm9 = vmmov %vm23782_vm0 }
 0x648   : > { %23775 = vst [vmem:[#allocation36_spill] sm:$0xff] %v21636_v6  ;;  %vm23796_vm13 = vmmov %vm23784_vm4 }
 0x649   : > { %v10901_v24 = vor.u32 %v10900_v25, %v10897_v10  ;;  %v10936_v10 = vrot.slane %v10934_v29, 2  ;;  %v10949_v25 = vshrl.u32 %v21588_v1, 16  ;;  %v10928_v2 = vor.u32 %v10927_v23, %v10924_v49 }
 0x64a   : > { %v10960_v49 = vrot.slane %v10958_v40, 1  ;;  %v10963_v29 = vrot.slane %v10961_v41, 2  ;;  %v10970_v23 = vshll.u32 %v21610_v58, 16  ;;  %v10994_v41 = vshrl.u32 %v21636_v6, 16 }
 0x64b   : > { %v21601_v33 = vsel %vm23767_vm10, %v10892_v39, %v10901_v24  ;;  %v10945_v39 = vrot.slane %v10943_v19, 2  ;;  %v10937_v12 = vor.u32 %v10936_v10, %v10933_v9  ;;  %v10951_v15 = vrot.slane %v10949_v25, 1  ;;  %v21647_v9 = vld [vmem:[#allocation2 + $0x88] sm:$0xff]   ;;  %v21656_v25 = vld [vmem:[#allocation2 + $0x90] sm:$0xff]   ;;  %vm23798_vm10 = vmmov %vm23782_vm0 }
 0x64c   : > { %23768 = vst [vmem:[#allocation34_spill] sm:$0xff] %v21601_v33  ;;  %23781 = vst [vmem:[#allocation64_spill] sm:$0xff] %v21647_v9  ;;  %v10976_v10 = vshrl.u32 %v21627_v38, 16 }
 0x64d   : > { %v10946_v55 = vor.u32 %v10945_v39, %v10942_v36  ;;  %v10979_v36 = vshll.u32 %v21627_v38, 16  ;;  %23785 = vst [vmem:[#allocation39_spill] sm:$0xff] %v21656_v25  ;;  %v10972_v39 = vrot.slane %v10970_v23, 2  ;;  %v11003_v23 = vshrl.u32 %v21647_v9, 16 }
 0x64e   : > { %15909 = vmatmul.mubr.msk.bf16.vlgmr.msra.gmra.mrb[36].mxu0 %vm23766_vm5, %v21594_v30  ;;  %vm23797_vm5 = vmmov %vm23784_vm4 }
 0x64f   : > { %15945 = vmatpush3.bf16.msra.mxu0 %v21269_v48  ;;  %15912 = vmatprep.mubr.msk.bf16.mxu0 %vm23769_vm6, %v21606_v50  ;;  %v21620_v48 = vsel %vm23770_vm12, %v10901_v24, %v10910_v62  ;;  %v21631_v24 = vld [vmem:[#allocation2 + $0x78] sm:$0xff]   ;;  %v21639_v62 = vsel %vm23776_vm14, %v10919_v28, %v10928_v2  ;;  %v21650_v19 = vsel %vm23782_vm0, %v10937_v12, %v10946_v55  ;;  %vm23801_vm6 = vmmov %vm23782_vm0  ;;  %vm23803_vm12 = vcmask 1045504  }
 0x650   : > { %15946 = vmatprep.subr.bf16.mxu0 %v17379_v45  ;;  %23771 = vst [vmem:[#allocation33_spill] sm:$0xff] %v21620_v48  ;;  %23774 = vst [vmem:[#allocation38_spill] sm:$0xff] %v21631_v24  ;;  %v10955_v28 = vor.u32 %v10954_v7, %v10951_v15  ;;  %v10985_v34 = vshrl.u32 %v21631_v24, 16  ;;  %v10981_v15 = vrot.slane %v10979_v36, 2  ;;  %v10973_v7 = vor.u32 %v10972_v39, %v10969_v54 }
 0x651   : > { %23777 = vst [vmem:[#allocation26_spill] sm:$0xff] %v21639_v62  ;;  %23783 = vst [vmem:[#allocation40_spill] sm:$0xff] %v21650_v19  ;;  %v11012_v36 = vshrl.u32 %v21656_v25, 16  ;;  %v11005_v39 = vrot.slane %v11003_v23, 1  ;;  %v11320_v23 = vrot.slane %v21545_v37, 2 }
 0x652   : > { %v21661_v40 = vsel %vm23786_vm3, %v10946_v55, %v10955_v28  ;;  %vm23807_vm14 = vmmov %vm23803_vm12 }
 0x653   : > { %15947 = vmatpush3.bf16.msra.mxu0 %v17379_v45  ;;  %v21642_v45 = vsel %vm23778_vm2, %v10928_v2, %v10937_v12  ;;  %v10964_v2 = vor.u32 %v10963_v29, %v10960_v49  ;;  %23787 = vst [vmem:[#allocation35_spill] sm:$0xff] %v21661_v40  ;;  %v10978_v12 = vrot.slane %v10976_v10, 1  ;;  %v10996_v49 = vrot.slane %v10994_v41, 1  ;;  %v11308_v41 = vld [vmem:[#allocation2 + $0x8] sm:$0xc]  ;;  %vm23809_vm2 = vmmov %vm23803_vm12 }
 0x654   : > { %15984 = vmatprep.subr.bf16.mxu0 %v21617_v57  ;;  %23779 = vst [vmem:[#allocation63_spill] sm:$0xff] %v21642_v45  ;;  %v10997_v29 = vshll.u32 %v21636_v6, 16  ;;  %v11006_v10 = vshll.u32 %v21647_v9, 16  ;;  %vm23813_vm0 = vmmov %vm23809_vm2 }
 0x655   : > { %v21665_v20 = vsel %vm23788_vm1, %v10955_v28, %v10964_v2  ;;  %v10982_v45 = vor.u32 %v10981_v15, %v10978_v12  ;;  %v21670_v62 = vsel %vm23790_vm9, %v10964_v2, %v10973_v7  ;;  %v11014_v15 = vrot.slane %v11012_v36, 1  ;;  %vm23818_vm3 = vmmov %vm23813_vm0 }
 0x656   : > { %15913 = vmatmul.mubr.msk.bf16.gmra.mrb[40].mxu0 %vm23780_vm8, %v21277_v3  ;;  %v10988_v3 = vshll.u32 %v21631_v24, 16  ;;  %23789 = vst [vmem:[#allocation65_spill] sm:$0xff] %v21665_v20  ;;  %23791 = vst [vmem:[#allocation56_spill] sm:$0xff] %v21670_v62  ;;  %v10999_v54 = vrot.slane %v10997_v29, 2  ;;  %v11008_v12 = vrot.slane %v11006_v10, 2  ;;  %v11318_v29 = vrot.slane %v21543_v22, 2 }
 0x657   : > { %15916 = vmatprep.mubr.msk.bf16.mxu0 %vm23784_vm4, %v21300_v63  ;;  %v10987_v63 = vrot.slane %v10985_v34, 1  ;;  %v21675_v28 = vsel %vm23792_vm15, %v10973_v7, %v10982_v45  ;;  %v11015_v34 = vshll.u32 %v21656_v25, 16  ;;  %vm23811_vm8 = vmmov %vm23809_vm2 }
 0x658   : > { %v10990_v19 = vrot.slane %v10988_v3, 2  ;;  %23793 = vst [vmem:[#allocation46_spill] sm:$0xff] %v21675_v28  ;;  %v11009_v7 = vor.u32 %v11008_v12, %v11005_v39  ;;  %v11326_v39 = vrot.slane %v21557_v17, 2  ;;  %vm23816_vm4 = vmmov %vm23813_vm0 }
 0x659   : > { %v11017_v2 = vrot.slane %v11015_v34, 2  ;;  %vm23820_vm1 = vmmov %vm23797_vm5 }
 0x65a   : > { %v10991_v55 = vor.u32 %v10990_v19, %v10987_v63  ;;  %v11000_v19 = vor.u32 %v10999_v54, %v10996_v49  ;;  %v14428_v63 = vcombine.low %v11308_v41, %v21535_v43  ;;  %v21697_v49 = vsel %vm23803_vm12, %v11318_v29, %v11320_v23  ;;  %vm23821_vm9 = vmmov %vm23813_vm0 }
 0x65b   : > { %v21691_v10 = vor.u32 %v11017_v2, %v11014_v15  ;;  %23804 = vst [vmem:[#allocation67_spill] sm:$0xff] %v21697_v49  ;;  %v11322_v43 = vrot.slane %v21548_v5, 2  ;;  %v11328_v15 = vrot.slane %v21563_v61, 2  ;;  %v11330_v41 = vrot.slane %v21569_v26, 2  ;;  %vm23823_vm15 = vmmov %vm23813_vm0 }
 0x65c   : > { %v21679_v3 = vsel %vm23794_vm7, %v10982_v45, %v10991_v55  ;;  %v21689_v45 = vsel %vm23798_vm10, %v10991_v55, %v11000_v19  ;;  %v11317_v36 = vrot.slane %v14428_v63, 2  ;;  %v11332_v2 = vrot.slane %v21571_v60, 2  ;;  %vm23825_vm7 = vmmov %vm23820_vm1 }
 0x65d   : > { %23795 = vst [vmem:[#allocation41_spill] sm:$0xff] %v21679_v3  ;;  %23799 = vst [vmem:[#allocation57_spill] sm:$0xff] %v21689_v45  ;;  %v21703_v54 = vsel %vm23805_vm11, %v11009_v7, %v21691_v10  ;;  %v21710_v34 = vsel %vm23809_vm2, %v11320_v23, %v11322_v43  ;;  %v11334_v63 = vrot.slane %v21575_v53, 2  ;;  %v21728_v23 = vsel %vm23818_vm3, %v11328_v15, %v11330_v41 }
 0x65e   : > { %15917 = vmatmul.mubr.msk.bf16.gmra.mrb[44].mxu0 %vm23796_vm13, %v21325_v46  ;;  %23800 = vst [vmem:[#allocation49_spill] sm:$0xff] %v21691_v10  ;;  %v21694_v46 = vsel %vm23801_vm6, %v11000_v19, %v11009_v7  ;;  %23806 = vst [vmem:[#allocation68_spill] sm:$0xff] %v21703_v54  ;;  %v21706_v55 = vsel %vm23807_vm14, %v11317_v36, %v11318_v29  ;;  %v21722_v7 = vld [vmem:[#allocation2 + $0x98] ss:$0 sps:$4 sm:$0x33]   ;;  %v21725_v29 = vsel %vm23816_vm4, %v11326_v39, %v11328_v15 }
 0x65f   : > { %15920 = vmatprep.mubr.msk.bf16.mxu0 %vm23797_vm5, %v21361_v35  ;;  %23802 = vst [vmem:[#allocation43_spill] sm:$0xff] %v21694_v46  ;;  %v11324_v35 = vrot.slane %v21550_v59, 2  ;;  %23808 = vst [vmem:[#allocation69_spill] sm:$0xff] %v21706_v55  ;;  %v11336_v36 = vrot.slane %v21588_v1, 2 }
 0x660   : > { %23810 = vst [vmem:[#allocation58_spill] sm:$0xff] %v21710_v34  ;;  %23815 = vst [vmem:[#allocation60_spill] sm:$0xff] %v21722_v7 }
 0x661   : > { %v21713_v12 = vsel %vm23811_vm8, %v11322_v43, %v11324_v35  ;;  %v21718_v19 = vsel %vm23813_vm0, %v11324_v35, %v11326_v39  ;;  %23817 = vst [vmem:[#allocation54_spill] sm:$0xff] %v21725_v29  ;;  %23819 = vst [vmem:[#allocation45_spill] sm:$0xff] %v21728_v23  ;;  %v11338_v43 = vrot.slane %v21598_v11, 2  ;;  %v21735_v35 = vsel %vm23821_vm9, %v11330_v41, %v11332_v2 }
 0x662   : > { %23812 = vst [vmem:[#allocation50_spill] sm:$0xff] %v21713_v12  ;;  %23814 = vst [vmem:[#allocation44_spill] sm:$0xff] %v21718_v19  ;;  %v21738_v19 = vsel %vm23823_vm15, %v11332_v2, %v11334_v63  ;;  %v11340_v12 = vrot.slane %v21610_v58, 2  ;;  %v11342_v39 = vrot.slane %v21627_v38, 2  ;;  %v11346_v41 = vrot.slane %v21636_v6, 2 }
 0x663   : > { %23822 = vst [vmem:[#allocation71_spill] sm:$0xff] %v21735_v35  ;;  %23824 = vst [vmem:[#allocation62_spill] sm:$0xff] %v21738_v19  ;;  %v11348_v35 = vrot.slane %v21647_v9, 2  ;;  %vm23849_vm9 = vsmask.f32 5376 }
 0x664   : > { %vm23826_vm13 = vmmov %vm23813_vm0 }
 0x665   : > { %v21745_v15 = vsel %vm23826_vm13, %v11334_v63, %v11336_v36  ;;  %vm23828_vm5 = vmmov %vm23813_vm0 }
 0x666   : > { %15921 = vmatmul.mubr.msk.bf16.gmra.mrb[48].mxu0 %vm23820_vm1, %v21372_v27  ;;  %23827 = vst [vmem:[#allocation59_spill] sm:$0xff] %v21745_v15  ;;  %v21748_v23 = vsel %vm23828_vm5, %v11336_v36, %v11338_v43  ;;  %v11344_v27 = vrot.slane %v21631_v24, 2  ;;  %vm23830_vm10 = vmmov %vm23813_vm0 }
 0x667   : > { %15924 = vmatprep.mubr.msk.bf16.mxu0 %vm23825_vm7, %v21402_v42  ;;  %23829 = vst [vmem:[#allocation52_spill] sm:$0xff] %v21748_v23  ;;  %v21753_v2 = vsel %vm23830_vm10, %v11338_v43, %v11340_v12  ;;  %vm23832_vm6 = vmmov %vm23813_vm0  ;;  %v11350_v42 = vrot.slane %v21656_v25, 2  ;;  %v11352_v23 = vrot.slane %v21722_v7, 2  ;;  %v21813_v7 = vld [vmem:[#allocation2 + $0x48] sm:$0xff]  }
 0x668   : > { %23831 = vst [vmem:[#allocation47_spill] sm:$0xff] %v21753_v2  ;;  %v21756_v19 = vsel %vm23832_vm6, %v11340_v12, %v11342_v39  ;;  %vm23834_vm12 = vmmov %vm23813_vm0 }
 0x669   : > { %23833 = vst [vmem:[#allocation70_spill] sm:$0xff] %v21756_v19  ;;  %v21761_v63 = vsel %vm23834_vm12, %v11342_v39, %v11344_v27  ;;  %vm23836_vm11 = vmmov %vm23813_vm0  ;;  %v11633_v19 = vld [vmem:[#allocation2 + $0x10] sm:$0xc]  ;;  %v10074_v39 = vld [vmem:[#allocation2] sm:$0xe] }
 0x66a   : > { %23835 = vst [vmem:[#allocation66_spill] sm:$0xff] %v21761_v63  ;;  %v21764_v36 = vsel %vm23836_vm11, %v11344_v27, %v11346_v41  ;;  %vm23838_vm14 = vmmov %vm23813_vm0  ;;  %v21778_v63 = vld [vmem:[#allocation2 + $0x14] sm:$0xf] }
 0x66b   : > { %23837 = vst [vmem:[#allocation25_spill] sm:$0xff] %v21764_v36  ;;  %v21768_v15 = vsel %vm23838_vm14, %v11346_v41, %v11348_v35  ;;  %vm23840_vm2 = vmmov %vm23813_vm0  ;;  %v21783_v27 = vcombine.low %v11633_v19, %v21778_v63  ;;  %v21785_v41 = vld [vmem:[#allocation2 + $0x18] sm:$0xff]  }
 0x66c   : > { %23839 = vst [vmem:[#allocation15_spill] sm:$0xff] %v21768_v15  ;;  %v21771_v43 = vsel %vm23840_vm2, %v11348_v35, %v11350_v42  ;;  %vm23842_vm8 = vmmov %vm23813_vm0  ;;  %v21787_v35 = vld [vmem:[#allocation2 + $0x20] sm:$0xff]   ;;  %v12102_v19 = vshrl.u32 %v21785_v41, 16  ;;  %v12105_v2 = vshll.u32 %v21785_v41, 16 }
 0x66d   : > { %23841 = vst [vmem:[#allocation17_spill] sm:$0xff] %v21771_v43  ;;  %v21774_v12 = vsel %vm23842_vm8, %v11350_v42, %v11352_v23  ;;  %vm23844_vm0 = vmmov %vm23820_vm1  ;;  %v17459_v43 = vld [vmem:[#allocation2 + $0x4] sm:$0xf]  ;;  %v21789_v42 = vld [vmem:[#allocation2 + $0x28] sm:$0xff]   ;;  %v12097_v15 = vshll.u32 %v21783_v27, 16  ;;  %v12111_v29 = vshrl.u32 %v21787_v35, 16 }
 0x66e   : > { %23843 = vst [vmem:[#allocation55_spill] sm:$0xff] %v21774_v12  ;;  %15925 = vmatmul.mubr.msk.bf16.gmra.mrb[52].mxu0 %vm23844_vm0, %v21446_v4  ;;  %vm23845_vm4 = vmmov %vm23844_vm0  ;;  %v14335_v23 = vcombine.low %v10074_v39, %v17459_v43  ;;  %v21791_v12 = vld [vmem:[#allocation2 + $0x30] sm:$0xff]   ;;  %v12094_v4 = vshrl.u32 %v21783_v27, 16  ;;  %v12114_v49 = vshll.u32 %v21787_v35, 16  ;;  %v12104_v36 = vrot.slane %v12102_v19, 2 }
 0x66f   : > { %15928 = vmatprep.mubr.msk.bf16.mxu0 %vm23845_vm4, %v21458_v52  ;;  %23846 = vst [vmem:[#allocation79_spill] sm:$0xff] %v21783_v27  ;;  %v21796_v52 = vld [vmem:[#allocation2 + $0x38] sm:$0xff]   ;;  %v12099_v39 = vrot.slane %v12097_v15, 3  ;;  %vm23847_vm3 = vmmov %vm23844_vm0  ;;  %v21806_v27 = vld [vmem:[#allocation2 + $0x40] sm:$0xff]   ;;  %v12107_v55 = vrot.slane %v12105_v2, 3  ;;  %v12113_v10 = vrot.slane %v12111_v29, 2 }
 0x670   : > { %v21801_v34 = vrot.slane %v14335_v23, 1  ;;  %v12096_v43 = vrot.slane %v12094_v4, 2  ;;  %v12120_v54 = vshrl.u32 %v21789_v42, 16  ;;  %vm23848_vm1 = vmmov %vm23844_vm0  ;;  %v12116_v23 = vrot.slane %v12114_v49, 3  ;;  %v21817_v29 = vld [vmem:[#allocation2 + $0x50] sm:$0xff]  }
 0x671   : > { %v12123_v4 = vshll.u32 %v21789_v42, 16  ;;  %v12129_v15 = vshrl.u32 %v21791_v12, 16  ;;  %v12108_v45 = vor.u32 %v12107_v55, %v12104_v36  ;;  %v12132_v3 = vshll.u32 %v21791_v12, 16  ;;  %v21824_v55 = vld [vmem:[#allocation2 + $0x58] sm:$0xff]   ;;  %vm23851_vm15 = vmmov %vm23849_vm9 }
 0x672   : > { %v12100_v46 = vor.u32 %v12099_v39, %v12096_v43  ;;  %v12138_v2 = vshrl.u32 %v21796_v52, 16  ;;  %v12117_v19 = vor.u32 %v12116_v23, %v12113_v10  ;;  %v12141_v43 = vshll.u32 %v21796_v52, 16  ;;  %v21830_v23 = vld [vmem:[#allocation2 + $0x60] sm:$0xff]   ;;  %vm23853_vm7 = vmmov %vm23849_vm9 }
 0x673   : > { %v12125_v28 = vrot.slane %v12123_v4, 3  ;;  %v12131_v62 = vrot.slane %v12129_v15, 2  ;;  %v12134_v39 = vrot.slane %v12132_v3, 3  ;;  %v12147_v40 = vshrl.u32 %v21806_v27, 16  ;;  %vm23855_vm13 = vmmov %vm23844_vm0 }
 0x674   : > { %v21821_v49 = vsel %vm23849_vm9, %v12100_v46, %v12108_v45  ;;  %v12140_v20 = vrot.slane %v12138_v2, 2  ;;  %v12143_v16 = vrot.slane %v12141_v43, 3  ;;  %v12150_v10 = vshll.u32 %v21806_v27, 16  ;;  %v21834_v2 = vld [vmem:[#allocation2 + $0x68] sm:$0xff]   ;;  %vm23856_vm5 = vmmov %vm23853_vm7 }
 0x675   : > { %23850 = vst [vmem:[#allocation80_spill] sm:$0xff] %v21821_v49  ;;  %v12135_v4 = vor.u32 %v12134_v39, %v12131_v62  ;;  %v12149_v15 = vrot.slane %v12147_v40, 2  ;;  %v12156_v46 = vshrl.u32 %v21813_v7, 16  ;;  %v12159_v3 = vshll.u32 %v21813_v7, 16  ;;  %vm23858_vm10 = vmmov %vm23844_vm0  ;;  %v21848_v39 = vld [vmem:[#allocation2 + $0x70] sm:$0xff]  }
 0x676   : > { %15929 = vmatmul.mubr.msk.bf16.gmra.mrb[56].mxu0 %vm23847_vm3, %v21460_v56  ;;  %v12122_v56 = vrot.slane %v12120_v54, 2  ;;  %v21827_v54 = vsel %vm23851_vm15, %v12108_v45, %v12117_v19  ;;  %v12144_v48 = vor.u32 %v12143_v16, %v12140_v20  ;;  %v12152_v45 = vrot.slane %v12150_v10, 3  ;;  %vm23859_vm6 = vmmov %vm23856_vm5 }
 0x677   : > { %15932 = vmatprep.mubr.msk.bf16.mxu0 %vm23848_vm1, %v21477_v32  ;;  %23852 = vst [vmem:[#allocation72_spill] sm:$0xff] %v21827_v54  ;;  %v12158_v62 = vrot.slane %v12156_v46, 2  ;;  %v12161_v40 = vrot.slane %v12159_v3, 3  ;;  %v12168_v43 = vshll.u32 %v21817_v29, 16  ;;  %v12174_v10 = vshrl.u32 %v21824_v55, 16  ;;  %vm23861_vm12 = vmmov %vm23856_vm5 }
 0x678   : > { %v12126_v36 = vor.u32 %v12125_v28, %v12122_v56  ;;  %v12165_v28 = vshrl.u32 %v21817_v29, 16  ;;  %v21851_v16 = vsel %vm23859_vm6, %v12135_v4, %v12144_v48  ;;  %v12153_v20 = vor.u32 %v12152_v45, %v12149_v15  ;;  %v21863_v15 = vld [vmem:[#allocation2 + $0x80] sm:$0xff]   ;;  %vm23863_vm11 = vmmov %vm23856_vm5 }
 0x679   : > { %23860 = vst [vmem:[#allocation83_spill] sm:$0xff] %v21851_v16  ;;  %v12177_v46 = vshll.u32 %v21824_v55, 16  ;;  %v12183_v3 = vshrl.u32 %v21830_v23, 16  ;;  %v12176_v33 = vrot.slane %v12174_v10, 2  ;;  %v12186_v8 = vshll.u32 %v21830_v23, 16  ;;  %vm23865_vm14 = vmmov %vm23856_vm5 }
 0x67a   : > { %v21837_v49 = vsel %vm23853_vm7, %v12117_v19, %v12126_v36  ;;  %v21843_v56 = vsel %vm23856_vm5, %v12126_v36, %v12135_v4  ;;  %v12167_v19 = vrot.slane %v12165_v28, 2  ;;  %v12162_v36 = vor.u32 %v12161_v40, %v12158_v62  ;;  %vm23867_vm2 = vmmov %vm23844_vm0 }
 0x67b   : > { %23854 = vst [vmem:[#allocation13_spill] sm:$0xff] %v21837_v49  ;;  %23857 = vst [vmem:[#allocation42_spill] sm:$0xff] %v21843_v56  ;;  %v21854_v49 = vld [vmem:[#allocation2 + $0x78] sm:$0xff]   ;;  %v12170_v56 = vrot.slane %v12168_v43, 3  ;;  %v21859_v54 = vsel %vm23861_vm12, %v12144_v48, %v12153_v20  ;;  %v12192_v4 = vshrl.u32 %v21834_v2, 16  ;;  %v12179_v62 = vrot.slane %v12177_v46, 3 }
 0x67c   : > { %23862 = vst [vmem:[#allocation84_spill] sm:$0xff] %v21859_v54  ;;  %v21866_v45 = vsel %vm23863_vm11, %v12153_v20, %v12162_v36  ;;  %v12185_v40 = vrot.slane %v12183_v3, 2  ;;  %v12188_v43 = vrot.slane %v12186_v8, 3  ;;  %v12195_v21 = vshll.u32 %v21834_v2, 16  ;;  %v21870_v54 = vld [vmem:[#allocation2 + $0x88] sm:$0xff]   ;;  %vm23868_vm8 = vmmov %vm23856_vm5 }
 0x67d   : > { %23864 = vst [vmem:[#allocation73_spill] sm:$0xff] %v21866_v45  ;;  %v12171_v28 = vor.u32 %v12170_v56, %v12167_v19  ;;  %v12194_v16 = vrot.slane %v12192_v4, 2  ;;  %v12201_v48 = vshrl.u32 %v21848_v39, 16  ;;  %v12180_v44 = vor.u32 %v12179_v62, %v12176_v33  ;;  %v21877_v45 = vld [vmem:[#allocation2 + $0x90] sm:$0xff]   ;;  %v21888_v62 = vld [vmem:[#allocation2 + $0x98] sm:$0xff]   ;;  %vm23870_vm4 = vmmov %vm23856_vm5 }
 0x67e   : > { %15933 = vmatmul.mubr.msk.bf16.gmra.mrb[60].mxu0 %vm23855_vm13, %v21482_v51  ;;  %v12204_v25 = vshll.u32 %v21848_v39, 16  ;;  %v12210_v20 = vshrl.u32 %v21854_v49, 16  ;;  %v12189_v56 = vor.u32 %v12188_v43, %v12185_v40  ;;  %v12197_v19 = vrot.slane %v12195_v21, 3  ;;  %vm23872_vm3 = vmmov %vm23870_vm4 }
 0x67f   : > { %15936 = vmatprep.mubr.msk.bf16.mxu0 %vm23858_vm10, %v21486_v31  ;;  %v21873_v10 = vsel %vm23865_vm14, %v12162_v36, %v12171_v28  ;;  %v12203_v8 = vrot.slane %v12201_v48, 2  ;;  %v12213_v46 = vshll.u32 %v21854_v49, 16  ;;  %v21883_v3 = vsel %vm23868_vm8, %v12171_v28, %v12180_v44  ;;  %vm23874_vm1 = vmmov %vm23872_vm3 }
 0x680   : > { %23866 = vst [vmem:[#allocation87_spill] sm:$0xff] %v21873_v10  ;;  %23869 = vst [vmem:[#allocation88_spill] sm:$0xff] %v21883_v3  ;;  %v12206_v36 = vrot.slane %v12204_v25, 3  ;;  %v12212_v4 = vrot.slane %v12210_v20, 2  ;;  %v12219_v33 = vshrl.u32 %v21863_v15, 16  ;;  %v21891_v21 = vsel %vm23870_vm4, %v12180_v44, %v12189_v56 }
 0x681   : > { %23871 = vst [vmem:[#allocation74_spill] sm:$0xff] %v21891_v21  ;;  %v12198_v40 = vor.u32 %v12197_v19, %v12194_v16  ;;  %v12215_v43 = vrot.slane %v12213_v46, 3  ;;  %v12222_v48 = vshll.u32 %v21863_v15, 16  ;;  %v12228_v28 = vshrl.u32 %v21870_v54, 16  ;;  %vm23875_vm9 = vmmov %vm23874_vm1 }
 0x682   : > { %v12207_v10 = vor.u32 %v12206_v36, %v12203_v8  ;;  %v12221_v9 = vrot.slane %v12219_v33, 2  ;;  %v12231_v25 = vshll.u32 %v21870_v54, 16  ;;  %v12237_v24 = vshrl.u32 %v21877_v45, 16  ;;  %v12542_v8 = vld [vmem:[#allocation2 + $0x10] sm:$0x8]  ;;  %vm23876_vm15 = vmmov %vm23874_vm1 }
 0x683   : > { %v21897_v20 = vsel %vm23872_vm3, %v12189_v56, %v12198_v40  ;;  %v12216_v3 = vor.u32 %v12215_v43, %v12212_v4  ;;  %v12224_v6 = vrot.slane %v12222_v48, 3  ;;  %v12230_v16 = vrot.slane %v12228_v28, 2  ;;  %vm23877_vm7 = vmmov %vm23844_vm0 }
 0x684   : > { %23873 = vst [vmem:[#allocation89_spill] sm:$0xff] %v21897_v20  ;;  %v21901_v44 = vsel %vm23874_vm1, %v12198_v40, %v12207_v10  ;;  %v12233_v19 = vrot.slane %v12231_v25, 3  ;;  %v12240_v46 = vshll.u32 %v21877_v45, 16  ;;  %v12239_v21 = vrot.slane %v12237_v24, 2  ;;  %vm23880_vm5 = vmmov %vm23874_vm1 }
 0x685   : > { %v21905_v36 = vsel %vm23875_vm9, %v12207_v10, %v12216_v3  ;;  %v12225_v33 = vor.u32 %v12224_v6, %v12221_v9  ;;  %v12246_v56 = vshrl.u32 %v21888_v62, 16  ;;  %v12249_v43 = vshll.u32 %v21888_v62, 16  ;;  %vm23881_vm10 = vmmov %vm23844_vm0 }
 0x686   : > { %15937 = vmatmul.mubr.msk.bf16.gmra.mrb[64].mxu0 %vm23867_vm2, %v21493_v0  ;;  %v12234_v20 = vor.u32 %v12233_v19, %v12230_v16  ;;  %v12242_v4 = vrot.slane %v12240_v46, 3  ;;  %v10086_v48 = vrot.slane %v21606_v50, 1  ;;  %v14521_v25 = vcombine.low %v12542_v8, %v21778_v63  ;;  %v17460_v50 = vld [vmem:[#allocation2 + $0x18] sm:$0xff]   ;;  %vm23882_vm6 = vmmov %vm23874_vm1 }
 0x687   : > { %15940 = vmatprep.mubr.msk.bf16.mxu0 %vm23844_vm0, %v21516_v14  ;;  %v21911_v40 = vsel %vm23876_vm15, %v12216_v3, %v12225_v33  ;;  %v12248_v28 = vrot.slane %v12246_v56, 2  ;;  %v23878_v6 = vrot.slane %v21594_v30, 1  ;;  %vm23879_vm13 = vcmask 1046528   ;;  %vm23889_vm2 = vmmov %vm23874_vm1 }
 0x688   : > { %v21921_v9 = vsel %vm23880_vm5, %v12225_v33, %v12234_v20  ;;  %v12243_v10 = vor.u32 %v12242_v4, %v12239_v21  ;;  %v12251_v16 = vrot.slane %v12249_v43, 3  ;;  %v10088_v3 = vrot.slane %v17460_v50, 1  ;;  %vm23884_vm12 = vmmov %vm23879_vm13  ;;  %v17381_v50 = vld [vmem:[%s22722_s3 + $0x38] sm:$0xff]  }
 0x689   : > { %v10085_v24 = vsel %vm23879_vm13, %v21801_v34, %v23878_v6  ;;  %v12551_v19 = vrot.slane %v14521_v25, 3  ;;  %v12552_v63 = vrot.slane %v21785_v41, 3  ;;  %v12554_v46 = vrot.slane %v21787_v35, 3  ;;  %vm23894_vm4 = vmmov %vm23884_vm12 }
 0x68a   : > { %v21927_v8 = vsel %vm23882_vm6, %v12234_v20, %v12243_v10  ;;  %v21929_v56 = vor.u32 %v12251_v16, %v12248_v28  ;;  %v12556_v34 = vrot.slane %v21789_v42, 3  ;;  %v12558_v33 = vrot.slane %v21791_v12, 3  ;;  %vm23908_vm6 = vmmov %vm23877_vm7 }
 0x68b   : > { %v23883_v21 = vmov %v23878_v6  ;;  %vm23885_vm11 = vcmask 1044480   ;;  %v12560_v6 = vrot.slane %v21796_v52, 3  ;;  %v12562_v30 = vrot.slane %v21806_v27, 3 }
 0x68c   : > { %v10087_v4 = vsel %vm23884_vm12, %v23883_v21, %v10086_v48  ;;  %v21937_v43 = vsel %vm23885_vm11, %v12551_v19, %v12552_v63  ;;  %vm23887_vm14 = vmmov %vm23885_vm11  ;;  %v21945_v20 = vsel %vm23889_vm2, %v12243_v10, %v21929_v56  ;;  %v10089_v16 = vsel %vm23894_vm4, %v10086_v48, %v10088_v3 }
 0x68d   : > { %23886 = vst [vmem:[#allocation90_spill] sm:$0xff] %v21937_v43  ;;  %v21940_v25 = vsel %vm23887_vm14, %v12552_v63, %v12554_v46  ;;  %vm23890_vm8 = vmmov %vm23885_vm11  ;;  %v12564_v10 = vrot.slane %v21813_v7, 3  ;;  %v12566_v63 = vrot.slane %v21817_v29, 3  ;;  %v12568_v21 = vrot.slane %v21824_v55, 3 }
 0x68e   : > { %15941 = vmatmul.mubr.msk.bf16.gmra.mrb[68].mxu0 %vm23877_vm7, %v21521_v47  ;;  %23888 = vst [vmem:[#allocation75_spill] sm:$0xff] %v21940_v25  ;;  %v21948_v28 = vsel %vm23890_vm8, %v12554_v46, %v12556_v34  ;;  %vm23892_vm0 = vmmov %vm23890_vm8  ;;  %v21963_v46 = vld [vmem:[#allocation2 + $0xa0] ss:$0 sps:$4 sm:$0x77]   ;;  %v12570_v48 = vrot.slane %v21830_v23, 3  ;;  %v12576_v25 = vrot.slane %v21854_v49, 3 }
 0x68f   : > { %15948 = vmatprep.mubr.msk.bf16.mxu0 %vm23881_vm10, %v10085_v24  ;;  %23891 = vst [vmem:[#allocation51_spill] sm:$0xff] %v21948_v28  ;;  %v21951_v24 = vsel %vm23892_vm0, %v12556_v34, %v12558_v33  ;;  %vm23895_vm3 = vmmov %vm23892_vm0 }
 0x690   : > { %23893 = vst [vmem:[#allocation61_spill] sm:$0xff] %v21951_v24  ;;  %v21959_v19 = vsel %vm23895_vm3, %v12558_v33, %v12560_v6  ;;  %vm23897_vm1 = vmmov %vm23892_vm0  ;;  %v12572_v24 = vrot.slane %v21834_v2, 3  ;;  %vm23919_vm3 = vcmask 1046528  }
 0x691   : > { %23896 = vst [vmem:[#allocation28_spill] sm:$0xff] %v21959_v19  ;;  %v21966_v34 = vsel %vm23897_vm1, %v12560_v6, %v12562_v30  ;;  %vm23899_vm9 = vmmov %vm23892_vm0  ;;  %v12574_v19 = vrot.slane %v21848_v39, 3 }
 0x692   : > { %23898 = vst [vmem:[#allocation97_spill] sm:$0xff] %v21966_v34  ;;  %v21972_v28 = vsel %vm23899_vm9, %v12562_v30, %v12564_v10  ;;  %vm23900_vm15 = vmmov %vm23892_vm0  ;;  %v12578_v30 = vrot.slane %v21863_v15, 3 }
 0x693   : > { %v21975_v33 = vsel %vm23900_vm15, %v12564_v10, %v12566_v63  ;;  %vm23902_vm13 = vmmov %vm23892_vm0 }
 0x694   : > { %23901 = vst [vmem:[#allocation91_spill] sm:$0xff] %v21975_v33  ;;  %v21981_v6 = vsel %vm23902_vm13, %v12566_v63, %v12568_v21  ;;  %vm23904_vm5 = vmmov %vm23892_vm0  ;;  %v12580_v63 = vrot.slane %v21870_v54, 3 }
 0x695   : > { %23903 = vst [vmem:[#allocation92_spill] sm:$0xff] %v21981_v6  ;;  %v21984_v34 = vsel %vm23904_vm5, %v12568_v21, %v12570_v48  ;;  %vm23906_vm10 = vmmov %vm23892_vm0  ;;  %v12582_v21 = vrot.slane %v21877_v45, 3 }
 0x696   : > { %15949 = vmatmul.mubr.msk.bf16.vlgmr.msra.gmra.mrb[36].mxu0 %vm23877_vm7, %v10087_v4  ;;  %23905 = vst [vmem:[#allocation77_spill] sm:$0xff] %v21984_v34  ;;  %v21987_v43 = vsel %vm23906_vm10, %v12570_v48, %v12572_v24  ;;  %vm23909_vm12 = vmmov %vm23892_vm0  ;;  %v22003_v48 = vld [vmem:[%s22722_s3 + $0x40] sm:$0xff]   ;;  %v17462_v34 = vld [vmem:[#allocation2 + $0x28] sm:$0xff]  }
 0x697   : > { %23907 = vst [vmem:[#allocation53_spill] sm:$0xff] %v21987_v43  ;;  %15985 = vmatpush3.bf16.msra.mxu0 %v21617_v57  ;;  %15952 = vmatprep.mubr.msk.bf16.mxu0 %vm23908_vm6, %v10089_v16  ;;  %v21993_v10 = vsel %vm23909_vm12, %v12572_v24, %v12574_v19  ;;  %vm23911_vm11 = vmmov %vm23892_vm0  ;;  %v12584_v16 = vrot.slane %v21888_v62, 3  ;;  %v12586_v24 = vrot.slane %v21963_v46, 3  ;;  %v10092_v6 = vrot.slane %v17462_v34, 1  ;;  %v17464_v34 = vld [vmem:[#allocation2 + $0x38] sm:$0xff]  }
 0x698   : > { %23910 = vst [vmem:[#allocation93_spill] sm:$0xff] %v21993_v10  ;;  %v21996_v4 = vsel %vm23911_vm11, %v12574_v19, %v12576_v25  ;;  %15986 = vmatprep.subr.bf16.mxu0 %v17381_v50  ;;  %vm23913_vm14 = vmmov %vm23892_vm0  ;;  %v17461_v10 = vld [vmem:[#allocation2 + $0x20] sm:$0xff]  }
 0x699   : > { %23912 = vst [vmem:[#allocation94_spill] sm:$0xff] %v21996_v4  ;;  %v22006_v57 = vsel %vm23913_vm14, %v12576_v25, %v12578_v30  ;;  %v10090_v19 = vrot.slane %v17461_v10, 1  ;;  %vm23915_vm2 = vmmov %vm23892_vm0  ;;  %v22017_v33 = vsel %vm23892_vm0, %v12582_v21, %v12584_v16  ;;  %v17463_v10 = vld [vmem:[#allocation2 + $0x30] sm:$0xff]  }
 0x69a   : > { %23914 = vst [vmem:[#allocation81_spill] sm:$0xff] %v22006_v57  ;;  %v22011_v4 = vsel %vm23915_vm2, %v12578_v30, %v12580_v63  ;;  %vm23916_vm8 = vmmov %vm23892_vm0 }
 0x69b   : > { %v22014_v43 = vsel %vm23916_vm8, %v12580_v63, %v12582_v21  ;;  %vm23918_vm4 = vmmov %vm23892_vm0  ;;  %15987 = vmatpush3.bf16.msra.mxu0 %v17381_v50  ;;  %v10091_v57 = vsel %vm23919_vm3, %v10088_v3, %v10090_v19  ;;  %v10094_v63 = vrot.slane %v17463_v10, 1  ;;  %v17467_v10 = vld [vmem:[#allocation2 + $0x50] sm:$0xff]  }
 0x69c   : > { %23917 = vst [vmem:[#allocation96_spill] sm:$0xff] %v22014_v43  ;;  %v22020_v25 = vsel %vm23918_vm4, %v12584_v16, %v12586_v24  ;;  %16024 = vmatprep.subr.bf16.mxu0 %v22003_v48  ;;  %vm23920_vm1 = vmmov %vm23908_vm6  ;;  %v10096_v43 = vrot.slane %v17464_v34, 1  ;;  %v17465_v16 = vld [vmem:[#allocation2 + $0x40] sm:$0xff]   ;;  %v17466_v24 = vld [vmem:[#allocation2 + $0x48] sm:$0xff]  }
 0x69d   : > { %vm23921_vm9 = vmmov %vm23919_vm3  ;;  %v10098_v3 = vrot.slane %v17465_v16, 1  ;;  %v17468_v34 = vld [vmem:[#allocation2 + $0x58] sm:$0xff]   ;;  %v10108_v16 = vrot.slane %v21482_v51, 1  ;;  %v10114_v51 = vrot.slane %v21516_v14, 1 }
 0x69e   : > { %15953 = vmatmul.mubr.msk.bf16.gmra.mrb[40].mxu0 %vm23920_vm1, %v10091_v57  ;;  %v10093_v30 = vsel %vm23921_vm9, %v10090_v19, %v10092_v6  ;;  %vm23922_vm15 = vmmov %vm23920_vm1  ;;  %v10100_v57 = vrot.slane %v17466_v24, 1 }
 0x69f   : > { %15956 = vmatprep.mubr.msk.bf16.mxu0 %vm23922_vm15, %v10093_v30  ;;  %vm23923_vm7 = vmmov %vm23919_vm3 }
 0x6a0   : > { %v10095_v21 = vsel %vm23923_vm7, %v10092_v6, %v10094_v63  ;;  %vm23924_vm13 = vmmov %vm23920_vm1  ;;  %v10102_v6 = vrot.slane %v17467_v10, 1  ;;  %v10116_v10 = vrot.slane %v21521_v47, 1  ;;  %v10537_v47 = vrot.slane %v21545_v37, 1  ;;  %v17403_v37 = vld [vmem:[%s22722_s3 + $0x50] sm:$0xff]  }
 0x6a1   : > { %vm23925_vm5 = vmmov %vm23919_vm3 }
 0x6a2   : > { %v10097_v50 = vsel %vm23925_vm5, %v10094_v63, %v10096_v43  ;;  %vm23926_vm10 = vmmov %vm23920_vm1 }
 0x6a3   : > { %vm23927_vm6 = vmmov %vm23919_vm3 }
 0x6a4   : > { %v10099_v19 = vsel %vm23927_vm6, %v10096_v43, %v10098_v3  ;;  %vm23928_vm12 = vmmov %vm23920_vm1  ;;  %v10106_v43 = vrot.slane %v21477_v32, 1 }
 0x6a5   : > { %vm23929_vm11 = vmmov %vm23919_vm3 }
 0x6a6   : > { %15957 = vmatmul.mubr.msk.bf16.gmra.mrb[44].mxu0 %vm23924_vm13, %v10095_v21  ;;  %v10101_v30 = vsel %vm23929_vm11, %v10098_v3, %v10100_v57  ;;  %vm23930_vm14 = vmmov %vm23920_vm1  ;;  %v10104_v21 = vrot.slane %v17468_v34, 1  ;;  %v10534_v34 = vrot.slane %v21541_v13, 1 }
 0x6a7   : > { %15960 = vmatprep.mubr.msk.bf16.mxu0 %vm23926_vm10, %v10097_v50  ;;  %vm23931_vm2 = vmmov %vm23919_vm3 }
 0x6a8   : > { %v10103_v63 = vsel %vm23931_vm2, %v10100_v57, %v10102_v6  ;;  %vm23932_vm8 = vmmov %vm23920_vm1  ;;  %v10110_v57 = vrot.slane %v21486_v31, 1 }
 0x6a9   : > { %vm23933_vm0 = vmmov %vm23931_vm2 }
 0x6aa   : > { %v10105_v50 = vsel %vm23933_vm0, %v10102_v6, %v10104_v21  ;;  %vm23934_vm4 = vmmov %vm23920_vm1 }
 0x6ab   : > { %vm23935_vm3 = vmmov %vm23933_vm0 }
 0x6ac   : > { %v10107_v3 = vsel %vm23935_vm3, %v10104_v21, %v10106_v43  ;;  %vm23936_vm9 = vmmov %vm23933_vm0  ;;  %v10535_v21 = vrot.slane %v21543_v22, 1 }
 0x6ad   : > { %v10109_v24 = vsel %vm23936_vm9, %v10106_v43, %v10108_v16  ;;  %vm23937_vm15 = vmmov %vm23920_vm1  ;;  %v10543_v43 = vrot.slane %v21557_v17, 1  ;;  %v10549_v17 = vrot.slane %v21571_v60, 1 }
 0x6ae   : > { %15961 = vmatmul.mubr.msk.bf16.gmra.mrb[48].mxu0 %vm23928_vm12, %v10099_v19  ;;  %v10112_v19 = vrot.slane %v21493_v0, 1  ;;  %vm23938_vm7 = vmmov %vm23933_vm0  ;;  %v10118_v0 = vrot.slane %v21529_v18, 1  ;;  %v10536_v14 = vsel %vm23933_vm0, %v10534_v34, %v10535_v21  ;;  %v17395_v18 = vld [vmem:[%s22722_s3 + $0x48] sm:$0xff]  }
 0x6af   : > { %15964 = vmatprep.mubr.msk.bf16.mxu0 %vm23930_vm14, %v10101_v30  ;;  %v10111_v30 = vsel %vm23938_vm7, %v10108_v16, %v10110_v57  ;;  %vm23939_vm13 = vmmov %vm23920_vm1 }
 0x6b0   : > { %vm23940_vm5 = vmmov %vm23933_vm0 }
 0x6b1   : > { %v10113_v32 = vsel %vm23940_vm5, %v10110_v57, %v10112_v19  ;;  %vm23941_vm10 = vmmov %vm23920_vm1 }
 0x6b2   : > { %vm23942_vm6 = vmmov %vm23933_vm0 }
 0x6b3   : > { %v10115_v6 = vsel %vm23942_vm6, %v10112_v19, %v10114_v51  ;;  %vm23943_vm12 = vmmov %vm23920_vm1  ;;  %v10551_v19 = vrot.slane %v21575_v53, 1  ;;  %v10557_v53 = vrot.slane %v21610_v58, 1 }
 0x6b4   : > { %vm23944_vm11 = vmmov %vm23933_vm0 }
 0x6b5   : > { %v10117_v31 = vsel %vm23944_vm11, %v10114_v51, %v10116_v10  ;;  %vm23945_vm14 = vmmov %vm23920_vm1 }
 0x6b6   : > { %15965 = vmatmul.mubr.msk.bf16.gmra.mrb[52].mxu0 %vm23932_vm8, %v10103_v63  ;;  %vm23946_vm2 = vmmov %vm23933_vm0 }
 0x6b7   : > { %15968 = vmatprep.mubr.msk.bf16.mxu0 %vm23934_vm4, %v10105_v50  ;;  %v10119_v63 = vsel %vm23946_vm2, %v10116_v10, %v10118_v0  ;;  %vm23947_vm8 = vmmov %vm23920_vm1  ;;  %v10539_v50 = vrot.slane %v21548_v5, 1  ;;  %v10541_v5 = vrot.slane %v21550_v59, 1  ;;  %v10559_v10 = vrot.slane %v21627_v38, 1  ;;  %v23971_v0 = vld [vmem:[#allocation36_spill] sm:$0xff] }
 0x6b8   : > { %vm23948_vm4 = vmmov %vm23920_vm1  ;;  %v10563_v34 = vrot.slane %v23971_v0, 1  ;;  %v23976_v38 = vld [vmem:[#allocation64_spill] sm:$0xff]  ;;  %v24013_v0 = vld [vmem:[#allocation43_spill] sm:$0xff] }
 0x6b9   : > { %vm23949_vm3 = vmmov %vm23933_vm0 }
 0x6ba   : > { %v10538_v13 = vsel %vm23949_vm3, %v10535_v21, %v10537_v47  ;;  %vm23950_vm9 = vmmov %vm23933_vm0 }
 0x6bb   : > { %v10540_v22 = vsel %vm23950_vm9, %v10537_v47, %v10539_v50  ;;  %vm23952_vm7 = vmmov %vm23933_vm0 }
 0x6bc   : > { %v10542_v16 = vsel %vm23952_vm7, %v10539_v50, %v10541_v5  ;;  %vm23954_vm5 = vmmov %vm23933_vm0 }
 0x6bd   : > { %vm23956_vm6 = vmmov %vm23933_vm0 }
 0x6be   : > { %15969 = vmatmul.mubr.msk.bf16.gmra.mrb[56].mxu0 %vm23920_vm1, %v10107_v3  ;;  %v10544_v3 = vsel %vm23954_vm5, %v10541_v5, %v10543_v43  ;;  %vm23958_vm11 = vmmov %vm23933_vm0 }
 0x6bf   : > { %15972 = vmatprep.mubr.msk.bf16.mxu0 %vm23937_vm15, %v10109_v24  ;;  %vm23951_vm15 = vmmov %vm23920_vm1  ;;  %v10547_v24 = vrot.slane %v21569_v26, 1  ;;  %v10553_v26 = vrot.slane %v21588_v1, 1 }
 0x6c0   : > { %vm23960_vm2 = vmmov %vm23933_vm0 }
 0x6c1   : > { %vm23963_vm3 = vmmov %vm23933_vm0 }
 0x6c2   : > { %v10554_v51 = vsel %vm23963_vm3, %v10551_v19, %v10553_v26  ;;  %vm23964_vm9 = vmmov %vm23933_vm0 }
 0x6c3   : > { %vm23966_vm7 = vmmov %vm23933_vm0 }
 0x6c4   : > { %vm23968_vm5 = vmmov %vm23933_vm0 }
 0x6c5   : > { %v10560_v1 = vsel %vm23968_vm5, %v10557_v53, %v10559_v10  ;;  %vm23981_vm3 = vmmov %vm23933_vm0 }
 0x6c6   : > { %15973 = vmatmul.mubr.msk.bf16.gmra.mrb[60].mxu0 %vm23939_vm13, %v10111_v30  ;;  %vm23953_vm13 = vmmov %vm23920_vm1  ;;  %v10550_v30 = vsel %vm23960_vm2, %v10547_v24, %v10549_v17 }
 0x6c7   : > { %15976 = vmatprep.mubr.msk.bf16.mxu0 %vm23941_vm10, %v10113_v32  ;;  %vm23955_vm10 = vmmov %vm23920_vm1  ;;  %v10555_v32 = vrot.slane %v21598_v11, 1  ;;  %v23970_v11 = vld [vmem:[#allocation38_spill] sm:$0xff] }
 0x6c8   : > { %vm23978_vm2 = vmmov %vm23933_vm0 }
 0x6c9   : > { %v10556_v60 = vsel %vm23964_vm9, %v10553_v26, %v10555_v32  ;;  %vm23983_vm9 = vmmov %vm23920_vm1  ;;  %v24002_v26 = vld [vmem:[#allocation65_spill] sm:$0xff] }
 0x6ca   : > { %vm23991_vm5 = vmmov %vm23920_vm1 }
 0x6ce   : > { %15977 = vmatmul.mubr.msk.bf16.gmra.mrb[64].mxu0 %vm23943_vm12, %v10115_v6  ;;  %vm23957_vm12 = vmmov %vm23920_vm1  ;;  %v10558_v6 = vsel %vm23966_vm7, %v10555_v32, %v10557_v53  ;;  %v24004_v32 = vld [vmem:[#allocation56_spill] sm:$0xff]  ;;  %v24010_v53 = vld [vmem:[#allocation57_spill] sm:$0xff] }
 0x6cf   : > { %15980 = vmatprep.mubr.msk.bf16.mxu0 %vm23945_vm14, %v10117_v31  ;;  %vm23959_vm14 = vmmov %vm23920_vm1  ;;  %v10561_v31 = vrot.slane %v23970_v11, 1 }
 0x6d0   : > { %vm23987_vm7 = vmmov %vm23920_vm1 }
 0x6d6   : > { %15981 = vmatmul.mubr.msk.bf16.gmra.mrb[68].mxu0 %vm23947_vm8, %v10119_v63  ;;  %vm23961_vm8 = vmmov %vm23920_vm1  ;;  %v10565_v63 = vrot.slane %v23976_v38, 1 }
 0x6d7   : > { %15988 = vmatprep.mubr.msk.bf16.mxu0 %vm23948_vm4, %v10536_v14  ;;  %vm23962_vm4 = vmmov %vm23920_vm1  ;;  %v23977_v14 = vld [vmem:[#allocation39_spill] sm:$0xff] }
 0x6d8   : > { %v10567_v47 = vrot.slane %v23977_v14, 1  ;;  %v10566_v50 = vsel %vm23978_vm2, %v10563_v34, %v10565_v63  ;;  %vm24003_vm2 = vmmov %vm23920_vm1  ;;  %v17408_v14 = vld [vmem:[%s22722_s3 + $0x68] sm:$0xff]  }
 0x6de   : > { %15989 = vmatmul.mubr.msk.bf16.vlgmr.msra.gmra.mrb[36].mxu0 %vm23920_vm1, %v10538_v13  ;;  %v10568_v13 = vsel %vm23933_vm0, %v10565_v63, %v10567_v47  ;;  %v24020_v63 = vld [vmem:[#allocation69_spill] sm:$0xff] }
 0x6df   : > { %16025 = vmatpush3.bf16.msra.mxu0 %v22003_v48  ;;  %15992 = vmatprep.mubr.msk.bf16.mxu0 %vm23951_vm15, %v10540_v22  ;;  %v10545_v48 = vrot.slane %v21563_v61, 1  ;;  %v10552_v61 = vsel %vm23933_vm0, %v10549_v17, %v10551_v19  ;;  %vm23965_vm15 = vmmov %vm23920_vm1  ;;  %v23992_v17 = vld [vmem:[#allocation24_spill] sm:$0xff]  ;;  %v23996_v19 = vld [vmem:[#allocation63_spill] sm:$0xff] }
 0x6e0   : > { %16026 = vmatprep.subr.bf16.mxu0 %v17395_v18 }
 0x6e1   : > { %v10546_v57 = vsel %vm23956_vm6, %v10543_v43, %v10545_v48  ;;  %v10548_v59 = vsel %vm23958_vm11, %v10545_v48, %v10547_v24  ;;  %vm23972_vm6 = vmmov %vm23933_vm0  ;;  %v23982_v43 = vld [vmem:[#allocation31_spill] sm:$0xff]  ;;  %v23986_v48 = vld [vmem:[#allocation22_spill] sm:$0xff] }
 0x6e2   : > { %v10562_v21 = vsel %vm23972_vm6, %v10559_v10, %v10561_v31  ;;  %vm23974_vm11 = vmmov %vm23933_vm0  ;;  %v17407_v24 = vld [vmem:[%s22722_s3 + $0x60] sm:$0xff]   ;;  %v24012_v10 = vld [vmem:[#allocation60_spill] sm:$0xff] }
 0x6e3   : > { %16027 = vmatpush3.bf16.msra.mxu0 %v17395_v18  ;;  %v10564_v58 = vsel %vm23974_vm11, %v10561_v31, %v10563_v34  ;;  %v17402_v18 = vld [vmem:[#allocation2 + $0x98] ss:$0 sps:$4 sm:$0x11]   ;;  %vm23995_vm6 = vmmov %vm23920_vm1  ;;  %v24015_v34 = vld [vmem:[#allocation68_spill] sm:$0xff] }
 0x6e4   : > { %16064 = vmatprep.subr.bf16.mxu0 %v17403_v37  ;;  %v10569_v22 = vrot.slane %v17402_v18, 1  ;;  %vm23999_vm11 = vmmov %vm23920_vm1  ;;  %v17411_v18 = vld [vmem:[%s22722_s3 + $0x70] sm:$0xff]  }
 0x6e5   : > { %vm24007_vm0 = vmmov %vm23920_vm1 }
 0x6e6   : > { %15993 = vmatmul.mubr.msk.bf16.gmra.mrb[40].mxu0 %vm23953_vm13, %v10542_v16  ;;  %vm23967_vm13 = vmmov %vm23920_vm1  ;;  %v10570_v5 = vsel %vm23981_vm3, %v10567_v47, %v10569_v22  ;;  %v17404_v16 = vld [vmem:[%s22722_s3 + $0x58] sm:$0xff]   ;;  %v24022_v47 = vld [vmem:[#allocation67_spill] sm:$0xff] }
 0x6e7   : > { %15996 = vmatprep.mubr.msk.bf16.mxu0 %vm23955_vm10, %v10544_v3  ;;  %vm23969_vm10 = vmmov %vm23920_vm1  ;;  %v23984_v3 = vld [vmem:[#allocation32_spill] sm:$0xff] }
 0x6e8   : > { %vm24011_vm3 = vmmov %vm24007_vm0  ;;  %v24028_v22 = vld [vmem:[#allocation44_spill] sm:$0xff] }
 0x6ee   : > { %15997 = vmatmul.mubr.msk.bf16.gmra.mrb[44].mxu0 %vm23957_vm12, %v10546_v57  ;;  %vm23973_vm12 = vmmov %vm23920_vm1  ;;  %v23988_v57 = vld [vmem:[#allocation34_spill] sm:$0xff] }
 0x6ef   : > { %16000 = vmatprep.mubr.msk.bf16.mxu0 %vm23959_vm14, %v10548_v59  ;;  %vm23975_vm14 = vmmov %vm23920_vm1  ;;  %v23990_v59 = vld [vmem:[#allocation33_spill] sm:$0xff] }
 0x6f6   : > { %16001 = vmatmul.mubr.msk.bf16.gmra.mrb[48].mxu0 %vm23961_vm8, %v10550_v30  ;;  %vm23979_vm8 = vmmov %vm23920_vm1  ;;  %v23998_v30 = vld [vmem:[#allocation40_spill] sm:$0xff] }
 0x6f7   : > { %16004 = vmatprep.mubr.msk.bf16.mxu0 %vm23962_vm4, %v10552_v61  ;;  %vm23980_vm4 = vmmov %vm23920_vm1  ;;  %v24000_v61 = vld [vmem:[#allocation35_spill] sm:$0xff] }
 0x6fe   : > { %16005 = vmatmul.mubr.msk.bf16.gmra.mrb[52].mxu0 %vm23920_vm1, %v10554_v51  ;;  %v24006_v51 = vld [vmem:[#allocation46_spill] sm:$0xff] }
 0x6ff   : > { %16008 = vmatprep.mubr.msk.bf16.mxu0 %vm23965_vm15, %v10556_v60  ;;  %vm23985_vm15 = vmmov %vm23920_vm1  ;;  %v24008_v60 = vld [vmem:[#allocation41_spill] sm:$0xff] }
 0x706   : > { %16009 = vmatmul.mubr.msk.bf16.gmra.mrb[56].mxu0 %vm23967_vm13, %v10558_v6  ;;  %vm23989_vm13 = vmmov %vm23920_vm1  ;;  %v11021_v6 = vshrl.u32 %v24012_v10, 16 }
 0x707   : > { %16012 = vmatprep.mubr.msk.bf16.mxu0 %vm23969_vm10, %v10560_v1  ;;  %vm23993_vm10 = vmmov %vm23920_vm1  ;;  %v11024_v1 = vshll.u32 %v24012_v10, 16  ;;  %v11773_v10 = vrot.slane %v21789_v42, 2  ;;  %v11775_v42 = vrot.slane %v21791_v12, 2 }
 0x708   : > { %v11023_v11 = vrot.slane %v11021_v6, 1  ;;  %v17422_v6 = vld [vmem:[%s22722_s3 + $0x78] sm:$0xff]  }
 0x709   : > { %v11026_v31 = vrot.slane %v11024_v1, 2 }
 0x70e   : > { %16013 = vmatmul.mubr.msk.bf16.gmra.mrb[60].mxu0 %vm23973_vm12, %v10562_v21  ;;  %vm23997_vm12 = vmmov %vm23920_vm1  ;;  %v11027_v21 = vor.u32 %v11026_v31, %v11023_v11  ;;  %v11777_v11 = vrot.slane %v21796_v52, 2  ;;  %v11783_v52 = vrot.slane %v21817_v29, 2 }
 0x70f   : > { %16016 = vmatprep.mubr.msk.bf16.mxu0 %vm23975_vm14, %v10564_v58  ;;  %vm24001_vm14 = vmmov %vm23920_vm1  ;;  %v24017_v58 = vld [vmem:[#allocation49_spill] sm:$0xff] }
 0x716   : > { %16017 = vmatmul.mubr.msk.bf16.gmra.mrb[64].mxu0 %vm23979_vm8, %v10566_v50  ;;  %vm24005_vm8 = vmmov %vm23920_vm1  ;;  %v24024_v50 = vld [vmem:[#allocation58_spill] sm:$0xff] }
 0x717   : > { %16020 = vmatprep.mubr.msk.bf16.mxu0 %vm23980_vm4, %v10568_v13  ;;  %vm24009_vm4 = vmmov %vm24007_vm0  ;;  %v24026_v13 = vld [vmem:[#allocation50_spill] sm:$0xff] }
 0x71e   : > { %16021 = vmatmul.mubr.msk.bf16.gmra.mrb[68].mxu0 %vm23920_vm1, %v10570_v5  ;;  %vm24014_vm1 = vmmov %vm24007_vm0  ;;  %v24030_v5 = vld [vmem:[#allocation54_spill] sm:$0xff] }
 0x71f   : > { %16028 = vmatprep.mubr.msk.bf16.mxu0 %vm23983_vm9, %v23982_v43  ;;  %vm24016_vm9 = vmmov %vm24007_vm0  ;;  %v24032_v43 = vld [vmem:[#allocation45_spill] sm:$0xff] }
 0x726   : > { %16029 = vmatmul.mubr.msk.bf16.vlgmr.msra.gmra.mrb[36].mxu0 %vm23985_vm15, %v23984_v3  ;;  %vm24018_vm15 = vsmask.f32 6400  ;;  %v24036_v3 = vld [vmem:[#allocation62_spill] sm:$0xff] }
 0x727   : > { %16065 = vmatpush3.bf16.msra.mxu0 %v17403_v37  ;;  %16032 = vmatprep.mubr.msk.bf16.mxu0 %vm23987_vm7, %v23986_v48  ;;  %v23994_v37 = vld [vmem:[#allocation26_spill] sm:$0xff]  ;;  %v11028_v38 = vsel %vm24018_vm15, %v24017_v58, %v11027_v21  ;;  %vm24019_vm7 = vmmov %vm24007_vm0  ;;  %v24038_v48 = vld [vmem:[#allocation59_spill] sm:$0xff]  ;;  %v11781_v21 = vrot.slane %v21813_v7, 2  ;;  %v11787_v7 = vrot.slane %v21830_v23, 2 }
 0x728   : > { %16066 = vmatprep.subr.bf16.mxu0 %v17404_v16  ;;  %vm24048_vm15 = vmmov %vm24007_vm0 }
 0x72b   : > { %16067 = vmatpush3.bf16.msra.mxu0 %v17404_v16  ;;  %v24034_v16 = vld [vmem:[#allocation71_spill] sm:$0xff] }
 0x72c   : > { %16104 = vmatprep.subr.bf16.mxu0 %v17407_v24 }
 0x72e   : > { %16033 = vmatmul.mubr.msk.bf16.gmra.mrb[40].mxu0 %vm23989_vm13, %v23988_v57  ;;  %vm24021_vm13 = vmmov %vm24007_vm0  ;;  %v24041_v57 = vld [vmem:[#allocation47_spill] sm:$0xff] }
 0x72f   : > { %16036 = vmatprep.mubr.msk.bf16.mxu0 %vm23991_vm5, %v23990_v59  ;;  %vm24023_vm5 = vmmov %vm24007_vm0  ;;  %v24043_v59 = vld [vmem:[#allocation70_spill] sm:$0xff] }
 0x736   : > { %16037 = vmatmul.mubr.msk.bf16.gmra.mrb[44].mxu0 %vm23993_vm10, %v23992_v17  ;;  %vm24025_vm10 = vmmov %vm24007_vm0  ;;  %v24045_v17 = vld [vmem:[#allocation66_spill] sm:$0xff] }
 0x737   : > { %16040 = vmatprep.mubr.msk.bf16.mxu0 %vm23995_vm6, %v23994_v37  ;;  %vm24027_vm6 = vmmov %vm24007_vm0  ;;  %v24047_v37 = vld [vmem:[#allocation25_spill] sm:$0xff] }
 0x73e   : > { %16041 = vmatmul.mubr.msk.bf16.gmra.mrb[48].mxu0 %vm23997_vm12, %v23996_v19  ;;  %vm24029_vm12 = vmmov %vm24007_vm0  ;;  %v24049_v19 = vld [vmem:[#allocation15_spill] sm:$0xff] }
 0x73f   : > { %16044 = vmatprep.mubr.msk.bf16.mxu0 %vm23999_vm11, %v23998_v30  ;;  %vm24031_vm11 = vmmov %vm24007_vm0  ;;  %v24051_v30 = vld [vmem:[#allocation17_spill] sm:$0xff] }
 0x746   : > { %16045 = vmatmul.mubr.msk.bf16.gmra.mrb[52].mxu0 %vm24001_vm14, %v24000_v61  ;;  %vm24033_vm14 = vmmov %vm24007_vm0  ;;  %v11769_v61 = vrot.slane %v21785_v41, 2 }
 0x747   : > { %16048 = vmatprep.mubr.msk.bf16.mxu0 %vm24003_vm2, %v24002_v26  ;;  %vm24035_vm2 = vmmov %vm24007_vm0  ;;  %v24053_v26 = vld [vmem:[#allocation79_spill] sm:$0xff] }
 0x74e   : > { %16049 = vmatmul.mubr.msk.bf16.gmra.mrb[56].mxu0 %vm24005_vm8, %v24004_v32  ;;  %vm24037_vm8 = vmmov %vm24007_vm0  ;;  %v11768_v32 = vrot.slane %v24053_v26, 2  ;;  %v24108_v26 = vld [vmem:[#allocation89_spill] sm:$0xff] }
 0x74f   : > { %16052 = vmatprep.mubr.msk.bf16.mxu0 %vm24007_vm0, %v24006_v51  ;;  %v24054_v51 = vld [vmem:[#allocation55_spill] sm:$0xff] }
 0x756   : > { %16053 = vmatmul.mubr.msk.bf16.gmra.mrb[60].mxu0 %vm24009_vm4, %v24008_v60  ;;  %vm24040_vm4 = vmmov %vm24007_vm0 }
 0x757   : > { %16056 = vmatprep.mubr.msk.bf16.mxu0 %vm24011_vm3, %v24010_v53  ;;  %vm24042_vm3 = vmmov %vm24007_vm0  ;;  %v11771_v53 = vrot.slane %v21787_v35, 2  ;;  %v17430_v35 = vld [vmem:[%s22722_s3 + $0x80] sm:$0xff]  }
 0x75e   : > { %16057 = vmatmul.mubr.msk.bf16.gmra.mrb[64].mxu0 %vm24014_vm1, %v24013_v0  ;;  %vm24044_vm1 = vmmov %vm24007_vm0 }
 0x75f   : > { %16060 = vmatprep.mubr.msk.bf16.mxu0 %vm24016_vm9, %v24015_v34  ;;  %vm24046_vm9 = vmmov %vm24007_vm0  ;;  %v11779_v34 = vrot.slane %v21806_v27, 2 }
 0x766   : > { %16061 = vmatmul.mubr.msk.bf16.gmra.mrb[68].mxu0 %vm24019_vm7, %v11028_v38  ;;  %vm24050_vm7 = vmmov %vm24007_vm0  ;;  %v11785_v38 = vrot.slane %v21824_v55, 2  ;;  %v11791_v55 = vrot.slane %v21848_v39, 2 }
 0x767   : > { %16068 = vmatprep.mubr.msk.bf16.mxu0 %vm24021_vm13, %v24020_v63  ;;  %vm24052_vm13 = vmmov %vm24007_vm0 }
 0x76e   : > { %16069 = vmatmul.mubr.msk.bf16.vlgmr.msra.gmra.mrb[36].mxu0 %vm24023_vm5, %v24022_v47  ;;  %vm24055_vm5 = vmmov %vm24007_vm0 }
 0x76f   : > { %16105 = vmatpush3.bf16.msra.mxu0 %v17407_v24  ;;  %16072 = vmatprep.mubr.msk.bf16.mxu0 %vm24025_vm10, %v24024_v50  ;;  %v24039_v24 = vld [vmem:[#allocation52_spill] sm:$0xff]  ;;  %vm24056_vm10 = vcmask 1045504   ;;  %v11793_v50 = vrot.slane %v21854_v49, 2  ;;  %v11799_v49 = vrot.slane %v21877_v45, 2 }
 0x770   : > { %16106 = vmatprep.subr.bf16.mxu0 %v17408_v14  ;;  %v11770_v60 = vsel %vm24056_vm10, %v11768_v32, %v11769_v61  ;;  %v17431_v45 = vld [vmem:[%s22722_s3 + $0x88] sm:$0xff]   ;;  %v12255_v32 = vshrl.u32 %v21963_v46, 16 }
 0x773   : > { %16107 = vmatpush3.bf16.msra.mxu0 %v17408_v14  ;;  %v11789_v14 = vrot.slane %v21834_v2, 2  ;;  %v11795_v2 = vrot.slane %v21863_v15, 2 }
 0x774   : > { %16144 = vmatprep.subr.bf16.mxu0 %v17411_v18 }
 0x776   : > { %16073 = vmatmul.mubr.msk.bf16.gmra.mrb[40].mxu0 %vm24027_vm6, %v24026_v13  ;;  %vm24057_vm6 = vmmov %vm24007_vm0  ;;  %v11797_v13 = vrot.slane %v21870_v54, 2 }
 0x777   : > { %16076 = vmatprep.mubr.msk.bf16.mxu0 %vm24029_vm12, %v24028_v22  ;;  %vm24058_vm12 = vmmov %vm24056_vm10 }
 0x778   : > { %v11772_v1 = vsel %vm24058_vm12, %v11769_v61, %v11771_v53  ;;  %v24106_v61 = vld [vmem:[#allocation74_spill] sm:$0xff] }
 0x77e   : > { %16077 = vmatmul.mubr.msk.bf16.gmra.mrb[44].mxu0 %vm24031_vm11, %v24030_v5  ;;  %vm24059_vm11 = vmmov %vm24007_vm0  ;;  %v11801_v5 = vrot.slane %v21888_v62, 2  ;;  %v24091_v62 = vld [vmem:[#allocation72_spill] sm:$0xff] }
 0x77f   : > { %16080 = vmatprep.mubr.msk.bf16.mxu0 %vm24033_vm14, %v24032_v43  ;;  %vm24060_vm14 = vmmov %vm24056_vm10 }
 0x780   : > { %v11774_v41 = vsel %vm24060_vm14, %v11771_v53, %v11773_v10 }
 0x786   : > { %16081 = vmatmul.mubr.msk.bf16.gmra.mrb[48].mxu0 %vm24035_vm2, %v24034_v16  ;;  %vm24061_vm2 = vmmov %vm24007_vm0  ;;  %v17429_v16 = vld [vmem:[#allocation2 + $0xa0] ss:$0 sps:$4 sm:$0x33]  }
 0x787   : > { %16084 = vmatprep.mubr.msk.bf16.mxu0 %vm24037_vm8, %v24036_v3  ;;  %vm24062_vm8 = vmmov %vm24056_vm10  ;;  %v11803_v54 = vrot.slane %v17429_v16, 2 }
 0x788   : > { %v11776_v31 = vsel %vm24062_vm8, %v11773_v10, %v11775_v42  ;;  %v24123_v10 = vld [vmem:[#allocation61_spill] sm:$0xff] }
 0x78e   : > { %16085 = vmatmul.mubr.msk.bf16.gmra.mrb[52].mxu0 %vm24007_vm0, %v24038_v48  ;;  %v24089_v48 = vld [vmem:[#allocation80_spill] sm:$0xff] }
 0x78f   : > { %16088 = vmatprep.mubr.msk.bf16.mxu0 %vm24040_vm4, %v24039_v24  ;;  %vm24063_vm4 = vmmov %vm24062_vm8  ;;  %v24093_v24 = vld [vmem:[#allocation13_spill] sm:$0xff] }
 0x790   : > { %v11778_v0 = vsel %vm24063_vm4, %v11775_v42, %v11777_v11  ;;  %v24140_v42 = vld [vmem:[#allocation94_spill] sm:$0xff] }
 0x796   : > { %16089 = vmatmul.mubr.msk.bf16.gmra.mrb[56].mxu0 %vm24042_vm3, %v24041_v57  ;;  %vm24064_vm3 = vmmov %vm24007_vm0  ;;  %v24095_v57 = vld [vmem:[#allocation42_spill] sm:$0xff] }
 0x797   : > { %16092 = vmatprep.mubr.msk.bf16.mxu0 %vm24044_vm1, %v24043_v59  ;;  %vm24065_vm1 = vmmov %vm24063_vm4  ;;  %v24096_v59 = vld [vmem:[#allocation83_spill] sm:$0xff] }
 0x798   : > { %v11780_v58 = vsel %vm24065_vm1, %v11777_v11, %v11779_v34  ;;  %vm24071_vm10 = vmmov %vm24065_vm1  ;;  %v11796_v22 = vsel %vm24065_vm1, %v11793_v50, %v11795_v2  ;;  %v24142_v11 = vld [vmem:[#allocation81_spill] sm:$0xff] }
 0x799   : > { %v11786_v27 = vsel %vm24071_vm10, %v11783_v52, %v11785_v38  ;;  %vm24073_vm12 = vmmov %vm24065_vm1 }
 0x79a   : > { %v11788_v47 = vsel %vm24073_vm12, %v11785_v38, %v11787_v7  ;;  %vm24075_vm14 = vmmov %vm24065_vm1 }
 0x79b   : > { %v11790_v29 = vsel %vm24075_vm14, %v11787_v7, %v11789_v14  ;;  %vm24077_vm8 = vmmov %vm24065_vm1 }
 0x79c   : > { %vm24078_vm4 = vmmov %vm24065_vm1 }
 0x79d   : > { %v11794_v23 = vsel %vm24078_vm4, %v11791_v55, %v11793_v50  ;;  %vm24085_vm10 = vmmov %vm24065_vm1 }
 0x79e   : > { %16093 = vmatmul.mubr.msk.bf16.gmra.mrb[60].mxu0 %vm24046_vm9, %v24045_v17  ;;  %vm24066_vm9 = vmmov %vm24007_vm0  ;;  %v11802_v15 = vsel %vm24085_vm10, %v11799_v49, %v11801_v5  ;;  %v24098_v17 = vld [vmem:[#allocation84_spill] sm:$0xff] }
 0x79f   : > { %16096 = vmatprep.mubr.msk.bf16.mxu0 %vm24048_vm15, %v24047_v37  ;;  %vm24067_vm15 = vmmov %vm24065_vm1  ;;  %v24100_v37 = vld [vmem:[#allocation73_spill] sm:$0xff] }
 0x7a0   : > { %v11782_v12 = vsel %vm24067_vm15, %v11779_v34, %v11781_v21  ;;  %vm24081_vm15 = vmmov %vm24065_vm1  ;;  %v22354_v34 = vld [vmem:[%s22723_s4 + $0x5] ss:$0 sm:$0xff] }
 0x7a1   : > { %v11798_v39 = vsel %vm24081_vm15, %v11795_v2, %v11797_v13  ;;  %vm24087_vm12 = vmmov %vm24065_vm1 }
 0x7a2   : > { %v11804_v3 = vsel %vm24087_vm12, %v11801_v5, %v11803_v54  ;;  %vm24090_vm14 = vmmov %vm24007_vm0 }
 0x7a3   : > { %vm24097_vm4 = vmmov %vm24007_vm0 }
 0x7a4   : > { %vm24105_vm15 = vmmov %vm24007_vm0 }
 0x7a5   : > { %vm24111_vm10 = vmmov %vm24007_vm0 }
 0x7a6   : > { %16097 = vmatmul.mubr.msk.bf16.gmra.mrb[64].mxu0 %vm24050_vm7, %v24049_v19  ;;  %vm24068_vm7 = vmmov %vm24007_vm0  ;;  %v24102_v19 = vld [vmem:[#allocation87_spill] sm:$0xff] }
 0x7a7   : > { %16100 = vmatprep.mubr.msk.bf16.mxu0 %vm24052_vm13, %v24051_v30  ;;  %vm24069_vm13 = vmmov %vm24065_vm1  ;;  %v24104_v30 = vld [vmem:[#allocation88_spill] sm:$0xff] }
 0x7a8   : > { %v11784_v63 = vsel %vm24069_vm13, %v11781_v21, %v11783_v52  ;;  %vm24083_vm13 = vmmov %vm24065_vm1 }
 0x7a9   : > { %v11800_v43 = vsel %vm24083_vm13, %v11797_v13, %v11799_v49  ;;  %vm24101_vm1 = vmmov %vm24007_vm0 }
 0x7aa   : > { %vm24109_vm13 = vmmov %vm24007_vm0 }
 0x7ab   : > { %vm24113_vm12 = vmmov %vm24007_vm0 }
 0x7ae   : > { %16101 = vmatmul.mubr.msk.bf16.gmra.mrb[68].mxu0 %vm24055_vm5, %v24054_v51  ;;  %vm24070_vm5 = vmmov %vm24007_vm0  ;;  %v12258_v51 = vshll.u32 %v21963_v46, 16  ;;  %v24121_v46 = vld [vmem:[#allocation51_spill] sm:$0xff] }
 0x7af   : > { %16108 = vmatprep.mubr.msk.bf16.mxu0 %vm24057_vm6, %v11770_v60  ;;  %vm24072_vm6 = vmmov %vm24007_vm0  ;;  %v12257_v60 = vrot.slane %v12255_v32, 2 }
 0x7b0   : > { %v12260_v53 = vrot.slane %v12258_v51, 3 }
 0x7b6   : > { %16109 = vmatmul.mubr.msk.bf16.vlgmr.msra.gmra.mrb[36].mxu0 %vm24059_vm11, %v11772_v1  ;;  %vm24074_vm11 = vmmov %vm24007_vm0  ;;  %v24134_v1 = vld [vmem:[#allocation77_spill] sm:$0xff] }
 0x7b7   : > { %16145 = vmatpush3.bf16.msra.mxu0 %v17411_v18  ;;  %16112 = vmatprep.mubr.msk.bf16.mxu0 %vm24061_vm2, %v11774_v41  ;;  %vm24076_vm2 = vmmov %vm24007_vm0  ;;  %v11792_v18 = vsel %vm24077_vm8, %v11789_v14, %v11791_v55  ;;  %v24136_v41 = vld [vmem:[#allocation53_spill] sm:$0xff] }
 0x7b8   : > { %16146 = vmatprep.subr.bf16.mxu0 %v17422_v6  ;;  %vm24094_vm8 = vmmov %vm24007_vm0 }
 0x7bb   : > { %16147 = vmatpush3.bf16.msra.mxu0 %v17422_v6  ;;  %v24132_v6 = vld [vmem:[#allocation92_spill] sm:$0xff] }
 0x7bc   : > { %16184 = vmatprep.subr.bf16.mxu0 %v17430_v35 }
 0x7be   : > { %16113 = vmatmul.mubr.msk.bf16.gmra.mrb[40].mxu0 %vm24007_vm0, %v11776_v31  ;;  %v22349_v31 = vld [vmem:[%s22723_s4 + $0x4] ss:$0 sm:$0xff] }
 0x7bf   : > { %16116 = vmatprep.mubr.msk.bf16.mxu0 %vm24064_vm3, %v11778_v0  ;;  %vm24079_vm3 = vmmov %vm24007_vm0 }
 0x7c6   : > { %16117 = vmatmul.mubr.msk.bf16.gmra.mrb[44].mxu0 %vm24066_vm9, %v11780_v58  ;;  %vm24080_vm9 = vmmov %vm24007_vm0 }
 0x7c7   : > { %16120 = vmatprep.mubr.msk.bf16.mxu0 %vm24068_vm7, %v11782_v12  ;;  %vm24082_vm7 = vmmov %vm24007_vm0 }
 0x7ce   : > { %16121 = vmatmul.mubr.msk.bf16.gmra.mrb[48].mxu0 %vm24070_vm5, %v11784_v63  ;;  %vm24084_vm5 = vmmov %vm24007_vm0 }
 0x7cf   : > { %16124 = vmatprep.mubr.msk.bf16.mxu0 %vm24072_vm6, %v11786_v27  ;;  %vm24086_vm6 = vmmov %vm24007_vm0 }
 0x7d6   : > { %16125 = vmatmul.mubr.msk.bf16.gmra.mrb[52].mxu0 %vm24074_vm11, %v11788_v47  ;;  %vm24088_vm11 = vmmov %vm24007_vm0 }
 0x7d7   : > { %16128 = vmatprep.mubr.msk.bf16.mxu0 %vm24076_vm2, %v11790_v29  ;;  %vm24092_vm2 = vmmov %vm24007_vm0 }
 0x7de   : > { %16129 = vmatmul.mubr.msk.bf16.gmra.mrb[56].mxu0 %vm24007_vm0, %v11792_v18 }
 0x7df   : > { %16132 = vmatprep.mubr.msk.bf16.mxu0 %vm24079_vm3, %v11794_v23  ;;  %vm24099_vm3 = vmmov %vm24007_vm0 }
 0x7e6   : > { %16133 = vmatmul.mubr.msk.bf16.gmra.mrb[60].mxu0 %vm24080_vm9, %v11796_v22  ;;  %vm24103_vm9 = vmmov %vm24007_vm0 }
 0x7e7   : > { %16136 = vmatprep.mubr.msk.bf16.mxu0 %vm24082_vm7, %v11798_v39  ;;  %vm24107_vm7 = vmmov %vm24007_vm0 }
 0x7ee   : > { %16137 = vmatmul.mubr.msk.bf16.gmra.mrb[64].mxu0 %vm24084_vm5, %v11800_v43  ;;  %vm24110_vm5 = vmmov %vm24007_vm0 }
 0x7ef   : > { %16140 = vmatprep.mubr.msk.bf16.mxu0 %vm24086_vm6, %v11802_v15  ;;  %vm24112_vm6 = vmmov %vm24007_vm0 }
 0x7f6   : > { %16141 = vmatmul.mubr.msk.bf16.gmra.mrb[68].mxu0 %vm24088_vm11, %v11804_v3  ;;  %vm24114_vm11 = vmmov %vm24007_vm0 }
 0x7f7   : > { %16148 = vmatprep.mubr.msk.bf16.mxu0 %vm24090_vm14, %v24089_v48  ;;  %vm24115_vm14 = vmmov %vm24007_vm0 }
 0x7fe   : > { %16149 = vmatmul.mubr.msk.bf16.vlgmr.msra.gmra.mrb[36].mxu0 %vm24092_vm2, %v24091_v62  ;;  %vm24116_vm2 = vsmask.f32 5376 }
 0x7ff   : > { %16185 = vmatpush3.bf16.msra.mxu0 %v17430_v35  ;;  %16152 = vmatprep.mubr.msk.bf16.mxu0 %vm24094_vm8, %v24093_v24  ;;  %vm24117_vm8 = vmmov %vm24007_vm0  ;;  %v24138_v35 = vld [vmem:[#allocation93_spill] sm:$0xff] }
 0x800   : > { %16186 = vmatprep.subr.bf16.mxu0 %v17431_v45 }
 0x803   : > { %16187 = vmatpush3.bf16.msra.mxu0 %v17431_v45 }
 0x806   : > { %16153 = vmatmul.mubr.msk.bf16.gmra.mrb[40].mxu0 %vm24007_vm0, %v24095_v57 }
 0x807   : > { %16156 = vmatprep.mubr.msk.bf16.mxu0 %vm24097_vm4, %v24096_v59  ;;  %vm24120_vm4 = vmmov %vm24007_vm0 }
 0x80e   : > { %16157 = vmatmul.mubr.msk.bf16.gmra.mrb[44].mxu0 %vm24099_vm3, %v24098_v17  ;;  %vm24122_vm3 = vmmov %vm24007_vm0 }
 0x80f   : > { %16160 = vmatprep.mubr.msk.bf16.mxu0 %vm24101_vm1, %v24100_v37  ;;  %vm24124_vm1 = vmmov %vm24007_vm0 }
 0x816   : > { %16161 = vmatmul.mubr.msk.bf16.gmra.mrb[48].mxu0 %vm24103_vm9, %v24102_v19  ;;  %vm24126_vm9 = vmmov %vm24007_vm0 }
 0x817   : > { %16164 = vmatprep.mubr.msk.bf16.mxu0 %vm24105_vm15, %v24104_v30  ;;  %vm24128_vm15 = vmmov %vm24007_vm0 }
 0x81e   : > { %16165 = vmatmul.mubr.msk.bf16.gmra.mrb[52].mxu0 %vm24107_vm7, %v24106_v61  ;;  %vm24129_vm7 = vmmov %vm24007_vm0 }
 0x81f   : > { %16168 = vmatprep.mubr.msk.bf16.mxu0 %vm24109_vm13, %v24108_v26  ;;  %vm24131_vm13 = vmmov %vm24007_vm0 }
 0x826   : > { %16169 = vmatmul.mubr.msk.bf16.gmra.mrb[56].mxu0 %vm24110_vm5, %v21901_v44  ;;  %v12261_v44 = vor.u32 %v12260_v53, %v12257_v60  ;;  %vm24133_vm5 = vmmov %vm24007_vm0 }
 0x827   : > { %16172 = vmatprep.mubr.msk.bf16.mxu0 %vm24111_vm10, %v21905_v36  ;;  %vm24135_vm10 = vmmov %vm24007_vm0 }
 0x828   : > { %v12262_v36 = vsel %vm24116_vm2, %v21929_v56, %v12261_v44  ;;  %v24130_v56 = vld [vmem:[#allocation91_spill] sm:$0xff]  ;;  %vm24144_vm2 = vmmov %vm24007_vm0 }
 0x82e   : > { %16173 = vmatmul.mubr.msk.bf16.gmra.mrb[60].mxu0 %vm24112_vm6, %v21911_v40  ;;  %v24118_v40 = vld [vmem:[#allocation90_spill] sm:$0xff]  ;;  %vm24137_vm6 = vmmov %vm24007_vm0 }
 0x82f   : > { %16176 = vmatprep.mubr.msk.bf16.mxu0 %vm24113_vm12, %v21921_v9  ;;  %v24119_v9 = vld [vmem:[#allocation75_spill] sm:$0xff]  ;;  %vm24139_vm12 = vmmov %vm24007_vm0 }
 0x836   : > { %16177 = vmatmul.mubr.msk.bf16.gmra.mrb[64].mxu0 %vm24114_vm11, %v21927_v8  ;;  %v24125_v8 = vld [vmem:[#allocation28_spill] sm:$0xff]  ;;  %vm24141_vm11 = vmmov %vm24007_vm0 }
 0x837   : > { %16180 = vmatprep.mubr.msk.bf16.mxu0 %vm24115_vm14, %v21945_v20  ;;  %v24127_v20 = vld [vmem:[#allocation97_spill] sm:$0xff]  ;;  %vm24143_vm14 = vmmov %vm24007_vm0 }
 0x83e   : > { %16181 = vmatmul.mubr.msk.bf16.gmra.mrb[68].mxu0 %vm24117_vm8, %v12262_v36  ;;  %vm24146_vm8 = vmmov %vm24007_vm0 }
 0x83f   : > { %16188 = vmatprep.mubr.msk.bf16.mxu0 %vm24007_vm0, %v24118_v40 }
 0x846   : > { %16189 = vmatmul.mubr.msk.bf16.vlgmr.msra.gmra.mrb[36].mxu0 %vm24120_vm4, %v24119_v9  ;;  %vm24147_vm4 = vmmov %vm24007_vm0 }
 0x847   : > { %16192 = vmatprep.mubr.msk.bf16.mxu0 %vm24122_vm3, %v24121_v46  ;;  %vm12989_vm3 = vcmask 261122  }
 0x84e   : > { %16193 = vmatmul.mubr.msk.bf16.gmra.mrb[40].mxu0 %vm24124_vm1, %v24123_v10  ;;  %vm24148_vm1 = vmmov %vm24007_vm0 }
 0x84f   : > { %16196 = vmatprep.mubr.msk.bf16.mxu0 %vm24126_vm9, %v24125_v8  ;;  %vm24149_vm9 = vmmov %vm24007_vm0 }
 0x856   : > { %16197 = vmatmul.mubr.msk.bf16.gmra.mrb[44].mxu0 %vm24128_vm15, %v24127_v20  ;;  %vm24150_vm15 = vmmov %vm24007_vm0 }
 0x857   : > { %16200 = vmatprep.mubr.msk.bf16.mxu0 %vm24129_vm7, %v21972_v28  ;;  %v24145_v28 = vld [vmem:[#allocation96_spill] sm:$0xff]  ;;  %vm13000_vm7 = vcmask 261126  }
 0x85e   : > { %16201 = vmatmul.mubr.msk.bf16.gmra.mrb[48].mxu0 %vm24131_vm13, %v24130_v56  ;;  %vm13098_vm13 = vcmask 253952  }
 0x85f   : > { %16204 = vmatprep.mubr.msk.bf16.mxu0 %vm24133_vm5, %v24132_v6  ;;  %vm24151_vm5 = vcmask 257024  }
 0x866   : > { %16205 = vmatmul.mubr.msk.bf16.gmra.mrb[52].mxu0 %vm24135_vm10, %v24134_v1  ;;  %vm12995_vm10 = vcmask 261124  }
 0x867   : > { %16208 = vmatprep.mubr.msk.bf16.mxu0 %vm24137_vm6, %v24136_v41  ;;  %vm24152_vm6 = vcmask 254976  }
 0x86e   : > { %16209 = vmatmul.mubr.msk.bf16.gmra.mrb[56].mxu0 %vm24139_vm12, %v24138_v35  ;;  %vm24153_vm12 = vmmov %vm24007_vm0 }
 0x86f   : > { %16212 = vmatprep.mubr.msk.bf16.mxu0 %vm24141_vm11, %v24140_v42  ;;  %vm24154_vm11 = vmmov %vm24007_vm0 }
 0x876   : > { %16213 = vmatmul.mubr.msk.bf16.gmra.mrb[60].mxu0 %vm24143_vm14, %v24142_v11  ;;  %vm13003_vm14 = vcmask 259072  }
 0x877   : > { %16216 = vmatprep.mubr.msk.bf16.mxu0 %vm24144_vm2, %v22011_v4  ;;  %vm24155_vm2 = vmmov %vm24007_vm0 }
 0x87e   : > { %16217 = vmatmul.mubr.msk.bf16.gmra.mrb[64].mxu0 %vm24146_vm8, %v24145_v28  ;;  %vm24156_vm8 = vmmov %vm24007_vm0 }
 0x87f   : > { %16220 = vmatprep.mubr.msk.bf16.mxu0 %vm24007_vm0, %v22017_v33 }
 0x886   : > { %16221 = vmatmul.mubr.msk.bf16.gmra.mrb[68].mxu0 %vm24147_vm4, %v22020_v25  ;;  %vm24157_vm4 = vmmov %vm24007_vm0 }
 0x919   : > { %v16190_v0 = vpop.f32.mrb[36].mxu0 }
 0x91a   : > { %v12875_v4 = vmul.f32 %v16190_v0, %v22349_v31  ;;  %v12688_v21 = vpop.f32.mrb[37].mxu0 }
 0x91b   : > { %v12873_v58 = vmul.f32 %v22349_v31, %v12688_v21  ;;  %v16191_v33 = vpop.f32.mrb[38].mxu0 }
 0x91c   : > { %v12916_v12 = vadd.f32 %v22354_v34, %v12875_v4  ;;  %v12876_v25 = vmul.f32 %v16191_v33, %v22349_v31  ;;  %v12691_v52 = vpop.f32.mrb[39].mxu0 }
 0x91d   : > { %v12914_v38 = vadd.f32 %v22354_v34, %v12873_v58  ;;  %v12874_v63 = vmul.f32 %v22349_v31, %v12691_v52 }
 0x91e   : > { %v12952_v27 = vmax.f32 %v12916_v12, 0.0  ;;  %v12917_v7 = vadd.f32 %v22354_v34, %v12876_v25 }
 0x91f   : > { %v12950_v14 = vmax.f32 %v12914_v38, 0.0  ;;  %v12915_v47 = vadd.f32 %v22354_v34, %v12874_v63 }
 0x920   : > { %12990 = vst.msk [vmem:[#allocation3 + $0xe] sm:$0xfc] %vm12989_vm3, %v12952_v27  ;;  %v12953_v29 = vmax.f32 %v12917_v7, 0.0 }
 0x921   : > { %12986 = vst.msk [vmem:[#allocation3] sm:$0xff] %vm24148_vm1, %v12950_v14  ;;  %v12951_v55 = vmax.f32 %v12915_v47, 0.0  ;;  %v16194_v50 = vpop.f32.mrb[40].mxu0  ;;  %vm24158_vm1 = vmmov %vm24151_vm5 }
 0x922   : > { %12991 = vst.msk [vmem:[#allocation3 + $0x16] sm:$0xff] %vm24149_vm9, %v12953_v29  ;;  %v12879_v18 = vmul.f32 %v16194_v50, %v22349_v31  ;;  %v12704_v23 = vpop.f32.mrb[41].mxu0  ;;  %vm24159_vm9 = vmmov %vm24152_vm6 }
 0x923   : > { %12987 = vst.msk [vmem:[#allocation3 + $0x8] sm:$0xff] %vm24150_vm15, %v12951_v55  ;;  %v16195_v2 = vpop.f32.mrb[42].mxu0  ;;  %v12877_v60 = vmul.f32 %v22349_v31, %v12704_v23  ;;  %vm24160_vm15 = vmmov %vm24007_vm0 }
 0x924   : > { %v12920_v13 = vadd.f32 %v22354_v34, %v12879_v18  ;;  %v12707_v22 = vpop.f32.mrb[43].mxu0  ;;  %v12880_v53 = vmul.f32 %v16195_v2, %v22349_v31 }
 0x925   : > { %v12878_v46 = vmul.f32 %v22349_v31, %v12707_v22  ;;  %v12918_v58 = vadd.f32 %v22354_v34, %v12877_v60 }
 0x926   : > { %v12956_v39 = vmax.f32 %v12920_v13, 0.0  ;;  %v12921_v33 = vadd.f32 %v22354_v34, %v12880_v53 }
 0x927   : > { %v13051_v49 = vld [vmem:[#allocation3 + $0x10] sm:$0x1]  ;;  %v13067_v5 = vld [vmem:[#allocation3 + $0x11] sm:$0x1]  ;;  %v13116_v43 = vld [vmem:[#allocation3 + $0x12] sm:$0x1]  ;;  %v12919_v63 = vadd.f32 %v22354_v34, %v12878_v46 }
 0x928   : > { %v13083_v16 = vmax.f32 %v13051_v49, %v13067_v5  ;;  %v13132_v15 = vld [vmem:[#allocation3 + $0x13] sm:$0x1]  ;;  %v13180_v54 = vld [vmem:[#allocation3 + $0x14] sm:$0x1]  ;;  %v13196_v3 = vld [vmem:[#allocation3 + $0x15] sm:$0x1] }
 0x929   : > { %12998 = vst.msk [vmem:[#allocation3 + $0x2c] sm:$0xf] %vm24151_vm5, %v12956_v39  ;;  %v13148_v48 = vmax.f32 %v13116_v43, %v13132_v15  ;;  %v13212_v45 = vmax.f32 %v13180_v54, %v13196_v3  ;;  %v13050_v62 = vld [vmem:[#allocation3] sm:$0x1]  ;;  %v13066_v24 = vld [vmem:[#allocation3 + $0x1] sm:$0x1]  ;;  %vm24161_vm5 = vmmov %vm24007_vm0 }
 0x92a   : > { %13001 = vst.msk [vmem:[#allocation3 + $0x2a] sm:$0xc0] %vm13000_vm7, %v12956_v39  ;;  %v13115_v57 = vld [vmem:[#allocation3 + $0x2] sm:$0x1]  ;;  %v13082_v59 = vmax.f32 %v13050_v62, %v13066_v24  ;;  %v13131_v17 = vld [vmem:[#allocation3 + $0x3] sm:$0x1] }
 0x92b   : > { %13100 = vst.msk [vmem:[#allocation3 + $0x10] sm:$0x1] %vm13098_vm13, %v13083_v16  ;;  %v13179_v37 = vld [vmem:[#allocation3 + $0x4] sm:$0x1]  ;;  %v13195_v19 = vld [vmem:[#allocation3 + $0x5] sm:$0x1]  ;;  %v13147_v30 = vmax.f32 %v13115_v57, %v13131_v17 }
 0x92c   : > { %13164 = vst.msk [vmem:[#allocation3 + $0x11] sm:$0x1] %vm13098_vm13, %v13148_v48  ;;  %13228 = vst.msk [vmem:[#allocation3 + $0x12] sm:$0x1] %vm13098_vm13, %v13212_v45  ;;  %v13211_v61 = vmax.f32 %v13179_v37, %v13195_v19  ;;  %v13243_v26 = vld [vmem:[#allocation3 + $0x6] sm:$0x1] }
 0x92d   : > { %v13259_v32 = vld [vmem:[#allocation3 + $0x7] sm:$0x1]  ;;  %v13244_v51 = vld [vmem:[#allocation3 + $0x16] sm:$0x1]  ;;  %13099 = vst.msk [vmem:[#allocation3] sm:$0x1] %vm13098_vm13, %v13082_v59 }
 0x92e   : > { %v13275_v44 = vmax.f32 %v13243_v26, %v13259_v32  ;;  %v13260_v36 = vld [vmem:[#allocation3 + $0x17] sm:$0x1]  ;;  %v13308_v40 = vld [vmem:[#allocation3 + $0x18] sm:$0x1]  ;;  %v13324_v9 = vld [vmem:[#allocation3 + $0x19] sm:$0x1] }
 0x92f   : > { %13163 = vst.msk [vmem:[#allocation3 + $0x1] sm:$0x1] %vm13098_vm13, %v13147_v30  ;;  %13227 = vst.msk [vmem:[#allocation3 + $0x2] sm:$0x1] %vm13098_vm13, %v13211_v61  ;;  %v13276_v10 = vmax.f32 %v13244_v51, %v13260_v36  ;;  %v13340_v8 = vmax.f32 %v13308_v40, %v13324_v9  ;;  %v13372_v20 = vld [vmem:[#allocation3 + $0x1a] sm:$0x1] }
 0x930   : > { %v13388_v56 = vld [vmem:[#allocation3 + $0x1b] sm:$0x1]  ;;  %v13436_v6 = vld [vmem:[#allocation3 + $0x1c] sm:$0x1]  ;;  %13291 = vst.msk [vmem:[#allocation3 + $0x3] sm:$0x1] %vm13098_vm13, %v13275_v44 }
 0x931   : > { %v13404_v1 = vmax.f32 %v13372_v20, %v13388_v56  ;;  %v13452_v41 = vld [vmem:[#allocation3 + $0x1d] sm:$0x1]  ;;  %v13307_v35 = vld [vmem:[#allocation3 + $0x8] sm:$0x1]  ;;  %v13323_v42 = vld [vmem:[#allocation3 + $0x9] sm:$0x1] }
 0x932   : > { %13292 = vst.msk [vmem:[#allocation3 + $0x13] sm:$0x1] %vm13098_vm13, %v13276_v10  ;;  %13356 = vst.msk [vmem:[#allocation3 + $0x14] sm:$0x1] %vm13098_vm13, %v13340_v8  ;;  %v13468_v11 = vmax.f32 %v13436_v6, %v13452_v41  ;;  %v13339_v28 = vmax.f32 %v13307_v35, %v13323_v42  ;;  %v13371_v0 = vld [vmem:[#allocation3 + $0xa] sm:$0x1] }
 0x933   : > { %v13387_v4 = vld [vmem:[#allocation3 + $0xb] sm:$0x1]  ;;  %v13435_v21 = vld [vmem:[#allocation3 + $0xc] sm:$0x1]  ;;  %13420 = vst.msk [vmem:[#allocation3 + $0x15] sm:$0x1] %vm13098_vm13, %v13404_v1 }
 0x934   : > { %v13403_v12 = vmax.f32 %v13371_v0, %v13387_v4  ;;  %v13451_v25 = vld [vmem:[#allocation3 + $0xd] sm:$0x1]  ;;  %v13499_v52 = vld [vmem:[#allocation3 + $0xe] sm:$0x1]  ;;  %v13515_v38 = vld [vmem:[#allocation3 + $0xf] sm:$0x1] }
 0x935   : > { %13484 = vst.msk [vmem:[#allocation3 + $0x16] sm:$0x1] %vm13098_vm13, %v13468_v11  ;;  %13355 = vst.msk [vmem:[#allocation3 + $0x4] sm:$0x1] %vm13098_vm13, %v13339_v28  ;;  %v13467_v27 = vmax.f32 %v13435_v21, %v13451_v25  ;;  %v13531_v7 = vmax.f32 %v13499_v52, %v13515_v38  ;;  %v13053_v14 = vld [vmem:[#allocation3 + $0x30] sm:$0x1] }
 0x936   : > { %v13069_v47 = vld [vmem:[#allocation3 + $0x31] sm:$0x1]  ;;  %13419 = vst.msk [vmem:[#allocation3 + $0x5] sm:$0x1] %vm13098_vm13, %v13403_v12  ;;  %v12954_v55 = vmax.f32 %v12918_v58, 0.0  ;;  %v12957_v50 = vmax.f32 %v12921_v33, 0.0 }
 0x937   : > { %v13085_v29 = vmax.f32 %v13053_v14, %v13069_v47  ;;  %13483 = vst.msk [vmem:[#allocation3 + $0x6] sm:$0x1] %vm13098_vm13, %v13467_v27  ;;  %13547 = vst.msk [vmem:[#allocation3 + $0x7] sm:$0x1] %vm13098_vm13, %v13531_v7  ;;  %v16198_v18 = vpop.f32.mrb[44].mxu0  ;;  %v12955_v23 = vmax.f32 %v12919_v63, 0.0 }
 0x938   : > { %v12883_v2 = vmul.f32 %v16198_v18, %v22349_v31  ;;  %v12720_v13 = vpop.f32.mrb[45].mxu0  ;;  %12993 = vst.msk [vmem:[#allocation3 + $0x1e] sm:$0x3] %vm24152_vm6, %v12954_v55  ;;  %v13437_v62 = vld [vmem:[#allocation3 + $0x2c] sm:$0x1]  ;;  %vm24162_vm6 = vmmov %vm24007_vm0 }
 0x939   : > { %13102 = vst.msk [vmem:[#allocation3 + $0x30] sm:$0x1] %vm13098_vm13, %v13085_v29  ;;  %v12881_v22 = vmul.f32 %v22349_v31, %v12720_v13  ;;  %v16199_v39 = vpop.f32.mrb[46].mxu0  ;;  %v13453_v17 = vld [vmem:[#allocation3 + $0x2d] sm:$0x1] }
 0x93a   : > { %12996 = vst.msk [vmem:[#allocation3 + $0x1c] sm:$0xf0] %vm12995_vm10, %v12954_v55  ;;  %v12924_v49 = vadd.f32 %v22354_v34, %v12883_v2  ;;  %v12884_v5 = vmul.f32 %v16199_v39, %v22349_v31  ;;  %v12723_v43 = vpop.f32.mrb[47].mxu0  ;;  %v13501_v37 = vld [vmem:[#allocation3 + $0x2e] sm:$0x1]  ;;  %v13469_v46 = vmax.f32 %v13437_v62, %v13453_v17 }
 0x93b   : > { %13002 = vst.msk [vmem:[#allocation3 + $0x32] sm:$0xff] %vm24153_vm12, %v12957_v50  ;;  %v12922_v16 = vadd.f32 %v22354_v34, %v12881_v22  ;;  %v12882_v15 = vmul.f32 %v22349_v31, %v12723_v43  ;;  %v16202_v54 = vpop.f32.mrb[48].mxu0  ;;  %v13517_v61 = vld [vmem:[#allocation3 + $0x2f] sm:$0x1]  ;;  %vm24163_vm12 = vmmov %vm24007_vm0 }
 0x93c   : > { %12997 = vst.msk [vmem:[#allocation3 + $0x24] sm:$0xff] %vm24154_vm11, %v12955_v23  ;;  %v12960_v3 = vmax.f32 %v12924_v49, 0.0  ;;  %v12925_v48 = vadd.f32 %v22354_v34, %v12884_v5  ;;  %v22406_v45 = vpop.f32.mrb[49].mxu0  ;;  %v13533_v10 = vmax.f32 %v13501_v37, %v13517_v61  ;;  %v12887_v47 = vmul.f32 %v16202_v54, %v22349_v31  ;;  %vm24164_vm11 = vmmov %vm24007_vm0 }
 0x93d   : > { %v12958_v24 = vmax.f32 %v12922_v16, 0.0  ;;  %v12923_v57 = vadd.f32 %v22354_v34, %v12882_v15  ;;  %v16203_v59 = vpop.f32.mrb[50].mxu0  ;;  %v12885_v23 = vmul.f32 %v22349_v31, %v22406_v45 }
 0x93e   : > { %13007 = vst.msk [vmem:[#allocation3 + $0x48] sm:$0xff] %vm24155_vm2, %v12960_v3  ;;  %v12961_v19 = vmax.f32 %v12925_v48, 0.0  ;;  %v12739_v30 = vpop.f32.mrb[51].mxu0  ;;  %v12888_v2 = vmul.f32 %v16203_v59, %v22349_v31  ;;  %v12928_v62 = vadd.f32 %v22354_v34, %v12887_v47  ;;  %vm24165_vm2 = vmmov %vm24159_vm9 }
 0x93f   : > { %13004 = vst.msk [vmem:[#allocation3 + $0x3a] sm:$0x3f] %vm13003_vm14, %v12958_v24  ;;  %v12959_v26 = vmax.f32 %v12923_v57, 0.0  ;;  %v16206_v32 = vpop.f32.mrb[52].mxu0  ;;  %v13500_v40 = vld [vmem:[#allocation3 + $0x1e] sm:$0x1]  ;;  %v12886_v13 = vmul.f32 %v22349_v31, %v12739_v30  ;;  %v12926_v37 = vadd.f32 %v22354_v34, %v12885_v23 }
 0x940   : > { %13009 = vst.msk [vmem:[#allocation3 + $0x4e] sm:$0xfc] %vm12989_vm3, %v12961_v19  ;;  %v13516_v9 = vld [vmem:[#allocation3 + $0x1f] sm:$0x1]  ;;  %v12891_v54 = vmul.f32 %v16206_v32, %v22349_v31  ;;  %v12929_v19 = vadd.f32 %v22354_v34, %v12888_v2 }
 0x941   : > { %v13052_v51 = vld [vmem:[#allocation3 + $0x20] sm:$0x1]  ;;  %v13068_v60 = vld [vmem:[#allocation3 + $0x21] sm:$0x1]  ;;  %v13117_v53 = vld [vmem:[#allocation3 + $0x22] sm:$0x1]  ;;  %v13532_v20 = vmax.f32 %v13500_v40, %v13516_v9  ;;  %v12927_v30 = vadd.f32 %v22354_v34, %v12886_v13 }
 0x942   : > { %v13084_v44 = vmax.f32 %v13052_v51, %v13068_v60  ;;  %v13133_v36 = vld [vmem:[#allocation3 + $0x23] sm:$0x1]  ;;  %13006 = vst.msk [vmem:[#allocation3 + $0x40] sm:$0xff] %vm24156_vm8, %v12959_v26  ;;  %v13118_v56 = vld [vmem:[#allocation3 + $0x32] sm:$0x1]  ;;  %vm24166_vm8 = vmmov %vm24007_vm0 }
 0x943   : > { %v13149_v8 = vmax.f32 %v13117_v53, %v13133_v36  ;;  %v13134_v6 = vld [vmem:[#allocation3 + $0x33] sm:$0x1]  ;;  %v13182_v1 = vld [vmem:[#allocation3 + $0x34] sm:$0x1]  ;;  %v13198_v35 = vld [vmem:[#allocation3 + $0x35] sm:$0x1] }
 0x944   : > { %13101 = vst.msk [vmem:[#allocation3 + $0x20] sm:$0x1] %vm13098_vm13, %v13084_v44  ;;  %v13150_v41 = vmax.f32 %v13118_v56, %v13134_v6  ;;  %v13246_v42 = vld [vmem:[#allocation3 + $0x36] sm:$0x1]  ;;  %v13262_v11 = vld [vmem:[#allocation3 + $0x37] sm:$0x1]  ;;  %v13214_v28 = vmax.f32 %v13182_v1, %v13198_v35 }
 0x945   : > { %13165 = vst.msk [vmem:[#allocation3 + $0x21] sm:$0x1] %vm13098_vm13, %v13149_v8  ;;  %13548 = vst.msk [vmem:[#allocation3 + $0x17] sm:$0x1] %vm13098_vm13, %v13532_v20  ;;  %v13278_v0 = vmax.f32 %v13246_v42, %v13262_v11  ;;  %v13310_v4 = vld [vmem:[#allocation3 + $0x38] sm:$0x1]  ;;  %v12932_v20 = vadd.f32 %v22354_v34, %v12891_v54 }
 0x946   : > { %v13326_v21 = vld [vmem:[#allocation3 + $0x39] sm:$0x1]  ;;  %v13181_v58 = vld [vmem:[#allocation3 + $0x24] sm:$0x1]  ;;  %13166 = vst.msk [vmem:[#allocation3 + $0x31] sm:$0x1] %vm13098_vm13, %v13150_v41 }
 0x947   : > { %v13342_v33 = vmax.f32 %v13310_v4, %v13326_v21  ;;  %v13197_v12 = vld [vmem:[#allocation3 + $0x25] sm:$0x1]  ;;  %v13245_v25 = vld [vmem:[#allocation3 + $0x26] sm:$0x1]  ;;  %v13261_v52 = vld [vmem:[#allocation3 + $0x27] sm:$0x1] }
 0x948   : > { %13230 = vst.msk [vmem:[#allocation3 + $0x32] sm:$0x1] %vm13098_vm13, %v13214_v28  ;;  %13294 = vst.msk [vmem:[#allocation3 + $0x33] sm:$0x1] %vm13098_vm13, %v13278_v0  ;;  %v13213_v38 = vmax.f32 %v13181_v58, %v13197_v12  ;;  %v13277_v63 = vmax.f32 %v13245_v25, %v13261_v52  ;;  %v13309_v27 = vld [vmem:[#allocation3 + $0x28] sm:$0x1] }
 0x949   : > { %v13325_v7 = vld [vmem:[#allocation3 + $0x29] sm:$0x1]  ;;  %v13373_v14 = vld [vmem:[#allocation3 + $0x2a] sm:$0x1]  ;;  %13485 = vst.msk [vmem:[#allocation3 + $0x26] sm:$0x1] %vm13098_vm13, %v13469_v46 }
 0x94a   : > { %13549 = vst.msk [vmem:[#allocation3 + $0x27] sm:$0x1] %vm13098_vm13, %v13533_v10  ;;  %13358 = vst.msk [vmem:[#allocation3 + $0x34] sm:$0x1] %vm13098_vm13, %v13342_v33  ;;  %v13341_v29 = vmax.f32 %v13309_v27, %v13325_v7  ;;  %v13389_v55 = vld [vmem:[#allocation3 + $0x2b] sm:$0x1] }
 0x94b   : > { %v13311_v50 = vld [vmem:[#allocation3 + $0x48] sm:$0x1]  ;;  %v13327_v18 = vld [vmem:[#allocation3 + $0x49] sm:$0x1]  ;;  %13229 = vst.msk [vmem:[#allocation3 + $0x22] sm:$0x1] %vm13098_vm13, %v13213_v38  ;;  %v13405_v22 = vmax.f32 %v13373_v14, %v13389_v55 }
 0x94c   : > { %13293 = vst.msk [vmem:[#allocation3 + $0x23] sm:$0x1] %vm13098_vm13, %v13277_v63  ;;  %v13375_v39 = vld [vmem:[#allocation3 + $0x4a] sm:$0x1]  ;;  %v13391_v49 = vld [vmem:[#allocation3 + $0x4b] sm:$0x1]  ;;  %v13343_v61 = vmax.f32 %v13311_v50, %v13327_v18 }
 0x94d   : > { %v13439_v5 = vld [vmem:[#allocation3 + $0x4c] sm:$0x1]  ;;  %13357 = vst.msk [vmem:[#allocation3 + $0x24] sm:$0x1] %vm13098_vm13, %v13341_v29  ;;  %v13455_v43 = vld [vmem:[#allocation3 + $0x4d] sm:$0x1]  ;;  %v13407_v26 = vmax.f32 %v13375_v39, %v13391_v49 }
 0x94e   : > { %v13503_v16 = vld [vmem:[#allocation3 + $0x4e] sm:$0x1]  ;;  %v13519_v15 = vld [vmem:[#allocation3 + $0x4f] sm:$0x1]  ;;  %13421 = vst.msk [vmem:[#allocation3 + $0x25] sm:$0x1] %vm13098_vm13, %v13405_v22  ;;  %v13471_v36 = vmax.f32 %v13439_v5, %v13455_v43 }
 0x94f   : > { %v13374_v3 = vld [vmem:[#allocation3 + $0x3a] sm:$0x1]  ;;  %v13390_v48 = vld [vmem:[#allocation3 + $0x3b] sm:$0x1]  ;;  %v13438_v45 = vld [vmem:[#allocation3 + $0x3c] sm:$0x1]  ;;  %v13535_v40 = vmax.f32 %v13503_v16, %v13519_v15 }
 0x950   : > { %v13406_v24 = vmax.f32 %v13374_v3, %v13390_v48  ;;  %v13454_v57 = vld [vmem:[#allocation3 + $0x3d] sm:$0x1]  ;;  %v13502_v59 = vld [vmem:[#allocation3 + $0x3e] sm:$0x1]  ;;  %v13518_v17 = vld [vmem:[#allocation3 + $0x3f] sm:$0x1] }
 0x951   : > { %v13470_v32 = vmax.f32 %v13438_v45, %v13454_v57  ;;  %v13534_v51 = vmax.f32 %v13502_v59, %v13518_v17  ;;  %v13055_v60 = vld [vmem:[#allocation3 + $0x50] sm:$0x1]  ;;  %v13071_v53 = vld [vmem:[#allocation3 + $0x51] sm:$0x1]  ;;  %v13120_v44 = vld [vmem:[#allocation3 + $0x52] sm:$0x1] }
 0x952   : > { %13422 = vst.msk [vmem:[#allocation3 + $0x35] sm:$0x1] %vm13098_vm13, %v13406_v24  ;;  %v13087_v9 = vmax.f32 %v13055_v60, %v13071_v53  ;;  %v13136_v46 = vld [vmem:[#allocation3 + $0x53] sm:$0x1]  ;;  %v13184_v10 = vld [vmem:[#allocation3 + $0x54] sm:$0x1] }
 0x953   : > { %v13200_v8 = vld [vmem:[#allocation3 + $0x55] sm:$0x1]  ;;  %13486 = vst.msk [vmem:[#allocation3 + $0x36] sm:$0x1] %vm13098_vm13, %v13470_v32  ;;  %13550 = vst.msk [vmem:[#allocation3 + $0x37] sm:$0x1] %vm13098_vm13, %v13534_v51  ;;  %v13152_v56 = vmax.f32 %v13120_v44, %v13136_v46 }
 0x954   : > { %v13216_v6 = vmax.f32 %v13184_v10, %v13200_v8  ;;  %v13054_v1 = vld [vmem:[#allocation3 + $0x40] sm:$0x1]  ;;  %v13070_v41 = vld [vmem:[#allocation3 + $0x41] sm:$0x1]  ;;  %v13119_v35 = vld [vmem:[#allocation3 + $0x42] sm:$0x1] }
 0x955   : > { %13104 = vst.msk [vmem:[#allocation3 + $0x50] sm:$0x1] %vm13098_vm13, %v13087_v9  ;;  %v13086_v42 = vmax.f32 %v13054_v1, %v13070_v41  ;;  %v13135_v11 = vld [vmem:[#allocation3 + $0x43] sm:$0x1]  ;;  %v13183_v28 = vld [vmem:[#allocation3 + $0x44] sm:$0x1] }
 0x956   : > { %v13199_v0 = vld [vmem:[#allocation3 + $0x45] sm:$0x1]  ;;  %13168 = vst.msk [vmem:[#allocation3 + $0x51] sm:$0x1] %vm13098_vm13, %v13152_v56  ;;  %13232 = vst.msk [vmem:[#allocation3 + $0x52] sm:$0x1] %vm13098_vm13, %v13216_v6  ;;  %v13151_v4 = vmax.f32 %v13119_v35, %v13135_v11 }
 0x957   : > { %v13215_v21 = vmax.f32 %v13183_v28, %v13199_v0  ;;  %v13247_v58 = vld [vmem:[#allocation3 + $0x46] sm:$0x1]  ;;  %v13263_v33 = vld [vmem:[#allocation3 + $0x47] sm:$0x1]  ;;  %13359 = vst.msk [vmem:[#allocation3 + $0x44] sm:$0x1] %vm13098_vm13, %v13343_v61 }
 0x958   : > { %13423 = vst.msk [vmem:[#allocation3 + $0x45] sm:$0x1] %vm13098_vm13, %v13407_v26  ;;  %v12964_v12 = vmax.f32 %v12928_v62, 0.0  ;;  %v12962_v25 = vmax.f32 %v12926_v37, 0.0  ;;  %13103 = vst.msk [vmem:[#allocation3 + $0x40] sm:$0x1] %vm13098_vm13, %v13086_v42  ;;  %v13279_v52 = vmax.f32 %v13247_v58, %v13263_v33 }
 0x959   : > { %13487 = vst.msk [vmem:[#allocation3 + $0x46] sm:$0x1] %vm13098_vm13, %v13471_v36  ;;  %13551 = vst.msk [vmem:[#allocation3 + $0x47] sm:$0x1] %vm13098_vm13, %v13535_v40  ;;  %v12965_v38 = vmax.f32 %v12929_v19, 0.0  ;;  %v12963_v63 = vmax.f32 %v12927_v30, 0.0 }
 0x95a   : > { %v12968_v27 = vmax.f32 %v12932_v20, 0.0  ;;  %v12752_v7 = vpop.f32.mrb[53].mxu0  ;;  %v13563_v14 = vld [vmem:[#allocation3] sm:$0xff]  ;;  %v13564_v47 = vld [vmem:[#allocation3 + $0x10] sm:$0xff]  ;;  %13167 = vst.msk [vmem:[#allocation3 + $0x41] sm:$0x1] %vm13098_vm13, %v13151_v4 }
 0x95b   : > { %13231 = vst.msk [vmem:[#allocation3 + $0x42] sm:$0x1] %vm13098_vm13, %v13215_v21  ;;  %v12889_v29 = vmul.f32 %v22349_v31, %v12752_v7  ;;  %v16207_v55 = vpop.f32.mrb[54].mxu0  ;;  %v13565_v50 = vmax.f32 %v13563_v14, %v13564_v47  ;;  %13295 = vst.msk [vmem:[#allocation3 + $0x43] sm:$0x1] %vm13098_vm13, %v13279_v52  ;;  %v13567_v5 = vld [vmem:[#allocation3 + $0x20] sm:$0xff] }
 0x95c   : > { %13014 = vst.msk [vmem:[#allocation3 + $0x64] sm:$0xff] %vm24007_vm0, %v12964_v12  ;;  %v12892_v18 = vmul.f32 %v16207_v55, %v22349_v31  ;;  %v12755_v23 = vpop.f32.mrb[55].mxu0  ;;  %v13568_v43 = vld [vmem:[#allocation3 + $0x30] sm:$0xff] }
 0x95d   : > { %13010 = vst.msk [vmem:[#allocation3 + $0x56] sm:$0xff] %vm24157_vm4, %v12962_v25  ;;  %v12930_v2 = vadd.f32 %v22354_v34, %v12889_v29  ;;  %v12890_v13 = vmul.f32 %v22349_v31, %v12755_v23  ;;  %v22466_v22 = vpop.f32.mrb[56].mxu0  ;;  %v13569_v3 = vmax.f32 %v13567_v5, %v13568_v43  ;;  %vm24167_vm4 = vmmov %vm24007_vm0 }
 0x95e   : > { %13015 = vst.msk [vmem:[#allocation3 + $0x6c] sm:$0xf] %vm24158_vm1, %v12965_v38  ;;  %v12933_v39 = vadd.f32 %v22354_v34, %v12892_v18  ;;  %v22474_v49 = vpop.f32.mrb[57].mxu0 }
 0x95f   : > { %13017 = vst.msk [vmem:[#allocation3 + $0x6a] sm:$0xc0] %vm13000_vm7, %v12965_v38  ;;  %v12966_v16 = vmax.f32 %v12930_v2, 0.0  ;;  %v12931_v15 = vadd.f32 %v22354_v34, %v12890_v13  ;;  %v22477_v54 = vpop.f32.mrb[58].mxu0 }
 0x960   : > { %13011 = vst.msk [vmem:[#allocation3 + $0x5e] sm:$0x3] %vm24159_vm9, %v12963_v63  ;;  %v12969_v48 = vmax.f32 %v12933_v39, 0.0  ;;  %v22479_v45 = vpop.f32.mrb[59].mxu0  ;;  %vm24168_vm9 = vmmov %vm24007_vm0 }
 0x961   : > { %13013 = vst.msk [vmem:[#allocation3 + $0x5c] sm:$0xf0] %vm12995_vm10, %v12963_v63  ;;  %v12967_v62 = vmax.f32 %v12931_v15, 0.0  ;;  %v22482_v24 = vpop.f32.mrb[60].mxu0  ;;  %v12893_v15 = vmul.f32 %v22349_v31, %v22474_v49 }
 0x962   : > { %13021 = vst.msk [vmem:[#allocation3 + $0x80] sm:$0xff] %vm24160_vm15, %v12968_v27  ;;  %vm24169_vm15 = vmmov %vm24007_vm0 }
 0x963   : > { %13566 = vst.msk [vmem:[%s22469_s14] sm:$0xff] %vm24161_vm5, %v13565_v50  ;;  %v13313_v57 = vld [vmem:[#allocation3 + $0x68] sm:$0x1]  ;;  %v13329_v59 = vld [vmem:[#allocation3 + $0x69] sm:$0x1]  ;;  %vm24170_vm5 = vmmov %vm24007_vm0 }
 0x964   : > { %13018 = vst.msk [vmem:[#allocation3 + $0x72] sm:$0xff] %vm24162_vm6, %v12966_v16  ;;  %v13377_v17 = vld [vmem:[#allocation3 + $0x6a] sm:$0x1]  ;;  %v13393_v37 = vld [vmem:[#allocation3 + $0x6b] sm:$0x1]  ;;  %v13345_v40 = vmax.f32 %v13313_v57, %v13329_v59  ;;  %v12895_v16 = vmul.f32 %v22466_v22, %v22349_v31  ;;  %v12899_v22 = vmul.f32 %v22482_v24, %v22349_v31  ;;  %vm24171_vm6 = vmmov %vm24007_vm0 }
 0x965   : > { %14546 = vst.msk [vmem:[%s22469_s14 + $0x8] sm:$0xff] %vm24163_vm12, %v13569_v3  ;;  %v13248_v19 = vld [vmem:[#allocation3 + $0x56] sm:$0x1]  ;;  %v13264_v30 = vld [vmem:[#allocation3 + $0x57] sm:$0x1]  ;;  %v13409_v9 = vmax.f32 %v13377_v17, %v13393_v37  ;;  %v12896_v3 = vmul.f32 %v22477_v54, %v22349_v31  ;;  %v12894_v37 = vmul.f32 %v22349_v31, %v22479_v45  ;;  %vm24172_vm12 = vmmov %vm24165_vm2 }
 0x966   : > { %13022 = vst.msk [vmem:[#allocation3 + $0x88] sm:$0xff] %vm24164_vm11, %v12969_v48  ;;  %v13280_v61 = vmax.f32 %v13248_v19, %v13264_v30  ;;  %v13312_v26 = vld [vmem:[#allocation3 + $0x58] sm:$0x1]  ;;  %v13328_v32 = vld [vmem:[#allocation3 + $0x59] sm:$0x1]  ;;  %vm24173_vm11 = vmmov %vm24007_vm0 }
 0x967   : > { %13019 = vst.msk [vmem:[#allocation3 + $0x7a] sm:$0x3f] %vm13003_vm14, %v12967_v62  ;;  %v13376_v51 = vld [vmem:[#allocation3 + $0x5a] sm:$0x1]  ;;  %v13344_v60 = vmax.f32 %v13312_v26, %v13328_v32  ;;  %v13392_v53 = vld [vmem:[#allocation3 + $0x5b] sm:$0x1] }
 0x968   : > { %v13440_v44 = vld [vmem:[#allocation3 + $0x5c] sm:$0x1]  ;;  %v13456_v36 = vld [vmem:[#allocation3 + $0x5d] sm:$0x1]  ;;  %13296 = vst.msk [vmem:[#allocation3 + $0x53] sm:$0x1] %vm13098_vm13, %v13280_v61  ;;  %v13408_v46 = vmax.f32 %v13376_v51, %v13392_v53 }
 0x969   : > { %v13472_v10 = vmax.f32 %v13440_v44, %v13456_v36  ;;  %v13057_v8 = vld [vmem:[#allocation3 + $0x70] sm:$0x1]  ;;  %v13073_v20 = vld [vmem:[#allocation3 + $0x71] sm:$0x1]  ;;  %v13441_v56 = vld [vmem:[#allocation3 + $0x6c] sm:$0x1]  ;;  %v12936_v36 = vadd.f32 %v22354_v34, %v12895_v16 }
 0x96a   : > { %13360 = vst.msk [vmem:[#allocation3 + $0x54] sm:$0x1] %vm13098_vm13, %v13344_v60  ;;  %v13089_v6 = vmax.f32 %v13057_v8, %v13073_v20  ;;  %v13457_v1 = vld [vmem:[#allocation3 + $0x6d] sm:$0x1]  ;;  %v13505_v41 = vld [vmem:[#allocation3 + $0x6e] sm:$0x1] }
 0x96b   : > { %v13521_v35 = vld [vmem:[#allocation3 + $0x6f] sm:$0x1]  ;;  %13424 = vst.msk [vmem:[#allocation3 + $0x55] sm:$0x1] %vm13098_vm13, %v13408_v46  ;;  %13488 = vst.msk [vmem:[#allocation3 + $0x56] sm:$0x1] %vm13098_vm13, %v13472_v10  ;;  %v13473_v42 = vmax.f32 %v13441_v56, %v13457_v1  ;;  %v12940_v1 = vadd.f32 %v22354_v34, %v12899_v22 }
 0x96c   : > { %v13537_v11 = vmax.f32 %v13505_v41, %v13521_v35  ;;  %v13056_v28 = vld [vmem:[#allocation3 + $0x60] sm:$0x1]  ;;  %v13072_v0 = vld [vmem:[#allocation3 + $0x61] sm:$0x1]  ;;  %v13121_v4 = vld [vmem:[#allocation3 + $0x62] sm:$0x1] }
 0x96d   : > { %13106 = vst.msk [vmem:[#allocation3 + $0x70] sm:$0x1] %vm13098_vm13, %v13089_v6  ;;  %v13088_v21 = vmax.f32 %v13056_v28, %v13072_v0  ;;  %v13137_v58 = vld [vmem:[#allocation3 + $0x63] sm:$0x1]  ;;  %v13185_v33 = vld [vmem:[#allocation3 + $0x64] sm:$0x1]  ;;  %v12935_v6 = vadd.f32 %v22354_v34, %v12894_v37 }
 0x96e   : > { %v13201_v12 = vld [vmem:[#allocation3 + $0x65] sm:$0x1]  ;;  %v13153_v25 = vmax.f32 %v13121_v4, %v13137_v58  ;;  %v13249_v38 = vld [vmem:[#allocation3 + $0x66] sm:$0x1]  ;;  %v13265_v63 = vld [vmem:[#allocation3 + $0x67] sm:$0x1] }
 0x96f   : > { %v13217_v52 = vmax.f32 %v13185_v33, %v13201_v12  ;;  %13361 = vst.msk [vmem:[#allocation3 + $0x64] sm:$0x1] %vm13098_vm13, %v13345_v40  ;;  %13425 = vst.msk [vmem:[#allocation3 + $0x65] sm:$0x1] %vm13098_vm13, %v13409_v9  ;;  %v13504_v27 = vld [vmem:[#allocation3 + $0x5e] sm:$0x1]  ;;  %v13281_v7 = vmax.f32 %v13249_v38, %v13265_v63  ;;  %v12934_v40 = vadd.f32 %v22354_v34, %v12893_v15 }
 0x970   : > { %13105 = vst.msk [vmem:[#allocation3 + $0x60] sm:$0x1] %vm13098_vm13, %v13088_v21  ;;  %13489 = vst.msk [vmem:[#allocation3 + $0x66] sm:$0x1] %vm13098_vm13, %v13473_v42  ;;  %v13520_v14 = vld [vmem:[#allocation3 + $0x5f] sm:$0x1]  ;;  %v12937_v9 = vadd.f32 %v22354_v34, %v12896_v3 }
 0x971   : > { %13553 = vst.msk [vmem:[#allocation3 + $0x67] sm:$0x1] %vm13098_vm13, %v13537_v11  ;;  %v13058_v47 = vld [vmem:[#allocation3 + $0x80] sm:$0x1]  ;;  %v13074_v29 = vld [vmem:[#allocation3 + $0x81] sm:$0x1]  ;;  %v13536_v55 = vmax.f32 %v13504_v27, %v13520_v14 }
 0x972   : > { %13169 = vst.msk [vmem:[#allocation3 + $0x61] sm:$0x1] %vm13098_vm13, %v13153_v25  ;;  %13233 = vst.msk [vmem:[#allocation3 + $0x62] sm:$0x1] %vm13098_vm13, %v13217_v52  ;;  %v13090_v50 = vmax.f32 %v13058_v47, %v13074_v29  ;;  %v13123_v18 = vld [vmem:[#allocation3 + $0x82] sm:$0x1] }
 0x973   : > { %v13139_v23 = vld [vmem:[#allocation3 + $0x83] sm:$0x1]  ;;  %v13187_v2 = vld [vmem:[#allocation3 + $0x84] sm:$0x1]  ;;  %13297 = vst.msk [vmem:[#allocation3 + $0x63] sm:$0x1] %vm13098_vm13, %v13281_v7 }
 0x974   : > { %v13155_v13 = vmax.f32 %v13123_v18, %v13139_v23  ;;  %v13203_v39 = vld [vmem:[#allocation3 + $0x85] sm:$0x1]  ;;  %v13251_v5 = vld [vmem:[#allocation3 + $0x86] sm:$0x1]  ;;  %v13267_v43 = vld [vmem:[#allocation3 + $0x87] sm:$0x1] }
 0x975   : > { %13552 = vst.msk [vmem:[#allocation3 + $0x57] sm:$0x1] %vm13098_vm13, %v13536_v55  ;;  %13107 = vst.msk [vmem:[#allocation3 + $0x80] sm:$0x1] %vm13098_vm13, %v13090_v50  ;;  %v13219_v48 = vmax.f32 %v13187_v2, %v13203_v39  ;;  %v13283_v62 = vmax.f32 %v13251_v5, %v13267_v43  ;;  %v13122_v57 = vld [vmem:[#allocation3 + $0x72] sm:$0x1] }
 0x976   : > { %v13138_v59 = vld [vmem:[#allocation3 + $0x73] sm:$0x1]  ;;  %v13186_v17 = vld [vmem:[#allocation3 + $0x74] sm:$0x1]  ;;  %13171 = vst.msk [vmem:[#allocation3 + $0x81] sm:$0x1] %vm13098_vm13, %v13155_v13 }
 0x977   : > { %v13154_v49 = vmax.f32 %v13122_v57, %v13138_v59  ;;  %v13202_v19 = vld [vmem:[#allocation3 + $0x75] sm:$0x1]  ;;  %v13250_v54 = vld [vmem:[#allocation3 + $0x76] sm:$0x1]  ;;  %v13266_v30 = vld [vmem:[#allocation3 + $0x77] sm:$0x1] }
 0x978   : > { %13235 = vst.msk [vmem:[#allocation3 + $0x82] sm:$0x1] %vm13098_vm13, %v13219_v48  ;;  %13299 = vst.msk [vmem:[#allocation3 + $0x83] sm:$0x1] %vm13098_vm13, %v13283_v62  ;;  %v13218_v61 = vmax.f32 %v13186_v17, %v13202_v19  ;;  %v13282_v26 = vmax.f32 %v13250_v54, %v13266_v30  ;;  %v13314_v32 = vld [vmem:[#allocation3 + $0x78] sm:$0x1] }
 0x979   : > { %v13330_v51 = vld [vmem:[#allocation3 + $0x79] sm:$0x1]  ;;  %v13315_v60 = vld [vmem:[#allocation3 + $0x88] sm:$0x1]  ;;  %13170 = vst.msk [vmem:[#allocation3 + $0x71] sm:$0x1] %vm13098_vm13, %v13154_v49 }
 0x97a   : > { %v13346_v45 = vmax.f32 %v13314_v32, %v13330_v51  ;;  %v13331_v53 = vld [vmem:[#allocation3 + $0x89] sm:$0x1]  ;;  %v13379_v24 = vld [vmem:[#allocation3 + $0x8a] sm:$0x1]  ;;  %v13395_v44 = vld [vmem:[#allocation3 + $0x8b] sm:$0x1] }
 0x97b   : > { %13234 = vst.msk [vmem:[#allocation3 + $0x72] sm:$0x1] %vm13098_vm13, %v13218_v61  ;;  %13298 = vst.msk [vmem:[#allocation3 + $0x73] sm:$0x1] %vm13098_vm13, %v13282_v26  ;;  %v13347_v46 = vmax.f32 %v13315_v60, %v13331_v53  ;;  %v13411_v10 = vmax.f32 %v13379_v24, %v13395_v44  ;;  %v13443_v8 = vld [vmem:[#allocation3 + $0x8c] sm:$0x1] }
 0x97c   : > { %v13459_v20 = vld [vmem:[#allocation3 + $0x8d] sm:$0x1]  ;;  %v13507_v56 = vld [vmem:[#allocation3 + $0x8e] sm:$0x1]  ;;  %13362 = vst.msk [vmem:[#allocation3 + $0x74] sm:$0x1] %vm13098_vm13, %v13346_v45 }
 0x97d   : > { %v13475_v41 = vmax.f32 %v13443_v8, %v13459_v20  ;;  %v13523_v35 = vld [vmem:[#allocation3 + $0x8f] sm:$0x1]  ;;  %v13378_v42 = vld [vmem:[#allocation3 + $0x7a] sm:$0x1]  ;;  %v13394_v11 = vld [vmem:[#allocation3 + $0x7b] sm:$0x1] }
 0x97e   : > { %13363 = vst.msk [vmem:[#allocation3 + $0x84] sm:$0x1] %vm13098_vm13, %v13347_v46  ;;  %13427 = vst.msk [vmem:[#allocation3 + $0x85] sm:$0x1] %vm13098_vm13, %v13411_v10  ;;  %v13539_v28 = vmax.f32 %v13507_v56, %v13523_v35  ;;  %v13410_v0 = vmax.f32 %v13378_v42, %v13394_v11  ;;  %v13442_v4 = vld [vmem:[#allocation3 + $0x7c] sm:$0x1] }
 0x97f   : > { %v13458_v21 = vld [vmem:[#allocation3 + $0x7d] sm:$0x1]  ;;  %v13506_v58 = vld [vmem:[#allocation3 + $0x7e] sm:$0x1]  ;;  %13491 = vst.msk [vmem:[#allocation3 + $0x86] sm:$0x1] %vm13098_vm13, %v13475_v41 }
 0x980   : > { %v13474_v33 = vmax.f32 %v13442_v4, %v13458_v21  ;;  %v13522_v12 = vld [vmem:[#allocation3 + $0x7f] sm:$0x1]  ;;  %v12972_v25 = vmax.f32 %v12936_v36, 0.0  ;;  %v12970_v52 = vmax.f32 %v12934_v40, 0.0  ;;  %v12973_v38 = vmax.f32 %v12937_v9, 0.0  ;;  %v12784_v63 = vpop.f32.mrb[61].mxu0 }
 0x981   : > { %13555 = vst.msk [vmem:[#allocation3 + $0x87] sm:$0x1] %vm13098_vm13, %v13539_v28  ;;  %13426 = vst.msk [vmem:[#allocation3 + $0x75] sm:$0x1] %vm13098_vm13, %v13410_v0  ;;  %v13538_v27 = vmax.f32 %v13506_v58, %v13522_v12  ;;  %v12971_v7 = vmax.f32 %v12935_v6, 0.0  ;;  %v12976_v14 = vmax.f32 %v12940_v1, 0.0  ;;  %v12897_v47 = vmul.f32 %v22349_v31, %v12784_v63 }
 0x982   : > { %v16215_v29 = vpop.f32.mrb[62].mxu0  ;;  %v13572_v55 = vld [vmem:[#allocation3 + $0x40] sm:$0xff]  ;;  %v13573_v50 = vld [vmem:[#allocation3 + $0x50] sm:$0xff]  ;;  %13490 = vst.msk [vmem:[#allocation3 + $0x76] sm:$0x1] %vm13098_vm13, %v13474_v33 }
 0x983   : > { %13026 = vst.msk [vmem:[#allocation3 + $0x9e] sm:$0x3] %vm24165_vm2, %v12972_v25  ;;  %v12900_v18 = vmul.f32 %v16215_v29, %v22349_v31  ;;  %v12787_v23 = vpop.f32.mrb[63].mxu0  ;;  %v13574_v2 = vmax.f32 %v13572_v55, %v13573_v50  ;;  %v12938_v13 = vadd.f32 %v22354_v34, %v12897_v47  ;;  %vm24174_vm2 = vmmov %vm24007_vm0 }
 0x984   : > { %13028 = vst.msk [vmem:[#allocation3 + $0x9c] sm:$0xf0] %vm12995_vm10, %v12972_v25  ;;  %v12898_v39 = vmul.f32 %v22349_v31, %v12787_v23  ;;  %v16218_v5 = vpop.f32.mrb[64].mxu0 }
 0x985   : > { %13024 = vst.msk [vmem:[#allocation3 + $0x8e] sm:$0xfc] %vm12989_vm3, %v12970_v52  ;;  %v12941_v43 = vadd.f32 %v22354_v34, %v12900_v18  ;;  %v12903_v16 = vmul.f32 %v16218_v5, %v22349_v31  ;;  %v22544_v15 = vpop.f32.mrb[65].mxu0  ;;  %v12974_v3 = vmax.f32 %v12938_v13, 0.0 }
 0x986   : > { %13029 = vst.msk [vmem:[#allocation3 + $0xa4] sm:$0xff] %vm24166_vm8, %v12973_v38  ;;  %v12939_v48 = vadd.f32 %v22354_v34, %v12898_v39  ;;  %v22549_v62 = vpop.f32.mrb[66].mxu0  ;;  %vm24175_vm8 = vmmov %vm24007_vm0 }
 0x987   : > { %13554 = vst.msk [vmem:[#allocation3 + $0x77] sm:$0x1] %vm13098_vm13, %v13538_v27  ;;  %v12977_v57 = vmax.f32 %v12941_v43, 0.0  ;;  %v12944_v59 = vadd.f32 %v22354_v34, %v12903_v16  ;;  %v22552_v17 = vpop.f32.mrb[67].mxu0 }
 0x988   : > { %13025 = vst.msk [vmem:[#allocation3 + $0x96] sm:$0xff] %vm24007_vm0, %v12971_v7  ;;  %v12975_v37 = vmax.f32 %v12939_v48, 0.0  ;;  %v22556_v31 = vpop.f32.mrb[68].mxu0  ;;  %v22584_v48 = vld [vmem:[%s22723_s4 + $0x4] ss:$0 sm:$0xff] }
 0x989   : > { %13034 = vst.msk [vmem:[#allocation3 + $0xba] sm:$0x3f] %vm13003_vm14, %v12976_v14  ;;  %v12980_v22 = vmax.f32 %v12944_v59, 0.0  ;;  %v22559_v49 = vpop.f32.mrb[69].mxu0  ;;  %v12904_v59 = vmul.f32 %v22584_v48, %v22549_v62 }
 0x98a   : > { %14547 = vst.msk [vmem:[%s22469_s14 + $0x10] sm:$0xff] %vm24167_vm4, %v13574_v2  ;;  %v13508_v26 = vld [vmem:[#allocation3 + $0x9e] sm:$0x1]  ;;  %v13524_v32 = vld [vmem:[#allocation3 + $0x9f] sm:$0x1] }
 0x98b   : > { %13030 = vst.msk [vmem:[#allocation3 + $0xac] sm:$0xf] %vm24158_vm1, %v12974_v3  ;;  %v13060_v19 = vld [vmem:[#allocation3 + $0xa0] sm:$0x1]  ;;  %v13076_v54 = vld [vmem:[#allocation3 + $0xa1] sm:$0x1]  ;;  %v13540_v56 = vmax.f32 %v13508_v26, %v13524_v32  ;;  %v12905_v26 = vmul.f32 %v22584_v48, %v22559_v49 }
 0x98c   : > { %13032 = vst.msk [vmem:[#allocation3 + $0xaa] sm:$0xc0] %vm13000_vm7, %v12974_v3  ;;  %v13125_v30 = vld [vmem:[#allocation3 + $0xa2] sm:$0x1]  ;;  %v13092_v34 = vmax.f32 %v13060_v19, %v13076_v54  ;;  %v13141_v61 = vld [vmem:[#allocation3 + $0xa3] sm:$0x1] }
 0x98d   : > { %13036 = vst.msk [vmem:[#allocation3 + $0xc0] sm:$0xff] %vm24168_vm9, %v12977_v57  ;;  %v13157_v51 = vmax.f32 %v13125_v30, %v13141_v61  ;;  %v13059_v60 = vld [vmem:[#allocation3 + $0x90] sm:$0x1]  ;;  %v13075_v45 = vld [vmem:[#allocation3 + $0x91] sm:$0x1]  ;;  %v12901_v57 = vmul.f32 %v22584_v48, %v22544_v15  ;;  %v12907_v61 = vmul.f32 %v22584_v48, %v22556_v31 }
 0x98e   : > { %13033 = vst.msk [vmem:[#allocation3 + $0xb2] sm:$0xff] %vm24169_vm15, %v12975_v37  ;;  %v13124_v53 = vld [vmem:[#allocation3 + $0x92] sm:$0x1]  ;;  %v13091_v24 = vmax.f32 %v13059_v60, %v13075_v45  ;;  %v13140_v44 = vld [vmem:[#allocation3 + $0x93] sm:$0x1]  ;;  %v12902_v37 = vmul.f32 %v22584_v48, %v22552_v17 }
 0x98f   : > { %13040 = vst.msk [vmem:[#allocation3 + $0xd6] sm:$0xff] %vm24170_vm5, %v12980_v22  ;;  %v13188_v36 = vld [vmem:[#allocation3 + $0x94] sm:$0x1]  ;;  %v13204_v40 = vld [vmem:[#allocation3 + $0x95] sm:$0x1]  ;;  %v13156_v9 = vmax.f32 %v13124_v53, %v13140_v44 }
 0x990   : > { %13109 = vst.msk [vmem:[#allocation3 + $0xa0] sm:$0x1] %vm13098_vm13, %v13092_v34  ;;  %13173 = vst.msk [vmem:[#allocation3 + $0xa1] sm:$0x1] %vm13098_vm13, %v13157_v51  ;;  %v13220_v46 = vmax.f32 %v13188_v36, %v13204_v40  ;;  %v13189_v10 = vld [vmem:[#allocation3 + $0xa4] sm:$0x1] }
 0x991   : > { %v13205_v8 = vld [vmem:[#allocation3 + $0xa5] sm:$0x1]  ;;  %v13253_v20 = vld [vmem:[#allocation3 + $0xa6] sm:$0x1]  ;;  %13108 = vst.msk [vmem:[#allocation3 + $0x90] sm:$0x1] %vm13098_vm13, %v13091_v24 }
 0x992   : > { %v13221_v6 = vmax.f32 %v13189_v10, %v13205_v8  ;;  %v13269_v1 = vld [vmem:[#allocation3 + $0xa7] sm:$0x1]  ;;  %v13317_v41 = vld [vmem:[#allocation3 + $0xa8] sm:$0x1]  ;;  %v13333_v35 = vld [vmem:[#allocation3 + $0xa9] sm:$0x1] }
 0x993   : > { %13172 = vst.msk [vmem:[#allocation3 + $0x91] sm:$0x1] %vm13098_vm13, %v13156_v9  ;;  %13236 = vst.msk [vmem:[#allocation3 + $0x92] sm:$0x1] %vm13098_vm13, %v13220_v46  ;;  %v13285_v42 = vmax.f32 %v13253_v20, %v13269_v1  ;;  %v13349_v11 = vmax.f32 %v13317_v41, %v13333_v35  ;;  %v13381_v28 = vld [vmem:[#allocation3 + $0xaa] sm:$0x1] }
 0x994   : > { %v13397_v0 = vld [vmem:[#allocation3 + $0xab] sm:$0x1]  ;;  %v13252_v4 = vld [vmem:[#allocation3 + $0x96] sm:$0x1]  ;;  %13237 = vst.msk [vmem:[#allocation3 + $0xa2] sm:$0x1] %vm13098_vm13, %v13221_v6 }
 0x995   : > { %v13413_v21 = vmax.f32 %v13381_v28, %v13397_v0  ;;  %v13268_v58 = vld [vmem:[#allocation3 + $0x97] sm:$0x1]  ;;  %v13316_v33 = vld [vmem:[#allocation3 + $0x98] sm:$0x1]  ;;  %v13332_v12 = vld [vmem:[#allocation3 + $0x99] sm:$0x1] }
 0x996   : > { %13301 = vst.msk [vmem:[#allocation3 + $0xa3] sm:$0x1] %vm13098_vm13, %v13285_v42  ;;  %13365 = vst.msk [vmem:[#allocation3 + $0xa4] sm:$0x1] %vm13098_vm13, %v13349_v11  ;;  %v13284_v25 = vmax.f32 %v13252_v4, %v13268_v58  ;;  %v13348_v52 = vmax.f32 %v13316_v33, %v13332_v12  ;;  %v13380_v38 = vld [vmem:[#allocation3 + $0x9a] sm:$0x1] }
 0x997   : > { %v13396_v63 = vld [vmem:[#allocation3 + $0x9b] sm:$0x1]  ;;  %v13444_v27 = vld [vmem:[#allocation3 + $0x9c] sm:$0x1]  ;;  %13556 = vst.msk [vmem:[#allocation3 + $0x97] sm:$0x1] %vm13098_vm13, %v13540_v56 }
 0x998   : > { %13429 = vst.msk [vmem:[#allocation3 + $0xa5] sm:$0x1] %vm13098_vm13, %v13413_v21  ;;  %v13412_v7 = vmax.f32 %v13380_v38, %v13396_v63  ;;  %v13460_v14 = vld [vmem:[#allocation3 + $0x9d] sm:$0x1]  ;;  %v22573_v47 = vld [vmem:[#allocation3 + $0xba] sm:$0x1] }
 0x999   : > { %v22575_v29 = vld [vmem:[#allocation3 + $0xbb] sm:$0x1]  ;;  %13300 = vst.msk [vmem:[#allocation3 + $0x93] sm:$0x1] %vm13098_vm13, %v13284_v25  ;;  %13364 = vst.msk [vmem:[#allocation3 + $0x94] sm:$0x1] %vm13098_vm13, %v13348_v52  ;;  %v13476_v55 = vmax.f32 %v13444_v27, %v13460_v14 }
 0x99a   : > { %v13446_v50 = vld [vmem:[#allocation3 + $0xbc] sm:$0x1]  ;;  %v13462_v18 = vld [vmem:[#allocation3 + $0xbd] sm:$0x1]  ;;  %v13510_v23 = vld [vmem:[#allocation3 + $0xbe] sm:$0x1]  ;;  %v13414_v22 = vmax.f32 %v22573_v47, %v22575_v29 }
 0x99b   : > { %13428 = vst.msk [vmem:[#allocation3 + $0x95] sm:$0x1] %vm13098_vm13, %v13412_v7  ;;  %v13526_v2 = vld [vmem:[#allocation3 + $0xbf] sm:$0x1]  ;;  %v13061_v13 = vld [vmem:[#allocation3 + $0xb0] sm:$0x1]  ;;  %v13478_v15 = vmax.f32 %v13446_v50, %v13462_v18 }
 0x99c   : > { %v13077_v39 = vld [vmem:[#allocation3 + $0xb1] sm:$0x1]  ;;  %13492 = vst.msk [vmem:[#allocation3 + $0x96] sm:$0x1] %vm13098_vm13, %v13476_v55  ;;  %v13445_v43 = vld [vmem:[#allocation3 + $0xac] sm:$0x1]  ;;  %v13542_v32 = vmax.f32 %v13510_v23, %v13526_v2 }
 0x99d   : > { %v13093_v5 = vmax.f32 %v13061_v13, %v13077_v39  ;;  %v13461_v16 = vld [vmem:[#allocation3 + $0xad] sm:$0x1]  ;;  %v13509_v3 = vld [vmem:[#allocation3 + $0xae] sm:$0x1]  ;;  %v13525_v54 = vld [vmem:[#allocation3 + $0xaf] sm:$0x1] }
 0x99e   : > { %v13477_v19 = vmax.f32 %v13445_v43, %v13461_v16  ;;  %v13062_v30 = vld [vmem:[#allocation3 + $0xc0] sm:$0x1]  ;;  %v13078_v34 = vld [vmem:[#allocation3 + $0xc1] sm:$0x1]  ;;  %v13541_v62 = vmax.f32 %v13509_v3, %v13525_v54  ;;  %v13127_v17 = vld [vmem:[#allocation3 + $0xc2] sm:$0x1] }
 0x99f   : > { %13110 = vst.msk [vmem:[#allocation3 + $0xb0] sm:$0x1] %vm13098_vm13, %v13093_v5  ;;  %v13094_v51 = vmax.f32 %v13062_v30, %v13078_v34  ;;  %v13143_v60 = vld [vmem:[#allocation3 + $0xc3] sm:$0x1]  ;;  %v13191_v45 = vld [vmem:[#allocation3 + $0xc4] sm:$0x1] }
 0x9a0   : > { %13493 = vst.msk [vmem:[#allocation3 + $0xa6] sm:$0x1] %vm13098_vm13, %v13477_v19  ;;  %v13159_v53 = vmax.f32 %v13127_v17, %v13143_v60  ;;  %v13207_v24 = vld [vmem:[#allocation3 + $0xc5] sm:$0x1]  ;;  %v13255_v44 = vld [vmem:[#allocation3 + $0xc6] sm:$0x1] }
 0x9a1   : > { %v13271_v36 = vld [vmem:[#allocation3 + $0xc7] sm:$0x1]  ;;  %13557 = vst.msk [vmem:[#allocation3 + $0xa7] sm:$0x1] %vm13098_vm13, %v13541_v62  ;;  %13111 = vst.msk [vmem:[#allocation3 + $0xc0] sm:$0x1] %vm13098_vm13, %v13094_v51  ;;  %v13223_v31 = vmax.f32 %v13191_v45, %v13207_v24 }
 0x9a2   : > { %v13287_v49 = vmax.f32 %v13255_v44, %v13271_v36  ;;  %v13126_v40 = vld [vmem:[#allocation3 + $0xb2] sm:$0x1]  ;;  %v13142_v9 = vld [vmem:[#allocation3 + $0xb3] sm:$0x1]  ;;  %v13190_v46 = vld [vmem:[#allocation3 + $0xb4] sm:$0x1] }
 0x9a3   : > { %13175 = vst.msk [vmem:[#allocation3 + $0xc1] sm:$0x1] %vm13098_vm13, %v13159_v53  ;;  %v13158_v10 = vmax.f32 %v13126_v40, %v13142_v9  ;;  %v13206_v8 = vld [vmem:[#allocation3 + $0xb5] sm:$0x1]  ;;  %v13254_v20 = vld [vmem:[#allocation3 + $0xb6] sm:$0x1] }
 0x9a4   : > { %v13270_v56 = vld [vmem:[#allocation3 + $0xb7] sm:$0x1]  ;;  %v17470_v6 = vld [vmem:[%s22723_s4 + $0x5] ss:$0 sm:$0xff]  ;;  %13239 = vst.msk [vmem:[#allocation3 + $0xc2] sm:$0x1] %vm13098_vm13, %v13223_v31  ;;  %v13222_v42 = vmax.f32 %v13190_v46, %v13206_v8 }
 0x9a5   : > { %v12942_v1 = vadd.f32 %v17470_v6, %v12901_v57  ;;  %v12945_v41 = vadd.f32 %v17470_v6, %v12904_v59  ;;  %v12943_v35 = vadd.f32 %v17470_v6, %v12902_v37  ;;  %13303 = vst.msk [vmem:[#allocation3 + $0xc3] sm:$0x1] %vm13098_vm13, %v13287_v49  ;;  %v13286_v11 = vmax.f32 %v13254_v20, %v13270_v56  ;;  %v13318_v28 = vld [vmem:[#allocation3 + $0xb8] sm:$0x1]  ;;  %v13334_v0 = vld [vmem:[#allocation3 + $0xb9] sm:$0x1] }
 0x9a6   : > { %13430 = vst.msk [vmem:[#allocation3 + $0xb5] sm:$0x1] %vm13098_vm13, %v13414_v22  ;;  %13494 = vst.msk [vmem:[#allocation3 + $0xb6] sm:$0x1] %vm13098_vm13, %v13478_v15  ;;  %v12948_v4 = vadd.f32 %v17470_v6, %v12907_v61  ;;  %v12946_v21 = vadd.f32 %v17470_v6, %v12905_v26  ;;  %v13350_v58 = vmax.f32 %v13318_v28, %v13334_v0  ;;  %v13448_v33 = vld [vmem:[#allocation3 + $0xdc] sm:$0x1] }
 0x9a7   : > { %13558 = vst.msk [vmem:[#allocation3 + $0xb7] sm:$0x1] %vm13098_vm13, %v13542_v32  ;;  %13174 = vst.msk [vmem:[#allocation3 + $0xb1] sm:$0x1] %vm13098_vm13, %v13158_v10  ;;  %v13577_v12 = vld [vmem:[#allocation3 + $0x60] sm:$0xff]  ;;  %v12978_v52 = vmax.f32 %v12942_v1, 0.0 }
 0x9a8   : > { %13238 = vst.msk [vmem:[#allocation3 + $0xb2] sm:$0x1] %vm13098_vm13, %v13222_v42  ;;  %13302 = vst.msk [vmem:[#allocation3 + $0xb3] sm:$0x1] %vm13098_vm13, %v13286_v11  ;;  %v13464_v25 = vld [vmem:[#allocation3 + $0xdd] sm:$0x1] }
 0x9a9   : > { %13366 = vst.msk [vmem:[#allocation3 + $0xb4] sm:$0x1] %vm13098_vm13, %v13350_v58  ;;  %v12981_v38 = vmax.f32 %v12945_v41, 0.0  ;;  %v12979_v63 = vmax.f32 %v12943_v35, 0.0  ;;  %v16223_v27 = vpop.f32.mrb[70].mxu0  ;;  %v13480_v7 = vmax.f32 %v13448_v33, %v13464_v25  ;;  %v12984_v14 = vmax.f32 %v12948_v4, 0.0 }
 0x9aa   : > { %v12982_v47 = vmax.f32 %v12946_v21, 0.0  ;;  %v12908_v29 = vmul.f32 %v22584_v48, %v16223_v27  ;;  %v12819_v55 = vpop.f32.mrb[71].mxu0  ;;  %v13578_v50 = vld [vmem:[#allocation3 + $0x70] sm:$0xff]  ;;  %v13582_v18 = vld [vmem:[#allocation3 + $0x80] sm:$0xff]  ;;  %13037 = vst.msk [vmem:[#allocation3 + $0xc8] sm:$0xff] %vm24171_vm6, %v12978_v52 }
 0x9ab   : > { %v13583_v23 = vld [vmem:[#allocation3 + $0x90] sm:$0xff]  ;;  %13041 = vst.msk [vmem:[#allocation3 + $0xde] sm:$0x3] %vm24172_vm12, %v12981_v38  ;;  %v12906_v13 = vmul.f32 %v22584_v48, %v12819_v55  ;;  %v13579_v39 = vmax.f32 %v13577_v12, %v13578_v50  ;;  %v13320_v37 = vld [vmem:[#allocation3 + $0xd8] sm:$0x1]  ;;  %v13587_v48 = vld [vmem:[#allocation3 + $0xa0] sm:$0xff] }
 0x9ac   : > { %v22616_v2 = vld [vmem:[#allocation3 + $0xd6] sm:$0x1]  ;;  %13043 = vst.msk [vmem:[#allocation3 + $0xdc] sm:$0xf0] %vm12995_vm10, %v12981_v38  ;;  %v13584_v5 = vmax.f32 %v13582_v18, %v13583_v23  ;;  %v12949_v43 = vadd.f32 %v17470_v6, %v12908_v29  ;;  %v13272_v57 = vld [vmem:[#allocation3 + $0xd7] sm:$0x1]  ;;  %vm24177_vm10 = vmmov %vm24007_vm0 }
 0x9ad   : > { %13039 = vst.msk [vmem:[#allocation3 + $0xce] sm:$0xfc] %vm12989_vm3, %v12979_v63  ;;  %v12947_v16 = vadd.f32 %v17470_v6, %v12906_v13  ;;  %v13336_v19 = vld [vmem:[#allocation3 + $0xd9] sm:$0x1]  ;;  %v13384_v54 = vld [vmem:[#allocation3 + $0xda] sm:$0x1]  ;;  %vm24176_vm3 = vmmov %vm24158_vm1  ;;  %v13288_v60 = vmax.f32 %v22616_v2, %v13272_v57 }
 0x9ae   : > { %13496 = vst.msk [vmem:[#allocation3 + $0xd6] sm:$0x1] %vm13098_vm13, %v13480_v7  ;;  %v12985_v3 = vmax.f32 %v12949_v43, 0.0  ;;  %v13400_v30 = vld [vmem:[#allocation3 + $0xdb] sm:$0x1]  ;;  %v13352_v31 = vmax.f32 %v13320_v37, %v13336_v19 }
 0x9af   : > { %13048 = vst.msk [vmem:[#allocation3 + $0xf2] sm:$0xff] %vm24173_vm11, %v12984_v14  ;;  %v12983_v59 = vmax.f32 %v12947_v16, 0.0  ;;  %v13416_v49 = vmax.f32 %v13384_v54, %v13400_v30 }
 0x9b0   : > { %13044 = vst.msk [vmem:[#allocation3 + $0xe4] sm:$0xff] %vm24174_vm2, %v12982_v47  ;;  %v13588_v22 = vld [vmem:[#allocation3 + $0xb0] sm:$0xff] }
 0x9b1   : > { %14548 = vst.msk [vmem:[%s22469_s14 + $0x18] sm:$0xff] %vm24175_vm8, %v13579_v39  ;;  %v13589_v34 = vmax.f32 %v13587_v48, %v13588_v22  ;;  %v13319_v61 = vld [vmem:[#allocation3 + $0xc8] sm:$0x1]  ;;  %v13335_v26 = vld [vmem:[#allocation3 + $0xc9] sm:$0x1] }
 0x9b2   : > { %14549 = vst.msk [vmem:[%s22469_s14 + $0x20] sm:$0xff] %vm24007_vm0, %v13584_v5  ;;  %v13383_v15 = vld [vmem:[#allocation3 + $0xca] sm:$0x1]  ;;  %v13351_v32 = vmax.f32 %v13319_v61, %v13335_v26  ;;  %v13399_v62 = vld [vmem:[#allocation3 + $0xcb] sm:$0x1] }
 0x9b3   : > { %13049 = vst.msk [vmem:[#allocation3 + $0xfa] sm:$0x3f] %vm13003_vm14, %v12985_v3  ;;  %v13447_v51 = vld [vmem:[#allocation3 + $0xcc] sm:$0x1]  ;;  %v13463_v17 = vld [vmem:[#allocation3 + $0xcd] sm:$0x1]  ;;  %v13415_v45 = vmax.f32 %v13383_v15, %v13399_v62  ;;  %vm24179_vm14 = vmmov %vm24007_vm0 }
 0x9b4   : > { %13045 = vst.msk [vmem:[#allocation3 + $0xec] sm:$0xf] %vm24176_vm3, %v12983_v59  ;;  %v13479_v53 = vmax.f32 %v13447_v51, %v13463_v17  ;;  %v13511_v24 = vld [vmem:[#allocation3 + $0xce] sm:$0x1]  ;;  %v13527_v44 = vld [vmem:[#allocation3 + $0xcf] sm:$0x1] }
 0x9b5   : > { %13047 = vst.msk [vmem:[#allocation3 + $0xea] sm:$0xc0] %vm13000_vm7, %v12983_v59  ;;  %v13064_v36 = vld [vmem:[#allocation3 + $0xe0] sm:$0x1]  ;;  %v13543_v40 = vmax.f32 %v13511_v24, %v13527_v44  ;;  %v13080_v9 = vld [vmem:[#allocation3 + $0xe1] sm:$0x1]  ;;  %vm24178_vm7 = vmmov %vm24007_vm0 }
 0x9b6   : > { %14550 = vst.msk [vmem:[%s22469_s14 + $0x28] sm:$0xff] %vm24177_vm10, %v13589_v34  ;;  %v13129_v46 = vld [vmem:[#allocation3 + $0xe2] sm:$0x1]  ;;  %v13145_v10 = vld [vmem:[#allocation3 + $0xe3] sm:$0x1]  ;;  %v13096_v8 = vmax.f32 %v13064_v36, %v13080_v9 }
 0x9b7   : > { %13367 = vst.msk [vmem:[#allocation3 + $0xc4] sm:$0x1] %vm13098_vm13, %v13351_v32  ;;  %13431 = vst.msk [vmem:[#allocation3 + $0xc5] sm:$0x1] %vm13098_vm13, %v13415_v45  ;;  %v13161_v20 = vmax.f32 %v13129_v46, %v13145_v10  ;;  %v13512_v56 = vld [vmem:[#allocation3 + $0xde] sm:$0x1] }
 0x9b8   : > { %13495 = vst.msk [vmem:[#allocation3 + $0xc6] sm:$0x1] %vm13098_vm13, %v13479_v53  ;;  %v13528_v6 = vld [vmem:[#allocation3 + $0xdf] sm:$0x1]  ;;  %v13063_v1 = vld [vmem:[#allocation3 + $0xd0] sm:$0x1] }
 0x9b9   : > { %13559 = vst.msk [vmem:[#allocation3 + $0xc7] sm:$0x1] %vm13098_vm13, %v13543_v40  ;;  %v13544_v41 = vmax.f32 %v13512_v56, %v13528_v6  ;;  %v13079_v35 = vld [vmem:[#allocation3 + $0xd1] sm:$0x1]  ;;  %v13128_v42 = vld [vmem:[#allocation3 + $0xd2] sm:$0x1] }
 0x9ba   : > { %v13144_v11 = vld [vmem:[#allocation3 + $0xd3] sm:$0x1]  ;;  %13113 = vst.msk [vmem:[#allocation3 + $0xe0] sm:$0x1] %vm13098_vm13, %v13096_v8  ;;  %13177 = vst.msk [vmem:[#allocation3 + $0xe1] sm:$0x1] %vm13098_vm13, %v13161_v20  ;;  %v13095_v28 = vmax.f32 %v13063_v1, %v13079_v35 }
 0x9bb   : > { %v13160_v0 = vmax.f32 %v13128_v42, %v13144_v11  ;;  %v13192_v4 = vld [vmem:[#allocation3 + $0xd4] sm:$0x1]  ;;  %v13208_v21 = vld [vmem:[#allocation3 + $0xd5] sm:$0x1]  ;;  %13304 = vst.msk [vmem:[#allocation3 + $0xd3] sm:$0x1] %vm13098_vm13, %v13288_v60 }
 0x9bc   : > { %v13322_v58 = vld [vmem:[#allocation3 + $0xf8] sm:$0x1]  ;;  %13560 = vst.msk [vmem:[#allocation3 + $0xd7] sm:$0x1] %vm13098_vm13, %v13544_v41  ;;  %v13224_v33 = vmax.f32 %v13192_v4, %v13208_v21  ;;  %13368 = vst.msk [vmem:[#allocation3 + $0xd4] sm:$0x1] %vm13098_vm13, %v13352_v31 }
 0x9bd   : > { %13432 = vst.msk [vmem:[#allocation3 + $0xd5] sm:$0x1] %vm13098_vm13, %v13416_v49  ;;  %v13338_v12 = vld [vmem:[#allocation3 + $0xf9] sm:$0x1]  ;;  %v13193_v25 = vld [vmem:[#allocation3 + $0xe4] sm:$0x1] }
 0x9be   : > { %v13209_v52 = vld [vmem:[#allocation3 + $0xe5] sm:$0x1]  ;;  %13112 = vst.msk [vmem:[#allocation3 + $0xd0] sm:$0x1] %vm13098_vm13, %v13095_v28  ;;  %13176 = vst.msk [vmem:[#allocation3 + $0xd1] sm:$0x1] %vm13098_vm13, %v13160_v0  ;;  %v13354_v50 = vmax.f32 %v13322_v58, %v13338_v12 }
 0x9bf   : > { %v13225_v38 = vmax.f32 %v13193_v25, %v13209_v52  ;;  %v13257_v63 = vld [vmem:[#allocation3 + $0xe6] sm:$0x1]  ;;  %v13273_v27 = vld [vmem:[#allocation3 + $0xe7] sm:$0x1]  ;;  %v13321_v7 = vld [vmem:[#allocation3 + $0xe8] sm:$0x1] }
 0x9c0   : > { %13240 = vst.msk [vmem:[#allocation3 + $0xd2] sm:$0x1] %vm13098_vm13, %v13224_v33  ;;  %v13289_v14 = vmax.f32 %v13257_v63, %v13273_v27  ;;  %v13337_v47 = vld [vmem:[#allocation3 + $0xe9] sm:$0x1]  ;;  %v13385_v29 = vld [vmem:[#allocation3 + $0xea] sm:$0x1] }
 0x9c1   : > { %v13401_v55 = vld [vmem:[#allocation3 + $0xeb] sm:$0x1]  ;;  %13241 = vst.msk [vmem:[#allocation3 + $0xe2] sm:$0x1] %vm13098_vm13, %v13225_v38  ;;  %v13353_v18 = vmax.f32 %v13321_v7, %v13337_v47  ;;  %v13386_v2 = vld [vmem:[#allocation3 + $0xfa] sm:$0x1] }
 0x9c2   : > { %v13417_v23 = vmax.f32 %v13385_v29, %v13401_v55  ;;  %v13402_v13 = vld [vmem:[#allocation3 + $0xfb] sm:$0x1]  ;;  %v13450_v39 = vld [vmem:[#allocation3 + $0xfc] sm:$0x1]  ;;  %13305 = vst.msk [vmem:[#allocation3 + $0xe3] sm:$0x1] %vm13098_vm13, %v13289_v14 }
 0x9c3   : > { %v13418_v5 = vmax.f32 %v13386_v2, %v13402_v13  ;;  %v13466_v43 = vld [vmem:[#allocation3 + $0xfd] sm:$0x1]  ;;  %v13514_v16 = vld [vmem:[#allocation3 + $0xfe] sm:$0x1]  ;;  %v13530_v3 = vld [vmem:[#allocation3 + $0xff] sm:$0x1] }
 0x9c4   : > { %13369 = vst.msk [vmem:[#allocation3 + $0xe4] sm:$0x1] %vm13098_vm13, %v13353_v18  ;;  %13433 = vst.msk [vmem:[#allocation3 + $0xe5] sm:$0x1] %vm13098_vm13, %v13417_v23  ;;  %v13482_v57 = vmax.f32 %v13450_v39, %v13466_v43  ;;  %v13546_v59 = vmax.f32 %v13514_v16, %v13530_v3  ;;  %v13065_v37 = vld [vmem:[#allocation3 + $0xf0] sm:$0x1] }
 0x9c5   : > { %v13081_v48 = vld [vmem:[#allocation3 + $0xf1] sm:$0x1]  ;;  %v13130_v22 = vld [vmem:[#allocation3 + $0xf2] sm:$0x1]  ;;  %v13146_v54 = vld [vmem:[#allocation3 + $0xf3] sm:$0x1] }
 0x9c6   : > { %v13097_v19 = vmax.f32 %v13065_v37, %v13081_v48  ;;  %v13194_v30 = vld [vmem:[#allocation3 + $0xf4] sm:$0x1]  ;;  %v13210_v34 = vld [vmem:[#allocation3 + $0xf5] sm:$0x1]  ;;  %v13162_v61 = vmax.f32 %v13130_v22, %v13146_v54  ;;  %v13258_v15 = vld [vmem:[#allocation3 + $0xf6] sm:$0x1] }
 0x9c7   : > { %v13226_v26 = vmax.f32 %v13194_v30, %v13210_v34  ;;  %v13274_v32 = vld [vmem:[#allocation3 + $0xf7] sm:$0x1]  ;;  %13370 = vst.msk [vmem:[#allocation3 + $0xf4] sm:$0x1] %vm13098_vm13, %v13354_v50  ;;  %13434 = vst.msk [vmem:[#allocation3 + $0xf5] sm:$0x1] %vm13098_vm13, %v13418_v5 }
 0x9c8   : > { %v13449_v62 = vld [vmem:[#allocation3 + $0xec] sm:$0x1]  ;;  %13114 = vst.msk [vmem:[#allocation3 + $0xf0] sm:$0x1] %vm13098_vm13, %v13097_v19  ;;  %v13290_v51 = vmax.f32 %v13258_v15, %v13274_v32  ;;  %v13465_v17 = vld [vmem:[#allocation3 + $0xed] sm:$0x1] }
 0x9c9   : > { %13498 = vst.msk [vmem:[#allocation3 + $0xf6] sm:$0x1] %vm13098_vm13, %v13482_v57  ;;  %v13513_v60 = vld [vmem:[#allocation3 + $0xee] sm:$0x1]  ;;  %v13529_v45 = vld [vmem:[#allocation3 + $0xef] sm:$0x1]  ;;  %v13481_v53 = vmax.f32 %v13449_v62, %v13465_v17 }
 0x9ca   : > { %13562 = vst.msk [vmem:[#allocation3 + $0xf7] sm:$0x1] %vm13098_vm13, %v13546_v59  ;;  %13178 = vst.msk [vmem:[#allocation3 + $0xf1] sm:$0x1] %vm13098_vm13, %v13162_v61  ;;  %v13545_v24 = vmax.f32 %v13513_v60, %v13529_v45  ;;  %v13592_v44 = vld [vmem:[#allocation3 + $0xc0] sm:$0xff]  ;;  %v13593_v36 = vld [vmem:[#allocation3 + $0xd0] sm:$0xff] }
 0x9cb   : > { %13242 = vst.msk [vmem:[#allocation3 + $0xf2] sm:$0x1] %vm13098_vm13, %v13226_v26  ;;  %13306 = vst.msk [vmem:[#allocation3 + $0xf3] sm:$0x1] %vm13098_vm13, %v13290_v51  ;;  %v13594_v31 = vmax.f32 %v13592_v44, %v13593_v36 }
 0x9cc   : > { %13497 = vst.msk [vmem:[#allocation3 + $0xe6] sm:$0x1] %vm13098_vm13, %v13481_v53  ;;  %13561 = vst.msk [vmem:[#allocation3 + $0xe7] sm:$0x1] %vm13098_vm13, %v13545_v24 }
 0x9cd   : > { %14551 = vst.msk [vmem:[%s22469_s14 + $0x30] sm:$0xff] %vm24178_vm7, %v13594_v31 }
 0x9d2   : > { %v13598_v49 = vld [vmem:[#allocation3 + $0xf0] sm:$0xff] }
 0x9d3   : > { %v13597_v40 = vld [vmem:[#allocation3 + $0xe0] sm:$0xff] }
 0x9d4   : > { %v13599_v9 = vmax.f32 %v13597_v40, %v13598_v49 }
 0x9d6   : > { %14552 = vst.msk [vmem:[%s22469_s14 + $0x38] sm:$0xff] %vm24179_vm14, %v13599_v9 }
 0x9d7   : > { %17484 = shalt.err (!%p17481_p3)
}
 0x9d8   : > { %s17485_s12 = scalar_lea.hbm %s22670_s7, 1024  ;;  %s17489_s15 = scalar_lea.hbm %s22724_s5, 2048 }
 0x9d9   : > { %p17486_p4 = scmp.ne.s32.totalorder %s22670_s7, %s17485_s12  ;;  %p17490_p9 = scmp.lt.u32.totalorder %s22670_s7, %s22724_s5 }
 0x9da   : > { %p17491_p10 = scmp.lt.u32.totalorder %s17489_s15, %s17485_s12  ;;  %p17493_p12 = scmp.lt.u32.totalorder %s17485_s12, %s22670_s7 }
 0x9db   : > { %p17487_p7 = pnand %p17486_p4, %p17607_p5 }
 0x9dc   : > { %p17492_p11 = por %p17491_p10, %p17490_p9 }
 0x9dd   : > { %p17488_p8 = pneg %p17487_p7 }
 0x9de   : > { %p17494_p13 = por %p17493_p12, %p17492_p11 }
 0x9e0   : > { %p17495_p0 = pnand %p17494_p13, %p17488_p8 }
 0x9e2   : > { %17498 = shalt.err (!%p17495_p0)
}
 0x9e3   : > { %s17537_s23 = smov 128   ;;  %s17538_s25 = smov 8  }
 0x9e4   : > { %17173 = dma.vmem_to_hbm [thread:$0]  (%p17607_p5), %s22672_s26, 1024, %s22670_s7, %s22678_s8, %s17537_s23, %s17537_s23, %s17538_s25  }
 0x9e5 PF: > { %p17179_p1 = scmp.ge.s32.totalorder %s17533_s21, 2  ;;  %s13631_s30 = sand.u32 1, %s17521_s18  }
 0x9e6   : > { %s13632_s6 = scalar_lea.sflag [#allocation5], %s13631_s30 }
 0x9e7   : > { %p17176_p2 = pnand %p17179_p1, %p17611_p6 }
 0x9e9   : > { %17516 = dma.done.wait (!%p17176_p2), %s13632_s6, 1024  }
 0x9ea   : > { %17518 = vsyncadd (!%p17176_p2), %s13632_s6, 4294966272  ;;  %p15_p3 = scmp.ge.s32.totalorder %s17594_s24, 4   ;;  %s24180_s18 = smov %s17525_s19 }
 0x9eb   : > { %s24181_s19 = smov %s17529_s20  ;;  %s24182_s20 = smov %s17605_s27 }
 0x9ec   : > { %s24183_s21 = smov %s17594_s24  ;;  %17 = sbr.rel (!%p15_p3) target bundleno = 3 (0x3), region = 123 }
 0x9f3   :  { %13637 = vsyncpa [#allocation5], 1 }
 0x9f4   :  { %13639 = vsyncpa [#allocation5 + $0x1], 1 }

</bundles_post_ra>
